<compile_context>
chip_gen: v7x
topology: tpu7x:2x2x1
jax: 0.10.0
libtpu: 0.0.40
codegen_flags: <defaults>
</compile_context>

<pallas_src>
import functools

import jax
import jax.numpy as jnp
from jax.experimental import pallas as pl
from jax.experimental.pallas import tpu as pltpu

PRELU_ALPHA = 0.25  # torch nn.PReLU() default (num_parameters=1, init=0.25)


# ---------------------------------------------------------------------------
# Fused kernel: entire LiteFusionSR forward for one batch element.
# ---------------------------------------------------------------------------
def _fused_kernel(x_ref,
                  we_ref, be_ref,                 # merged conv1(folded)+conv2
                  w3_ref, b3_ref, w4_ref, b4_ref,
                  w5_ref, b5_ref, w6_ref, b6_ref,
                  o_ref,
                  pad_in, pad_a, pad_b, pad_c, pad_d,
                  *, H, W, a1, a2, a_out):

    def to_padded(dst, act_hwc):
        """Write an (H, W, C) activation into a zero-halo (H+2, W+2, C) buffer."""
        dst[...] = jnp.zeros(dst.shape, dst.dtype)           # zero the halo
        dst[1:H + 1, 1:W + 1, :] = act_hwc.astype(dst.dtype)

    def im2col(src):
        """Padded (H+2, W+2, C) buffer -> (H*W, 9*C) bf16, K ordered (dy,dx,c).

        Single bf16 cast of the whole buffer (instead of one cast per tap).
        """
        buf = src[...].astype(jnp.bfloat16)
        c = buf.shape[-1]
        taps = [buf[dy:dy + H, dx:dx + W, :].reshape(H * W, c)
                for dy in range(3) for dx in range(3)]
        return jnp.concatenate(taps, axis=-1)

    def conv(src, w_ref, b_ref):
        """3x3 same-conv as a single MXU matmul (K = 9*Cin), f32 accumulation."""
        acc = jnp.dot(im2col(src), w_ref[...],
                      preferred_element_type=jnp.float32)
        return acc + b_ref[...].astype(jnp.float32)          # (H*W, Cout) f32

    def prelu(v, a):
        return jnp.where(v >= 0.0, v, a * v)

    # ---- in-kernel halo padding of the input (no wrapper-side jnp.pad) -----
    to_padded(pad_in, x_ref[...])                            # (H, W, 3)

    # ---- entry stage: one matmul (N = 96) computes both conv1 (folded,
    # ---- grouped, block-diagonal 3->48) and conv2 (3->48); then
    # ---- PReLU(conv1) + PReLU(conv2) -> 48 channels ------------------------
    y12 = conv(pad_in, we_ref, be_ref)                       # (H*W, 96) f32
    ent = prelu(y12[:, :48], a1) + prelu(y12[:, 48:], a2)
    to_padded(pad_a, ent.reshape(H, W, 48))

    # ---- conv3..conv5 (no activation); activations never leave VMEM --------
    to_padded(pad_b, conv(pad_a, w3_ref, b3_ref).reshape(H, W, 48))   # 48->48
    to_padded(pad_c, conv(pad_b, w4_ref, b4_ref).reshape(H, W, 24))   # 48->24
    to_padded(pad_d, conv(pad_c, w5_ref, b5_ref).reshape(H, W, 24))   # 24->24

    # ---- conv6 + final PReLU + clip (scalar alpha commutes with shuffle) ---
    y6 = conv(pad_d, w6_ref, b6_ref)                         # (H*W, 48) f32
    y6 = jnp.clip(prelu(y6, a_out), 0.0, 1.0)
    # lane-dense store: (48, H*W) == conv6 output in NCHW, spatially flattened
    o_ref[...] = y6.T.astype(o_ref.dtype)


# ---------------------------------------------------------------------------
# pallas_call wrapper
# ---------------------------------------------------------------------------
def _wspec(k, c):
    return pl.BlockSpec((k, c), lambda n: (0, 0))


def _bspec(c):
    return pl.BlockSpec((1, c), lambda n: (0, 0))


def _to_col(w_hwio):
    """HWIO (3, 3, Cin, Cout) -> im2col weight (9*Cin, Cout) in bf16."""
    kh, kw, cin, cout = w_hwio.shape
    return w_hwio.reshape(kh * kw * cin, cout).astype(jnp.bfloat16)


def _to_row(b):
    return b.reshape(1, -1).astype(jnp.float32)


@functools.partial(jax.jit, static_argnames=("a1", "a2", "a_out"))
def _forward(x_nchw, p, *, a1, a2, a_out):
    N, C, H, W = x_nchw.shape
    x = jnp.transpose(x_nchw, (0, 2, 3, 1))   # NHWC; tiny 3-channel tensor

    # Fold conv1 (Conv2d(1->16) applied per input channel via the torch
    # X_in.reshape(-1, 1, H, W) trick) into a block-diagonal 3->48 conv whose
    # output-channel order matches the torch reshape back to (N, 48, H, W).
    w1 = p["w1"][:, :, 0, :]                                  # (3, 3, 16)
    w1_eff = jnp.zeros((3, 3, 3, 48), jnp.float32)
    for g in range(3):
        w1_eff = w1_eff.at[:, :, g, g * 16:(g + 1) * 16].set(w1)
    b1_t = jnp.tile(p["b1"], 3)                               # (48,)

    # Merge the folded conv1 with conv2 into a single (27, 96) matmul weight.
    we = jnp.concatenate([_to_col(w1_eff), _to_col(p["w2"])], axis=1)  # (27,96)
    be = jnp.concatenate([b1_t, p["b2"]]).reshape(1, -1).astype(jnp.float32)

    kern = functools.partial(_fused_kernel, H=H, W=W, a1=a1, a2=a2, a_out=a_out)

    y = pl.pallas_call(
        kern,
        out_shape=jax.ShapeDtypeStruct((N, 48, H * W), jnp.float32),
        grid_spec=pltpu.PrefetchScalarGridSpec(
            num_scalar_prefetch=0,
            grid=(N,),
            in_specs=[
                pl.BlockSpec((pl.Squeezed(), H, W, 3), lambda n: (n, 0, 0, 0)),
                _wspec(27, 96), _bspec(96),    # conv1 (folded) + conv2 merged
                _wspec(432, 48), _bspec(48),   # conv3
                _wspec(432, 24), _bspec(24),   # conv4
                _wspec(216, 24), _bspec(24),   # conv5
                _wspec(216, 48), _bspec(48),   # conv6
            ],
            out_specs=pl.BlockSpec((pl.Squeezed(), 48, H * W),
                                   lambda n: (n, 0, 0)),
            scratch_shapes=[
                pltpu.VMEM((H + 2, W + 2, 3), jnp.float32),   # padded input
                pltpu.VMEM((H + 2, W + 2, 48), jnp.float32),  # entry / conv3 in
                pltpu.VMEM((H + 2, W + 2, 48), jnp.float32),  # conv4 in
                pltpu.VMEM((H + 2, W + 2, 24), jnp.float32),  # conv5 in
                pltpu.VMEM((H + 2, W + 2, 24), jnp.float32),  # conv6 in
            ],
        ),
        compiler_params=pltpu.CompilerParams(
            dimension_semantics=("parallel",),
            vmem_limit_bytes=48 * 1024 * 1024,
        ),
    )(x,
      we, be,
      _to_col(p["w3"]), _to_row(p["b3"]),
      _to_col(p["w4"]), _to_row(p["b4"]),
      _to_col(p["w5"]), _to_row(p["b5"]),
      _to_col(p["w6"]), _to_row(p["b6"]))

    # PixelShuffle(4): y is conv6's NCHW output (spatially flattened) with the
    # final PReLU + clip already applied in-kernel (scalar alpha commutes with
    # the shuffle), so only layout plumbing remains: a free reshape + one
    # transpose -> (N, 3, 4H, 4W).  Fused into this jit.
    y = y.reshape(N, 3, 4, 4, H, W)
    y = jnp.transpose(y, (0, 1, 4, 2, 5, 3))
    return y.reshape(N, 3, 4 * H, 4 * W)


def lite_fusion_sr(x_nchw, p):
    """x_nchw: (N, 3, H, W) float32  ->  (N, 3, 4H, 4W) float32 in [0, 1]."""
    assert x_nchw.shape[1] == 3
    weights = {k: p[k] for k in ("w1", "b1", "w2", "b2", "w3", "b3",
                                 "w4", "b4", "w5", "b5", "w6", "b6")}
    return _forward(x_nchw, weights,
                    a1=float(p["alpha1"]),
                    a2=float(p["alpha2"]),
                    a_out=float(p["alpha_out"]))


# ---------------------------------------------------------------------------
# Parameters (matches the torch init: weight ~ N(0, 0.001), bias = 0)
# ---------------------------------------------------------------------------
def init_params(key):
    ks = jax.random.split(key, 6)

    def w(k, cin, cout):  # HWIO
        return jax.random.normal(k, (3, 3, cin, cout), jnp.float32) * 1e-3

    return {
        "w1": w(ks[0], 1, 16),  "b1": jnp.zeros((16,), jnp.float32),
        "w2": w(ks[1], 3, 48),  "b2": jnp.zeros((48,), jnp.float32),
        "w3": w(ks[2], 48, 48), "b3": jnp.zeros((48,), jnp.float32),
        "w4": w(ks[3], 48, 24), "b4": jnp.zeros((24,), jnp.float32),
        "w5": w(ks[4], 24, 24), "b5": jnp.zeros((24,), jnp.float32),
        "w6": w(ks[5], 24, 48), "b6": jnp.zeros((48,), jnp.float32),
        # torch nn.PReLU() defaults (one learnable scalar each, init 0.25);
        # treated as compile-time constants in this script.
        "alpha1": PRELU_ALPHA, "alpha2": PRELU_ALPHA, "alpha_out": PRELU_ALPHA,
    }


if __name__ == "__main__":
    key = jax.random.PRNGKey(0)
    kx, kp = jax.random.split(key)
    params = init_params(kp)

    # torch-style NCHW input: (N, 3, H, W)
    x = jax.random.uniform(kx, (2, 3, 16, 16), dtype=jnp.float32)

    y = lite_fusion_sr(x, params)
    y = jax.block_until_ready(y)

    assert y.shape == (2, 3, 64, 64), y.shape
    assert bool(jnp.all((y >= 0.0) & (y <= 1.0)))
    print("KERNEL_OK")
</pallas_src>

<mosaic_0001>
module attributes {stable_mosaic.version = 11 : i64} {
  func.func @_fused_kernel(%arg0: i32, %arg1: memref<1x16x16x3xf32, #tpu.memory_space<vmem>>, %arg2: memref<27x96xbf16, #tpu.memory_space<vmem>>, %arg3: memref<1x96xf32, #tpu.memory_space<vmem>>, %arg4: memref<432x48xbf16, #tpu.memory_space<vmem>>, %arg5: memref<1x48xf32, #tpu.memory_space<vmem>>, %arg6: memref<432x24xbf16, #tpu.memory_space<vmem>>, %arg7: memref<1x24xf32, #tpu.memory_space<vmem>>, %arg8: memref<216x24xbf16, #tpu.memory_space<vmem>>, %arg9: memref<1x24xf32, #tpu.memory_space<vmem>>, %arg10: memref<216x48xbf16, #tpu.memory_space<vmem>>, %arg11: memref<1x48xf32, #tpu.memory_space<vmem>>, %arg12: memref<1x48x256xf32, #tpu.memory_space<vmem>>, %arg13: memref<18x18x3xf32, #tpu.memory_space<vmem>>, %arg14: memref<18x18x48xf32, #tpu.memory_space<vmem>>, %arg15: memref<18x18x48xf32, #tpu.memory_space<vmem>>, %arg16: memref<18x18x24xf32, #tpu.memory_space<vmem>>, %arg17: memref<18x18x24xf32, #tpu.memory_space<vmem>>) attributes {dimension_semantics = [#tpu.dimension_semantics<parallel>], iteration_bounds = array<i64: 2>, scalar_prefetch = 0 : i64, scratch_operands = 5 : i64, tpu.core_type = #tpu.core_type<tc>, window_params = [{transform_indices = @transform_0, window_bounds = array<i64: 1, 16, 16, 3>}, {pipeline_mode = #tpu.pipeline_mode<synchronous>, transform_indices = @transform_1, window_bounds = array<i64: 27, 96>}, {pipeline_mode = #tpu.pipeline_mode<synchronous>, transform_indices = @transform_2, window_bounds = array<i64: 1, 96>}, {pipeline_mode = #tpu.pipeline_mode<synchronous>, transform_indices = @transform_3, window_bounds = array<i64: 432, 48>}, {pipeline_mode = #tpu.pipeline_mode<synchronous>, transform_indices = @transform_4, window_bounds = array<i64: 1, 48>}, {pipeline_mode = #tpu.pipeline_mode<synchronous>, transform_indices = @transform_5, window_bounds = array<i64: 432, 24>}, {pipeline_mode = #tpu.pipeline_mode<synchronous>, transform_indices = @transform_6, window_bounds = array<i64: 1, 24>}, {pipeline_mode = #tpu.pipeline_mode<synchronous>, transform_indices = @transform_7, window_bounds = array<i64: 216, 24>}, {pipeline_mode = #tpu.pipeline_mode<synchronous>, transform_indices = @transform_8, window_bounds = array<i64: 1, 24>}, {pipeline_mode = #tpu.pipeline_mode<synchronous>, transform_indices = @transform_9, window_bounds = array<i64: 216, 48>}, {pipeline_mode = #tpu.pipeline_mode<synchronous>, transform_indices = @transform_10, window_bounds = array<i64: 1, 48>}, {transform_indices = @transform_11, window_bounds = array<i64: 1, 48, 256>}]} {
    %c0 = arith.constant 0 : index
    %c0_0 = arith.constant 0 : index
    %c0_1 = arith.constant 0 : index
    %c0_2 = arith.constant 0 : index
    %0 = vector.load %arg1[%c0, %c0_0, %c0_1, %c0_2] : memref<1x16x16x3xf32, #tpu.memory_space<vmem>>, vector<1x16x16x3xf32>
    %1 = vector.shape_cast %0 : vector<1x16x16x3xf32> to vector<16x16x3xf32>
    %cst = arith.constant 0.000000e+00 : f32
    %2 = vector.broadcast %cst : f32 to vector<18x18x3xf32>
    %c0_3 = arith.constant 0 : index
    %c0_4 = arith.constant 0 : index
    %c0_5 = arith.constant 0 : index
    %3 = vector.load %arg13[%c0_3, %c0_4, %c0_5] : memref<18x18x3xf32, #tpu.memory_space<vmem>>, vector<18x18x3xf32>
    tpu.vector_store %arg13[%c0_3, %c0_4, %c0_5], %2 {strides = array<i32>} : memref<18x18x3xf32, #tpu.memory_space<vmem>>, vector<18x18x3xf32>,
    %c1 = arith.constant 1 : index
    %c1_6 = arith.constant 1 : index
    %c0_7 = arith.constant 0 : index
    %4 = vector.load %arg13[%c1, %c1_6, %c0_7] : memref<18x18x3xf32, #tpu.memory_space<vmem>>, vector<16x16x3xf32>
    tpu.vector_store %arg13[%c1, %c1_6, %c0_7], %1 {strides = array<i32>} : memref<18x18x3xf32, #tpu.memory_space<vmem>>, vector<16x16x3xf32>,
    %c0_8 = arith.constant 0 : index
    %c0_9 = arith.constant 0 : index
    %c0_10 = arith.constant 0 : index
    %5 = vector.load %arg13[%c0_8, %c0_9, %c0_10] : memref<18x18x3xf32, #tpu.memory_space<vmem>>, vector<18x18x3xf32>
    %6 = arith.truncf %5 : vector<18x18x3xf32> to vector<18x18x3xbf16>
    %7 = vector.extract_strided_slice %6 {offsets = [0, 0, 0], sizes = [16, 16, 3], strides = [1, 1, 1]} : vector<18x18x3xbf16> to vector<16x16x3xbf16>
    %8 = vector.shape_cast %7 : vector<16x16x3xbf16> to vector<256x3xbf16>
    %9 = vector.extract_strided_slice %6 {offsets = [0, 1, 0], sizes = [16, 16, 3], strides = [1, 1, 1]} : vector<18x18x3xbf16> to vector<16x16x3xbf16>
    %10 = vector.shape_cast %9 : vector<16x16x3xbf16> to vector<256x3xbf16>
    %11 = vector.extract_strided_slice %6 {offsets = [0, 2, 0], sizes = [16, 16, 3], strides = [1, 1, 1]} : vector<18x18x3xbf16> to vector<16x16x3xbf16>
    %12 = vector.shape_cast %11 : vector<16x16x3xbf16> to vector<256x3xbf16>
    %13 = vector.extract_strided_slice %6 {offsets = [1, 0, 0], sizes = [16, 16, 3], strides = [1, 1, 1]} : vector<18x18x3xbf16> to vector<16x16x3xbf16>
    %14 = vector.shape_cast %13 : vector<16x16x3xbf16> to vector<256x3xbf16>
    %15 = vector.extract_strided_slice %6 {offsets = [1, 1, 0], sizes = [16, 16, 3], strides = [1, 1, 1]} : vector<18x18x3xbf16> to vector<16x16x3xbf16>
    %16 = vector.shape_cast %15 : vector<16x16x3xbf16> to vector<256x3xbf16>
    %17 = vector.extract_strided_slice %6 {offsets = [1, 2, 0], sizes = [16, 16, 3], strides = [1, 1, 1]} : vector<18x18x3xbf16> to vector<16x16x3xbf16>
    %18 = vector.shape_cast %17 : vector<16x16x3xbf16> to vector<256x3xbf16>
    %19 = vector.extract_strided_slice %6 {offsets = [2, 0, 0], sizes = [16, 16, 3], strides = [1, 1, 1]} : vector<18x18x3xbf16> to vector<16x16x3xbf16>
    %20 = vector.shape_cast %19 : vector<16x16x3xbf16> to vector<256x3xbf16>
    %21 = vector.extract_strided_slice %6 {offsets = [2, 1, 0], sizes = [16, 16, 3], strides = [1, 1, 1]} : vector<18x18x3xbf16> to vector<16x16x3xbf16>
    %22 = vector.shape_cast %21 : vector<16x16x3xbf16> to vector<256x3xbf16>
    %23 = vector.extract_strided_slice %6 {offsets = [2, 2, 0], sizes = [16, 16, 3], strides = [1, 1, 1]} : vector<18x18x3xbf16> to vector<16x16x3xbf16>
    %24 = vector.shape_cast %23 : vector<16x16x3xbf16> to vector<256x3xbf16>
    %25 = tpu.concatenate %8, %10, %12, %14, %16, %18, %20, %22, %24 in 1 : vector<256x3xbf16>, vector<256x3xbf16>, vector<256x3xbf16>, vector<256x3xbf16>, vector<256x3xbf16>, vector<256x3xbf16>, vector<256x3xbf16>, vector<256x3xbf16>, vector<256x3xbf16> -> vector<256x27xbf16>
    %c0_11 = arith.constant 0 : index
    %c0_12 = arith.constant 0 : index
    %26 = vector.load %arg2[%c0_11, %c0_12] : memref<27x96xbf16, #tpu.memory_space<vmem>>, vector<27x96xbf16>
    %cst_13 = arith.constant dense<0.000000e+00> : vector<256x96xf32>
    %27 = tpu.matmul %25, %26, %cst_13 {dimension_numbers = #tpu.dot_dimension_numbers<[1], [0], [0], [1], [0, 0, 1, 1], [], []>} : vector<256x27xbf16>, vector<27x96xbf16>, vector<256x96xf32> -> vector<256x96xf32>
    %c0_14 = arith.constant 0 : index
    %c0_15 = arith.constant 0 : index
    %28 = vector.load %arg3[%c0_14, %c0_15] : memref<1x96xf32, #tpu.memory_space<vmem>>, vector<1x96xf32>
    %29 = vector.broadcast %28 : vector<1x96xf32> to vector<256x96xf32>
    %30 = arith.addf %27, %29 : vector<256x96xf32>
    %31 = vector.extract_strided_slice %30 {offsets = [0, 0], sizes = [256, 48], strides = [1, 1]} : vector<256x96xf32> to vector<256x48xf32>
    %cst_16 = arith.constant 0.000000e+00 : f32
    %32 = vector.broadcast %cst_16 : f32 to vector<256x48xf32>
    %33 = arith.cmpf oge, %31, %32 : vector<256x48xf32>
    %cst_17 = arith.constant 2.500000e-01 : f32
    %34 = vector.broadcast %cst_17 : f32 to vector<256x48xf32>
    %35 = arith.mulf %34, %31 : vector<256x48xf32>
    %36 = arith.select %33, %31, %35 : vector<256x48xi1>, vector<256x48xf32>
    %37 = vector.extract_strided_slice %30 {offsets = [0, 48], sizes = [256, 48], strides = [1, 1]} : vector<256x96xf32> to vector<256x48xf32>
    %cst_18 = arith.constant 0.000000e+00 : f32
    %38 = vector.broadcast %cst_18 : f32 to vector<256x48xf32>
    %39 = arith.cmpf oge, %37, %38 : vector<256x48xf32>
    %cst_19 = arith.constant 2.500000e-01 : f32
    %40 = vector.broadcast %cst_19 : f32 to vector<256x48xf32>
    %41 = arith.mulf %40, %37 : vector<256x48xf32>
    %42 = arith.select %39, %37, %41 : vector<256x48xi1>, vector<256x48xf32>
    %43 = arith.addf %36, %42 : vector<256x48xf32>
    %44 = vector.shape_cast %43 : vector<256x48xf32> to vector<16x16x48xf32>
    %cst_20 = arith.constant 0.000000e+00 : f32
    %45 = vector.broadcast %cst_20 : f32 to vector<18x18x48xf32>
    %c0_21 = arith.constant 0 : index
    %c0_22 = arith.constant 0 : index
    %c0_23 = arith.constant 0 : index
    %46 = vector.load %arg14[%c0_21, %c0_22, %c0_23] : memref<18x18x48xf32, #tpu.memory_space<vmem>>, vector<18x18x48xf32>
    tpu.vector_store %arg14[%c0_21, %c0_22, %c0_23], %45 {strides = array<i32>} : memref<18x18x48xf32, #tpu.memory_space<vmem>>, vector<18x18x48xf32>,
    %c1_24 = arith.constant 1 : index
    %c1_25 = arith.constant 1 : index
    %c0_26 = arith.constant 0 : index
    %47 = vector.load %arg14[%c1_24, %c1_25, %c0_26] : memref<18x18x48xf32, #tpu.memory_space<vmem>>, vector<16x16x48xf32>
    tpu.vector_store %arg14[%c1_24, %c1_25, %c0_26], %44 {strides = array<i32>} : memref<18x18x48xf32, #tpu.memory_space<vmem>>, vector<16x16x48xf32>,
    %c0_27 = arith.constant 0 : index
    %c0_28 = arith.constant 0 : index
    %c0_29 = arith.constant 0 : index
    %48 = vector.load %arg14[%c0_27, %c0_28, %c0_29] : memref<18x18x48xf32, #tpu.memory_space<vmem>>, vector<18x18x48xf32>
    %49 = arith.truncf %48 : vector<18x18x48xf32> to vector<18x18x48xbf16>
    %50 = vector.extract_strided_slice %49 {offsets = [0, 0, 0], sizes = [16, 16, 48], strides = [1, 1, 1]} : vector<18x18x48xbf16> to vector<16x16x48xbf16>
    %51 = vector.shape_cast %50 : vector<16x16x48xbf16> to vector<256x48xbf16>
    %52 = vector.extract_strided_slice %49 {offsets = [0, 1, 0], sizes = [16, 16, 48], strides = [1, 1, 1]} : vector<18x18x48xbf16> to vector<16x16x48xbf16>
    %53 = vector.shape_cast %52 : vector<16x16x48xbf16> to vector<256x48xbf16>
    %54 = vector.extract_strided_slice %49 {offsets = [0, 2, 0], sizes = [16, 16, 48], strides = [1, 1, 1]} : vector<18x18x48xbf16> to vector<16x16x48xbf16>
    %55 = vector.shape_cast %54 : vector<16x16x48xbf16> to vector<256x48xbf16>
    %56 = vector.extract_strided_slice %49 {offsets = [1, 0, 0], sizes = [16, 16, 48], strides = [1, 1, 1]} : vector<18x18x48xbf16> to vector<16x16x48xbf16>
    %57 = vector.shape_cast %56 : vector<16x16x48xbf16> to vector<256x48xbf16>
    %58 = vector.extract_strided_slice %49 {offsets = [1, 1, 0], sizes = [16, 16, 48], strides = [1, 1, 1]} : vector<18x18x48xbf16> to vector<16x16x48xbf16>
    %59 = vector.shape_cast %58 : vector<16x16x48xbf16> to vector<256x48xbf16>
    %60 = vector.extract_strided_slice %49 {offsets = [1, 2, 0], sizes = [16, 16, 48], strides = [1, 1, 1]} : vector<18x18x48xbf16> to vector<16x16x48xbf16>
    %61 = vector.shape_cast %60 : vector<16x16x48xbf16> to vector<256x48xbf16>
    %62 = vector.extract_strided_slice %49 {offsets = [2, 0, 0], sizes = [16, 16, 48], strides = [1, 1, 1]} : vector<18x18x48xbf16> to vector<16x16x48xbf16>
    %63 = vector.shape_cast %62 : vector<16x16x48xbf16> to vector<256x48xbf16>
    %64 = vector.extract_strided_slice %49 {offsets = [2, 1, 0], sizes = [16, 16, 48], strides = [1, 1, 1]} : vector<18x18x48xbf16> to vector<16x16x48xbf16>
    %65 = vector.shape_cast %64 : vector<16x16x48xbf16> to vector<256x48xbf16>
    %66 = vector.extract_strided_slice %49 {offsets = [2, 2, 0], sizes = [16, 16, 48], strides = [1, 1, 1]} : vector<18x18x48xbf16> to vector<16x16x48xbf16>
    %67 = vector.shape_cast %66 : vector<16x16x48xbf16> to vector<256x48xbf16>
    %68 = tpu.concatenate %51, %53, %55, %57, %59, %61, %63, %65, %67 in 1 : vector<256x48xbf16>, vector<256x48xbf16>, vector<256x48xbf16>, vector<256x48xbf16>, vector<256x48xbf16>, vector<256x48xbf16>, vector<256x48xbf16>, vector<256x48xbf16>, vector<256x48xbf16> -> vector<256x432xbf16>
    %c0_30 = arith.constant 0 : index
    %c0_31 = arith.constant 0 : index
    %69 = vector.load %arg4[%c0_30, %c0_31] : memref<432x48xbf16, #tpu.memory_space<vmem>>, vector<432x48xbf16>
    %cst_32 = arith.constant dense<0.000000e+00> : vector<256x48xf32>
    %70 = tpu.matmul %68, %69, %cst_32 {dimension_numbers = #tpu.dot_dimension_numbers<[1], [0], [0], [1], [0, 0, 1, 1], [], []>} : vector<256x432xbf16>, vector<432x48xbf16>, vector<256x48xf32> -> vector<256x48xf32>
    %c0_33 = arith.constant 0 : index
    %c0_34 = arith.constant 0 : index
    %71 = vector.load %arg5[%c0_33, %c0_34] : memref<1x48xf32, #tpu.memory_space<vmem>>, vector<1x48xf32>
    %72 = vector.broadcast %71 : vector<1x48xf32> to vector<256x48xf32>
    %73 = arith.addf %70, %72 : vector<256x48xf32>
    %74 = vector.shape_cast %73 : vector<256x48xf32> to vector<16x16x48xf32>
    %cst_35 = arith.constant 0.000000e+00 : f32
    %75 = vector.broadcast %cst_35 : f32 to vector<18x18x48xf32>
    %c0_36 = arith.constant 0 : index
    %c0_37 = arith.constant 0 : index
    %c0_38 = arith.constant 0 : index
    %76 = vector.load %arg15[%c0_36, %c0_37, %c0_38] : memref<18x18x48xf32, #tpu.memory_space<vmem>>, vector<18x18x48xf32>
    tpu.vector_store %arg15[%c0_36, %c0_37, %c0_38], %75 {strides = array<i32>} : memref<18x18x48xf32, #tpu.memory_space<vmem>>, vector<18x18x48xf32>,
    %c1_39 = arith.constant 1 : index
    %c1_40 = arith.constant 1 : index
    %c0_41 = arith.constant 0 : index
    %77 = vector.load %arg15[%c1_39, %c1_40, %c0_41] : memref<18x18x48xf32, #tpu.memory_space<vmem>>, vector<16x16x48xf32>
    tpu.vector_store %arg15[%c1_39, %c1_40, %c0_41], %74 {strides = array<i32>} : memref<18x18x48xf32, #tpu.memory_space<vmem>>, vector<16x16x48xf32>,
    %c0_42 = arith.constant 0 : index
    %c0_43 = arith.constant 0 : index
    %c0_44 = arith.constant 0 : index
    %78 = vector.load %arg15[%c0_42, %c0_43, %c0_44] : memref<18x18x48xf32, #tpu.memory_space<vmem>>, vector<18x18x48xf32>
    %79 = arith.truncf %78 : vector<18x18x48xf32> to vector<18x18x48xbf16>
    %80 = vector.extract_strided_slice %79 {offsets = [0, 0, 0], sizes = [16, 16, 48], strides = [1, 1, 1]} : vector<18x18x48xbf16> to vector<16x16x48xbf16>
    %81 = vector.shape_cast %80 : vector<16x16x48xbf16> to vector<256x48xbf16>
    %82 = vector.extract_strided_slice %79 {offsets = [0, 1, 0], sizes = [16, 16, 48], strides = [1, 1, 1]} : vector<18x18x48xbf16> to vector<16x16x48xbf16>
    %83 = vector.shape_cast %82 : vector<16x16x48xbf16> to vector<256x48xbf16>
    %84 = vector.extract_strided_slice %79 {offsets = [0, 2, 0], sizes = [16, 16, 48], strides = [1, 1, 1]} : vector<18x18x48xbf16> to vector<16x16x48xbf16>
    %85 = vector.shape_cast %84 : vector<16x16x48xbf16> to vector<256x48xbf16>
    %86 = vector.extract_strided_slice %79 {offsets = [1, 0, 0], sizes = [16, 16, 48], strides = [1, 1, 1]} : vector<18x18x48xbf16> to vector<16x16x48xbf16>
    %87 = vector.shape_cast %86 : vector<16x16x48xbf16> to vector<256x48xbf16>
    %88 = vector.extract_strided_slice %79 {offsets = [1, 1, 0], sizes = [16, 16, 48], strides = [1, 1, 1]} : vector<18x18x48xbf16> to vector<16x16x48xbf16>
    %89 = vector.shape_cast %88 : vector<16x16x48xbf16> to vector<256x48xbf16>
    %90 = vector.extract_strided_slice %79 {offsets = [1, 2, 0], sizes = [16, 16, 48], strides = [1, 1, 1]} : vector<18x18x48xbf16> to vector<16x16x48xbf16>
    %91 = vector.shape_cast %90 : vector<16x16x48xbf16> to vector<256x48xbf16>
    %92 = vector.extract_strided_slice %79 {offsets = [2, 0, 0], sizes = [16, 16, 48], strides = [1, 1, 1]} : vector<18x18x48xbf16> to vector<16x16x48xbf16>
    %93 = vector.shape_cast %92 : vector<16x16x48xbf16> to vector<256x48xbf16>
    %94 = vector.extract_strided_slice %79 {offsets = [2, 1, 0], sizes = [16, 16, 48], strides = [1, 1, 1]} : vector<18x18x48xbf16> to vector<16x16x48xbf16>
    %95 = vector.shape_cast %94 : vector<16x16x48xbf16> to vector<256x48xbf16>
    %96 = vector.extract_strided_slice %79 {offsets = [2, 2, 0], sizes = [16, 16, 48], strides = [1, 1, 1]} : vector<18x18x48xbf16> to vector<16x16x48xbf16>
    %97 = vector.shape_cast %96 : vector<16x16x48xbf16> to vector<256x48xbf16>
    %98 = tpu.concatenate %81, %83, %85, %87, %89, %91, %93, %95, %97 in 1 : vector<256x48xbf16>, vector<256x48xbf16>, vector<256x48xbf16>, vector<256x48xbf16>, vector<256x48xbf16>, vector<256x48xbf16>, vector<256x48xbf16>, vector<256x48xbf16>, vector<256x48xbf16> -> vector<256x432xbf16>
    %c0_45 = arith.constant 0 : index
    %c0_46 = arith.constant 0 : index
    %99 = vector.load %arg6[%c0_45, %c0_46] : memref<432x24xbf16, #tpu.memory_space<vmem>>, vector<432x24xbf16>
    %cst_47 = arith.constant dense<0.000000e+00> : vector<256x24xf32>
    %100 = tpu.matmul %98, %99, %cst_47 {dimension_numbers = #tpu.dot_dimension_numbers<[1], [0], [0], [1], [0, 0, 1, 1], [], []>} : vector<256x432xbf16>, vector<432x24xbf16>, vector<256x24xf32> -> vector<256x24xf32>
    %c0_48 = arith.constant 0 : index
    %c0_49 = arith.constant 0 : index
    %101 = vector.load %arg7[%c0_48, %c0_49] : memref<1x24xf32, #tpu.memory_space<vmem>>, vector<1x24xf32>
    %102 = vector.broadcast %101 : vector<1x24xf32> to vector<256x24xf32>
    %103 = arith.addf %100, %102 : vector<256x24xf32>
    %104 = vector.shape_cast %103 : vector<256x24xf32> to vector<16x16x24xf32>
    %cst_50 = arith.constant 0.000000e+00 : f32
    %105 = vector.broadcast %cst_50 : f32 to vector<18x18x24xf32>
    %c0_51 = arith.constant 0 : index
    %c0_52 = arith.constant 0 : index
    %c0_53 = arith.constant 0 : index
    %106 = vector.load %arg16[%c0_51, %c0_52, %c0_53] : memref<18x18x24xf32, #tpu.memory_space<vmem>>, vector<18x18x24xf32>
    tpu.vector_store %arg16[%c0_51, %c0_52, %c0_53], %105 {strides = array<i32>} : memref<18x18x24xf32, #tpu.memory_space<vmem>>, vector<18x18x24xf32>,
    %c1_54 = arith.constant 1 : index
    %c1_55 = arith.constant 1 : index
    %c0_56 = arith.constant 0 : index
    %107 = vector.load %arg16[%c1_54, %c1_55, %c0_56] : memref<18x18x24xf32, #tpu.memory_space<vmem>>, vector<16x16x24xf32>
    tpu.vector_store %arg16[%c1_54, %c1_55, %c0_56], %104 {strides = array<i32>} : memref<18x18x24xf32, #tpu.memory_space<vmem>>, vector<16x16x24xf32>,
    %c0_57 = arith.constant 0 : index
    %c0_58 = arith.constant 0 : index
    %c0_59 = arith.constant 0 : index
    %108 = vector.load %arg16[%c0_57, %c0_58, %c0_59] : memref<18x18x24xf32, #tpu.memory_space<vmem>>, vector<18x18x24xf32>
    %109 = arith.truncf %108 : vector<18x18x24xf32> to vector<18x18x24xbf16>
    %110 = vector.extract_strided_slice %109 {offsets = [0, 0, 0], sizes = [16, 16, 24], strides = [1, 1, 1]} : vector<18x18x24xbf16> to vector<16x16x24xbf16>
    %111 = vector.shape_cast %110 : vector<16x16x24xbf16> to vector<256x24xbf16>
    %112 = vector.extract_strided_slice %109 {offsets = [0, 1, 0], sizes = [16, 16, 24], strides = [1, 1, 1]} : vector<18x18x24xbf16> to vector<16x16x24xbf16>
    %113 = vector.shape_cast %112 : vector<16x16x24xbf16> to vector<256x24xbf16>
    %114 = vector.extract_strided_slice %109 {offsets = [0, 2, 0], sizes = [16, 16, 24], strides = [1, 1, 1]} : vector<18x18x24xbf16> to vector<16x16x24xbf16>
    %115 = vector.shape_cast %114 : vector<16x16x24xbf16> to vector<256x24xbf16>
    %116 = vector.extract_strided_slice %109 {offsets = [1, 0, 0], sizes = [16, 16, 24], strides = [1, 1, 1]} : vector<18x18x24xbf16> to vector<16x16x24xbf16>
    %117 = vector.shape_cast %116 : vector<16x16x24xbf16> to vector<256x24xbf16>
    %118 = vector.extract_strided_slice %109 {offsets = [1, 1, 0], sizes = [16, 16, 24], strides = [1, 1, 1]} : vector<18x18x24xbf16> to vector<16x16x24xbf16>
    %119 = vector.shape_cast %118 : vector<16x16x24xbf16> to vector<256x24xbf16>
    %120 = vector.extract_strided_slice %109 {offsets = [1, 2, 0], sizes = [16, 16, 24], strides = [1, 1, 1]} : vector<18x18x24xbf16> to vector<16x16x24xbf16>
    %121 = vector.shape_cast %120 : vector<16x16x24xbf16> to vector<256x24xbf16>
    %122 = vector.extract_strided_slice %109 {offsets = [2, 0, 0], sizes = [16, 16, 24], strides = [1, 1, 1]} : vector<18x18x24xbf16> to vector<16x16x24xbf16>
    %123 = vector.shape_cast %122 : vector<16x16x24xbf16> to vector<256x24xbf16>
    %124 = vector.extract_strided_slice %109 {offsets = [2, 1, 0], sizes = [16, 16, 24], strides = [1, 1, 1]} : vector<18x18x24xbf16> to vector<16x16x24xbf16>
    %125 = vector.shape_cast %124 : vector<16x16x24xbf16> to vector<256x24xbf16>
    %126 = vector.extract_strided_slice %109 {offsets = [2, 2, 0], sizes = [16, 16, 24], strides = [1, 1, 1]} : vector<18x18x24xbf16> to vector<16x16x24xbf16>
    %127 = vector.shape_cast %126 : vector<16x16x24xbf16> to vector<256x24xbf16>
    %128 = tpu.concatenate %111, %113, %115, %117, %119, %121, %123, %125, %127 in 1 : vector<256x24xbf16>, vector<256x24xbf16>, vector<256x24xbf16>, vector<256x24xbf16>, vector<256x24xbf16>, vector<256x24xbf16>, vector<256x24xbf16>, vector<256x24xbf16>, vector<256x24xbf16> -> vector<256x216xbf16>
    %c0_60 = arith.constant 0 : index
    %c0_61 = arith.constant 0 : index
    %129 = vector.load %arg8[%c0_60, %c0_61] : memref<216x24xbf16, #tpu.memory_space<vmem>>, vector<216x24xbf16>
    %cst_62 = arith.constant dense<0.000000e+00> : vector<256x24xf32>
    %130 = tpu.matmul %128, %129, %cst_62 {dimension_numbers = #tpu.dot_dimension_numbers<[1], [0], [0], [1], [0, 0, 1, 1], [], []>} : vector<256x216xbf16>, vector<216x24xbf16>, vector<256x24xf32> -> vector<256x24xf32>
    %c0_63 = arith.constant 0 : index
    %c0_64 = arith.constant 0 : index
    %131 = vector.load %arg9[%c0_63, %c0_64] : memref<1x24xf32, #tpu.memory_space<vmem>>, vector<1x24xf32>
    %132 = vector.broadcast %131 : vector<1x24xf32> to vector<256x24xf32>
    %133 = arith.addf %130, %132 : vector<256x24xf32>
    %134 = vector.shape_cast %133 : vector<256x24xf32> to vector<16x16x24xf32>
    %cst_65 = arith.constant 0.000000e+00 : f32
    %135 = vector.broadcast %cst_65 : f32 to vector<18x18x24xf32>
    %c0_66 = arith.constant 0 : index
    %c0_67 = arith.constant 0 : index
    %c0_68 = arith.constant 0 : index
    %136 = vector.load %arg17[%c0_66, %c0_67, %c0_68] : memref<18x18x24xf32, #tpu.memory_space<vmem>>, vector<18x18x24xf32>
    tpu.vector_store %arg17[%c0_66, %c0_67, %c0_68], %135 {strides = array<i32>} : memref<18x18x24xf32, #tpu.memory_space<vmem>>, vector<18x18x24xf32>,
    %c1_69 = arith.constant 1 : index
    %c1_70 = arith.constant 1 : index
    %c0_71 = arith.constant 0 : index
    %137 = vector.load %arg17[%c1_69, %c1_70, %c0_71] : memref<18x18x24xf32, #tpu.memory_space<vmem>>, vector<16x16x24xf32>
    tpu.vector_store %arg17[%c1_69, %c1_70, %c0_71], %134 {strides = array<i32>} : memref<18x18x24xf32, #tpu.memory_space<vmem>>, vector<16x16x24xf32>,
    %c0_72 = arith.constant 0 : index
    %c0_73 = arith.constant 0 : index
    %c0_74 = arith.constant 0 : index
    %138 = vector.load %arg17[%c0_72, %c0_73, %c0_74] : memref<18x18x24xf32, #tpu.memory_space<vmem>>, vector<18x18x24xf32>
    %139 = arith.truncf %138 : vector<18x18x24xf32> to vector<18x18x24xbf16>
    %140 = vector.extract_strided_slice %139 {offsets = [0, 0, 0], sizes = [16, 16, 24], strides = [1, 1, 1]} : vector<18x18x24xbf16> to vector<16x16x24xbf16>
    %141 = vector.shape_cast %140 : vector<16x16x24xbf16> to vector<256x24xbf16>
    %142 = vector.extract_strided_slice %139 {offsets = [0, 1, 0], sizes = [16, 16, 24], strides = [1, 1, 1]} : vector<18x18x24xbf16> to vector<16x16x24xbf16>
    %143 = vector.shape_cast %142 : vector<16x16x24xbf16> to vector<256x24xbf16>
    %144 = vector.extract_strided_slice %139 {offsets = [0, 2, 0], sizes = [16, 16, 24], strides = [1, 1, 1]} : vector<18x18x24xbf16> to vector<16x16x24xbf16>
    %145 = vector.shape_cast %144 : vector<16x16x24xbf16> to vector<256x24xbf16>
    %146 = vector.extract_strided_slice %139 {offsets = [1, 0, 0], sizes = [16, 16, 24], strides = [1, 1, 1]} : vector<18x18x24xbf16> to vector<16x16x24xbf16>
    %147 = vector.shape_cast %146 : vector<16x16x24xbf16> to vector<256x24xbf16>
    %148 = vector.extract_strided_slice %139 {offsets = [1, 1, 0], sizes = [16, 16, 24], strides = [1, 1, 1]} : vector<18x18x24xbf16> to vector<16x16x24xbf16>
    %149 = vector.shape_cast %148 : vector<16x16x24xbf16> to vector<256x24xbf16>
    %150 = vector.extract_strided_slice %139 {offsets = [1, 2, 0], sizes = [16, 16, 24], strides = [1, 1, 1]} : vector<18x18x24xbf16> to vector<16x16x24xbf16>
    %151 = vector.shape_cast %150 : vector<16x16x24xbf16> to vector<256x24xbf16>
    %152 = vector.extract_strided_slice %139 {offsets = [2, 0, 0], sizes = [16, 16, 24], strides = [1, 1, 1]} : vector<18x18x24xbf16> to vector<16x16x24xbf16>
    %153 = vector.shape_cast %152 : vector<16x16x24xbf16> to vector<256x24xbf16>
    %154 = vector.extract_strided_slice %139 {offsets = [2, 1, 0], sizes = [16, 16, 24], strides = [1, 1, 1]} : vector<18x18x24xbf16> to vector<16x16x24xbf16>
    %155 = vector.shape_cast %154 : vector<16x16x24xbf16> to vector<256x24xbf16>
    %156 = vector.extract_strided_slice %139 {offsets = [2, 2, 0], sizes = [16, 16, 24], strides = [1, 1, 1]} : vector<18x18x24xbf16> to vector<16x16x24xbf16>
    %157 = vector.shape_cast %156 : vector<16x16x24xbf16> to vector<256x24xbf16>
    %158 = tpu.concatenate %141, %143, %145, %147, %149, %151, %153, %155, %157 in 1 : vector<256x24xbf16>, vector<256x24xbf16>, vector<256x24xbf16>, vector<256x24xbf16>, vector<256x24xbf16>, vector<256x24xbf16>, vector<256x24xbf16>, vector<256x24xbf16>, vector<256x24xbf16> -> vector<256x216xbf16>
    %c0_75 = arith.constant 0 : index
    %c0_76 = arith.constant 0 : index
    %159 = vector.load %arg10[%c0_75, %c0_76] : memref<216x48xbf16, #tpu.memory_space<vmem>>, vector<216x48xbf16>
    %cst_77 = arith.constant dense<0.000000e+00> : vector<256x48xf32>
    %160 = tpu.matmul %158, %159, %cst_77 {dimension_numbers = #tpu.dot_dimension_numbers<[1], [0], [0], [1], [0, 0, 1, 1], [], []>} : vector<256x216xbf16>, vector<216x48xbf16>, vector<256x48xf32> -> vector<256x48xf32>
    %c0_78 = arith.constant 0 : index
    %c0_79 = arith.constant 0 : index
    %161 = vector.load %arg11[%c0_78, %c0_79] : memref<1x48xf32, #tpu.memory_space<vmem>>, vector<1x48xf32>
    %162 = vector.broadcast %161 : vector<1x48xf32> to vector<256x48xf32>
    %163 = arith.addf %160, %162 : vector<256x48xf32>
    %cst_80 = arith.constant 0.000000e+00 : f32
    %164 = vector.broadcast %cst_80 : f32 to vector<256x48xf32>
    %165 = arith.cmpf oge, %163, %164 : vector<256x48xf32>
    %cst_81 = arith.constant 2.500000e-01 : f32
    %166 = vector.broadcast %cst_81 : f32 to vector<256x48xf32>
    %167 = arith.mulf %166, %163 : vector<256x48xf32>
    %168 = arith.select %165, %163, %167 : vector<256x48xi1>, vector<256x48xf32>
    %cst_82 = arith.constant 0.000000e+00 : f32
    %cst_83 = arith.constant 1.000000e+00 : f32
    %169 = vector.broadcast %cst_82 : f32 to vector<256x48xf32>
    %170 = arith.maximumf %169, %168 : vector<256x48xf32>
    %171 = vector.broadcast %cst_83 : f32 to vector<256x48xf32>
    %172 = arith.minimumf %171, %170 : vector<256x48xf32>
    %173 = tpu.transpose %172, [1, 0] : vector<256x48xf32> -> vector<48x256xf32>
    %c0_84 = arith.constant 0 : index
    %c0_85 = arith.constant 0 : index
    %c0_86 = arith.constant 0 : index
    %174 = vector.load %arg12[%c0_84, %c0_85, %c0_86] : memref<1x48x256xf32, #tpu.memory_space<vmem>>, vector<1x48x256xf32>
    %175 = vector.shape_cast %174 : vector<1x48x256xf32> to vector<48x256xf32>
    %176 = vector.shape_cast %173 : vector<48x256xf32> to vector<1x48x256xf32>
    tpu.vector_store %arg12[%c0_84, %c0_85, %c0_86], %176 {strides = array<i32>} : memref<1x48x256xf32, #tpu.memory_space<vmem>>, vector<1x48x256xf32>,
    return
  }
  func.func @transform_0(%arg0: i32) -> (i32, i32, i32, i32) {
    %c0_i32 = arith.constant 0 : i32
    %c0_i32_0 = arith.constant 0 : i32
    %c0_i32_1 = arith.constant 0 : i32
    %c0_i32_2 = arith.constant 0 : i32
    return %arg0, %c0_i32, %c0_i32_0, %c0_i32_1 : i32, i32, i32, i32
  }
  func.func @transform_1(%arg0: i32) -> (i32, i32) {
    %c0_i32 = arith.constant 0 : i32
    %c0_i32_0 = arith.constant 0 : i32
    %c0_i32_1 = arith.constant 0 : i32
    return %c0_i32, %c0_i32_0 : i32, i32
  }
  func.func @transform_2(%arg0: i32) -> (i32, i32) {
    %c0_i32 = arith.constant 0 : i32
    %c0_i32_0 = arith.constant 0 : i32
    %c0_i32_1 = arith.constant 0 : i32
    return %c0_i32, %c0_i32_0 : i32, i32
  }
  func.func @transform_3(%arg0: i32) -> (i32, i32) {
    %c0_i32 = arith.constant 0 : i32
    %c0_i32_0 = arith.constant 0 : i32
    %c0_i32_1 = arith.constant 0 : i32
    return %c0_i32, %c0_i32_0 : i32, i32
  }
  func.func @transform_4(%arg0: i32) -> (i32, i32) {
    %c0_i32 = arith.constant 0 : i32
    %c0_i32_0 = arith.constant 0 : i32
    %c0_i32_1 = arith.constant 0 : i32
    return %c0_i32, %c0_i32_0 : i32, i32
  }
  func.func @transform_5(%arg0: i32) -> (i32, i32) {
    %c0_i32 = arith.constant 0 : i32
    %c0_i32_0 = arith.constant 0 : i32
    %c0_i32_1 = arith.constant 0 : i32
    return %c0_i32, %c0_i32_0 : i32, i32
  }
  func.func @transform_6(%arg0: i32) -> (i32, i32) {
    %c0_i32 = arith.constant 0 : i32
    %c0_i32_0 = arith.constant 0 : i32
    %c0_i32_1 = arith.constant 0 : i32
    return %c0_i32, %c0_i32_0 : i32, i32
  }
  func.func @transform_7(%arg0: i32) -> (i32, i32) {
    %c0_i32 = arith.constant 0 : i32
    %c0_i32_0 = arith.constant 0 : i32
    %c0_i32_1 = arith.constant 0 : i32
    return %c0_i32, %c0_i32_0 : i32, i32
  }
  func.func @transform_8(%arg0: i32) -> (i32, i32) {
    %c0_i32 = arith.constant 0 : i32
    %c0_i32_0 = arith.constant 0 : i32
    %c0_i32_1 = arith.constant 0 : i32
    return %c0_i32, %c0_i32_0 : i32, i32
  }
  func.func @transform_9(%arg0: i32) -> (i32, i32) {
    %c0_i32 = arith.constant 0 : i32
    %c0_i32_0 = arith.constant 0 : i32
    %c0_i32_1 = arith.constant 0 : i32
    return %c0_i32, %c0_i32_0 : i32, i32
  }
  func.func @transform_10(%arg0: i32) -> (i32, i32) {
    %c0_i32 = arith.constant 0 : i32
    %c0_i32_0 = arith.constant 0 : i32
    %c0_i32_1 = arith.constant 0 : i32
    return %c0_i32, %c0_i32_0 : i32, i32
  }
  func.func @transform_11(%arg0: i32) -> (i32, i32, i32) {
    %c0_i32 = arith.constant 0 : i32
    %c0_i32_0 = arith.constant 0 : i32
    %c0_i32_1 = arith.constant 0 : i32
    return %arg0, %c0_i32, %c0_i32_0 : i32, i32, i32
  }
}

</mosaic_0001>

<bundles_post_ra>
// kernel: tile.8
= control target key start
LH: loop header
LB: loop body
LE: loop exit
PB: predicated region body
PF: predicated region fallthrough
CT: control target
= control target key end

     0   :  { %2 = vsyncpa [#allocation1], 0  ;;  %s44_s6 = smov [#allocation0]   ;;  %s70_s0 = inlined_call_operand.hbm [shape: f32[16], index: 0, kind: input, shape index: {}]   ;;  %s71_s1 = inlined_call_operand.vmem [shape: f32[3,16], index: 1, kind: output, shape index: {}]  }
   0x1   :  { %s9_s7 = sshll.u32 %s44_s6, 4  ;;  %s20_s10 = scalar_lea.hbm %s70_s0, 16  ;;  %s10_s7 = int_to_ptr.vmem [resolvable:$true] %s9_s7 }
   0x2   :  { %p21_p0 = scmp.ne.s32.totalorder %s70_s0, %s20_s10  ;;  %p24_p1 = scmp.lt.u32.totalorder %s20_s10, %s70_s0 }
   0x4   :  { %p26_p2 = pnand %p24_p1, %p21_p0 }
   0x6   :  { %29 = shalt.err (!%p26_p2)
}
   0x7   :  { %s30_s15 = scalar_lea.vmem %s10_s7, 16  ;;  %s34_s16 = scalar_lea.vmem %s10_s7, 32 }
   0x8   :  { %p31_p3 = scmp.ne.s32.totalorder %s10_s7, %s30_s15  ;;  %p35_p4 = scmp.lt.s32.totalorder %s10_s7, %s10_s7 }
   0x9   :  { %p36_p5 = scmp.lt.s32.totalorder %s34_s16, %s30_s15 }
   0xb   :  { %p37_p6 = por %p36_p5, %p35_p4 }
   0xd   :  { %p38_p7 = pnand %p37_p6, %p31_p3 }
   0xf   :  { %41 = shalt.err (!%p38_p7)
}
  0x10   :  { %12 = dma.hbm_to_vmem [thread:$0]  %s70_s0, 16, %s10_s7, [#allocation1]  }
  0x11   :  { %42 = dma.done.wait [#allocation1], 16  }
  0x12   :  { %43 = vsyncadd [#allocation1], 4294967280  ;;  %v16_v0 = vld [vmem:[#allocation0] ss:$0 sm:$0xff] }
  0x13   :  { %17 = vst [vmem:[%s71_s1] sm:$0xf] %v16_v0 }
  0x14   :  { %18 = vsyncpa [#allocation1], 1 }

// kernel: tile.9
= control target key start
LH: loop header
LB: loop body
LE: loop exit
PB: predicated region body
PF: predicated region fallthrough
CT: control target
= control target key end

     0   :  { %vm7_vm0 = vcmask 130048   ;;  %s30_s8 = smov 16   ;;  %vm13_vm1 = vcmask 392448   ;;  %vm19_vm2 = vcmask 261248   ;;  %s47_s0 = inlined_call_operand.vmem [shape: f32[3,16], index: 0, kind: input, shape index: {}]   ;;  %s48_s1 = inlined_call_operand.vmem [shape: f32[48], index: 1, kind: output, shape index: {}]  }
   0x1   :  { %v4_v0 = vld [vmem:[%s47_s0] sm:$0xf]  ;;  %s29_s0 = smov 32  }
   0x2   :  { %5 = vst [vmem:[#allocation1] sm:$0xf] %v4_v0 }
   0x9   :  { %v10_v1 = vld [vmem:[#allocation1 + $0x2] sm:$0x1]   ;;  %v6_v2 = vld [vmem:[#allocation1] sm:$0x1]   ;;  %v16_v3 = vld [vmem:[#allocation1 + $0x1] sm:$0x1]  }
   0xa   :  { %11 = vrot.lane.b32.xlu0 %v10_v1, %s29_s0  ;;  %8 = vst.msk [vmem:[#allocation0] sm:$0x1] %vm7_vm0, %v6_v2  }
   0xe   :  { %17 = vrot.lane.b32.xlu0 %v16_v3, %s30_s8 }
  0x7c   :  { %v12_v4 = vpop.permute.xlu0 %11  }
  0x7d   :  { %14 = vst.msk [vmem:[#allocation0] sm:$0x1] %vm13_vm1, %v12_v4  }
  0x80   :  { %v18_v5 = vpop.permute.xlu0 %17  }
  0x81   :  { %20 = vst.msk [vmem:[#allocation0] sm:$0x1] %vm19_vm2, %v18_v5  }
  0x88   :  { %v24_v6 = vld [vmem:[#allocation0] sm:$0x1] }
  0x89   :  { %26 = vst [vmem:[%s48_s1] sm:$0x1] %v24_v6 }

// kernel: _forward.1
= control target key start
LH: loop header
LB: loop body
LE: loop exit
PB: predicated region body
PF: predicated region fallthrough
CT: control target
= control target key end

     0   :  { %16 = vsyncpa [#allocation8], 0  ;;  %s13424_s0 = inlined_call_operand.vmem [shape: f32[2,16,16,3], index: 0, kind: input, shape index: {}]   ;;  %s13425_s1 = inlined_call_operand.vmem [shape: bf16[27,96], index: 1, kind: input, shape index: {}]   ;;  %s13426_s2 = inlined_call_operand.vmem [shape: f32[1,96], index: 2, kind: input, shape index: {}]   ;;  %s13427_s3 = inlined_call_operand.vmem [shape: bf16[432,48], index: 3, kind: input, shape index: {}]   ;;  %s13428_s4 = inlined_call_operand.hbm [shape: f32[1,48], index: 4, kind: input, shape index: {}]   ;;  %s13429_s5 = inlined_call_operand.vmem [shape: bf16[432,24], index: 5, kind: input, shape index: {}]   ;;  %s13430_s6 = inlined_call_operand.hbm [shape: f32[1,24], index: 6, kind: input, shape index: {}]   ;;  %s13431_s7 = inlined_call_operand.vmem [shape: bf16[216,24], index: 7, kind: input, shape index: {}]   ;;  %s13432_s8 = inlined_call_operand.hbm [shape: f32[1,24], index: 8, kind: input, shape index: {}]   ;;  %s13433_s9 = inlined_call_operand.vmem [shape: bf16[216,48], index: 9, kind: input, shape index: {}]   ;;  %s13434_s10 = inlined_call_operand.hbm [shape: f32[1,48], index: 10, kind: input, shape index: {}]   ;;  %s13435_s11 = inlined_call_operand.vmem [shape: f32[2,48,256], index: 11, kind: output, shape index: {}]  }
   0x1   :  { %17 = vsyncpa [#allocation10], 0 }
   0x2   :  { %18 = vsyncpa [#allocation13], 0  ;;  %s8963_s17 = smov 0  }
   0x3 LB: > { %s8969_s18 = sadd.s32 4294967295, %s8876_s17   ;;  %p8092_p0 = scmp.ge.s32.totalorder %s8876_s17, 1  ;;  %s8876_s17 = sphi %s8963_s17, %s24_s17  }
   0x4   : > { %p291_p1 = scmp.lt.s32.totalorder %s8876_s17, 3  ;;  %p13436_p2 = scmp.eq.s32.totalorder %s8969_s18, 0 }
   0x5   : > { %s8878_s19 = smov [#allocation9]   ;;  %s8879_s22 = smov [#allocation7]  }
   0x6   : > { %s327_s20 = sshll.u32 %s8878_s19, 4  ;;  %p8974_p3 = pnand %p8092_p0, %p291_p1  ;;  %s328_s20 = int_to_ptr.vmem [resolvable:$true] %s327_s20 }
   0x7   : > { %s313_s23 = sshll.u32 %s8879_s22, 4  ;;  %s8880_s24 = smov [#allocation11]   ;;  %s8986_s23 = int_to_ptr.vmem [resolvable:$true] %s313_s23 }
   0x8   : > { %s13438_s21 = scalar_select %p8974_p3, 1, 0 }
   0x9   : > { %p8605_p4 = pneg %p8974_p3  ;;  %s341_s25 = sshll.u32 %s8880_s24, 4  ;;  %s8988_s25 = int_to_ptr.vmem [resolvable:$true] %s341_s25 }
   0xa   : > { %s8881_s27 = smov [#allocation12]   ;;  %s8746_s12 = scalar_lea.hbm %s13430_s6, 16 }
   0xb   : > { %p8982_p5 = pnand %p13436_p2, %p8605_p4  ;;  %s355_s28 = sshll.u32 %s8881_s27, 4  ;;  %s8990_s28 = int_to_ptr.vmem [resolvable:$true] %s355_s28 }
   0xc   : > { %p8747_p6 = scmp.ne.s32.totalorder %s13430_s6, %s8746_s12  ;;  %p8753_p10 = scmp.lt.u32.totalorder %s8746_s12, %s13430_s6 }
   0xd   : > { %p9000_p7 = pneg %p8982_p5 }
   0xf   : > { %p8749_p8 = pnand %p9000_p7, %p8747_p6 }
  0x11   : > { %p8750_p9 = pneg %p8749_p8 }
  0x13   : > { %p8755_p11 = pnand %p8753_p10, %p8750_p9 }
  0x15   : > { %8758 = shalt.err (!%p8755_p11)
}
  0x16   : > { %s8759_s22 = scalar_lea.vmem %s328_s20, 16  ;;  %s8766_s24 = scalar_lea.vmem %s328_s20, 32 }
  0x17   : > { %p8760_p12 = scmp.ne.s32.totalorder %s328_s20, %s8759_s22  ;;  %p8767_p1 = scmp.lt.s32.totalorder %s328_s20, %s328_s20 }
  0x18   : > { %p8768_p4 = scmp.lt.s32.totalorder %s8766_s24, %s8759_s22 }
  0x19   : > { %p8762_p13 = pnand %p8760_p12, %p9000_p7 }
  0x1a   : > { %p8769_p2 = por %p8768_p4, %p8767_p1 }
  0x1b   : > { %p8763_p0 = pneg %p8762_p13 }
  0x1d   : > { %p8770_p3 = pnand %p8769_p2, %p8763_p0 }
  0x1f   : > { %8773 = shalt.err (!%p8770_p3)
}
  0x20   : > { %8611 = dma.hbm_to_vmem [thread:$0]  (!%p8982_p5), %s13430_s6, 16, %s328_s20, [#allocation10]  }
  0x21   : > { %s8774_s13 = scalar_lea.hbm %s13428_s4, 16 }
  0x22   : > { %p8775_p6 = scmp.ne.s32.totalorder %s13428_s4, %s8774_s13  ;;  %p8781_p2 = scmp.lt.u32.totalorder %s8774_s13, %s13428_s4 }
  0x24   : > { %p8777_p8 = pnand %p8775_p6, %p9000_p7 }
  0x26   : > { %p8778_p9 = pneg %p8777_p8 }
  0x28   : > { %p8783_p3 = pnand %p8781_p2, %p8778_p9 }
  0x2a   : > { %8786 = shalt.err (!%p8783_p3)
}
  0x2b   : > { %s8787_s20 = scalar_lea.vmem %s8986_s23, 16  ;;  %s8794_s24 = scalar_lea.vmem %s8986_s23, 32 }
  0x2c   : > { %p8788_p10 = scmp.ne.s32.totalorder %s8986_s23, %s8787_s20  ;;  %p8795_p13 = scmp.lt.s32.totalorder %s8986_s23, %s8986_s23 }
  0x2d   : > { %p8796_p0 = scmp.lt.s32.totalorder %s8794_s24, %s8787_s20 }
  0x2e   : > { %p8790_p11 = pnand %p8788_p10, %p9000_p7 }
  0x2f   : > { %p8797_p1 = por %p8796_p0, %p8795_p13 }
  0x30   : > { %p8791_p12 = pneg %p8790_p11 }
  0x32   : > { %p8798_p4 = pnand %p8797_p1, %p8791_p12 }
  0x34   : > { %8801 = shalt.err (!%p8798_p4)
}
  0x35   : > { %8608 = dma.hbm_to_vmem [thread:$0]  (!%p8982_p5), %s13428_s4, 16, %s8986_s23, [#allocation8]  }
  0x36   : > { %s8802_s13 = scalar_lea.hbm %s13432_s8, 16 }
  0x37   : > { %p8803_p6 = scmp.ne.s32.totalorder %s13432_s8, %s8802_s13  ;;  %p8809_p2 = scmp.lt.u32.totalorder %s8802_s13, %s13432_s8 }
  0x39   : > { %p8805_p8 = pnand %p8803_p6, %p9000_p7 }
  0x3b   : > { %p8806_p9 = pneg %p8805_p8 }
  0x3d   : > { %p8811_p3 = pnand %p8809_p2, %p8806_p9 }
  0x3f   : > { %8814 = shalt.err (!%p8811_p3)
}
  0x40   : > { %s8815_s23 = scalar_lea.vmem %s8988_s25, 16  ;;  %s8822_s20 = scalar_lea.vmem %s8988_s25, 32 }
  0x41   : > { %p8816_p10 = scmp.ne.s32.totalorder %s8988_s25, %s8815_s23  ;;  %p8823_p13 = scmp.lt.s32.totalorder %s8988_s25, %s8988_s25 }
  0x42   : > { %p8824_p0 = scmp.lt.s32.totalorder %s8822_s20, %s8815_s23 }
  0x43   : > { %p8818_p11 = pnand %p8816_p10, %p9000_p7 }
  0x44   : > { %p8825_p1 = por %p8824_p0, %p8823_p13 }
  0x45   : > { %p8819_p12 = pneg %p8818_p11 }
  0x47   : > { %p8826_p4 = pnand %p8825_p1, %p8819_p12 }
  0x49   : > { %8829 = shalt.err (!%p8826_p4)
}
  0x4a   : > { %8614 = dma.hbm_to_vmem [thread:$0]  (!%p8982_p5), %s13432_s8, 16, %s8988_s25, [#allocation10]  }
  0x4b   : > { %s8830_s12 = scalar_lea.hbm %s13434_s10, 16 }
  0x4c   : > { %p8831_p6 = scmp.ne.s32.totalorder %s13434_s10, %s8830_s12  ;;  %p8837_p2 = scmp.lt.u32.totalorder %s8830_s12, %s13434_s10 }
  0x4e   : > { %p8833_p8 = pnand %p8831_p6, %p9000_p7 }
  0x50   : > { %p8834_p9 = pneg %p8833_p8 }
  0x52   : > { %p8839_p3 = pnand %p8837_p2, %p8834_p9 }
  0x54   : > { %8842 = shalt.err (!%p8839_p3)
}
  0x55   : > { %s8843_s25 = scalar_lea.vmem %s8990_s28, 16  ;;  %s8850_s22 = scalar_lea.vmem %s8990_s28, 32 }
  0x56   : > { %p8844_p10 = scmp.ne.s32.totalorder %s8990_s28, %s8843_s25  ;;  %p8851_p13 = scmp.lt.s32.totalorder %s8990_s28, %s8990_s28 }
  0x57   : > { %p8852_p0 = scmp.lt.s32.totalorder %s8850_s22, %s8843_s25 }
  0x58   : > { %p8846_p11 = pnand %p8844_p10, %p9000_p7 }
  0x59   : > { %p8853_p1 = por %p8852_p0, %p8851_p13 }
  0x5a   : > { %p8847_p12 = pneg %p8846_p11 }
  0x5c   : > { %p8854_p4 = pnand %p8853_p1, %p8847_p12 }
  0x5e   : > { %8857 = shalt.err (!%p8854_p4)
}
  0x5f   : > { %8617 = dma.hbm_to_vmem [thread:$0]  (!%p8982_p5), %s13434_s10, 16, %s8990_s28, [#allocation13]  }
  0x60   : > { %p13441_p6 = scmp.ne.s32.totalorder %s13438_s21, 0 }
  0x61   : > { %p13442_p7 = scmp.eq.s32.totalorder (!%p13441_p6), %s8969_s18, 0 }
  0x62   : > { %376 = sbr.rel (%p13441_p6) target bundleno = 2637 (0xa4d), region = 64 }
  0x69   : > { %8863 = dma.done.wait (%p13442_p7), [#allocation8], 16   ;;  %p13443_p8 = pmov %p13442_p7 }
  0x6a   : > { %p13444_p9 = pmov %p13442_p7 }
  0x6b   : > { %8865 = vsyncadd (%p13443_p8), [#allocation8], 4294967280 }
  0x6c   : > { %8867 = dma.done.wait (%p13444_p9), [#allocation10], 32   ;;  %p13445_p2 = pmov %p13442_p7 }
  0x6e   : > { %8869 = vsyncadd (%p13445_p2), [#allocation10], 4294967264  ;;  %p13446_p3 = pmov %p13445_p2 }
  0x6f   : > { %p13447_p5 = pmov %p13445_p2 }
  0x70   : > { %8871 = dma.done.wait (%p13446_p3), [#allocation13], 16  }
  0x71   : > { %8873 = vsyncadd (%p13447_p5), [#allocation13], 4294967280  ;;  %vm471_vm0 = vcmask 23552   ;;  %vm474_vm1 = vcmask 17408   ;;  %v8882_v0 = vmov 0.0   ;;  %p428_p10 = scmp.lt.s32.totalorder %s8969_s18, 1 }
  0x72   : > { %472 = vst.msk [vmem:[#allocation2] sm:$0xff] %vm471_vm0, %v8882_v0  ;;  %473 = vst.msk [vmem:[#allocation2 + $0x8] sm:$0xff] %vm471_vm0, %v8882_v0  ;;  %vm875_vm2 = vcmask 1046528   ;;  %s8883_s24 = smov 6   ;;  %vm650_vm3 = vsmask.f32 7424 }
  0x73   : > { %475 = vst.msk [vmem:[#allocation2 + $0x10] sm:$0x3] %vm474_vm1, %v8882_v0  ;;  %478 = vst.msk [vmem:[#allocation2 + $0x28] sm:$0x3] %vm474_vm1, %v8882_v0  ;;  %s13449_s18 = smov (!%p428_p10, %s8969_s18), 1  ;;  %s8884_s27 = smov 3  }
  0x74   : > { %476 = vst.msk [vmem:[#allocation2 + $0x18] sm:$0xff] %vm471_vm0, %v8882_v0  ;;  %477 = vst.msk [vmem:[#allocation2 + $0x20] sm:$0xff] %vm471_vm0, %v8882_v0  ;;  %s8277_s21 = sshll.u32 %s13449_s18, 8  ;;  %s8885_s29 = smov 9   ;;  %vm1444_vm4 = vcmask 195584   ;;  %vm1532_vm5 = vcmask 1044480  }
  0x75   : > { %479 = vst.msk [vmem:[#allocation2 + $0x30] sm:$0xff] %vm471_vm0, %v8882_v0  ;;  %480 = vst.msk [vmem:[#allocation2 + $0x38] sm:$0xff] %vm471_vm0, %v8882_v0  ;;  %s9218_s15 = scalar_lea.vmem %s13424_s0, %s8277_s21  ;;  %s8886_s30 = smov 18   ;;  %vm1533_vm6 = vcmask 1045504   ;;  %vm1246_vm7 = vcmask 48128   ;;  %vm1279_vm8 = vcmask 72704  }
  0x76   : > { %481 = vst.msk [vmem:[#allocation2 + $0x40] sm:$0x3] %vm474_vm1, %v8882_v0  ;;  %484 = vst.msk [vmem:[#allocation2 + $0x58] sm:$0x3] %vm474_vm1, %v8882_v0  ;;  %v441_v6 = vld [vmem:[%s9218_s15 + $0x10] sm:$0xff]  ;;  %v442_v7 = vld [vmem:[%s9218_s15 + $0x18] sm:$0xff] }
  0x77   : > { %482 = vst.msk [vmem:[#allocation2 + $0x48] sm:$0xff] %vm471_vm0, %v8882_v0  ;;  %483 = vst.msk [vmem:[#allocation2 + $0x50] sm:$0xff] %vm471_vm0, %v8882_v0  ;;  %v443_v8 = vld [vmem:[%s9218_s15 + $0x20] sm:$0xff]  ;;  %v444_v9 = vld [vmem:[%s9218_s15 + $0x28] sm:$0xff]  ;;  %s8887_s14 = smov 15   ;;  %s8888_s16 = smov 12  }
  0x78   : > { %485 = vst.msk [vmem:[#allocation2 + $0x60] sm:$0xff] %vm471_vm0, %v8882_v0  ;;  %486 = vst.msk [vmem:[#allocation2 + $0x68] sm:$0xff] %vm471_vm0, %v8882_v0  ;;  %v439_v10 = vld [vmem:[%s9218_s15] sm:$0xff]  ;;  %v440_v11 = vld [vmem:[%s9218_s15 + $0x8] sm:$0xff]  ;;  %s8889_s19 = smov 21   ;;  %s8890_s25 = smov 24  }
  0x79   : > { %487 = vst.msk [vmem:[#allocation2 + $0x70] sm:$0x3] %vm474_vm1, %v8882_v0  ;;  %490 = vst.msk [vmem:[#allocation2 + $0x88] sm:$0x3] %vm474_vm1, %v8882_v0  ;;  %v560_v1 = vld [vmem:[#allocation2] sm:$0xff]  ;;  %v561_v2 = vld [vmem:[#allocation2 + $0x8] sm:$0xff] }
  0x7a   : > { %488 = vst.msk [vmem:[#allocation2 + $0x78] sm:$0xff] %vm471_vm0, %v8882_v0  ;;  %489 = vst.msk [vmem:[#allocation2 + $0x80] sm:$0xff] %vm471_vm0, %v8882_v0  ;;  %v562_v3 = vld [vmem:[#allocation2 + $0x10] sm:$0x3]  ;;  %v9220_v4 = vpack.c.bf16 %v561_v2, %v560_v1  ;;  %v446_v17 = vld [vmem:[%s9218_s15 + $0x38] sm:$0xff]  ;;  %vm1312_vm9 = vcmask 97280  }
  0x7b   : > { %491 = vst.msk [vmem:[#allocation2 + $0x90] sm:$0xff] %vm471_vm0, %v8882_v0  ;;  %492 = vst.msk [vmem:[#allocation2 + $0x98] sm:$0xff] %vm471_vm0, %v8882_v0  ;;  %v615_v5 = vpack.c.bf16 %v562_v3, %v562_v3  ;;  %v445_v16 = vld [vmem:[%s9218_s15 + $0x30] sm:$0xff]  ;;  %v447_v19 = vld [vmem:[%s9218_s15 + $0x40] sm:$0xff]  ;;  %vm1345_vm10 = vcmask 121856   ;;  %vm1378_vm11 = vcmask 146432  }
  0x7c   : > { %493 = vst.msk [vmem:[#allocation2 + $0xa0] sm:$0x3] %vm474_vm1, %v8882_v0  ;;  %496 = vst.msk [vmem:[#allocation2 + $0xb8] sm:$0x3] %vm474_vm1, %v8882_v0  ;;  %v876_v12 = vrot.slane %v9220_v4, 1  ;;  %v652_v14 = vshrl.u32 %v9220_v4, 16 }
  0x7d   : > { %494 = vst.msk [vmem:[#allocation2 + $0xa8] sm:$0xff] %vm471_vm0, %v8882_v0  ;;  %495 = vst.msk [vmem:[#allocation2 + $0xb0] sm:$0xff] %vm471_vm0, %v8882_v0  ;;  %v877_v13 = vrot.slane %v615_v5, 1  ;;  %v654_v15 = vshll.u32 %v9220_v4, 16  ;;  %v659_v18 = vshll.u32 %v615_v5, 16  ;;  %v448_v20 = vld [vmem:[%s9218_s15 + $0x48] sm:$0xff] }
  0x7e   : > { %497 = vst.msk [vmem:[#allocation2 + $0xc0] sm:$0xff] %vm471_vm0, %v8882_v0  ;;  %498 = vst.msk [vmem:[#allocation2 + $0xc8] sm:$0xff] %vm471_vm0, %v8882_v0  ;;  %v449_v21 = vld [vmem:[%s9218_s15 + $0x50] sm:$0xff]  ;;  %v450_v24 = vld [vmem:[%s9218_s15 + $0x58] sm:$0xff]  ;;  %vm1411_vm12 = vcmask 171008   ;;  %vm1499_vm13 = vcmask 220160  }
  0x7f   : > { %499 = vst.msk [vmem:[#allocation2 + $0xd0] sm:$0x3] %vm474_vm1, %v8882_v0  ;;  %502 = vst.msk [vmem:[#allocation2 + $0xe8] sm:$0x3] %vm474_vm1, %v8882_v0  ;;  %v878_v22 = vsel %vm875_vm2, %v876_v12, %v877_v13  ;;  %v656_v23 = vrot.slane %v654_v15, 1  ;;  %v451_v25 = vld [vmem:[%s9218_s15 + $0x60] sm:$0xff] }
  0x80   : > { %500 = vst.msk [vmem:[#allocation2 + $0xd8] sm:$0xff] %vm471_vm0, %v8882_v0  ;;  %501 = vst.msk [vmem:[#allocation2 + $0xe0] sm:$0xff] %vm471_vm0, %v8882_v0  ;;  %v452_v26 = vld [vmem:[%s9218_s15 + $0x68] sm:$0xff]  ;;  %990 = vrot.lane.b32.xlu1 %v878_v22, %s8883_s24  ;;  %v661_v27 = vrot.slane %v659_v18, 1  ;;  %v453_v28 = vld [vmem:[%s9218_s15 + $0x70] sm:$0xff]  ;;  %vm1956_vm14 = vcmask 392192  }
  0x81   : > { %503 = vst.msk [vmem:[#allocation2 + $0xf0] sm:$0xff] %vm471_vm0, %v8882_v0  ;;  %504 = vst.msk [vmem:[#allocation2 + $0xf8] sm:$0xff] %vm471_vm0, %v8882_v0  ;;  %v454_v29 = vld [vmem:[%s9218_s15 + $0x78] sm:$0xff]  ;;  %v455_v30 = vld [vmem:[%s9218_s15 + $0x80] sm:$0xff]  ;;  %v657_v31 = vor.u32 %v656_v23, %v652_v14  ;;  %vm1959_vm15 = vcmask 386048   ;;  %s8892_s20 = smov 48  }
  0x82   : > { %505 = vst.msk [vmem:[#allocation2 + $0x100] sm:$0x3] %vm474_vm1, %v8882_v0  ;;  %508 = vst.msk [vmem:[#allocation2 + $0x118] sm:$0x3] %vm474_vm1, %v8882_v0  ;;  %v456_v32 = vld [vmem:[%s9218_s15 + $0x88] sm:$0xff]  ;;  %v457_v33 = vld [vmem:[%s9218_s15 + $0x90] sm:$0xff] }
  0x83   : > { %506 = vst.msk [vmem:[#allocation2 + $0x108] sm:$0xff] %vm471_vm0, %v8882_v0  ;;  %507 = vst.msk [vmem:[#allocation2 + $0x110] sm:$0xff] %vm471_vm0, %v8882_v0  ;;  %v458_v34 = vld [vmem:[%s9218_s15 + $0x98] sm:$0xff]  ;;  %v662_v35 = vsel %vm650_vm3, %v657_v31, %v661_v27  ;;  %v8659_v5 = vld [vmem:[%s13425_s1] sm:$0xff]   ;;  %s8893_s21 = smov 96   ;;  %s8898_s12 = smov 112  }
  0x84   : > { %509 = vst.msk [vmem:[#allocation2 + $0x120] sm:$0xff] %vm471_vm0, %v8882_v0  ;;  %510 = vst.msk [vmem:[#allocation2 + $0x128] sm:$0xff] %vm471_vm0, %v8882_v0  ;;  %958 = vrot.lane.b32.xlu0 %v662_v35, %s8884_s27  ;;  %8520 = vmatprep.subr.bf16.mxu0 %v8659_v5  ;;  %v460_v13 = vld [vmem:[%s9218_s15 + $0xa8] sm:$0xff]  ;;  %v462_v27 = vld [vmem:[%s9218_s15 + $0xb8] sm:$0xff] }
  0x85   : > { %511 = vst.msk [vmem:[#allocation2 + $0x130] sm:$0x3] %vm474_vm1, %v8882_v0  ;;  %514 = vst.msk [vmem:[#allocation2 + $0x148] sm:$0x3] %vm474_vm1, %v8882_v0  ;;  %8556 = vmatprep.subr.bf16.mxu1 %v8659_v5  ;;  %8521 = vmatpush3.bf16.msra.mxu0 %v8659_v5  ;;  %v8660_v35 = vld [vmem:[%s13425_s1 + $0x8] sm:$0x3f]  }
  0x86   : > { %512 = vst.msk [vmem:[#allocation2 + $0x138] sm:$0xff] %vm471_vm0, %v8882_v0  ;;  %513 = vst.msk [vmem:[#allocation2 + $0x140] sm:$0xff] %vm471_vm0, %v8882_v0  ;;  %8558 = vmatpush3.bf16.msra.mxu1 %v8659_v5 }
  0x87   : > { %515 = vst.msk [vmem:[#allocation2 + $0x150] sm:$0xff] %vm471_vm0, %v8882_v0  ;;  %516 = vst.msk [vmem:[#allocation2 + $0x158] sm:$0xff] %vm471_vm0, %v8882_v0 }
  0x88   : > { %517 = vst.msk [vmem:[#allocation2 + $0x160] sm:$0x3] %vm474_vm1, %v8882_v0  ;;  %520 = vst.msk [vmem:[#allocation2 + $0x178] sm:$0x3] %vm474_vm1, %v8882_v0 }
  0x89   : > { %518 = vst.msk [vmem:[#allocation2 + $0x168] sm:$0xff] %vm471_vm0, %v8882_v0  ;;  %519 = vst.msk [vmem:[#allocation2 + $0x170] sm:$0xff] %vm471_vm0, %v8882_v0 }
  0x8a   : > { %521 = vst.msk [vmem:[#allocation2 + $0x180] sm:$0xff] %vm471_vm0, %v8882_v0  ;;  %522 = vst.msk [vmem:[#allocation2 + $0x188] sm:$0xff] %vm471_vm0, %v8882_v0 }
  0x8b   : > { %523 = vst.msk [vmem:[#allocation2 + $0x190] sm:$0x3] %vm474_vm1, %v8882_v0  ;;  %526 = vst.msk [vmem:[#allocation2 + $0x1a8] sm:$0x3] %vm474_vm1, %v8882_v0 }
  0x8c   : > { %524 = vst.msk [vmem:[#allocation2 + $0x198] sm:$0xff] %vm471_vm0, %v8882_v0  ;;  %525 = vst.msk [vmem:[#allocation2 + $0x1a0] sm:$0xff] %vm471_vm0, %v8882_v0 }
  0x8d   : > { %530 = vst.msk [vmem:[#allocation2 + $0x31] sm:$0xff] %vm471_vm0, %v441_v6  ;;  %531 = vst.msk [vmem:[#allocation2 + $0x39] sm:$0xff] %vm471_vm0, %v442_v7 }
  0x8e   : > { %532 = vst.msk [vmem:[#allocation2 + $0x49] sm:$0xff] %vm471_vm0, %v443_v8  ;;  %533 = vst.msk [vmem:[#allocation2 + $0x51] sm:$0xff] %vm471_vm0, %v444_v9  ;;  %v459_v8 = vld [vmem:[%s9218_s15 + $0xa0] sm:$0xff] }
  0x8f   : > { %528 = vst.msk [vmem:[#allocation2 + $0x19] sm:$0xff] %vm471_vm0, %v439_v10  ;;  %529 = vst.msk [vmem:[#allocation2 + $0x21] sm:$0xff] %vm471_vm0, %v440_v11 }
  0x90   : > { %534 = vst.msk [vmem:[#allocation2 + $0x61] sm:$0xff] %vm471_vm0, %v445_v16  ;;  %535 = vst.msk [vmem:[#allocation2 + $0x69] sm:$0xff] %vm471_vm0, %v446_v17 }
  0x91   : > { %536 = vst.msk [vmem:[#allocation2 + $0x79] sm:$0xff] %vm471_vm0, %v447_v19  ;;  %537 = vst.msk [vmem:[#allocation2 + $0x81] sm:$0xff] %vm471_vm0, %v448_v20 }
  0x92   : > { %538 = vst.msk [vmem:[#allocation2 + $0x91] sm:$0xff] %vm471_vm0, %v449_v21  ;;  %539 = vst.msk [vmem:[#allocation2 + $0x99] sm:$0xff] %vm471_vm0, %v450_v24 }
  0x93   : > { %540 = vst.msk [vmem:[#allocation2 + $0xa9] sm:$0xff] %vm471_vm0, %v451_v25  ;;  %541 = vst.msk [vmem:[#allocation2 + $0xb1] sm:$0xff] %vm471_vm0, %v452_v26  ;;  %v461_v26 = vld [vmem:[%s9218_s15 + $0xb0] sm:$0xff] }
  0x94   : > { %542 = vst.msk [vmem:[#allocation2 + $0xc1] sm:$0xff] %vm471_vm0, %v453_v28  ;;  %543 = vst.msk [vmem:[#allocation2 + $0xc9] sm:$0xff] %vm471_vm0, %v454_v29  ;;  %v566_v36 = vld [vmem:[#allocation2 + $0x30] sm:$0xff]  ;;  %v567_v37 = vld [vmem:[#allocation2 + $0x38] sm:$0xff] }
  0x95   : > { %544 = vst.msk [vmem:[#allocation2 + $0xd9] sm:$0xff] %vm471_vm0, %v455_v30  ;;  %545 = vst.msk [vmem:[#allocation2 + $0xe1] sm:$0xff] %vm471_vm0, %v456_v32  ;;  %v569_v38 = vld [vmem:[#allocation2 + $0x48] sm:$0xff]  ;;  %v9269_v39 = vpack.c.bf16 %v567_v37, %v566_v36  ;;  %v570_v40 = vld [vmem:[#allocation2 + $0x50] sm:$0xff]  ;;  %v8891_v36 = vmov 65535  }
  0x96   : > { %546 = vst.msk [vmem:[#allocation2 + $0xf1] sm:$0xff] %vm471_vm0, %v457_v33  ;;  %547 = vst.msk [vmem:[#allocation2 + $0xf9] sm:$0xff] %vm471_vm0, %v458_v34  ;;  %v563_v41 = vld [vmem:[#allocation2 + $0x18] sm:$0xff]  ;;  %v564_v42 = vld [vmem:[#allocation2 + $0x20] sm:$0xff]  ;;  %v9275_v46 = vpack.c.bf16 %v570_v40, %v569_v38  ;;  %v1534_v37 = vsel %vm1532_vm5, 4294967295, %v8891_v36 }
  0x97   : > { %v9271_v43 = vpack.c.bf16 %v564_v42, %v563_v41  ;;  %v565_v44 = vld [vmem:[#allocation2 + $0x28] sm:$0x3]  ;;  %v568_v45 = vld [vmem:[#allocation2 + $0x40] sm:$0x3]  ;;  %1024 = vrot.lane.b32.xlu1 %v9269_v39, %s8885_s29  ;;  %v678_v50 = vshll.u32 %v9269_v39, 16  ;;  %v882_v57 = vrot.slane %v9269_v39, 1 }
  0x98   : > { %v617_v47 = vpack.c.bf16 %v565_v44, %v565_v44  ;;  %v619_v48 = vpack.c.bf16 %v568_v45, %v568_v45  ;;  %v571_v53 = vld [vmem:[#allocation2 + $0x58] sm:$0x3]  ;;  %v676_v59 = vshrl.u32 %v9269_v39, 16  ;;  %v690_v1 = vshll.u32 %v9275_v46, 16  ;;  %548 = vst.msk [vmem:[#allocation2 + $0x109] sm:$0xff] %vm471_vm0, %v459_v8  ;;  %549 = vst.msk [vmem:[#allocation2 + $0x111] sm:$0xff] %vm471_vm0, %v460_v13 }
  0x99   : > { %v879_v49 = vrot.slane %v9271_v43, 1  ;;  %v666_v51 = vshll.u32 %v9271_v43, 16  ;;  %1022 = vrot.lane.b32.xlu0 %v9271_v43, %s8885_s29  ;;  %v664_v54 = vshrl.u32 %v9271_v43, 16  ;;  %v680_v62 = vrot.slane %v678_v50, 1  ;;  %v572_v21 = vld [vmem:[#allocation2 + $0x60] sm:$0xff]  ;;  %v573_v22 = vld [vmem:[#allocation2 + $0x68] sm:$0xff] }
  0x9a   : > { %v880_v52 = vrot.slane %v617_v47, 1  ;;  %v671_v56 = vshll.u32 %v617_v47, 16  ;;  %v883_v58 = vrot.slane %v619_v48, 1  ;;  %v683_v60 = vshll.u32 %v619_v48, 16  ;;  %v574_v25 = vld [vmem:[#allocation2 + $0x70] sm:$0x3] }
  0x9b   : > { %v668_v55 = vrot.slane %v666_v51, 1  ;;  %1120 = vrot.lane.b32.xlu1 %v9275_v46, %s8886_s30  ;;  %v621_v63 = vpack.c.bf16 %v571_v53, %v571_v53  ;;  %v688_v7 = vshrl.u32 %v9275_v46, 16  ;;  %v681_v9 = vor.u32 %v680_v62, %v676_v59  ;;  %550 = vst.msk [vmem:[#allocation2 + $0x121] sm:$0xff] %vm471_vm0, %v461_v26  ;;  %551 = vst.msk [vmem:[#allocation2 + $0x129] sm:$0xff] %vm471_vm0, %v462_v27  ;;  %v9338_v30 = vld [vmem:[#allocation2 + $0x78] sm:$0xff]  ;;  %v9340_v31 = vld [vmem:[#allocation2 + $0x80] sm:$0xff] }
  0x9c   : > { %v881_v61 = vsel %vm875_vm2, %v879_v49, %v880_v52  ;;  %v673_v3 = vrot.slane %v671_v56, 1  ;;  %v9296_v6 = vsel %vm875_vm2, %v882_v57, %v883_v58  ;;  %v685_v10 = vrot.slane %v683_v60, 1  ;;  %5108 = vst.msk [vmem:[#allocation5] sm:$0xff] %vm1444_vm4, %v8882_v0  ;;  %5109 = vst.msk [vmem:[#allocation5 + $0x8] sm:$0xff] %vm1444_vm4, %v8882_v0  ;;  %v577_v40 = vld [vmem:[#allocation2 + $0x88] sm:$0x3] }
  0x9d   : > { %1118 = vrot.lane.b32.xlu0 %v9269_v39, %s8886_s30  ;;  %v669_v2 = vor.u32 %v668_v55, %v664_v54  ;;  %v692_v11 = vrot.slane %v690_v1, 1  ;;  %v695_v12 = vshll.u32 %v621_v63, 16  ;;  %v885_v19 = vrot.slane %v9275_v46, 1  ;;  %5112 = vst.msk [vmem:[#allocation5 + $0x18] sm:$0xff] %vm1444_vm4, %v8882_v0  ;;  %5113 = vst.msk [vmem:[#allocation5 + $0x20] sm:$0xff] %vm1444_vm4, %v8882_v0  ;;  %v463_v47 = vld [vmem:[%s9218_s15 + $0xc0] sm:$0xff] }
  0x9e   : > { %v9308_v15 = vsel %vm650_vm3, %v681_v9, %v685_v10  ;;  %v886_v20 = vrot.slane %v621_v63, 1  ;;  %v9323_v24 = vpack.c.bf16 %v573_v22, %v572_v21  ;;  %v9333_v28 = vpack.c.bf16 %v574_v25, %v574_v25  ;;  %5115 = vst.msk [vmem:[#allocation5 + $0x30] sm:$0xff] %vm1444_vm4, %v8882_v0  ;;  %5116 = vst.msk [vmem:[#allocation5 + $0x38] sm:$0xff] %vm1444_vm4, %v8882_v0  ;;  %v464_v48 = vld [vmem:[%s9218_s15 + $0xc8] sm:$0xff]  ;;  %v578_v58 = vld [vmem:[#allocation2 + $0x90] sm:$0xff] }
  0x9f   : > { %992 = vrot.lane.b32.xlu1 %v881_v61, %s8883_s24  ;;  %v674_v14 = vsel %vm650_vm3, %v669_v2, %v673_v3  ;;  %v693_v16 = vor.u32 %v692_v11, %v688_v7  ;;  %v697_v17 = vrot.slane %v695_v12, 1  ;;  %5118 = vst.msk [vmem:[#allocation5 + $0x48] sm:$0xff] %vm1444_vm4, %v8882_v0  ;;  %5119 = vst.msk [vmem:[#allocation5 + $0x50] sm:$0xff] %vm1444_vm4, %v8882_v0  ;;  %v1535_v41 = vsel %vm1533_vm6, %v1534_v37, 0  ;;  %v579_v59 = vld [vmem:[#allocation2 + $0x98] sm:$0xff]  ;;  %v465_v11 = vld [vmem:[%s9218_s15 + $0xd0] sm:$0xff] }
  0xa0   : > { %v9321_v23 = vsel %vm875_vm2, %v885_v19, %v886_v20  ;;  %v702_v29 = vshll.u32 %v9323_v24, 16  ;;  %v700_v32 = vshrl.u32 %v9323_v24, 16  ;;  %v707_v33 = vshll.u32 %v9333_v28, 16  ;;  %5121 = vst.msk [vmem:[#allocation5 + $0x60] sm:$0xff] %vm1444_vm4, %v8882_v0  ;;  %5122 = vst.msk [vmem:[#allocation5 + $0x68] sm:$0xff] %vm1444_vm4, %v8882_v0  ;;  %v466_v12 = vld [vmem:[%s9218_s15 + $0xd8] sm:$0xff] }
  0xa1   : > { %1086 = vrot.lane.b32.xlu0 %v881_v61, %s8887_s14  ;;  %v9314_v18 = vsel %vm650_vm3, %v693_v16, %v697_v17  ;;  %5124 = vst.msk [vmem:[#allocation5 + $0x78] sm:$0xff] %vm1444_vm4, %v8882_v0  ;;  %5125 = vst.msk [vmem:[#allocation5 + $0x80] sm:$0xff] %vm1444_vm4, %v8882_v0  ;;  %v9502_v38 = vpack.c.bf16 %v9340_v31, %v9338_v30  ;;  %v1537_v45 = vand.u32 %v8660_v35, %v1535_v41  ;;  %v580_v1 = vld [vmem:[#allocation2 + $0xa0] sm:$0x3]  ;;  %v581_v13 = vld [vmem:[#allocation2 + $0xa8] sm:$0xff] }
  0xa2   : > { %v9346_v34 = vrot.slane %v702_v29, 1  ;;  %5127 = vst.msk [vmem:[#allocation5 + $0x90] sm:$0xff] %vm1444_vm4, %v8882_v0  ;;  %5128 = vst.msk [vmem:[#allocation5 + $0x98] sm:$0xff] %vm1444_vm4, %v8882_v0  ;;  %v709_v44 = vrot.slane %v707_v33, 1  ;;  %v888_v49 = vrot.slane %v9323_v24, 1  ;;  %v889_v50 = vrot.slane %v9333_v28, 1 }
  0xa3   : > { %1088 = vrot.lane.b32.xlu1 %v9296_v6, %s8887_s14  ;;  %5130 = vst.msk [vmem:[#allocation5 + $0xa8] sm:$0xff] %vm1444_vm4, %v8882_v0  ;;  %5131 = vst.msk [vmem:[#allocation5 + $0xb0] sm:$0xff] %vm1444_vm4, %v8882_v0  ;;  %8522 = vmatprep.subr.bf16.mxu0 %v1537_v45  ;;  %v714_v51 = vshll.u32 %v9502_v38, 16  ;;  %v625_v53 = vpack.c.bf16 %v577_v40, %v577_v40  ;;  %v712_v54 = vshrl.u32 %v9502_v38, 16  ;;  %v891_v63 = vrot.slane %v9502_v38, 1  ;;  %v467_v19 = vld [vmem:[%s9218_s15 + $0xe0] sm:$0xff] }
  0xa4   : > { %5133 = vst.msk [vmem:[#allocation5 + $0xc0] sm:$0xff] %vm1444_vm4, %v8882_v0  ;;  %5134 = vst.msk [vmem:[#allocation5 + $0xc8] sm:$0xff] %vm1444_vm4, %v8882_v0  ;;  %v705_v42 = vor.u32 %v9346_v34, %v700_v32  ;;  %8557 = vmatprep.subr.bf16.mxu1 %v1537_v45  ;;  %8523 = vmatpush3.bf16.msra.mxu0 %v1537_v45  ;;  %v890_v55 = vsel %vm875_vm2, %v888_v49, %v889_v50  ;;  %v468_v20 = vld [vmem:[%s9218_s15 + $0xe8] sm:$0xff]  ;;  %v584_v33 = vld [vmem:[#allocation2 + $0xc0] sm:$0xff] }
  0xa5   : > { %960 = vrot.lane.b32.xlu0 %v674_v14, %s8884_s27  ;;  %5136 = vst.msk [vmem:[#allocation5 + $0xd8] sm:$0xff] %vm1444_vm4, %v8882_v0  ;;  %5137 = vst.msk [vmem:[#allocation5 + $0xe0] sm:$0xff] %vm1444_vm4, %v8882_v0  ;;  %8559 = vmatpush3.bf16.msra.mxu1 %v1537_v45  ;;  %v716_v56 = vrot.slane %v714_v51, 1  ;;  %v719_v57 = vshll.u32 %v625_v53, 16  ;;  %v9529_v62 = vpack.c.bf16 %v579_v59, %v578_v58  ;;  %v892_v3 = vrot.slane %v625_v53, 1  ;;  %v585_v34 = vld [vmem:[#allocation2 + $0xc8] sm:$0xff] }
  0xa6   : > { %5139 = vst.msk [vmem:[#allocation5 + $0xf0] sm:$0xff] %vm1444_vm4, %v8882_v0  ;;  %5140 = vst.msk [vmem:[#allocation5 + $0xf8] sm:$0xff] %vm1444_vm4, %v8882_v0  ;;  %v710_v52 = vsel %vm650_vm3, %v705_v42, %v709_v44  ;;  %v9581_v41 = vpack.c.bf16 %v585_v34, %v584_v33  ;;  %v586_v42 = vld [vmem:[#allocation2 + $0xd0] sm:$0x3]  ;;  %v470_v45 = vld [vmem:[%s9218_s15 + $0xf8] sm:$0xff] }
  0xa7   : > { %1056 = vrot.lane.b32.xlu1 %v9308_v15, %s8888_s16  ;;  %5142 = vst.msk [vmem:[#allocation5 + $0x108] sm:$0xff] %vm1444_vm4, %v8882_v0  ;;  %5143 = vst.msk [vmem:[#allocation5 + $0x110] sm:$0xff] %vm1444_vm4, %v8882_v0  ;;  %v717_v60 = vor.u32 %v716_v56, %v712_v54  ;;  %v721_v61 = vrot.slane %v719_v57, 1  ;;  %v726_v5 = vshll.u32 %v9529_v62, 16  ;;  %v893_v7 = vsel %vm875_vm2, %v891_v63, %v892_v3  ;;  %v469_v44 = vld [vmem:[%s9218_s15 + $0xf0] sm:$0xff]  ;;  %v588_v53 = vld [vmem:[#allocation2 + $0xe0] sm:$0xff] }
  0xa8   : > { %5145 = vst.msk [vmem:[#allocation5 + $0x120] sm:$0xff] %vm1444_vm4, %v8882_v0  ;;  %5146 = vst.msk [vmem:[#allocation5 + $0x128] sm:$0xff] %vm1444_vm4, %v8882_v0  ;;  %v724_v8 = vshrl.u32 %v9529_v62, 16  ;;  %v894_v21 = vrot.slane %v9529_v62, 1  ;;  %v748_v49 = vshrl.u32 %v9581_v41, 16  ;;  %v900_v58 = vrot.slane %v9581_v41, 1 }
  0xa9   : > { %1054 = vrot.lane.b32.xlu0 %v674_v14, %s8888_s16  ;;  %5148 = vst.msk [vmem:[#allocation5 + $0x138] sm:$0xff] %vm1444_vm4, %v8882_v0  ;;  %5149 = vst.msk [vmem:[#allocation5 + $0x140] sm:$0xff] %vm1444_vm4, %v8882_v0  ;;  %v722_v2 = vsel %vm650_vm3, %v717_v60, %v721_v61  ;;  %v728_v9 = vrot.slane %v726_v5, 1  ;;  %v582_v14 = vld [vmem:[#allocation2 + $0xb0] sm:$0xff]  ;;  %v589_v57 = vld [vmem:[#allocation2 + $0xe8] sm:$0x3] }
  0xaa   : > { %5151 = vst.msk [vmem:[#allocation5 + $0x150] sm:$0xff] %vm1444_vm4, %v8882_v0  ;;  %5152 = vst.msk [vmem:[#allocation5 + $0x158] sm:$0xff] %vm1444_vm4, %v8882_v0  ;;  %v633_v61 = vpack.c.bf16 %v589_v57, %v589_v57  ;;  %v594_v33 = vld [vmem:[#allocation2 + $0x110] sm:$0xff]  ;;  %s8894_s15 = smov 80  }
  0xab   : > { %1152 = vrot.lane.b32.xlu1 %v9314_v18, %s8889_s19  ;;  %5154 = vst.msk [vmem:[#allocation5 + $0x168] sm:$0xff] %vm1444_vm4, %v8882_v0  ;;  %5155 = vst.msk [vmem:[#allocation5 + $0x170] sm:$0xff] %vm1444_vm4, %v8882_v0  ;;  %v729_v16 = vor.u32 %v728_v9, %v724_v8 }
  0xac   : > { %5157 = vst.msk [vmem:[#allocation5 + $0x180] sm:$0xff] %vm1444_vm4, %v8882_v0  ;;  %5158 = vst.msk [vmem:[#allocation5 + $0x188] sm:$0xff] %vm1444_vm4, %v8882_v0  ;;  %v767_v5 = vshll.u32 %v633_v61, 16 }
  0xad   : > { %1150 = vrot.lane.b32.xlu0 %v9308_v15, %s8889_s19  ;;  %5160 = vst.msk [vmem:[#allocation5 + $0x198] sm:$0xff] %vm1444_vm4, %v8882_v0  ;;  %5161 = vst.msk [vmem:[#allocation5 + $0x1a0] sm:$0xff] %vm1444_vm4, %v8882_v0 }
  0xae   : > { %6436 = vst.msk [vmem:[#allocation6] sm:$0xff] %vm1444_vm4, %v8882_v0  ;;  %6437 = vst.msk [vmem:[#allocation6 + $0x8] sm:$0xff] %vm1444_vm4, %v8882_v0  ;;  %v769_v8 = vrot.slane %v767_v5, 1 }
  0xaf   : > { %1184 = vrot.lane.b32.xlu1 %v9321_v23, %s8890_s25  ;;  %6439 = vst.msk [vmem:[#allocation6 + $0x18] sm:$0xff] %vm1444_vm4, %v8882_v0  ;;  %6440 = vst.msk [vmem:[#allocation6 + $0x20] sm:$0xff] %vm1444_vm4, %v8882_v0 }
  0xb0   : > { %6442 = vst.msk [vmem:[#allocation6 + $0x30] sm:$0xff] %vm1444_vm4, %v8882_v0  ;;  %6443 = vst.msk [vmem:[#allocation6 + $0x38] sm:$0xff] %vm1444_vm4, %v8882_v0 }
  0xb1   : > { %1182 = vrot.lane.b32.xlu0 %v9296_v6, %s8890_s25  ;;  %6445 = vst.msk [vmem:[#allocation6 + $0x48] sm:$0xff] %vm1444_vm4, %v8882_v0  ;;  %6446 = vst.msk [vmem:[#allocation6 + $0x50] sm:$0xff] %vm1444_vm4, %v8882_v0 }
  0xb2   : > { %6448 = vst.msk [vmem:[#allocation6 + $0x60] sm:$0xff] %vm1444_vm4, %v8882_v0  ;;  %6449 = vst.msk [vmem:[#allocation6 + $0x68] sm:$0xff] %vm1444_vm4, %v8882_v0 }
  0xb3   : > { %964 = vrot.lane.b32.xlu1 %v9314_v18, %s8884_s27  ;;  %6451 = vst.msk [vmem:[#allocation6 + $0x78] sm:$0xff] %vm1444_vm4, %v8882_v0  ;;  %6452 = vst.msk [vmem:[#allocation6 + $0x80] sm:$0xff] %vm1444_vm4, %v8882_v0 }
  0xb4   : > { %6454 = vst.msk [vmem:[#allocation6 + $0x90] sm:$0xff] %vm1444_vm4, %v8882_v0  ;;  %6455 = vst.msk [vmem:[#allocation6 + $0x98] sm:$0xff] %vm1444_vm4, %v8882_v0 }
  0xb5   : > { %6457 = vst.msk [vmem:[#allocation6 + $0xa8] sm:$0xff] %vm1444_vm4, %v8882_v0  ;;  %6458 = vst.msk [vmem:[#allocation6 + $0xb0] sm:$0xff] %vm1444_vm4, %v8882_v0  ;;  %962 = vrot.lane.b32.xlu0 %v9308_v15, %s8884_s27  ;;  %v583_v15 = vld [vmem:[#allocation2 + $0xb8] sm:$0x3] }
  0xb6   : > { %6460 = vst.msk [vmem:[#allocation6 + $0xc0] sm:$0xff] %vm1444_vm4, %v8882_v0  ;;  %6461 = vst.msk [vmem:[#allocation6 + $0xc8] sm:$0xff] %vm1444_vm4, %v8882_v0  ;;  %v629_v25 = vpack.c.bf16 %v583_v15, %v583_v15  ;;  %v591_v15 = vld [vmem:[#allocation2 + $0xf8] sm:$0xff] }
  0xb7   : > { %6463 = vst.msk [vmem:[#allocation6 + $0xd8] sm:$0xff] %vm1444_vm4, %v8882_v0  ;;  %6464 = vst.msk [vmem:[#allocation6 + $0xe0] sm:$0xff] %vm1444_vm4, %v8882_v0  ;;  %996 = vrot.lane.b32.xlu1 %v9321_v23, %s8883_s24 }
  0xb8   : > { %6466 = vst.msk [vmem:[#allocation6 + $0xf0] sm:$0xff] %vm1444_vm4, %v8882_v0  ;;  %6467 = vst.msk [vmem:[#allocation6 + $0xf8] sm:$0xff] %vm1444_vm4, %v8882_v0  ;;  %v743_v30 = vshll.u32 %v629_v25, 16  ;;  %v898_v37 = vrot.slane %v629_v25, 1 }
  0xb9   : > { %6469 = vst.msk [vmem:[#allocation6 + $0x108] sm:$0xff] %vm1444_vm4, %v8882_v0  ;;  %6470 = vst.msk [vmem:[#allocation6 + $0x110] sm:$0xff] %vm1444_vm4, %v8882_v0  ;;  %994 = vrot.lane.b32.xlu0 %v9296_v6, %s8883_s24  ;;  %v627_v6 = vpack.c.bf16 %v580_v1, %v580_v1 }
  0xba   : > { %6472 = vst.msk [vmem:[#allocation6 + $0x120] sm:$0xff] %vm1444_vm4, %v8882_v0  ;;  %6473 = vst.msk [vmem:[#allocation6 + $0x128] sm:$0xff] %vm1444_vm4, %v8882_v0  ;;  %v745_v32 = vrot.slane %v743_v30, 1 }
  0xbb   : > { %6475 = vst.msk [vmem:[#allocation6 + $0x138] sm:$0xff] %vm1444_vm4, %v8882_v0  ;;  %6476 = vst.msk [vmem:[#allocation6 + $0x140] sm:$0xff] %vm1444_vm4, %v8882_v0  ;;  %1028 = vrot.lane.b32.xlu1 %v9323_v24, %s8885_s29  ;;  %v731_v10 = vshll.u32 %v627_v6, 16  ;;  %v895_v22 = vrot.slane %v627_v6, 1 }
  0xbc   : > { %6478 = vst.msk [vmem:[#allocation6 + $0x150] sm:$0xff] %vm1444_vm4, %v8882_v0  ;;  %6479 = vst.msk [vmem:[#allocation6 + $0x158] sm:$0xff] %vm1444_vm4, %v8882_v0 }
  0xbd   : > { %6481 = vst.msk [vmem:[#allocation6 + $0x168] sm:$0xff] %vm1444_vm4, %v8882_v0  ;;  %6482 = vst.msk [vmem:[#allocation6 + $0x170] sm:$0xff] %vm1444_vm4, %v8882_v0  ;;  %1026 = vrot.lane.b32.xlu0 %v9275_v46, %s8885_s29  ;;  %v733_v17 = vrot.slane %v731_v10, 1  ;;  %v896_v28 = vsel %vm875_vm2, %v894_v21, %v895_v22  ;;  %v592_v21 = vld [vmem:[#allocation2 + $0x100] sm:$0x3] }
  0xbe   : > { %6484 = vst.msk [vmem:[#allocation6 + $0x180] sm:$0xff] %vm1444_vm4, %v8882_v0  ;;  %6485 = vst.msk [vmem:[#allocation6 + $0x188] sm:$0xff] %vm1444_vm4, %v8882_v0 }
  0xbf   : > { %6487 = vst.msk [vmem:[#allocation6 + $0x198] sm:$0xff] %vm1444_vm4, %v8882_v0  ;;  %6488 = vst.msk [vmem:[#allocation6 + $0x1a0] sm:$0xff] %vm1444_vm4, %v8882_v0  ;;  %1060 = vrot.lane.b32.xlu1 %v710_v52, %s8888_s16 }
  0xc0   : > { %552 = vst.msk [vmem:[#allocation2 + $0x139] sm:$0xff] %vm471_vm0, %v463_v47  ;;  %553 = vst.msk [vmem:[#allocation2 + $0x141] sm:$0xff] %vm471_vm0, %v464_v48  ;;  %v631_v47 = vpack.c.bf16 %v586_v42, %v586_v42  ;;  %v750_v48 = vshll.u32 %v9581_v41, 16 }
  0xc1   : > { %1058 = vrot.lane.b32.xlu0 %v9314_v18, %s8888_s16  ;;  %554 = vst.msk [vmem:[#allocation2 + $0x151] sm:$0xff] %vm471_vm0, %v465_v11  ;;  %555 = vst.msk [vmem:[#allocation2 + $0x159] sm:$0xff] %vm471_vm0, %v466_v12  ;;  %v9553_v18 = vpack.c.bf16 %v582_v14, %v581_v13  ;;  %v904_v12 = vrot.slane %v633_v61, 1  ;;  %v590_v14 = vld [vmem:[#allocation2 + $0xf0] sm:$0xff] }
  0xc2   : > { %556 = vst.msk [vmem:[#allocation2 + $0x169] sm:$0xff] %vm471_vm0, %v467_v19  ;;  %557 = vst.msk [vmem:[#allocation2 + $0x171] sm:$0xff] %vm471_vm0, %v468_v20  ;;  %v752_v50 = vrot.slane %v750_v48, 1  ;;  %v755_v51 = vshll.u32 %v631_v47, 16  ;;  %v901_v60 = vrot.slane %v631_v47, 1  ;;  %v9624_v19 = vpack.c.bf16 %v591_v15, %v590_v14 }
  0xc3   : > { %1092 = vrot.lane.b32.xlu1 %v890_v55, %s8887_s14  ;;  %v736_v26 = vshrl.u32 %v9553_v18, 16  ;;  %v738_v27 = vshll.u32 %v9553_v18, 16  ;;  %v897_v36 = vrot.slane %v9553_v18, 1  ;;  %558 = vst.msk [vmem:[#allocation2 + $0x181] sm:$0xff] %vm471_vm0, %v469_v44  ;;  %559 = vst.msk [vmem:[#allocation2 + $0x189] sm:$0xff] %vm471_vm0, %v470_v45 }
  0xc4   : > { %v753_v54 = vor.u32 %v752_v50, %v748_v49  ;;  %v902_v1 = vsel %vm875_vm2, %v900_v58, %v901_v60  ;;  %v774_v25 = vshll.u32 %v9624_v19, 16  ;;  %v595_v44 = vld [vmem:[#allocation2 + $0x118] sm:$0x3]  ;;  %v906_v49 = vrot.slane %v9624_v19, 1  ;;  %1957 = vst.msk [vmem:[#allocation3] sm:$0xff] %vm1956_vm14, %v8882_v0  ;;  %1958 = vst.msk [vmem:[#allocation3 + $0x8] sm:$0xff] %vm1956_vm14, %v8882_v0 }
  0xc5   : > { %1090 = vrot.lane.b32.xlu0 %v9321_v23, %s8887_s14  ;;  %v734_v23 = vsel %vm650_vm3, %v729_v16, %v733_v17  ;;  %v740_v29 = vrot.slane %v738_v27, 1  ;;  %v899_v40 = vsel %vm875_vm2, %v897_v36, %v898_v37  ;;  %1961 = vst.msk [vmem:[#allocation3 + $0x18] sm:$0xff] %vm1956_vm14, %v8882_v0  ;;  %1962 = vst.msk [vmem:[#allocation3 + $0x20] sm:$0xff] %vm1956_vm14, %v8882_v0 }
  0xc6   : > { %1964 = vst.msk [vmem:[#allocation3 + $0x30] sm:$0xff] %vm1956_vm14, %v8882_v0  ;;  %1965 = vst.msk [vmem:[#allocation3 + $0x38] sm:$0xff] %vm1956_vm14, %v8882_v0 }
  0xc7   : > { %1124 = vrot.lane.b32.xlu1 %v9502_v38, %s8886_s30  ;;  %v741_v31 = vor.u32 %v740_v29, %v736_v26  ;;  %v776_v29 = vrot.slane %v774_v25, 1  ;;  %v596_v25 = vld [vmem:[#allocation2 + $0x120] sm:$0xff]  ;;  %1967 = vst.msk [vmem:[#allocation3 + $0x48] sm:$0xff] %vm1956_vm14, %v8882_v0  ;;  %1968 = vst.msk [vmem:[#allocation3 + $0x50] sm:$0xff] %vm1956_vm14, %v8882_v0 }
  0xc8   : > { %1970 = vst.msk [vmem:[#allocation3 + $0x60] sm:$0xff] %vm1956_vm14, %v8882_v0  ;;  %1971 = vst.msk [vmem:[#allocation3 + $0x68] sm:$0xff] %vm1956_vm14, %v8882_v0 }
  0xc9   : > { %1122 = vrot.lane.b32.xlu0 %v9323_v24, %s8886_s30  ;;  %v746_v35 = vsel %vm650_vm3, %v741_v31, %v745_v32  ;;  %v593_v32 = vld [vmem:[#allocation2 + $0x108] sm:$0xff]  ;;  %1973 = vst.msk [vmem:[#allocation3 + $0x78] sm:$0xff] %vm1956_vm14, %v8882_v0  ;;  %1974 = vst.msk [vmem:[#allocation3 + $0x80] sm:$0xff] %vm1956_vm14, %v8882_v0 }
  0xca   : > { %v9641_v42 = vpack.c.bf16 %v594_v33, %v593_v32  ;;  %1976 = vst.msk [vmem:[#allocation3 + $0x90] sm:$0xff] %vm1956_vm14, %v8882_v0  ;;  %1977 = vst.msk [vmem:[#allocation3 + $0x98] sm:$0xff] %vm1956_vm14, %v8882_v0 }
  0xcb   : > { %1156 = vrot.lane.b32.xlu1 %v722_v2, %s8889_s19  ;;  %1979 = vst.msk [vmem:[#allocation3 + $0xa8] sm:$0xff] %vm1956_vm14, %v8882_v0  ;;  %1980 = vst.msk [vmem:[#allocation3 + $0xb0] sm:$0xff] %vm1956_vm14, %v8882_v0 }
  0xcc   : > { %v786_v58 = vshll.u32 %v9641_v42, 16  ;;  %1982 = vst.msk [vmem:[#allocation3 + $0xc0] sm:$0xff] %vm1956_vm14, %v8882_v0  ;;  %1983 = vst.msk [vmem:[#allocation3 + $0xc8] sm:$0xff] %vm1956_vm14, %v8882_v0 }
  0xcd   : > { %1154 = vrot.lane.b32.xlu0 %v710_v52, %s8889_s19  ;;  %1985 = vst.msk [vmem:[#allocation3 + $0xd8] sm:$0xff] %vm1956_vm14, %v8882_v0  ;;  %1986 = vst.msk [vmem:[#allocation3 + $0xe0] sm:$0xff] %vm1956_vm14, %v8882_v0 }
  0xce   : > { %v788_v5 = vrot.slane %v786_v58, 1  ;;  %1988 = vst.msk [vmem:[#allocation3 + $0xf0] sm:$0xff] %vm1956_vm14, %v8882_v0  ;;  %1989 = vst.msk [vmem:[#allocation3 + $0xf8] sm:$0xff] %vm1956_vm14, %v8882_v0 }
  0xcf   : > { %1188 = vrot.lane.b32.xlu1 %v893_v7, %s8890_s25  ;;  %1991 = vst.msk [vmem:[#allocation3 + $0x108] sm:$0xff] %vm1956_vm14, %v8882_v0  ;;  %1992 = vst.msk [vmem:[#allocation3 + $0x110] sm:$0xff] %vm1956_vm14, %v8882_v0 }
  0xd0   : > { %1994 = vst.msk [vmem:[#allocation3 + $0x120] sm:$0xff] %vm1956_vm14, %v8882_v0  ;;  %1995 = vst.msk [vmem:[#allocation3 + $0x128] sm:$0xff] %vm1956_vm14, %v8882_v0 }
  0xd1   : > { %1186 = vrot.lane.b32.xlu0 %v890_v55, %s8890_s25  ;;  %1997 = vst.msk [vmem:[#allocation3 + $0x138] sm:$0xff] %vm1956_vm14, %v8882_v0  ;;  %1998 = vst.msk [vmem:[#allocation3 + $0x140] sm:$0xff] %vm1956_vm14, %v8882_v0 }
  0xd2   : > { %2000 = vst.msk [vmem:[#allocation3 + $0x150] sm:$0xff] %vm1956_vm14, %v8882_v0  ;;  %2001 = vst.msk [vmem:[#allocation3 + $0x158] sm:$0xff] %vm1956_vm14, %v8882_v0 }
  0xd3   : > { %968 = vrot.lane.b32.xlu1 %v722_v2, %s8884_s27  ;;  %2003 = vst.msk [vmem:[#allocation3 + $0x168] sm:$0xff] %vm1956_vm14, %v8882_v0  ;;  %2004 = vst.msk [vmem:[#allocation3 + $0x170] sm:$0xff] %vm1956_vm14, %v8882_v0 }
  0xd4   : > { %2006 = vst.msk [vmem:[#allocation3 + $0x180] sm:$0xff] %vm1956_vm14, %v8882_v0  ;;  %2007 = vst.msk [vmem:[#allocation3 + $0x188] sm:$0xff] %vm1956_vm14, %v8882_v0 }
  0xd5   : > { %966 = vrot.lane.b32.xlu0 %v710_v52, %s8884_s27  ;;  %v587_v52 = vld [vmem:[#allocation2 + $0xd8] sm:$0xff]  ;;  %2009 = vst.msk [vmem:[#allocation3 + $0x198] sm:$0xff] %vm1956_vm14, %v8882_v0  ;;  %2010 = vst.msk [vmem:[#allocation3 + $0x1a0] sm:$0xff] %vm1956_vm14, %v8882_v0 }
  0xd6   : > { %v9595_v56 = vpack.c.bf16 %v588_v53, %v587_v52  ;;  %v637_v53 = vpack.c.bf16 %v595_v44, %v595_v44  ;;  %3536 = vst.msk [vmem:[#allocation4] sm:$0xff] %vm1956_vm14, %v8882_v0  ;;  %3537 = vst.msk [vmem:[#allocation4 + $0x8] sm:$0xff] %vm1956_vm14, %v8882_v0 }
  0xd7   : > { %1000 = vrot.lane.b32.xlu1 %v893_v7, %s8883_s24  ;;  %3539 = vst.msk [vmem:[#allocation4 + $0x18] sm:$0xff] %vm1956_vm14, %v8882_v0  ;;  %3540 = vst.msk [vmem:[#allocation4 + $0x20] sm:$0xff] %vm1956_vm14, %v8882_v0 }
  0xd8   : > { %v762_v63 = vshll.u32 %v9595_v56, 16  ;;  %v903_v11 = vrot.slane %v9595_v56, 1  ;;  %3542 = vst.msk [vmem:[#allocation4 + $0x30] sm:$0xff] %vm1956_vm14, %v8882_v0  ;;  %3543 = vst.msk [vmem:[#allocation4 + $0x38] sm:$0xff] %vm1956_vm14, %v8882_v0 }
  0xd9   : > { %998 = vrot.lane.b32.xlu0 %v890_v55, %s8883_s24  ;;  %v757_v55 = vrot.slane %v755_v51, 1  ;;  %3545 = vst.msk [vmem:[#allocation4 + $0x48] sm:$0xff] %vm1956_vm14, %v8882_v0  ;;  %3546 = vst.msk [vmem:[#allocation4 + $0x50] sm:$0xff] %vm1956_vm14, %v8882_v0 }
  0xda   : > { %v764_v3 = vrot.slane %v762_v63, 1  ;;  %v9622_v17 = vsel %vm875_vm2, %v903_v11, %v904_v12  ;;  %3548 = vst.msk [vmem:[#allocation4 + $0x60] sm:$0xff] %vm1956_vm14, %v8882_v0  ;;  %3549 = vst.msk [vmem:[#allocation4 + $0x68] sm:$0xff] %vm1956_vm14, %v8882_v0 }
  0xdb   : > { %1032 = vrot.lane.b32.xlu1 %v9529_v62, %s8885_s29  ;;  %v758_v59 = vsel %vm650_vm3, %v753_v54, %v757_v55  ;;  %3551 = vst.msk [vmem:[#allocation4 + $0x78] sm:$0xff] %vm1956_vm14, %v8882_v0  ;;  %3552 = vst.msk [vmem:[#allocation4 + $0x80] sm:$0xff] %vm1956_vm14, %v8882_v0 }
  0xdc   : > { %3554 = vst.msk [vmem:[#allocation4 + $0x90] sm:$0xff] %vm1956_vm14, %v8882_v0  ;;  %3555 = vst.msk [vmem:[#allocation4 + $0x98] sm:$0xff] %vm1956_vm14, %v8882_v0 }
  0xdd   : > { %1030 = vrot.lane.b32.xlu0 %v9502_v38, %s8885_s29  ;;  %3557 = vst.msk [vmem:[#allocation4 + $0xa8] sm:$0xff] %vm1956_vm14, %v8882_v0  ;;  %3558 = vst.msk [vmem:[#allocation4 + $0xb0] sm:$0xff] %vm1956_vm14, %v8882_v0 }
  0xde   : > { %3560 = vst.msk [vmem:[#allocation4 + $0xc0] sm:$0xff] %vm1956_vm14, %v8882_v0  ;;  %3561 = vst.msk [vmem:[#allocation4 + $0xc8] sm:$0xff] %vm1956_vm14, %v8882_v0 }
  0xdf   : > { %1064 = vrot.lane.b32.xlu1 %v734_v23, %s8888_s16  ;;  %3563 = vst.msk [vmem:[#allocation4 + $0xd8] sm:$0xff] %vm1956_vm14, %v8882_v0  ;;  %3564 = vst.msk [vmem:[#allocation4 + $0xe0] sm:$0xff] %vm1956_vm14, %v8882_v0 }
  0xe0   : > { %3566 = vst.msk [vmem:[#allocation4 + $0xf0] sm:$0xff] %vm1956_vm14, %v8882_v0  ;;  %3567 = vst.msk [vmem:[#allocation4 + $0xf8] sm:$0xff] %vm1956_vm14, %v8882_v0 }
  0xe1   : > { %1062 = vrot.lane.b32.xlu0 %v722_v2, %s8888_s16  ;;  %v760_v2 = vshrl.u32 %v9595_v56, 16  ;;  %3569 = vst.msk [vmem:[#allocation4 + $0x108] sm:$0xff] %vm1956_vm14, %v8882_v0  ;;  %3570 = vst.msk [vmem:[#allocation4 + $0x110] sm:$0xff] %vm1956_vm14, %v8882_v0 }
  0xe2   : > { %3572 = vst.msk [vmem:[#allocation4 + $0x120] sm:$0xff] %vm1956_vm14, %v8882_v0  ;;  %3573 = vst.msk [vmem:[#allocation4 + $0x128] sm:$0xff] %vm1956_vm14, %v8882_v0 }
  0xe3   : > { %1096 = vrot.lane.b32.xlu1 %v896_v28, %s8887_s14  ;;  %3575 = vst.msk [vmem:[#allocation4 + $0x138] sm:$0xff] %vm1956_vm14, %v8882_v0  ;;  %3576 = vst.msk [vmem:[#allocation4 + $0x140] sm:$0xff] %vm1956_vm14, %v8882_v0 }
  0xe4   : > { %3578 = vst.msk [vmem:[#allocation4 + $0x150] sm:$0xff] %vm1956_vm14, %v8882_v0  ;;  %3579 = vst.msk [vmem:[#allocation4 + $0x158] sm:$0xff] %vm1956_vm14, %v8882_v0 }
  0xe5   : > { %1094 = vrot.lane.b32.xlu0 %v893_v7, %s8887_s14  ;;  %v765_v7 = vor.u32 %v764_v3, %v760_v2  ;;  %v784_v3 = vshrl.u32 %v9641_v42, 16  ;;  %3581 = vst.msk [vmem:[#allocation4 + $0x168] sm:$0xff] %vm1956_vm14, %v8882_v0  ;;  %3582 = vst.msk [vmem:[#allocation4 + $0x170] sm:$0xff] %vm1956_vm14, %v8882_v0 }
  0xe6   : > { %3584 = vst.msk [vmem:[#allocation4 + $0x180] sm:$0xff] %vm1956_vm14, %v8882_v0  ;;  %3585 = vst.msk [vmem:[#allocation4 + $0x188] sm:$0xff] %vm1956_vm14, %v8882_v0 }
  0xe7   : > { %1128 = vrot.lane.b32.xlu1 %v9553_v18, %s8886_s30  ;;  %v9614_v10 = vsel %vm650_vm3, %v765_v7, %v769_v8  ;;  %3587 = vst.msk [vmem:[#allocation4 + $0x198] sm:$0xff] %vm1956_vm14, %v8882_v0  ;;  %3588 = vst.msk [vmem:[#allocation4 + $0x1a0] sm:$0xff] %vm1956_vm14, %v8882_v0 }
  0xe8   : > { %1960 = vst.msk [vmem:[#allocation3 + $0x10] sm:$0x3] %vm1959_vm15, %v8882_v0  ;;  %1963 = vst.msk [vmem:[#allocation3 + $0x28] sm:$0x3] %vm1959_vm15, %v8882_v0 }
  0xe9   : > { %1126 = vrot.lane.b32.xlu0 %v9529_v62, %s8886_s30  ;;  %1966 = vst.msk [vmem:[#allocation3 + $0x40] sm:$0x3] %vm1959_vm15, %v8882_v0  ;;  %1969 = vst.msk [vmem:[#allocation3 + $0x58] sm:$0x3] %vm1959_vm15, %v8882_v0 }
  0xea   : > { %1972 = vst.msk [vmem:[#allocation3 + $0x70] sm:$0x3] %vm1959_vm15, %v8882_v0  ;;  %1975 = vst.msk [vmem:[#allocation3 + $0x88] sm:$0x3] %vm1959_vm15, %v8882_v0 }
  0xeb   : > { %1160 = vrot.lane.b32.xlu1 %v746_v35, %s8889_s19  ;;  %1978 = vst.msk [vmem:[#allocation3 + $0xa0] sm:$0x3] %vm1959_vm15, %v8882_v0  ;;  %1981 = vst.msk [vmem:[#allocation3 + $0xb8] sm:$0x3] %vm1959_vm15, %v8882_v0 }
  0xec   : > { %1984 = vst.msk [vmem:[#allocation3 + $0xd0] sm:$0x3] %vm1959_vm15, %v8882_v0  ;;  %1987 = vst.msk [vmem:[#allocation3 + $0xe8] sm:$0x3] %vm1959_vm15, %v8882_v0 }
  0xed   : > { %1158 = vrot.lane.b32.xlu0 %v734_v23, %s8889_s19  ;;  %1990 = vst.msk [vmem:[#allocation3 + $0x100] sm:$0x3] %vm1959_vm15, %v8882_v0  ;;  %1993 = vst.msk [vmem:[#allocation3 + $0x118] sm:$0x3] %vm1959_vm15, %v8882_v0 }
  0xee   : > { %1996 = vst.msk [vmem:[#allocation3 + $0x130] sm:$0x3] %vm1959_vm15, %v8882_v0  ;;  %1999 = vst.msk [vmem:[#allocation3 + $0x148] sm:$0x3] %vm1959_vm15, %v8882_v0 }
  0xef   : > { %1192 = vrot.lane.b32.xlu1 %v899_v40, %s8890_s25  ;;  %2002 = vst.msk [vmem:[#allocation3 + $0x160] sm:$0x3] %vm1959_vm15, %v8882_v0  ;;  %2005 = vst.msk [vmem:[#allocation3 + $0x178] sm:$0x3] %vm1959_vm15, %v8882_v0 }
  0xf0   : > { %2008 = vst.msk [vmem:[#allocation3 + $0x190] sm:$0x3] %vm1959_vm15, %v8882_v0  ;;  %2011 = vst.msk [vmem:[#allocation3 + $0x1a8] sm:$0x3] %vm1959_vm15, %v8882_v0 }
  0xf1   : > { %1190 = vrot.lane.b32.xlu0 %v896_v28, %s8890_s25  ;;  %3538 = vst.msk [vmem:[#allocation4 + $0x10] sm:$0x3] %vm1959_vm15, %v8882_v0  ;;  %3541 = vst.msk [vmem:[#allocation4 + $0x28] sm:$0x3] %vm1959_vm15, %v8882_v0 }
  0xf2   : > { %v991_v6 = vpop.permute.xlu1 %990  ;;  %3544 = vst.msk [vmem:[#allocation4 + $0x40] sm:$0x3] %vm1959_vm15, %v8882_v0  ;;  %3547 = vst.msk [vmem:[#allocation4 + $0x58] sm:$0x3] %vm1959_vm15, %v8882_v0 }
  0xf3   : > { %972 = vrot.lane.b32.xlu1 %v746_v35, %s8884_s27  ;;  %3550 = vst.msk [vmem:[#allocation4 + $0x70] sm:$0x3] %vm1959_vm15, %v8882_v0  ;;  %3553 = vst.msk [vmem:[#allocation4 + $0x88] sm:$0x3] %vm1959_vm15, %v8882_v0 }
  0xf4   : > { %3556 = vst.msk [vmem:[#allocation4 + $0xa0] sm:$0x3] %vm1959_vm15, %v8882_v0  ;;  %3559 = vst.msk [vmem:[#allocation4 + $0xb8] sm:$0x3] %vm1959_vm15, %v8882_v0 }
  0xf5   : > { %970 = vrot.lane.b32.xlu0 %v734_v23, %s8884_s27  ;;  %v635_v23 = vpack.c.bf16 %v592_v21, %v592_v21  ;;  %v909_v21 = vrot.slane %v9641_v42, 1  ;;  %3562 = vst.msk [vmem:[#allocation4 + $0xd0] sm:$0x3] %vm1959_vm15, %v8882_v0  ;;  %3565 = vst.msk [vmem:[#allocation4 + $0xe8] sm:$0x3] %vm1959_vm15, %v8882_v0 }
  0xf6   : > { %v959_v9 = vpop.permute.xlu0 %958  ;;  %3568 = vst.msk [vmem:[#allocation4 + $0x100] sm:$0x3] %vm1959_vm15, %v8882_v0  ;;  %3571 = vst.msk [vmem:[#allocation4 + $0x118] sm:$0x3] %vm1959_vm15, %v8882_v0 }
  0xf7   : > { %1004 = vrot.lane.b32.xlu1 %v899_v40, %s8883_s24  ;;  %v779_v30 = vshll.u32 %v635_v23, 16  ;;  %v1215_v34 = vsel %vm471_vm0, %v9220_v4, %v959_v9  ;;  %v907_v52 = vrot.slane %v635_v23, 1  ;;  %3574 = vst.msk [vmem:[#allocation4 + $0x130] sm:$0x3] %vm1959_vm15, %v8882_v0  ;;  %3577 = vst.msk [vmem:[#allocation4 + $0x148] sm:$0x3] %vm1959_vm15, %v8882_v0 }
  0xf8   : > { %v1248_v4 = vsel %vm1246_vm7, %v1215_v34, %v991_v6  ;;  %v791_v6 = vshll.u32 %v637_v53, 16  ;;  %3580 = vst.msk [vmem:[#allocation4 + $0x160] sm:$0x3] %vm1959_vm15, %v8882_v0  ;;  %3583 = vst.msk [vmem:[#allocation4 + $0x178] sm:$0x3] %vm1959_vm15, %v8882_v0 }
  0xf9   : > { %1002 = vrot.lane.b32.xlu0 %v896_v28, %s8883_s24  ;;  %v772_v28 = vshrl.u32 %v9624_v19, 16  ;;  %3586 = vst.msk [vmem:[#allocation4 + $0x190] sm:$0x3] %vm1959_vm15, %v8882_v0  ;;  %3589 = vst.msk [vmem:[#allocation4 + $0x1a8] sm:$0x3] %vm1959_vm15, %v8882_v0 }
  0xfa   : > { %v793_v14 = vrot.slane %v791_v6, 1 }
  0xfb   : > { %1036 = vrot.lane.b32.xlu1 %v9581_v41, %s8885_s29  ;;  %v777_v37 = vor.u32 %v776_v29, %v772_v28 }
  0xfd   : > { %1034 = vrot.lane.b32.xlu0 %v9553_v18, %s8885_s29 }
  0xff   : > { %1068 = vrot.lane.b32.xlu1 %v758_v59, %s8888_s16 }
 0x101   : > { %1066 = vrot.lane.b32.xlu0 %v746_v35, %s8888_s16 }
 0x103   : > { %1100 = vrot.lane.b32.xlu1 %v902_v1, %s8887_s14 }
 0x105   : > { %1098 = vrot.lane.b32.xlu0 %v899_v40, %s8887_s14  ;;  %v781_v40 = vrot.slane %v779_v30, 1  ;;  %v598_v30 = vld [vmem:[#allocation2 + $0x130] sm:$0x3] }
 0x106   : > { %v639_v32 = vpack.c.bf16 %v598_v30, %v598_v30 }
 0x107   : > { %1132 = vrot.lane.b32.xlu1 %v9595_v56, %s8886_s30  ;;  %v782_v57 = vsel %vm650_vm3, %v777_v37, %v781_v40 }
 0x108   : > { %v803_v40 = vshll.u32 %v639_v32, 16 }
 0x109   : > { %v1025_v13 = vpop.permute.xlu1 %1024  ;;  %1130 = vrot.lane.b32.xlu0 %v9581_v41, %s8886_s30 }
 0x10b   : > { %1164 = vrot.lane.b32.xlu1 %v9614_v10, %s8889_s19  ;;  %v1023_v16 = vpop.permute.xlu0 %1022 }
 0x10d   : > { %v1121_v20 = vpop.permute.xlu1 %1120  ;;  %1162 = vrot.lane.b32.xlu0 %v758_v59, %s8889_s19 }
 0x10f   : > { %1196 = vrot.lane.b32.xlu1 %v9622_v17, %s8890_s25  ;;  %v1119_v22 = vpop.permute.xlu0 %1118 }
 0x111   : > { %v993_v26 = vpop.permute.xlu1 %992  ;;  %1194 = vrot.lane.b32.xlu0 %v902_v1, %s8890_s25 }
 0x113   : > { %976 = vrot.lane.b32.xlu1 %v9614_v10, %s8884_s27  ;;  %v1087_v27 = vpop.permute.xlu0 %1086 }
 0x115   : > { %v1089_v31 = vpop.permute.xlu1 %1088  ;;  %974 = vrot.lane.b32.xlu0 %v758_v59, %s8884_s27 }
 0x117   : > { %1008 = vrot.lane.b32.xlu1 %v9622_v17, %s8883_s24  ;;  %v961_v35 = vpop.permute.xlu0 %960 }
 0x118   : > { %v1217_v36 = vsel %vm471_vm0, %v9271_v43, %v961_v35  ;;  %v1281_v43 = vsel %vm1279_vm8, %v1248_v4, %v1023_v16 }
 0x119   : > { %v1057_v45 = vpop.permute.xlu1 %1056  ;;  %v1250_v47 = vsel %vm1246_vm7, %v1217_v36, %v993_v26  ;;  %1006 = vrot.lane.b32.xlu0 %v902_v1, %s8883_s24  ;;  %v908_v1 = vsel %vm875_vm2, %v906_v49, %v907_v52  ;;  %v597_v26 = vld [vmem:[#allocation2 + $0x128] sm:$0xff]  ;;  %v805_v49 = vrot.slane %v803_v40, 1  ;;  %v604_v40 = vld [vmem:[#allocation2 + $0x160] sm:$0x3] }
 0x11a   : > { %v1283_v48 = vsel %vm1279_vm8, %v1250_v47, %v1025_v13  ;;  %v789_v13 = vor.u32 %v788_v5, %v784_v3  ;;  %v9685_v28 = vpack.c.bf16 %v597_v26, %v596_v25  ;;  %v600_v47 = vld [vmem:[#allocation2 + $0x140] sm:$0xff] }
 0x11b   : > { %1040 = vrot.lane.b32.xlu1 %v9624_v19, %s8885_s29  ;;  %v1316_v50 = vsel %vm1312_vm9, %v1283_v48, %v1057_v45  ;;  %v1055_v51 = vpop.permute.xlu0 %1054  ;;  %v599_v45 = vld [vmem:[#allocation2 + $0x138] sm:$0xff] }
 0x11c   : > { %v1349_v54 = vsel %vm1345_vm10, %v1316_v50, %v1089_v31  ;;  %v1314_v55 = vsel %vm1312_vm9, %v1281_v43, %v1055_v51  ;;  %v798_v33 = vshll.u32 %v9685_v28, 16  ;;  %v796_v36 = vshrl.u32 %v9685_v28, 16  ;;  %v601_v51 = vld [vmem:[#allocation2 + $0x148] sm:$0x3] }
 0x11d   : > { %v1153_v59 = vpop.permute.xlu1 %1152  ;;  %v1347_v60 = vsel %vm1345_vm10, %v1314_v55, %v1087_v27  ;;  %1038 = vrot.lane.b32.xlu0 %v9595_v56, %s8885_s29  ;;  %v1382_v61 = vsel %vm1378_vm11, %v1349_v54, %v1121_v20  ;;  %v794_v20 = vsel %vm650_vm3, %v789_v13, %v793_v14  ;;  %v9697_v43 = vpack.c.bf16 %v600_v47, %v599_v45 }
 0x11e   : > { %v1380_v2 = vsel %vm1378_vm11, %v1347_v60, %v1119_v22  ;;  %v1415_v8 = vsel %vm1411_vm12, %v1382_v61, %v1153_v59  ;;  %v910_v22 = vrot.slane %v637_v53, 1  ;;  %v800_v37 = vrot.slane %v798_v33, 1  ;;  %v602_v33 = vld [vmem:[#allocation2 + $0x150] sm:$0xff] }
 0x11f   : > { %1072 = vrot.lane.b32.xlu1 %v782_v57, %s8888_s16  ;;  %v1151_v63 = vpop.permute.xlu0 %1150  ;;  %v912_v54 = vrot.slane %v9685_v28, 1  ;;  %v913_v55 = vrot.slane %v639_v32, 1  ;;  %v641_v58 = vpack.c.bf16 %v601_v51, %v601_v51  ;;  %v810_v59 = vshll.u32 %v9697_v43, 16 }
 0x120   : > { %v1413_v9 = vsel %vm1411_vm12, %v1380_v2, %v1151_v63  ;;  %v9683_v27 = vsel %vm875_vm2, %v909_v21, %v910_v22  ;;  %v801_v48 = vor.u32 %v800_v37, %v796_v36  ;;  %v808_v5 = vshrl.u32 %v9697_v43, 16 }
 0x121   : > { %v1185_v7 = vpop.permute.xlu1 %1184  ;;  %1070 = vrot.lane.b32.xlu0 %v9614_v10, %s8888_s16  ;;  %v914_v3 = vsel %vm875_vm2, %v912_v54, %v913_v55  ;;  %v915_v30 = vrot.slane %v9697_v43, 1  ;;  %v643_v45 = vpack.c.bf16 %v604_v40, %v604_v40  ;;  %v606_v54 = vld [vmem:[#allocation2 + $0x170] sm:$0xff] }
 0x122   : > { %v1448_v15 = vsel %vm1444_vm4, %v1415_v8, %v1185_v7  ;;  %v812_v7 = vrot.slane %v810_v59, 1  ;;  %v815_v8 = vshll.u32 %v641_v58, 16 }
 0x123   : > { %1104 = vrot.lane.b32.xlu1 %v908_v1, %s8887_s14  ;;  %v1183_v11 = vpop.permute.xlu0 %1182  ;;  %v827_v51 = vshll.u32 %v643_v45, 16 }
 0x124   : > { %v1446_v12 = vsel %vm1444_vm4, %v1413_v9, %v1183_v11  ;;  %v817_v25 = vrot.slane %v815_v8, 1 }
 0x125   : > { %v965_v16 = vpop.permute.xlu1 %964  ;;  %1102 = vrot.lane.b32.xlu0 %v9622_v17, %s8887_s14  ;;  %8524 = vmatprep.mubr.msk.bf16.mxu0 %vm1499_vm13, %v1446_v12  ;;  %v829_v59 = vrot.slane %v827_v51, 1  ;;  %v9831_v51 = vld [vmem:[#allocation2 + $0x190] sm:$0x3] }
 0x126   : > { %8525 = vmatmul.mubr.msk.bf16.vlgmr.msra.gmra.mrb[0].mxu0 %vm1499_vm13, %v1448_v15  ;;  %v1221_v52 = vsel %vm471_vm0, %v9275_v46, %v965_v16 }
 0x127   : > { %1136 = vrot.lane.b32.xlu1 %v9641_v42, %s8886_s30  ;;  %v963_v10 = vpop.permute.xlu0 %962 }
 0x128   : > { %v1219_v61 = vsel %vm471_vm0, %v9269_v39, %v963_v10 }
 0x129   : > { %v997_v23 = vpop.permute.xlu1 %996  ;;  %1134 = vrot.lane.b32.xlu0 %v9624_v19, %s8886_s30 }
 0x12a   : > { %v1254_v60 = vsel %vm1246_vm7, %v1221_v52, %v997_v23  ;;  %v813_v23 = vor.u32 %v812_v7, %v808_v5 }
 0x12b   : > { %1168 = vrot.lane.b32.xlu1 %v794_v20, %s8889_s19  ;;  %v995_v17 = vpop.permute.xlu0 %994 }
 0x12c   : > { %v1252_v46 = vsel %vm1246_vm7, %v1219_v61, %v995_v17 }
 0x12d   : > { %v1029_v29 = vpop.permute.xlu1 %1028  ;;  %1166 = vrot.lane.b32.xlu0 %v782_v57, %s8889_s19 }
 0x12e   : > { %v1287_v6 = vsel %vm1279_vm8, %v1254_v60, %v1029_v29  ;;  %v818_v29 = vsel %vm650_vm3, %v813_v23, %v817_v25 }
 0x12f   : > { %1200 = vrot.lane.b32.xlu1 %v9683_v27, %s8890_s25  ;;  %v1027_v31 = vpop.permute.xlu0 %1026 }
 0x131   : > { %v1061_v34 = vpop.permute.xlu1 %1060  ;;  %1198 = vrot.lane.b32.xlu0 %v908_v1, %s8890_s25 }
 0x132   : > { %v1320_v9 = vsel %vm1312_vm9, %v1287_v6, %v1061_v34  ;;  %v603_v34 = vld [vmem:[#allocation2 + $0x158] sm:$0xff] }
 0x133   : > { %980 = vrot.lane.b32.xlu1 %v794_v20, %s8884_s27  ;;  %v1059_v35 = vpop.permute.xlu0 %1058  ;;  %v9747_v36 = vpack.c.bf16 %v603_v34, %v602_v33 }
 0x135   : > { %v1093_v44 = vpop.permute.xlu1 %1092  ;;  %978 = vrot.lane.b32.xlu0 %v782_v57, %s8884_s27  ;;  %v9706_v57 = vsel %vm650_vm3, %v801_v48, %v805_v49  ;;  %v822_v47 = vshll.u32 %v9747_v36, 16  ;;  %v820_v49 = vshrl.u32 %v9747_v36, 16 }
 0x136   : > { %v1353_v13 = vsel %vm1345_vm10, %v1320_v9, %v1093_v44 }
 0x137   : > { %1012 = vrot.lane.b32.xlu1 %v9683_v27, %s8883_s24  ;;  %v1091_v4 = vpop.permute.xlu0 %1090 }
 0x139   : > { %v1125_v50 = vpop.permute.xlu1 %1124  ;;  %1010 = vrot.lane.b32.xlu0 %v908_v1, %s8883_s24  ;;  %v1285_v1 = vsel %vm1279_vm8, %v1252_v46, %v1027_v31  ;;  %v916_v31 = vrot.slane %v641_v58, 1 }
 0x13a   : > { %v1318_v39 = vsel %vm1312_vm9, %v1285_v1, %v1059_v35  ;;  %v1386_v15 = vsel %vm1378_vm11, %v1353_v13, %v1125_v50  ;;  %v824_v50 = vrot.slane %v822_v47, 1  ;;  %v918_v1 = vrot.slane %v9747_v36, 1  ;;  %v609_v47 = vld [vmem:[#allocation2 + $0x188] sm:$0xff] }
 0x13b   : > { %1044 = vrot.lane.b32.xlu1 %v9685_v28, %s8885_s29  ;;  %v1123_v53 = vpop.permute.xlu0 %1122  ;;  %v1351_v11 = vsel %vm1345_vm10, %v1318_v39, %v1091_v4  ;;  %v9745_v35 = vsel %vm875_vm2, %v915_v30, %v916_v31 }
 0x13c   : > { %v1384_v14 = vsel %vm1378_vm11, %v1351_v11, %v1123_v53  ;;  %v605_v53 = vld [vmem:[#allocation2 + $0x168] sm:$0xff]  ;;  %v825_v58 = vor.u32 %v824_v50, %v820_v49 }
 0x13d   : > { %v1157_v63 = vpop.permute.xlu1 %1156  ;;  %1042 = vrot.lane.b32.xlu0 %v9641_v42, %s8885_s29  ;;  %v9761_v60 = vpack.c.bf16 %v606_v54, %v605_v53  ;;  %v9983_v53 = vpack.c.bf16 %v9831_v51, %v9831_v51 }
 0x13e   : > { %v1419_v21 = vsel %vm1411_vm12, %v1386_v15, %v1157_v63  ;;  %v607_v63 = vld [vmem:[#allocation2 + $0x178] sm:$0x3]  ;;  %v9770_v5 = vsel %vm650_vm3, %v825_v58, %v829_v59 }
 0x13f   : > { %1076 = vrot.lane.b32.xlu1 %v9706_v57, %s8888_s16  ;;  %v1155_v2 = vpop.permute.xlu0 %1154  ;;  %v645_v6 = vpack.c.bf16 %v607_v63, %v607_v63  ;;  %v834_v39 = vshll.u32 %v9761_v60, 16  ;;  %v832_v13 = vshrl.u32 %v9761_v60, 16  ;;  %v921_v40 = vrot.slane %v9761_v60, 1 }
 0x140   : > { %v1417_v16 = vsel %vm1411_vm12, %v1384_v14, %v1155_v2  ;;  %v919_v2 = vrot.slane %v643_v45, 1  ;;  %v932_v63 = vshll.u32 %v9983_v53, 16 }
 0x141   : > { %v1189_v12 = vpop.permute.xlu1 %1188  ;;  %1074 = vrot.lane.b32.xlu0 %v794_v20, %s8888_s16  ;;  %v836_v15 = vrot.slane %v834_v39, 1 }
 0x142   : > { %v1452_v26 = vsel %vm1444_vm4, %v1419_v21, %v1189_v12  ;;  %v9783_v12 = vsel %vm875_vm2, %v918_v1, %v919_v2 }
 0x143   : > { %1108 = vrot.lane.b32.xlu1 %v914_v3, %s8887_s14  ;;  %v1187_v10 = vpop.permute.xlu0 %1186 }
 0x144   : > { %v1450_v22 = vsel %vm1444_vm4, %v1417_v16, %v1187_v10  ;;  %v839_v16 = vshll.u32 %v645_v6, 16 }
 0x145   : > { %v969_v20 = vpop.permute.xlu1 %968  ;;  %1106 = vrot.lane.b32.xlu0 %v9683_v27, %s8887_s14  ;;  %8528 = vmatprep.mubr.msk.bf16.mxu0 %vm1499_vm13, %v1450_v22 }
 0x146   : > { %8529 = vmatmul.mubr.msk.bf16.gmra.mrb[4].mxu0 %vm1499_vm13, %v1452_v26  ;;  %v1225_v46 = vsel %vm471_vm0, %v9502_v38, %v969_v20  ;;  %v841_v33 = vrot.slane %v839_v16, 1  ;;  %v2045_v16 = vld [vmem:[#allocation3] sm:$0xff] }
 0x147   : > { %1140 = vrot.lane.b32.xlu1 %v9697_v43, %s8886_s30  ;;  %v967_v17 = vpop.permute.xlu0 %966 }
 0x149   : > { %v1001_v32 = vpop.permute.xlu1 %1000  ;;  %1138 = vrot.lane.b32.xlu0 %v9685_v28, %s8886_s30 }
 0x14a   : > { %v1258_v7 = vsel %vm1246_vm7, %v1225_v46, %v1001_v32  ;;  %v837_v32 = vor.u32 %v836_v15, %v832_v13  ;;  %v611_v46 = vld [vmem:[#allocation2 + $0x198] sm:$0xff] }
 0x14b   : > { %1172 = vrot.lane.b32.xlu1 %v818_v29, %s8889_s19  ;;  %v999_v27 = vpop.permute.xlu0 %998 }
 0x14d   : > { %v1033_v37 = vpop.permute.xlu1 %1032  ;;  %1170 = vrot.lane.b32.xlu0 %v9706_v57, %s8889_s19 }
 0x14e   : > { %v1291_v14 = vsel %vm1279_vm8, %v1258_v7, %v1033_v37  ;;  %v9811_v37 = vsel %vm650_vm3, %v837_v32, %v841_v33  ;;  %v934_v7 = vrot.slane %v932_v63, 1 }
 0x14f   : > { %1204 = vrot.lane.b32.xlu1 %v9745_v35, %s8890_s25  ;;  %v1031_v44 = vpop.permute.xlu0 %1030 }
 0x151   : > { %v1065_v4 = vpop.permute.xlu1 %1064  ;;  %1202 = vrot.lane.b32.xlu0 %v914_v3, %s8890_s25 }
 0x152   : > { %v1324_v10 = vsel %vm1312_vm9, %v1291_v14, %v1065_v4 }
 0x153   : > { %984 = vrot.lane.b32.xlu1 %v818_v29, %s8884_s27  ;;  %v1063_v48 = vpop.permute.xlu0 %1062 }
 0x155   : > { %v1097_v52 = vpop.permute.xlu1 %1096  ;;  %982 = vrot.lane.b32.xlu0 %v9706_v57, %s8884_s27 }
 0x156   : > { %v1357_v23 = vsel %vm1345_vm10, %v1324_v10, %v1097_v52  ;;  %v2046_v10 = vld [vmem:[#allocation3 + $0x8] sm:$0xff] }
 0x157   : > { %1016 = vrot.lane.b32.xlu1 %v9745_v35, %s8883_s24  ;;  %v1095_v55 = vpop.permute.xlu0 %1094 }
 0x159   : > { %v1129_v61 = vpop.permute.xlu1 %1128  ;;  %1014 = vrot.lane.b32.xlu0 %v914_v3, %s8883_s24  ;;  %v1223_v3 = vsel %vm471_vm0, %v9323_v24, %v967_v17 }
 0x15a   : > { %v1256_v38 = vsel %vm1246_vm7, %v1223_v3, %v999_v27  ;;  %v1390_v26 = vsel %vm1378_vm11, %v1357_v23, %v1129_v61  ;;  %v613_v3 = vld [vmem:[#allocation2 + $0x1a8] sm:$0x3] }
 0x15b   : > { %1048 = vrot.lane.b32.xlu1 %v9747_v36, %s8885_s29  ;;  %v1127_v57 = vpop.permute.xlu0 %1126  ;;  %v1289_v9 = vsel %vm1279_vm8, %v1256_v38, %v1031_v44  ;;  %v922_v44 = vrot.slane %v645_v6, 1 }
 0x15c   : > { %v1322_v24 = vsel %vm1312_vm9, %v1289_v9, %v1063_v48  ;;  %v649_v9 = vpack.c.bf16 %v613_v3, %v613_v3 }
 0x15d   : > { %v1161_v8 = vpop.permute.xlu1 %1160  ;;  %1046 = vrot.lane.b32.xlu0 %v9697_v43, %s8885_s29  ;;  %v1355_v21 = vsel %vm1345_vm10, %v1322_v24, %v1095_v55  ;;  %v9823_v48 = vsel %vm875_vm2, %v921_v40, %v922_v44  ;;  %v939_v24 = vrot.slane %v9983_v53, 1 }
 0x15e   : > { %v1388_v25 = vsel %vm1378_vm11, %v1355_v21, %v1127_v57  ;;  %v1423_v30 = vsel %vm1411_vm12, %v1390_v26, %v1161_v8  ;;  %v612_v57 = vld [vmem:[#allocation2 + $0x1a0] sm:$0xff] }
 0x15f   : > { %1080 = vrot.lane.b32.xlu1 %v9770_v5, %s8888_s16  ;;  %v1159_v11 = vpop.permute.xlu0 %1158  ;;  %v10068_v6 = vpack.c.bf16 %v612_v57, %v611_v46 }
 0x160   : > { %v1421_v20 = vsel %vm1411_vm12, %v1388_v25, %v1159_v11 }
 0x161   : > { %v1193_v22 = vpop.permute.xlu1 %1192  ;;  %1078 = vrot.lane.b32.xlu0 %v818_v29, %s8888_s16  ;;  %v944_v11 = vshll.u32 %v10068_v6, 16  ;;  %v942_v25 = vshrl.u32 %v10068_v6, 16 }
 0x162   : > { %v1456_v29 = vsel %vm1444_vm4, %v1423_v30, %v1193_v22 }
 0x163   : > { %1112 = vrot.lane.b32.xlu1 %v9783_v12, %s8887_s14  ;;  %v1191_v17 = vpop.permute.xlu0 %1190  ;;  %v946_v26 = vrot.slane %v944_v11, 1 }
 0x164   : > { %v1454_v31 = vsel %vm1444_vm4, %v1421_v20, %v1191_v17  ;;  %v949_v20 = vshll.u32 %v649_v9, 16 }
 0x165   : > { %v9800_v34 = vpop.permute.xlu1 %972  ;;  %1110 = vrot.lane.b32.xlu0 %v9745_v35, %s8887_s14  ;;  %8532 = vmatprep.mubr.msk.bf16.mxu0 %vm1499_vm13, %v1454_v31  ;;  %v608_v35 = vld [vmem:[#allocation2 + $0x180] sm:$0xff]  ;;  %v10098_v31 = vpack.c.bf16 %v2046_v10, %v2045_v16 }
 0x166   : > { %8533 = vmatmul.mubr.msk.bf16.gmra.mrb[8].mxu0 %vm1499_vm13, %v1456_v29  ;;  %v9825_v49 = vpack.c.bf16 %v609_v47, %v608_v35  ;;  %v1229_v38 = vsel %vm471_vm0, %v9553_v18, %v9800_v34  ;;  %v2047_v34 = vld [vmem:[#allocation3 + $0x10] sm:$0x3]  ;;  %v947_v47 = vor.u32 %v946_v26, %v942_v25 }
 0x167   : > { %1144 = vrot.lane.b32.xlu1 %v9761_v60, %s8886_s30  ;;  %v9808_v27 = vpop.permute.xlu0 %970  ;;  %v2136_v63 = vshrl.u32 %v10098_v31, 16 }
 0x168   : > { %v927_v54 = vshll.u32 %v9825_v49, 16  ;;  %v925_v59 = vshrl.u32 %v9825_v49, 16  ;;  %v938_v14 = vrot.slane %v9825_v49, 1  ;;  %v1227_v18 = vsel %vm471_vm0, %v9529_v62, %v9808_v27 }
 0x169   : > { %v9814_v45 = vpop.permute.xlu1 %1004  ;;  %1142 = vrot.lane.b32.xlu0 %v9747_v36, %s8886_s30 }
 0x16a   : > { %v929_v61 = vrot.slane %v927_v54, 1  ;;  %v940_v30 = vsel %vm875_vm2, %v938_v14, %v939_v24 }
 0x16b   : > { %1176 = vrot.lane.b32.xlu1 %v9811_v37, %s8889_s19  ;;  %v9820_v4 = vpop.permute.xlu0 %1002 }
 0x16c   : > { %v930_v39 = vor.u32 %v929_v61, %v925_v59  ;;  %v1260_v21 = vsel %vm1246_vm7, %v1227_v18, %v9820_v4  ;;  %v951_v4 = vrot.slane %v949_v20, 1  ;;  %v955_v59 = vrot.slane %v10068_v6, 1 }
 0x16d   : > { %v9827_v50 = vpop.permute.xlu1 %1036  ;;  %1174 = vrot.lane.b32.xlu0 %v9770_v5, %s8889_s19  ;;  %v956_v61 = vrot.slane %v649_v9, 1 }
 0x16e   : > { %v935_v13 = vsel %vm650_vm3, %v930_v39, %v934_v7 }
 0x16f   : > { %1208 = vrot.lane.b32.xlu1 %v9823_v48, %s8890_s25  ;;  %v9979_v52 = vpop.permute.xlu0 %1034 }
 0x170   : > { %v1293_v22 = vsel %vm1279_vm8, %v1260_v21, %v9979_v52  ;;  %v2100_v52 = vpack.c.bf16 %v2047_v34, %v2047_v34 }
 0x171   : > { %v1069_v55 = vpop.permute.xlu1 %1068  ;;  %1206 = vrot.lane.b32.xlu0 %v9783_v12, %s8890_s25 }
 0x172   : > { %v2143_v57 = vshll.u32 %v2100_v52, 16 }
 0x173   : > { %988 = vrot.lane.b32.xlu1 %v9811_v37, %s8884_s27  ;;  %v1067_v58 = vpop.permute.xlu0 %1066 }
 0x174   : > { %v1326_v17 = vsel %vm1312_vm9, %v1293_v22, %v1067_v58  ;;  %v952_v58 = vsel %vm650_vm3, %v947_v47, %v951_v4  ;;  %v2145_v7 = vrot.slane %v2143_v57, 1 }
 0x175   : > { %v1101_v1 = vpop.permute.xlu1 %1100  ;;  %986 = vrot.lane.b32.xlu0 %v9770_v5, %s8884_s27  ;;  %s8896_s27 = smov 16  }
 0x177   : > { %1020 = vrot.lane.b32.xlu1 %v9823_v48, %s8883_s24  ;;  %v1099_v2 = vpop.permute.xlu0 %1098 }
 0x178   : > { %v1359_v33 = vsel %vm1345_vm10, %v1326_v17, %v1099_v2  ;;  %v957_v2 = vsel %vm875_vm2, %v955_v59, %v956_v61 }
 0x179   : > { %v1133_v8 = vpop.permute.xlu1 %1132  ;;  %1018 = vrot.lane.b32.xlu0 %v9783_v12, %s8883_s24  ;;  %v1262_v12 = vsel %vm1246_vm7, %v1229_v38, %v9814_v45  ;;  %s8895_s24 = smov 32  }
 0x17a   : > { %v1295_v62 = vsel %vm1279_vm8, %v1262_v12, %v9827_v50 }
 0x17b   : > { %1052 = vrot.lane.b32.xlu1 %v9825_v49, %s8885_s29  ;;  %v1131_v5 = vpop.permute.xlu0 %1130  ;;  %v1328_v32 = vsel %vm1312_vm9, %v1295_v62, %v1069_v55 }
 0x17c   : > { %v1361_v27 = vsel %vm1345_vm10, %v1328_v32, %v1101_v1  ;;  %v1392_v40 = vsel %vm1378_vm11, %v1359_v33, %v1131_v5 }
 0x17d   : > { %v1165_v15 = vpop.permute.xlu1 %1164  ;;  %1050 = vrot.lane.b32.xlu0 %v9761_v60, %s8885_s29  ;;  %v1394_v44 = vsel %vm1378_vm11, %v1361_v27, %v1133_v8  ;;  %v2360_v8 = vrot.slane %v2100_v52, 1  ;;  %s8899_s29 = smov 64  }
 0x17e   : > { %v1427_v50 = vsel %vm1411_vm12, %v1394_v44, %v1165_v15 }
 0x17f   : > { %1084 = vrot.lane.b32.xlu1 %v935_v13, %s8888_s16  ;;  %v1163_v23 = vpop.permute.xlu0 %1162 }
 0x180   : > { %v1425_v45 = vsel %vm1411_vm12, %v1392_v40, %v1163_v23 }
 0x181   : > { %v1197_v29 = vpop.permute.xlu1 %1196  ;;  %1082 = vrot.lane.b32.xlu0 %v9811_v37, %s8888_s16  ;;  %v2138_v37 = vshll.u32 %v10098_v31, 16  ;;  %s8902_s16 = smov 40  }
 0x182   : > { %v1460_v53 = vsel %vm1444_vm4, %v1427_v50, %v1197_v29 }
 0x183   : > { %1116 = vrot.lane.b32.xlu1 %v940_v30, %s8887_s14  ;;  %v1195_v35 = vpop.permute.xlu0 %1194  ;;  %v2140_v46 = vrot.slane %v2138_v37, 1 }
 0x184   : > { %v1458_v51 = vsel %vm1444_vm4, %v1425_v45, %v1195_v35 }
 0x185   : > { %v977_v54 = vpop.permute.xlu1 %976  ;;  %1114 = vrot.lane.b32.xlu0 %v9823_v48, %s8887_s14  ;;  %8536 = vmatprep.mubr.msk.bf16.mxu0 %vm1499_vm13, %v1458_v51  ;;  %v2141_v39 = vor.u32 %v2140_v46, %v2136_v63 }
 0x186   : > { %8537 = vmatmul.mubr.msk.bf16.gmra.mrb[12].mxu0 %vm1499_vm13, %v1460_v53  ;;  %v1233_v12 = vsel %vm471_vm0, %v9595_v56, %v977_v54 }
 0x187   : > { %1148 = vrot.lane.b32.xlu1 %v10068_v6, %s8886_s30  ;;  %v975_v55 = vpop.permute.xlu0 %974  ;;  %v2359_v6 = vrot.slane %v10098_v31, 1  ;;  %v2146_v5 = vsel %vm650_vm3, %v2141_v39, %v2145_v7 }
 0x188   : > { %v1231_v16 = vsel %vm471_vm0, %v9581_v41, %v975_v55 }
 0x189   : > { %v1009_v1 = vpop.permute.xlu1 %1008  ;;  %1146 = vrot.lane.b32.xlu0 %v9825_v49, %s8886_s30  ;;  %v2361_v49 = vsel %vm875_vm2, %v2359_v6, %v2360_v8 }
 0x18a   : > { %v1266_v15 = vsel %vm1246_vm7, %v1233_v12, %v1009_v1 }
 0x18b   : > { %1180 = vrot.lane.b32.xlu1 %v952_v58, %s8889_s19  ;;  %v1007_v48 = vpop.permute.xlu0 %1006 }
 0x18c   : > { %v1264_v21 = vsel %vm1246_vm7, %v1231_v16, %v1007_v48 }
 0x18d   : > { %v1041_v3 = vpop.permute.xlu1 %1040  ;;  %1178 = vrot.lane.b32.xlu0 %v935_v13, %s8889_s19 }
 0x18e   : > { %v1299_v25 = vsel %vm1279_vm8, %v1266_v15, %v1041_v3 }
 0x18f   : > { %1212 = vrot.lane.b32.xlu1 %v957_v2, %s8890_s25  ;;  %v1039_v38 = vpop.permute.xlu0 %1038 }
 0x190   : > { %v1297_v22 = vsel %vm1279_vm8, %v1264_v21, %v1039_v38 }
 0x191   : > { %v1073_v9 = vpop.permute.xlu1 %1072  ;;  %1210 = vrot.lane.b32.xlu0 %v940_v30, %s8890_s25 }
 0x192   : > { %v1332_v20 = vsel %vm1312_vm9, %v1299_v25, %v1073_v9 }
 0x193   : > { %v1071_v11 = vpop.permute.xlu0 %1070  ;;  %2441 = vrot.lane.b32.xlu1 %v2146_v5, %s8892_s20 }
 0x194   : > { %v1330_v26 = vsel %vm1312_vm9, %v1297_v22, %v1071_v11 }
 0x195   : > { %v1105_v14 = vpop.permute.xlu1 %1104  ;;  %2473 = vrot.lane.b32.xlu0 %v2361_v49, %s8893_s21 }
 0x196   : > { %v1365_v17 = vsel %vm1345_vm10, %v1332_v20, %v1105_v14 }
 0x197   : > { %v1103_v13 = vpop.permute.xlu0 %1102 }
 0x198   : > { %v1363_v56 = vsel %vm1345_vm10, %v1330_v26, %v1103_v13 }
 0x199   : > { %v1137_v24 = vpop.permute.xlu1 %1136 }
 0x19a   : > { %v1398_v41 = vsel %vm1378_vm11, %v1365_v17, %v1137_v24 }
 0x19b   : > { %v1135_v18 = vpop.permute.xlu0 %1134 }
 0x19c   : > { %v1396_v30 = vsel %vm1378_vm11, %v1363_v56, %v1135_v18 }
 0x19d   : > { %v1169_v10 = vpop.permute.xlu1 %1168 }
 0x19e   : > { %v1431_v29 = vsel %vm1411_vm12, %v1398_v41, %v1169_v10 }
 0x19f   : > { %v1167_v23 = vpop.permute.xlu0 %1166 }
 0x1a0   : > { %v1429_v32 = vsel %vm1411_vm12, %v1396_v30, %v1167_v23 }
 0x1a1   : > { %v1201_v62 = vpop.permute.xlu1 %1200 }
 0x1a2   : > { %v1464_v27 = vsel %vm1444_vm4, %v1431_v29, %v1201_v62 }
 0x1a3   : > { %v1199_v33 = vpop.permute.xlu0 %1198 }
 0x1a4   : > { %v1462_v34 = vsel %vm1444_vm4, %v1429_v32, %v1199_v33 }
 0x1a5   : > { %v981_v40 = vpop.permute.xlu1 %980  ;;  %8540 = vmatprep.mubr.msk.bf16.mxu0 %vm1499_vm13, %v1462_v34 }
 0x1a6   : > { %8541 = vmatmul.mubr.msk.bf16.gmra.mrb[16].mxu0 %vm1499_vm13, %v1464_v27  ;;  %v1237_v54 = vsel %vm471_vm0, %v9641_v42, %v981_v40 }
 0x1a7   : > { %v979_v44 = vpop.permute.xlu0 %978 }
 0x1a8   : > { %v1235_v59 = vsel %vm471_vm0, %v9624_v19, %v979_v44 }
 0x1a9   : > { %v1013_v45 = vpop.permute.xlu1 %1012 }
 0x1aa   : > { %v1270_v58 = vsel %vm1246_vm7, %v1237_v54, %v1013_v45 }
 0x1ab   : > { %v1011_v35 = vpop.permute.xlu0 %1010 }
 0x1ac   : > { %v1268_v63 = vsel %vm1246_vm7, %v1235_v59, %v1011_v35  ;;  %v10197_v59 = vld [vmem:[%s13426_s2] ss:$0 sm:$0xff] }
 0x1ad   : > { %v1045_v47 = vpop.permute.xlu1 %1044 }
 0x1ae   : > { %v1303_v1 = vsel %vm1279_vm8, %v1270_v58, %v1045_v47 }
 0x1af   : > { %v1043_v4 = vpop.permute.xlu0 %1042 }
 0x1b0   : > { %v1301_v46 = vsel %vm1279_vm8, %v1268_v63, %v1043_v4 }
 0x1b1   : > { %v1077_v50 = vpop.permute.xlu1 %1076 }
 0x1b2   : > { %v1336_v2 = vsel %vm1312_vm9, %v1303_v1, %v1077_v50 }
 0x1b3   : > { %v1075_v51 = vpop.permute.xlu0 %1074 }
 0x1b4   : > { %v1334_v48 = vsel %vm1312_vm9, %v1301_v46, %v1075_v51 }
 0x1b5   : > { %v1109_v52 = vpop.permute.xlu1 %1108 }
 0x1b6   : > { %v1369_v7 = vsel %vm1345_vm10, %v1336_v2, %v1109_v52 }
 0x1b7   : > { %v1107_v37 = vpop.permute.xlu0 %1106 }
 0x1b8   : > { %v1367_v42 = vsel %vm1345_vm10, %v1334_v48, %v1107_v37 }
 0x1b9   : > { %v1141_v53 = vpop.permute.xlu1 %1140 }
 0x1ba   : > { %v1402_v19 = vsel %vm1378_vm11, %v1369_v7, %v1141_v53 }
 0x1bb   : > { %v1139_v55 = vpop.permute.xlu0 %1138 }
 0x1bc   : > { %v1400_v3 = vsel %vm1378_vm11, %v1367_v42, %v1139_v55 }
 0x1bd   : > { %v1173_v61 = vpop.permute.xlu1 %1172 }
 0x1be   : > { %v1435_v38 = vsel %vm1411_vm12, %v1402_v19, %v1173_v61 }
 0x1bf   : > { %v1171_v57 = vpop.permute.xlu0 %1170 }
 0x1c0   : > { %v1433_v6 = vsel %vm1411_vm12, %v1400_v3, %v1171_v57 }
 0x1c1   : > { %v1205_v39 = vpop.permute.xlu1 %1204 }
 0x1c2   : > { %v1468_v9 = vsel %vm1444_vm4, %v1435_v38, %v1205_v39 }
 0x1c3   : > { %v1203_v8 = vpop.permute.xlu0 %1202 }
 0x1c4   : > { %v1466_v5 = vsel %vm1444_vm4, %v1433_v6, %v1203_v8 }
 0x1c5   : > { %v985_v49 = vpop.permute.xlu1 %984  ;;  %8544 = vmatprep.mubr.msk.bf16.mxu0 %vm1499_vm13, %v1466_v5 }
 0x1c6   : > { %8545 = vmatmul.mubr.msk.bf16.gmra.mrb[20].mxu0 %vm1499_vm13, %v1468_v9  ;;  %v1241_v22 = vsel %vm471_vm0, %v9697_v43, %v985_v49 }
 0x1c7   : > { %v983_v11 = vpop.permute.xlu0 %982 }
 0x1c8   : > { %v1239_v26 = vsel %vm471_vm0, %v9685_v28, %v983_v11 }
 0x1c9   : > { %v1017_v14 = vpop.permute.xlu1 %1016 }
 0x1ca   : > { %v1274_v25 = vsel %vm1246_vm7, %v1241_v22, %v1017_v14 }
 0x1cb   : > { %v1015_v13 = vpop.permute.xlu0 %1014 }
 0x1cc   : > { %v1272_v56 = vsel %vm1246_vm7, %v1239_v26, %v1015_v13 }
 0x1cd   : > { %v1049_v24 = vpop.permute.xlu1 %1048 }
 0x1ce   : > { %v1307_v30 = vsel %vm1279_vm8, %v1274_v25, %v1049_v24 }
 0x1cf   : > { %v1047_v12 = vpop.permute.xlu0 %1046 }
 0x1d0   : > { %v1305_v62 = vsel %vm1279_vm8, %v1272_v56, %v1047_v12 }
 0x1d1   : > { %v1081_v18 = vpop.permute.xlu1 %1080 }
 0x1d2   : > { %v1340_v32 = vsel %vm1312_vm9, %v1307_v30, %v1081_v18 }
 0x1d3   : > { %v1079_v15 = vpop.permute.xlu0 %1078 }
 0x1d4   : > { %v1338_v41 = vsel %vm1312_vm9, %v1305_v62, %v1079_v15 }
 0x1d5   : > { %v1113_v16 = vpop.permute.xlu1 %1112 }
 0x1d6   : > { %v1373_v29 = vsel %vm1345_vm10, %v1340_v32, %v1113_v16 }
 0x1d7   : > { %v1111_v10 = vpop.permute.xlu0 %1110 }
 0x1d8   : > { %v1371_v43 = vsel %vm1345_vm10, %v1338_v41, %v1111_v10 }
 0x1d9   : > { %v1145_v21 = vpop.permute.xlu1 %1144 }
 0x1da   : > { %v1406_v28 = vsel %vm1378_vm11, %v1373_v29, %v1145_v21 }
 0x1db   : > { %v1143_v23 = vpop.permute.xlu0 %1142 }
 0x1dc   : > { %v1404_v34 = vsel %vm1378_vm11, %v1371_v43, %v1143_v23 }
 0x1dd   : > { %v1177_v20 = vpop.permute.xlu1 %1176 }
 0x1de   : > { %v1439_v44 = vsel %vm1411_vm12, %v1406_v28, %v1177_v20 }
 0x1df   : > { %v1175_v17 = vpop.permute.xlu0 %1174 }
 0x1e0   : > { %v1437_v27 = vsel %vm1411_vm12, %v1404_v34, %v1175_v17 }
 0x1e1   : > { %v1209_v33 = vpop.permute.xlu1 %1208 }
 0x1e2   : > { %v1472_v35 = vsel %vm1444_vm4, %v1439_v44, %v1209_v33 }
 0x1e3   : > { %v1207_v40 = vpop.permute.xlu0 %1206 }
 0x1e4   : > { %v1470_v45 = vsel %vm1444_vm4, %v1437_v27, %v1207_v40 }
 0x1e5   : > { %v989_v47 = vpop.permute.xlu1 %988  ;;  %8548 = vmatprep.mubr.msk.bf16.mxu1 %vm1499_vm13, %v1470_v45 }
 0x1e6   : > { %8549 = vmatmul.mubr.msk.bf16.vlgmr.msra.gmra.mrb[0].mxu1 %vm1499_vm13, %v1472_v35  ;;  %v1245_v46 = vsel %vm471_vm0, %v9761_v60, %v989_v47 }
 0x1e7   : > { %v987_v4 = vpop.permute.xlu0 %986 }
 0x1e8   : > { %v1243_v39 = vsel %vm471_vm0, %v9747_v36, %v987_v4 }
 0x1e9   : > { %v1021_v50 = vpop.permute.xlu1 %1020 }
 0x1ea   : > { %v1278_v6 = vsel %vm1246_vm7, %v1245_v46, %v1021_v50 }
 0x1eb   : > { %v1019_v51 = vpop.permute.xlu0 %1018 }
 0x1ec   : > { %v1276_v60 = vsel %vm1246_vm7, %v1243_v39, %v1019_v51 }
 0x1ed   : > { %v1053_v52 = vpop.permute.xlu1 %1052 }
 0x1ee   : > { %v1311_v11 = vsel %vm1279_vm8, %v1278_v6, %v1053_v52 }
 0x1ef   : > { %v1051_v37 = vpop.permute.xlu0 %1050 }
 0x1f0   : > { %v1309_v49 = vsel %vm1279_vm8, %v1276_v60, %v1051_v37 }
 0x1f1   : > { %v1085_v53 = vpop.permute.xlu1 %1084 }
 0x1f2   : > { %v1344_v24 = vsel %vm1312_vm9, %v1311_v11, %v1085_v53 }
 0x1f3   : > { %v1083_v54 = vpop.permute.xlu0 %1082 }
 0x1f4   : > { %v1342_v14 = vsel %vm1312_vm9, %v1309_v49, %v1083_v54 }
 0x1f5   : > { %v1117_v55 = vpop.permute.xlu1 %1116 }
 0x1f6   : > { %v1377_v18 = vsel %vm1345_vm10, %v1344_v24, %v1117_v55 }
 0x1f7   : > { %v1115_v58 = vpop.permute.xlu0 %1114 }
 0x1f8   : > { %v1375_v12 = vsel %vm1345_vm10, %v1342_v14, %v1115_v58 }
 0x1f9   : > { %v1149_v61 = vpop.permute.xlu1 %1148  ;;  %v8526_v63 = vpop.f32.mrb[0].mxu0 }
 0x1fa   : > { %v1582_v57 = vadd.f32 %v8526_v63, %v10197_v59  ;;  %v1573_v1 = vpop.f32.mrb[1].mxu0  ;;  %v1410_v21 = vsel %vm1378_vm11, %v1377_v18, %v1149_v61 }
 0x1fb   : > { %v1574_v48 = vadd.f32 %v10197_v59, %v1573_v1  ;;  %v8527_v2 = vpop.f32.mrb[2].mxu0  ;;  %v1147_v42 = vpop.permute.xlu0 %1146 }
 0x1fc   : > { %vm1702_vm1 = vcmp.ge.f32.partialorder %v1582_v57, 0.0  ;;  %v1734_v7 = vmul.f32 0.25, %v1582_v57  ;;  %v1585_v3 = vadd.f32 %v8527_v2, %v10197_v59  ;;  %v10206_v19 = vpop.f32.mrb[3].mxu0  ;;  %v1408_v15 = vsel %vm1378_vm11, %v1375_v12, %v1147_v42 }
 0x1fd   : > { %v1181_v8 = vpop.permute.xlu1 %1180  ;;  %v1732_v38 = vmul.f32 0.25, %v1574_v48  ;;  %vm1700_vm6 = vcmp.ge.f32.partialorder %v1574_v48, 0.0  ;;  %v1577_v6 = vadd.f32 %v10197_v59, %v10206_v19 }
 0x1fe   : > { %vm1703_vm5 = vcmp.ge.f32.partialorder %v1585_v3, 0.0  ;;  %v1735_v5 = vmul.f32 0.25, %v1585_v3  ;;  %v1766_v9 = vsel %vm1702_vm1, %v1582_v57, %v1734_v7  ;;  %v1443_v25 = vsel %vm1411_vm12, %v1410_v21, %v1181_v8 }
 0x1ff   : > { %1832 = vrot.lane.b32.xlu0 %v1766_v9, %s8894_s15  ;;  %v1179_v36 = vpop.permute.xlu0 %1178  ;;  %v1764_v10 = vsel %vm1700_vm6, %v1574_v48, %v1732_v38  ;;  %v1733_v14 = vmul.f32 0.25, %v1577_v6  ;;  %vm1701_vm9 = vcmp.ge.f32.partialorder %v1577_v6, 0.0 }
 0x200   : > { %v1767_v13 = vsel %vm1703_vm5, %v1585_v3, %v1735_v5  ;;  %v1441_v22 = vsel %vm1411_vm12, %v1408_v15, %v1179_v36 }
 0x201   : > { %1834 = vrot.lane.b32.xlu1 %v1767_v13, %s8894_s15  ;;  %v1213_v16 = vpop.permute.xlu1 %1212 }
 0x202   : > { %v1476_v20 = vsel %vm1444_vm4, %v1443_v25, %v1213_v16 }
 0x203   : > { %1828 = vrot.lane.b32.xlu0 %v1764_v10, %s8894_s15  ;;  %v1211_v23 = vpop.permute.xlu0 %1210 }
 0x204   : > { %v1474_v26 = vsel %vm1444_vm4, %v1441_v22, %v1211_v23  ;;  %v10306_v23 = vsel %vm1701_vm9, %v1577_v6, %v1733_v14 }
 0x205   : > { %8552 = vmatprep.mubr.msk.bf16.mxu1 %vm1499_vm13, %v1474_v26  ;;  %v10251_v44 = vpop.permute.xlu1 %2441 }
 0x206   : > { %8553 = vmatmul.mubr.msk.bf16.gmra.mrb[4].mxu1 %vm1499_vm13, %v1476_v20 }
 0x207   : > { %v10249_v40 = vpop.permute.xlu0 %2473 }
 0x219   : > { %v8530_v56 = vpop.f32.mrb[4].mxu0 }
 0x21a   : > { %v10227_v62 = vpop.f32.mrb[5].mxu0 }
 0x21b   : > { %v10229_v17 = vpop.f32.mrb[6].mxu0 }
 0x21c   : > { %v10231_v30 = vpop.f32.mrb[7].mxu0  ;;  %v1601_v21 = vadd.f32 %v10229_v17, %v10197_v59 }
 0x21e   : > { %v1739_v20 = vmul.f32 0.25, %v1601_v21  ;;  %vm1707_vm13 = vcmp.ge.f32.partialorder %v1601_v21, 0.0 }
 0x220   : > { %v10322_v17 = vsel %vm1707_vm13, %v1601_v21, %v1739_v20 }
 0x239   : > { %v10233_v41 = vpop.f32.mrb[8].mxu0 }
 0x23a   : > { %v10235_v32 = vpop.f32.mrb[9].mxu0 }
 0x23b   : > { %v10237_v43 = vpop.f32.mrb[10].mxu0 }
 0x23c   : > { %v10239_v33 = vpop.f32.mrb[11].mxu0 }
 0x259   : > { %v10241_v29 = vpop.f32.mrb[12].mxu0 }
 0x25a   : > { %v10243_v34 = vpop.f32.mrb[13].mxu0  ;;  %v1630_v14 = vadd.f32 %v10241_v29, %v10197_v59 }
 0x25b   : > { %v10245_v28 = vpop.f32.mrb[14].mxu0  ;;  %v1622_v29 = vadd.f32 %v10197_v59, %v10243_v34 }
 0x25c   : > { %v10247_v27 = vpop.f32.mrb[15].mxu0 }
 0x271   : > { %v1833_v45 = vpop.permute.xlu0 %1832 }
 0x272   : > { %v1926_v35 = vadd.f32 %v1833_v45, %v1766_v9 }
 0x273   : > { %v1835_v47 = vpop.permute.xlu1 %1834 }
 0x274   : > { %2015 = vst.msk [vmem:[#allocation3 + $0x31] sm:$0xff] %vm1956_vm14, %v1926_v35  ;;  %v1927_v4 = vadd.f32 %v1835_v47, %v1767_v13  ;;  %v1598_v13 = vadd.f32 %v8530_v56, %v10197_v59  ;;  %v1593_v35 = vadd.f32 %v10197_v59, %v10231_v30 }
 0x275   : > { %v1829_v50 = vpop.permute.xlu0 %1828 }
 0x276   : > { %2016 = vst.msk [vmem:[#allocation3 + $0x39] sm:$0xff] %vm1956_vm14, %v1927_v4  ;;  %v1924_v51 = vadd.f32 %v1829_v50, %v1764_v10  ;;  %v1738_v16 = vmul.f32 0.25, %v1598_v13  ;;  %v1590_v10 = vadd.f32 %v10197_v59, %v10227_v62  ;;  %vm1706_vm10 = vcmp.ge.f32.partialorder %v1598_v13, 0.0 }
 0x277   : > { %vm1705_vm6 = vcmp.ge.f32.partialorder %v1593_v35, 0.0 }
 0x278   : > { %2013 = vst.msk [vmem:[#allocation3 + $0x19] sm:$0xff] %vm1956_vm14, %v1924_v51  ;;  %v1736_v25 = vmul.f32 0.25, %v1590_v10  ;;  %v10310_v26 = vsel %vm1706_vm10, %v1598_v13, %v1738_v16  ;;  %vm1704_vm12 = vcmp.ge.f32.partialorder %v1590_v10, 0.0  ;;  %vm1714_vm10 = vcmp.ge.f32.partialorder %v1630_v14, 0.0 }
 0x279   : > { %v10256_v52 = vpop.f32.mrb[16].mxu0 }
 0x27a   : > { %v10258_v37 = vpop.f32.mrb[17].mxu0  ;;  %v10318_v62 = vsel %vm1704_vm12, %v1590_v10, %v1736_v25  ;;  %v1646_v34 = vadd.f32 %v10256_v52, %v10197_v59  ;;  %vm1712_vm12 = vcmp.ge.f32.partialorder %v1622_v29, 0.0 }
 0x27b   : > { %v10260_v53 = vpop.f32.mrb[18].mxu0  ;;  %v2051_v55 = vld [vmem:[#allocation3 + $0x30] sm:$0xff]  ;;  %v1638_v52 = vadd.f32 %v10197_v59, %v10258_v37 }
 0x27c   : > { %v10262_v54 = vpop.f32.mrb[19].mxu0 }
 0x27d   : > { %v2052_v58 = vld [vmem:[#allocation3 + $0x38] sm:$0xff]  ;;  %v2053_v61 = vld [vmem:[#allocation3 + $0x40] sm:$0x3] }
 0x27e   : > { %v10264_v63 = vpack.c.bf16 %v2052_v58, %v2051_v55  ;;  %v10266_v46 = vpack.c.bf16 %v2053_v61, %v2053_v61 }
 0x280   : > { %v2365_v57 = vrot.slane %v10264_v63, 1  ;;  %v2366_v1 = vrot.slane %v10266_v46, 1 }
 0x282   : > { %v10271_v48 = vsel %vm875_vm2, %v2365_v57, %v2366_v1  ;;  %v1737_v1 = vmul.f32 0.25, %v1593_v35 }
 0x283   : > { %8153 = vmatprep.mubr.msk.bf16.mxu0 %vm1956_vm14, %v10271_v48 }
 0x299   : > { %v10275_v2 = vpop.f32.mrb[20].mxu0 }
 0x29a   : > { %v10277_v42 = vpop.f32.mrb[21].mxu0  ;;  %v1662_v37 = vadd.f32 %v10275_v2, %v10197_v59 }
 0x29b   : > { %v10279_v39 = vpop.f32.mrb[22].mxu0 }
 0x29c   : > { %v10281_v7 = vpop.f32.mrb[23].mxu0 }
 0x29d   : > { %v1657_v2 = vadd.f32 %v10197_v59, %v10281_v7 }
 0x2b9   : > { %v8550_v3 = vpop.f32.mrb[0].mxu1 }
 0x2ba   : > { %v1678_v60 = vadd.f32 %v8550_v3, %v10197_v59  ;;  %v1669_v8 = vpop.f32.mrb[1].mxu1  ;;  %v1614_v3 = vadd.f32 %v10233_v41, %v10197_v59  ;;  %v1606_v41 = vadd.f32 %v10197_v59, %v10235_v32 }
 0x2bb   : > { %v1670_v38 = vadd.f32 %v10197_v59, %v1669_v8  ;;  %v8551_v5 = vpop.f32.mrb[2].mxu1 }
 0x2bc   : > { %vm1726_vm0 = vcmp.ge.f32.partialorder %v1678_v60, 0.0  ;;  %v1758_v9 = vmul.f32 0.25, %v1678_v60  ;;  %v1672_v49 = vpop.f32.mrb[3].mxu1  ;;  %v1681_v19 = vadd.f32 %v8551_v5, %v10197_v59  ;;  %v1742_v5 = vmul.f32 0.25, %v1614_v3 }
 0x2bd   : > { %vm1724_vm7 = vcmp.ge.f32.partialorder %v1670_v38, 0.0  ;;  %v1756_v36 = vmul.f32 0.25, %v1670_v38  ;;  %v1673_v11 = vadd.f32 %v10197_v59, %v1672_v49 }
 0x2be   : > { %v10289_v24 = vsel %vm1726_vm0, %v1678_v60, %v1758_v9  ;;  %v1759_v22 = vmul.f32 0.25, %v1681_v19  ;;  %vm1727_vm11 = vcmp.ge.f32.partialorder %v1681_v19, 0.0  ;;  %vm1710_vm0 = vcmp.ge.f32.partialorder %v1614_v3, 0.0 }
 0x2bf   : > { %vm1725_vm8 = vcmp.ge.f32.partialorder %v1673_v11, 0.0  ;;  %v1757_v12 = vmul.f32 0.25, %v1673_v11  ;;  %1880 = vrot.lane.b32.xlu0 %v10289_v24, %s8894_s15  ;;  %v10294_v18 = vsel %vm1724_vm7, %v1670_v38, %v1756_v36  ;;  %v1617_v9 = vadd.f32 %v10237_v43, %v10197_v59 }
 0x2c0   : > { %1876 = vrot.lane.b32.xlu1 %v10294_v18, %s8894_s15  ;;  %v10314_v56 = vsel %vm1727_vm11, %v1681_v19, %v1759_v22  ;;  %v10350_v36 = vsel %vm1705_vm6, %v1593_v35, %v1737_v1  ;;  %v10356_v13 = vsel %vm1710_vm0, %v1614_v3, %v1742_v5  ;;  %v1609_v43 = vadd.f32 %v10197_v59, %v10239_v33 }
 0x2c1   : > { %v10298_v15 = vsel %vm1725_vm8, %v1673_v11, %v1757_v12  ;;  %v1740_v11 = vmul.f32 0.25, %v1606_v41  ;;  %vm1708_vm8 = vcmp.ge.f32.partialorder %v1606_v41, 0.0  ;;  %v1743_v32 = vmul.f32 0.25, %v1617_v9 }
 0x2c2   : > { %vm1711_vm9 = vcmp.ge.f32.partialorder %v1617_v9, 0.0  ;;  %v1746_v12 = vmul.f32 0.25, %v1630_v14  ;;  %v1741_v10 = vmul.f32 0.25, %v1609_v43  ;;  %v1633_v33 = vadd.f32 %v10245_v28, %v10197_v59 }
 0x2c3   : > { %1878 = vrot.lane.b32.xlu0 %v10298_v15, %s8894_s15  ;;  %v10368_v16 = vsel %vm1708_vm8, %v1606_v41, %v1740_v11  ;;  %v10374_v21 = vsel %vm1711_vm9, %v1617_v9, %v1743_v32  ;;  %vm1709_vm11 = vcmp.ge.f32.partialorder %v1609_v43, 0.0  ;;  %v1744_v22 = vmul.f32 0.25, %v1622_v29  ;;  %v8662_v32 = vld [vmem:[%s13427_s3 + $0x88] sm:$0xff]  }
 0x2c4   : > { %1830 = vrot.lane.b32.xlu1 %v10306_v23, %s8894_s15  ;;  %v10380_v25 = vsel %vm1714_vm10, %v1630_v14, %v1746_v12  ;;  %v1747_v20 = vmul.f32 0.25, %v1633_v33  ;;  %v1625_v28 = vadd.f32 %v10197_v59, %v10247_v27  ;;  %vm1715_vm13 = vcmp.ge.f32.partialorder %v1633_v33, 0.0  ;;  %v8664_v12 = vld [vmem:[%s13427_s3 + $0x98] sm:$0xff]  }
 0x2c5   : > { %v1750_v35 = vmul.f32 0.25, %v1646_v34  ;;  %v1649_v27 = vadd.f32 %v10260_v53, %v10197_v59  ;;  %v1641_v53 = vadd.f32 %v10197_v59, %v10262_v54  ;;  %vm1722_vm0 = vcmp.ge.f32.partialorder %v1662_v37, 0.0 }
 0x2c6   : > { %v1654_v54 = vadd.f32 %v10197_v59, %v10277_v42  ;;  %v1665_v41 = vadd.f32 %v10279_v39, %v10197_v59  ;;  %vm1721_vm8 = vcmp.ge.f32.partialorder %v1657_v2, 0.0  ;;  %v8661_v39 = vld [vmem:[%s13427_s3 + $0x80] sm:$0xff]   ;;  %v8897_v14 = vmov 0  }
 0x2c7   : > { %1840 = vrot.lane.b32.xlu0 %v10310_v26, %s8894_s15  ;;  %vm1719_vm6 = vcmp.ge.f32.partialorder %v1649_v27, 0.0  ;;  %v1749_v3 = vmul.f32 0.25, %v1641_v53  ;;  %3375 = vmatprep.subr.bf16.mxu0 %v8897_v14 }
 0x2c8   : > { %1882 = vrot.lane.b32.xlu1 %v10314_v56, %s8894_s15  ;;  %v1752_v7 = vmul.f32 0.25, %v1654_v54  ;;  %vm1720_vm9 = vcmp.ge.f32.partialorder %v1654_v54, 0.0  ;;  %vm1723_vm10 = vcmp.ge.f32.partialorder %v1665_v41, 0.0  ;;  %3376 = vmatpush1.bf16.msra.mxu0 %v8661_v39 }
 0x2c9   : > { %3377 = vmatprep.subr.bf16.mxu0 %v8897_v14 }
 0x2ca   : > { %v10440_v11 = vsel %vm1720_vm9, %v1654_v54, %v1752_v7  ;;  %v8675_v54 = vld [vmem:[%s13427_s3 + $0x58] sm:$0xff]   ;;  %vm5977_vm9 = vcmask 982016  }
 0x2cb   : > { %1836 = vrot.lane.b32.xlu0 %v10318_v62, %s8894_s15  ;;  %v8676_v7 = vld [vmem:[%s13427_s3 + $0x18] sm:$0xff]  }
 0x2cc   : > { %1842 = vrot.lane.b32.xlu1 %v10322_v17, %s8894_s15  ;;  %3378 = vmatpush1.bf16.msra.mxu0 %v8662_v32 }
 0x2cd   : > { %3379 = vmatprep.subr.bf16.mxu0 %v8897_v14 }
 0x2d9   : > { %v8554_v45 = vpop.f32.mrb[4].mxu1 }
 0x2da   : > { %v1694_v47 = vadd.f32 %v8554_v45, %v10197_v59  ;;  %v1685_v4 = vpop.f32.mrb[5].mxu1  ;;  %v10386_v45 = vsel %vm1709_vm11, %v1609_v43, %v1741_v10  ;;  %v8663_v43 = vld [vmem:[%s13427_s3 + $0x90] sm:$0xff]   ;;  %v8666_v10 = vld [vmem:[%s13427_s3 + $0x40] sm:$0xff]   ;;  %vm2861_vm11 = vcmask 261120  }
 0x2db   : > { %v1686_v50 = vadd.f32 %v10197_v59, %v1685_v4  ;;  %v8555_v51 = vpop.f32.mrb[6].mxu1  ;;  %v1745_v4 = vmul.f32 0.25, %v1625_v28  ;;  %3380 = vmatpush1.bf16.msra.mxu0 %v8663_v43  ;;  %8296 = vmatprep.subr.bf16.mxu1 %v8666_v10  ;;  %v8678_v43 = vld [vmem:[%s13427_s3 + $0x60] sm:$0xff]  }
 0x2dc   : > { %vm1730_vm15 = vcmp.ge.f32.partialorder %v1694_v47, 0.0  ;;  %v1762_v55 = vmul.f32 0.25, %v1694_v47  ;;  %v1688_v58 = vpop.f32.mrb[7].mxu1  ;;  %v1697_v30 = vadd.f32 %v8555_v51, %v10197_v59  ;;  %v1748_v51 = vmul.f32 0.25, %v1638_v52  ;;  %3381 = vmatprep.subr.bf16.mxu0 %v8897_v14 }
 0x2dd   : > { %vm1728_vm1 = vcmp.ge.f32.partialorder %v1686_v50, 0.0  ;;  %v1760_v61 = vmul.f32 0.25, %v1686_v50  ;;  %v1689_v57 = vadd.f32 %v10197_v59, %v1688_v58  ;;  %v1751_v58 = vmul.f32 0.25, %v1649_v27 }
 0x2de   : > { %v10333_v6 = vsel %vm1730_vm15, %v1694_v47, %v1762_v55  ;;  %v1763_v49 = vmul.f32 0.25, %v1697_v30  ;;  %vm1731_vm7 = vcmp.ge.f32.partialorder %v1697_v30, 0.0  ;;  %v10392_v47 = vsel %vm1712_vm12, %v1622_v29, %v1744_v22  ;;  %v8665_v29 = vld [vmem:[%s13427_s3 + $0xa0] sm:$0xff]   ;;  %v8668_v22 = vld [vmem:[%s13427_s3 + $0xa8] sm:$0xff]  }
 0x2df   : > { %vm1729_vm5 = vcmp.ge.f32.partialorder %v1689_v57, 0.0  ;;  %v1761_v60 = vmul.f32 0.25, %v1689_v57  ;;  %1888 = vrot.lane.b32.xlu0 %v10333_v6, %s8894_s15  ;;  %v10338_v8 = vsel %vm1728_vm1, %v1686_v50, %v1760_v61  ;;  %vm1718_vm15 = vcmp.ge.f32.partialorder %v1646_v34, 0.0  ;;  %3382 = vmatpush1.bf16.msra.mxu0 %v8664_v12 }
 0x2e0   : > { %1884 = vrot.lane.b32.xlu1 %v10338_v8, %s8894_s15  ;;  %v10362_v19 = vsel %vm1731_vm7, %v1697_v30, %v1763_v49  ;;  %v10398_v50 = vsel %vm1715_vm13, %v1633_v33, %v1747_v20  ;;  %vm1713_vm1 = vcmp.ge.f32.partialorder %v1625_v28, 0.0  ;;  %v10404_v55 = vsel %vm1718_vm15, %v1646_v34, %v1750_v35  ;;  %3383 = vmatprep.subr.bf16.mxu0 %v8897_v14  ;;  %v8667_v33 = vld [vmem:[%s13427_s3] sm:$0xff]  }
 0x2e1   : > { %v10342_v38 = vsel %vm1729_vm5, %v1689_v57, %v1761_v60  ;;  %vm1716_vm5 = vcmp.ge.f32.partialorder %v1638_v52, 0.0  ;;  %v10410_v61 = vsel %vm1713_vm1, %v1625_v28, %v1745_v4  ;;  %v1754_v57 = vmul.f32 0.25, %v1662_v37  ;;  %8297 = vmatpush3.bf16.msra.mxu1 %v8667_v33  ;;  %v8670_v4 = vld [vmem:[%s13427_s3 + $0x8] sm:$0xff]  }
 0x2e2   : > { %v10416_v1 = vsel %vm1716_vm5, %v1638_v52, %v1748_v51  ;;  %v10422_v30 = vsel %vm1719_vm6, %v1649_v27, %v1751_v58  ;;  %vm1717_vm7 = vcmp.ge.f32.partialorder %v1641_v53, 0.0  ;;  %v1753_v60 = vmul.f32 0.25, %v1657_v2  ;;  %v8669_v52 = vld [vmem:[%s13427_s3 + $0x48] sm:$0xff]   ;;  %v8672_v58 = vld [vmem:[%s13427_s3 + $0x50] sm:$0xff]  }
 0x2e3   : > { %1886 = vrot.lane.b32.xlu0 %v10342_v38, %s8894_s15  ;;  %v10426_v5 = vsel %vm1722_vm0, %v1662_v37, %v1754_v57  ;;  %v10432_v42 = vsel %vm1717_vm7, %v1641_v53, %v1749_v3  ;;  %v1755_v49 = vmul.f32 0.25, %v1665_v41  ;;  %3384 = vmatpush1.bf16.msra.mxu0 %v8665_v29  ;;  %v8673_v53 = vld [vmem:[%s13427_s3 + $0x10] sm:$0xff]   ;;  %v2048_v29 = vld [vmem:[#allocation3 + $0x18] sm:$0xff]  ;;  %vm2894_vm12 = vcmask 654336  }
 0x2e4   : > { %1838 = vrot.lane.b32.xlu1 %v10350_v36, %s8894_s15  ;;  %v10436_v9 = vsel %vm1721_vm8, %v1657_v2, %v1753_v60  ;;  %3385 = vmatprep.subr.bf16.mxu0 %v8897_v14  ;;  %vm2746_vm13 = vcmask 130048   ;;  %vm2779_vm15 = vcmask 523264   ;;  %vm2697_vm1 = vcmask 785408  }
 0x2e5   : > { %v10444_v59 = vsel %vm1723_vm10, %v1665_v41, %v1755_v49  ;;  %8298 = vmatprep.subr.bf16.mxu1 %v8669_v52  ;;  %vm2812_vm5 = vcmask 916480   ;;  %vm5110_vm6 = vcmask 189440   ;;  %vm6271_vm0 = vcmask 1043456  }
 0x2e6   : > { %8299 = vmatpush3.bf16.msra.mxu1 %v8670_v4  ;;  %5114 = vst.msk [vmem:[#allocation5 + $0x28] sm:$0x3] %vm5110_vm6, %v8882_v0  ;;  %5111 = vst.msk [vmem:[#allocation5 + $0x10] sm:$0x3] %vm5110_vm6, %v8882_v0  ;;  %vm5912_vm7 = vcmask 588800   ;;  %vm6058_vm8 = vcmask 326656  }
 0x2e7   : > { %1848 = vrot.lane.b32.xlu0 %v10356_v13, %s8894_s15  ;;  %3386 = vmatpush1.bf16.msra.mxu0 %v8668_v22  ;;  %v8679_v22 = vld [vmem:[%s13427_s3 + $0x20] sm:$0xff]   ;;  %5117 = vst.msk [vmem:[#allocation5 + $0x40] sm:$0x3] %vm5110_vm6, %v8882_v0  ;;  %5120 = vst.msk [vmem:[#allocation5 + $0x58] sm:$0x3] %vm5110_vm6, %v8882_v0  ;;  %vm6238_vm10 = vcmask 719872  }
 0x2e8   : > { %1890 = vrot.lane.b32.xlu1 %v10362_v19, %s8894_s15  ;;  %3387 = vmatprep.subr.bf16.mxu0 %v8897_v14  ;;  %5123 = vst.msk [vmem:[#allocation5 + $0x70] sm:$0x3] %vm5110_vm6, %v8882_v0  ;;  %5126 = vst.msk [vmem:[#allocation5 + $0x88] sm:$0x3] %vm5110_vm6, %v8882_v0 }
 0x2e9   : > { %8300 = vmatprep.subr.bf16.mxu1 %v8672_v58  ;;  %v2167_v58 = vshll.u32 %v10266_v46, 16  ;;  %v8686_v46 = vld [vmem:[%s13427_s3 + $0x78] sm:$0xff]   ;;  %5129 = vst.msk [vmem:[#allocation5 + $0xa0] sm:$0x3] %vm5110_vm6, %v8882_v0  ;;  %5132 = vst.msk [vmem:[#allocation5 + $0xb8] sm:$0x3] %vm5110_vm6, %v8882_v0 }
 0x2ea   : > { %8301 = vmatpush3.bf16.msra.mxu1 %v8673_v53  ;;  %5135 = vst.msk [vmem:[#allocation5 + $0xd0] sm:$0x3] %vm5110_vm6, %v8882_v0  ;;  %5138 = vst.msk [vmem:[#allocation5 + $0xe8] sm:$0x3] %vm5110_vm6, %v8882_v0 }
 0x2eb   : > { %1844 = vrot.lane.b32.xlu0 %v10368_v16, %s8894_s15  ;;  %8302 = vmatprep.subr.bf16.mxu1 %v8675_v54  ;;  %5141 = vst.msk [vmem:[#allocation5 + $0x100] sm:$0x3] %vm5110_vm6, %v8882_v0  ;;  %5144 = vst.msk [vmem:[#allocation5 + $0x118] sm:$0x3] %vm5110_vm6, %v8882_v0 }
 0x2ec   : > { %1850 = vrot.lane.b32.xlu1 %v10374_v21, %s8894_s15  ;;  %5147 = vst.msk [vmem:[#allocation5 + $0x130] sm:$0x3] %vm5110_vm6, %v8882_v0  ;;  %5150 = vst.msk [vmem:[#allocation5 + $0x148] sm:$0x3] %vm5110_vm6, %v8882_v0 }
 0x2ed   : > { %5153 = vst.msk [vmem:[#allocation5 + $0x160] sm:$0x3] %vm5110_vm6, %v8882_v0  ;;  %5156 = vst.msk [vmem:[#allocation5 + $0x178] sm:$0x3] %vm5110_vm6, %v8882_v0 }
 0x2ee   : > { %8303 = vmatpush3.bf16.msra.mxu1 %v8676_v7  ;;  %v8687_v7 = vld [vmem:[%s13427_s3 + $0x38] sm:$0xff]   ;;  %5159 = vst.msk [vmem:[#allocation5 + $0x190] sm:$0x3] %vm5110_vm6, %v8882_v0  ;;  %5162 = vst.msk [vmem:[#allocation5 + $0x1a8] sm:$0x3] %vm5110_vm6, %v8882_v0 }
 0x2ef   : > { %1856 = vrot.lane.b32.xlu0 %v10380_v25, %s8894_s15  ;;  %8304 = vmatprep.subr.bf16.mxu1 %v8678_v43  ;;  %6438 = vst.msk [vmem:[#allocation6 + $0x10] sm:$0x3] %vm5110_vm6, %v8882_v0  ;;  %6441 = vst.msk [vmem:[#allocation6 + $0x28] sm:$0x3] %vm5110_vm6, %v8882_v0 }
 0x2f0   : > { %1846 = vrot.lane.b32.xlu1 %v10386_v45, %s8894_s15  ;;  %6444 = vst.msk [vmem:[#allocation6 + $0x40] sm:$0x3] %vm5110_vm6, %v8882_v0  ;;  %6447 = vst.msk [vmem:[#allocation6 + $0x58] sm:$0x3] %vm5110_vm6, %v8882_v0 }
 0x2f1   : > { %6450 = vst.msk [vmem:[#allocation6 + $0x70] sm:$0x3] %vm5110_vm6, %v8882_v0  ;;  %6453 = vst.msk [vmem:[#allocation6 + $0x88] sm:$0x3] %vm5110_vm6, %v8882_v0 }
 0x2f2   : > { %8305 = vmatpush3.bf16.msra.mxu1 %v8679_v22  ;;  %6456 = vst.msk [vmem:[#allocation6 + $0xa0] sm:$0x3] %vm5110_vm6, %v8882_v0  ;;  %6459 = vst.msk [vmem:[#allocation6 + $0xb8] sm:$0x3] %vm5110_vm6, %v8882_v0 }
 0x2f3   : > { %1852 = vrot.lane.b32.xlu0 %v10392_v47, %s8894_s15  ;;  %6462 = vst.msk [vmem:[#allocation6 + $0xd0] sm:$0x3] %vm5110_vm6, %v8882_v0  ;;  %6465 = vst.msk [vmem:[#allocation6 + $0xe8] sm:$0x3] %vm5110_vm6, %v8882_v0 }
 0x2f4   : > { %1858 = vrot.lane.b32.xlu1 %v10398_v50, %s8894_s15  ;;  %6468 = vst.msk [vmem:[#allocation6 + $0x100] sm:$0x3] %vm5110_vm6, %v8882_v0  ;;  %6471 = vst.msk [vmem:[#allocation6 + $0x118] sm:$0x3] %vm5110_vm6, %v8882_v0 }
 0x2f5   : > { %6474 = vst.msk [vmem:[#allocation6 + $0x130] sm:$0x3] %vm5110_vm6, %v8882_v0  ;;  %6477 = vst.msk [vmem:[#allocation6 + $0x148] sm:$0x3] %vm5110_vm6, %v8882_v0 }
 0x2f6   : > { %6480 = vst.msk [vmem:[#allocation6 + $0x160] sm:$0x3] %vm5110_vm6, %v8882_v0  ;;  %6483 = vst.msk [vmem:[#allocation6 + $0x178] sm:$0x3] %vm5110_vm6, %v8882_v0 }
 0x2f7   : > { %1864 = vrot.lane.b32.xlu0 %v10404_v55, %s8894_s15  ;;  %6486 = vst.msk [vmem:[#allocation6 + $0x190] sm:$0x3] %vm5110_vm6, %v8882_v0  ;;  %6489 = vst.msk [vmem:[#allocation6 + $0x1a8] sm:$0x3] %vm5110_vm6, %v8882_v0 }
 0x2f8   : > { %1854 = vrot.lane.b32.xlu1 %v10410_v61, %s8894_s15 }
 0x2fb   : > { %1860 = vrot.lane.b32.xlu0 %v10416_v1, %s8894_s15 }
 0x2fc   : > { %1866 = vrot.lane.b32.xlu1 %v10422_v30, %s8894_s15 }
 0x2ff   : > { %1872 = vrot.lane.b32.xlu0 %v10426_v5, %s8894_s15 }
 0x300   : > { %1862 = vrot.lane.b32.xlu1 %v10432_v42, %s8894_s15 }
 0x303   : > { %1870 = vrot.lane.b32.xlu0 %v10436_v9, %s8894_s15 }
 0x304   : > { %1868 = vrot.lane.b32.xlu1 %v10440_v11, %s8894_s15 }
 0x308   : > { %1874 = vrot.lane.b32.xlu1 %v10444_v59, %s8894_s15 }
 0x30c   : > { %2601 = vrot.lane.b32.xlu1 %v10264_v63, %s8895_s24 }
 0x310   : > { %2507 = vrot.lane.b32.xlu1 %v10264_v63, %s8896_s27 }
 0x331   : > { %v1881_v34 = vpop.permute.xlu0 %1880 }
 0x332   : > { %v1950_v20 = vadd.f32 %v1881_v34, %v10289_v24  ;;  %v1877_v28 = vpop.permute.xlu1 %1876  ;;  %v2162_v34 = vshll.u32 %v10264_v63, 16 }
 0x333   : > { %v1948_v35 = vadd.f32 %v1877_v28, %v10294_v18  ;;  %v8671_v18 = vld [vmem:[%s13427_s3 + $0xb0] sm:$0xff]   ;;  %v8681_v28 = vld [vmem:[%s13427_s3 + $0x68] sm:$0xff]  }
 0x334   : > { %2039 = vst.msk [vmem:[#allocation3 + $0x151] sm:$0xff] %vm1956_vm14, %v1950_v20  ;;  %3388 = vmatpush1.bf16.msra.mxu0 %v8671_v18  ;;  %v8680_v20 = vld [vmem:[%s13427_s3 + $0xc8] sm:$0xff]   ;;  %8306 = vmatprep.subr.bf16.mxu1 %v8681_v28  ;;  %v8684_v18 = vld [vmem:[%s13427_s3 + $0x70] sm:$0xff]  }
 0x335   : > { %2037 = vst.msk [vmem:[#allocation3 + $0x139] sm:$0xff] %vm1956_vm14, %v1948_v35  ;;  %v1879_v27 = vpop.permute.xlu0 %1878  ;;  %3389 = vmatprep.subr.bf16.mxu0 %v8897_v14  ;;  %v8682_v35 = vld [vmem:[%s13427_s3 + $0x28] sm:$0xff]  }
 0x336   : > { %v1949_v24 = vadd.f32 %v1879_v27, %v10298_v15  ;;  %v1831_v51 = vpop.permute.xlu1 %1830  ;;  %v2164_v27 = vrot.slane %v2162_v34, 1  ;;  %8307 = vmatpush3.bf16.msra.mxu1 %v8682_v35 }
 0x337   : > { %v1925_v37 = vadd.f32 %v1831_v51, %v10306_v23  ;;  %v8674_v23 = vld [vmem:[%s13427_s3 + $0xb8] sm:$0xff]   ;;  %v8683_v51 = vld [vmem:[%s13427_s3 + $0xd0] sm:$0xff]   ;;  %8308 = vmatprep.subr.bf16.mxu1 %v8684_v18 }
 0x338   : > { %2038 = vst.msk [vmem:[#allocation3 + $0x141] sm:$0xff] %vm1956_vm14, %v1949_v24  ;;  %3390 = vmatpush1.bf16.msra.mxu0 %v8674_v23  ;;  %v8685_v23 = vld [vmem:[%s13427_s3 + $0x30] sm:$0xff]  }
 0x339   : > { %2014 = vst.msk [vmem:[#allocation3 + $0x21] sm:$0xff] %vm1956_vm14, %v1925_v37  ;;  %v1841_v15 = vpop.permute.xlu0 %1840  ;;  %3391 = vmatprep.subr.bf16.mxu0 %v8897_v14  ;;  %v2160_v37 = vshrl.u32 %v10264_v63, 16 }
 0x33a   : > { %v1930_v57 = vadd.f32 %v1841_v15, %v10310_v26  ;;  %v1883_v2 = vpop.permute.xlu1 %1882  ;;  %v8677_v26 = vld [vmem:[%s13427_s3 + $0xc0] sm:$0xff]   ;;  %8309 = vmatpush3.bf16.msra.mxu1 %v8685_v23 }
 0x33b   : > { %v1951_v3 = vadd.f32 %v1883_v2, %v10314_v56  ;;  %v2169_v2 = vrot.slane %v2167_v58, 1  ;;  %8310 = vmatprep.subr.bf16.mxu1 %v8686_v46 }
 0x33c   : > { %2019 = vst.msk [vmem:[#allocation3 + $0x61] sm:$0xff] %vm1956_vm14, %v1930_v57  ;;  %v2084_v39 = vld [vmem:[#allocation3 + $0x138] sm:$0xff]  ;;  %3392 = vmatpush1.bf16.msra.mxu0 %v8677_v26  ;;  %v2165_v57 = vor.u32 %v2164_v27, %v2160_v37 }
 0x33d   : > { %2040 = vst.msk [vmem:[#allocation3 + $0x159] sm:$0xff] %vm1956_vm14, %v1951_v3  ;;  %v1837_v60 = vpop.permute.xlu0 %1836  ;;  %3393 = vmatprep.subr.bf16.mxu0 %v8897_v14 }
 0x33e   : > { %v1928_v56 = vadd.f32 %v1837_v60, %v10318_v62  ;;  %v1843_v41 = vpop.permute.xlu1 %1842  ;;  %v2170_v26 = vsel %vm650_vm3, %v2165_v57, %v2169_v2  ;;  %8311 = vmatpush3.bf16.msra.mxu1 %v8687_v7 }
 0x33f   : > { %v1931_v49 = vadd.f32 %v1843_v41, %v10322_v17  ;;  %v2085_v32 = vld [vmem:[#allocation3 + $0x140] sm:$0xff]  ;;  %v2086_v24 = vld [vmem:[#allocation3 + $0x148] sm:$0x3] }
 0x340   : > { %2017 = vst.msk [vmem:[#allocation3 + $0x49] sm:$0xff] %vm1956_vm14, %v1928_v56  ;;  %v10530_v12 = vpack.c.bf16 %v2085_v32, %v2084_v39  ;;  %v2049_v10 = vld [vmem:[#allocation3 + $0x20] sm:$0xff]  ;;  %v2050_v33 = vld [vmem:[#allocation3 + $0x28] sm:$0x3]  ;;  %3394 = vmatpush1.bf16.msra.mxu0 %v8680_v20  ;;  %v2126_v15 = vpack.c.bf16 %v2086_v24, %v2086_v24 }
 0x341   : > { %2020 = vst.msk [vmem:[#allocation3 + $0x69] sm:$0xff] %vm1956_vm14, %v1931_v49  ;;  %v10533_v62 = vpack.c.bf16 %v2049_v10, %v2048_v29  ;;  %v10535_v17 = vpack.c.bf16 %v2050_v33, %v2050_v33  ;;  %3395 = vmatprep.subr.bf16.mxu0 %v8897_v14 }
 0x342   : > { %2623 = vrot.lane.b32.xlu0 %v10530_v12, %s8895_s24  ;;  %v2398_v3 = vrot.slane %v10530_v12, 1  ;;  %v2399_v54 = vrot.slane %v2126_v15, 1  ;;  %v2294_v43 = vshll.u32 %v10530_v12, 16  ;;  %v2292_v27 = vshrl.u32 %v10530_v12, 16 }
 0x343   : > { %2505 = vrot.lane.b32.xlu1 %v10533_v62, %s8896_s27  ;;  %v2362_v52 = vrot.slane %v10533_v62, 1  ;;  %v2363_v4 = vrot.slane %v10535_v17, 1  ;;  %v2150_v60 = vshll.u32 %v10533_v62, 16  ;;  %v2148_v10 = vshrl.u32 %v10533_v62, 16  ;;  %v2057_v22 = vld [vmem:[#allocation3 + $0x60] sm:$0xff] }
 0x344   : > { %3396 = vmatpush1.bf16.msra.mxu0 %v8683_v51  ;;  %v10590_v56 = vsel %vm875_vm2, %v2398_v3, %v2399_v54  ;;  %v2155_v33 = vshll.u32 %v10535_v17, 16  ;;  %v2299_v24 = vshll.u32 %v2126_v15, 16 }
 0x345   : > { %v2364_v53 = vsel %vm875_vm2, %v2362_v52, %v2363_v4  ;;  %4947 = vmatprep.subr.bf16.mxu0 %v8897_v14  ;;  %v2152_v41 = vrot.slane %v2150_v60, 1 }
 0x346   : > { %2529 = vrot.lane.b32.xlu0 %v10530_v12, %s8896_s27  ;;  %v2157_v17 = vrot.slane %v2155_v33, 1  ;;  %v2301_v15 = vrot.slane %v2299_v24, 1 }
 0x347   : > { %2571 = vrot.lane.b32.xlu1 %v10271_v48, %s8898_s12  ;;  %v2153_v20 = vor.u32 %v2152_v41, %v2148_v10  ;;  %v2054_v60 = vld [vmem:[#allocation3 + $0x48] sm:$0xff] }
 0x348   : > { %v2058_v32 = vld [vmem:[#allocation3 + $0x68] sm:$0xff]  ;;  %v2059_v4 = vld [vmem:[#allocation3 + $0x70] sm:$0x3] }
 0x349   : > { %v10602_v34 = vpack.c.bf16 %v2058_v32, %v2057_v22  ;;  %v2108_v58 = vpack.c.bf16 %v2059_v4, %v2059_v4 }
 0x34a   : > { %2569 = vrot.lane.b32.xlu0 %v2364_v53, %s8898_s12 }
 0x34b   : > { %2477 = vrot.lane.b32.xlu1 %v10271_v48, %s8893_s21  ;;  %v2186_v57 = vshll.u32 %v10602_v34, 16  ;;  %v2372_v3 = vrot.slane %v2108_v58, 1  ;;  %v2184_v32 = vshrl.u32 %v10602_v34, 16 }
 0x34e   : > { %2475 = vrot.lane.b32.xlu0 %v2364_v53, %s8893_s21 }
 0x34f   : > { %2539 = vrot.lane.b32.xlu1 %v2170_v26, %s8899_s29 }
 0x351   : > { %v1889_v48 = vpop.permute.xlu0 %1888 }
 0x352   : > { %v1954_v49 = vadd.f32 %v1889_v48, %v10333_v6  ;;  %v1885_v39 = vpop.permute.xlu1 %1884  ;;  %2593 = vrot.lane.b32.xlu0 %v10590_v56, %s8898_s12  ;;  %v2188_v48 = vrot.slane %v2186_v57, 1 }
 0x353   : > { %v1952_v29 = vadd.f32 %v1885_v39, %v10338_v8  ;;  %2445 = vrot.lane.b32.xlu1 %v2170_v26, %s8892_s20  ;;  %v2296_v8 = vrot.slane %v2294_v43, 1  ;;  %v2191_v43 = vshll.u32 %v2108_v58, 16 }
 0x354   : > { %2043 = vst.msk [vmem:[#allocation3 + $0x181] sm:$0xff] %vm1956_vm14, %v1954_v49  ;;  %v2189_v10 = vor.u32 %v2188_v48, %v2184_v32 }
 0x355   : > { %2041 = vst.msk [vmem:[#allocation3 + $0x169] sm:$0xff] %vm1956_vm14, %v1952_v29  ;;  %v1887_v6 = vpop.permute.xlu0 %1886 }
 0x356   : > { %v1953_v28 = vadd.f32 %v1887_v6, %v10342_v38  ;;  %v1839_v35 = vpop.permute.xlu1 %1838  ;;  %2633 = vrot.lane.b32.xlu0 %v2170_v26, %s8894_s15  ;;  %v2158_v38 = vsel %vm650_vm3, %v2153_v20, %v2157_v17 }
 0x357   : > { %v1929_v52 = vadd.f32 %v1839_v35, %v10350_v36  ;;  %2605 = vrot.lane.b32.xlu1 %v10602_v34, %s8895_s24  ;;  %v2297_v36 = vor.u32 %v2296_v8, %v2292_v27 }
 0x358   : > { %2042 = vst.msk [vmem:[#allocation3 + $0x171] sm:$0xff] %vm1956_vm14, %v1953_v28  ;;  %v2193_v28 = vrot.slane %v2191_v43, 1 }
 0x359   : > { %2018 = vst.msk [vmem:[#allocation3 + $0x51] sm:$0xff] %vm1956_vm14, %v1929_v52  ;;  %v1849_v51 = vpop.permute.xlu0 %1848  ;;  %v10624_v46 = vsel %vm650_vm3, %v2297_v36, %v2301_v15 }
 0x35a   : > { %v1934_v18 = vadd.f32 %v1849_v51, %v10356_v13  ;;  %v1891_v37 = vpop.permute.xlu1 %1890  ;;  %2537 = vrot.lane.b32.xlu0 %v2158_v38, %s8899_s29 }
 0x35b   : > { %v1955_v53 = vadd.f32 %v1891_v37, %v10362_v19  ;;  %2511 = vrot.lane.b32.xlu1 %v10602_v34, %s8896_s27  ;;  %v2371_v19 = vrot.slane %v10602_v34, 1 }
 0x35c   : > { %2023 = vst.msk [vmem:[#allocation3 + $0x91] sm:$0xff] %vm1956_vm14, %v1934_v18 }
 0x35d   : > { %2044 = vst.msk [vmem:[#allocation3 + $0x189] sm:$0xff] %vm1956_vm14, %v1955_v53  ;;  %v1845_v23 = vpop.permute.xlu0 %1844  ;;  %v10636_v39 = vsel %vm875_vm2, %v2371_v19, %v2372_v3 }
 0x35e   : > { %v1932_v13 = vadd.f32 %v1845_v23, %v10368_v16  ;;  %v1851_v2 = vpop.permute.xlu1 %1850  ;;  %2443 = vrot.lane.b32.xlu0 %v2158_v38, %s8892_s20 }
 0x35f   : > { %v1935_v54 = vadd.f32 %v1851_v2, %v10374_v21  ;;  %2655 = vrot.lane.b32.xlu1 %v10624_v46, %s8894_s15 }
 0x360   : > { %2021 = vst.msk [vmem:[#allocation3 + $0x79] sm:$0xff] %vm1956_vm14, %v1932_v13  ;;  %v2055_v7 = vld [vmem:[#allocation3 + $0x50] sm:$0xff]  ;;  %v2056_v29 = vld [vmem:[#allocation3 + $0x58] sm:$0x3] }
 0x361   : > { %2024 = vst.msk [vmem:[#allocation3 + $0x99] sm:$0xff] %vm1956_vm14, %v1935_v54  ;;  %v1857_v16 = vpop.permute.xlu0 %1856  ;;  %v10632_v26 = vpack.c.bf16 %v2055_v7, %v2054_v60 }
 0x362   : > { %v1938_v41 = vadd.f32 %v1857_v16, %v10380_v25  ;;  %v1847_v49 = vpop.permute.xlu1 %1846 }
 0x363   : > { %v1933_v21 = vadd.f32 %v1847_v49, %v10386_v45  ;;  %2575 = vrot.lane.b32.xlu1 %v10636_v39, %s8898_s12  ;;  %2603 = vrot.lane.b32.xlu0 %v10632_v26, %s8895_s24  ;;  %v2106_v45 = vpack.c.bf16 %v2056_v29, %v2056_v29  ;;  %v2174_v6 = vshll.u32 %v10632_v26, 16  ;;  %v2368_v17 = vrot.slane %v10632_v26, 1  ;;  %v2063_v2 = vld [vmem:[#allocation3 + $0x90] sm:$0xff] }
 0x364   : > { %2027 = vst.msk [vmem:[#allocation3 + $0xc1] sm:$0xff] %vm1956_vm14, %v1938_v41  ;;  %v2172_v24 = vshrl.u32 %v10632_v26, 16 }
 0x365   : > { %2022 = vst.msk [vmem:[#allocation3 + $0x81] sm:$0xff] %vm1956_vm14, %v1933_v21  ;;  %v1853_v25 = vpop.permute.xlu0 %1852  ;;  %v2176_v4 = vrot.slane %v2174_v6, 1  ;;  %v2179_v51 = vshll.u32 %v2106_v45, 16 }
 0x366   : > { %v1936_v33 = vadd.f32 %v1853_v25, %v10392_v47  ;;  %v1859_v22 = vpop.permute.xlu1 %1858  ;;  %v2194_v47 = vsel %vm650_vm3, %v2189_v10, %v2193_v28 }
 0x367   : > { %v1939_v20 = vadd.f32 %v1859_v22, %v10398_v50  ;;  %2481 = vrot.lane.b32.xlu1 %v10636_v39, %s8893_s21  ;;  %2509 = vrot.lane.b32.xlu0 %v10632_v26, %s8896_s27  ;;  %v2369_v50 = vrot.slane %v2106_v45, 1  ;;  %v2181_v58 = vrot.slane %v2179_v51, 1  ;;  %v2060_v49 = vld [vmem:[#allocation3 + $0x78] sm:$0xff] }
 0x368   : > { %2025 = vst.msk [vmem:[#allocation3 + $0xa9] sm:$0xff] %vm1956_vm14, %v1936_v33  ;;  %v2064_v57 = vld [vmem:[#allocation3 + $0x98] sm:$0xff] }
 0x369   : > { %2028 = vst.msk [vmem:[#allocation3 + $0xc9] sm:$0xff] %vm1956_vm14, %v1939_v20  ;;  %v1865_v35 = vpop.permute.xlu0 %1864  ;;  %v10667_v37 = vsel %vm875_vm2, %v2368_v17, %v2369_v50  ;;  %v10683_v3 = vpack.c.bf16 %v2064_v57, %v2063_v2 }
 0x36a   : > { %v1942_v8 = vadd.f32 %v1865_v35, %v10404_v55  ;;  %v1855_v52 = vpop.permute.xlu1 %1854 }
 0x36b   : > { %v1937_v27 = vadd.f32 %v1855_v52, %v10410_v61  ;;  %2543 = vrot.lane.b32.xlu1 %v2194_v47, %s8899_s29  ;;  %2561 = vrot.lane.b32.xlu0 %v10624_v46, %s8899_s29  ;;  %v2177_v61 = vor.u32 %v2176_v4, %v2172_v24  ;;  %v2377_v16 = vrot.slane %v10683_v3, 1  ;;  %v2210_v41 = vshll.u32 %v10683_v3, 16  ;;  %v2069_v51 = vld [vmem:[#allocation3 + $0xc0] sm:$0xff] }
 0x36c   : > { %2031 = vst.msk [vmem:[#allocation3 + $0xf1] sm:$0xff] %vm1956_vm14, %v1942_v8  ;;  %v2208_v29 = vshrl.u32 %v10683_v3, 16 }
 0x36d   : > { %2026 = vst.msk [vmem:[#allocation3 + $0xb1] sm:$0xff] %vm1956_vm14, %v1937_v27  ;;  %v1861_v55 = vpop.permute.xlu0 %1860  ;;  %v2182_v23 = vsel %vm650_vm3, %v2177_v61, %v2181_v58  ;;  %v2212_v43 = vrot.slane %v2210_v41, 1 }
 0x36e   : > { %v1940_v38 = vadd.f32 %v1861_v55, %v10416_v1  ;;  %v1867_v18 = vpop.permute.xlu1 %1866 }
 0x36f   : > { %v1943_v36 = vadd.f32 %v1867_v18, %v10422_v30  ;;  %2449 = vrot.lane.b32.xlu1 %v2194_v47, %s8892_s20  ;;  %2573 = vrot.lane.b32.xlu0 %v10667_v37, %s8898_s12  ;;  %v2065_v30 = vld [vmem:[#allocation3 + $0xa0] sm:$0x3]  ;;  %v2213_v10 = vor.u32 %v2212_v43, %v2208_v29 }
 0x370   : > { %2029 = vst.msk [vmem:[#allocation3 + $0xd9] sm:$0xff] %vm1956_vm14, %v1940_v38  ;;  %v2112_v60 = vpack.c.bf16 %v2065_v30, %v2065_v30  ;;  %v2070_v27 = vld [vmem:[#allocation3 + $0xc8] sm:$0xff]  ;;  %v2071_v24 = vld [vmem:[#allocation3 + $0xd0] sm:$0x3] }
 0x371   : > { %2032 = vst.msk [vmem:[#allocation3 + $0xf9] sm:$0xff] %vm1956_vm14, %v1943_v36  ;;  %v1873_v53 = vpop.permute.xlu0 %1872  ;;  %v10729_v55 = vpack.c.bf16 %v2070_v27, %v2069_v51  ;;  %v2116_v38 = vpack.c.bf16 %v2071_v24, %v2071_v24 }
 0x372   : > { %v1946_v1 = vadd.f32 %v1873_v53, %v10426_v5  ;;  %v1863_v15 = vpop.permute.xlu1 %1862  ;;  %v2378_v48 = vrot.slane %v2112_v60, 1  ;;  %v2215_v25 = vshll.u32 %v2112_v60, 16  ;;  %v2066_v53 = vld [vmem:[#allocation3 + $0xa8] sm:$0xff] }
 0x373   : > { %v1941_v13 = vadd.f32 %v1863_v15, %v10432_v42  ;;  %2479 = vrot.lane.b32.xlu0 %v10667_v37, %s8893_s21  ;;  %2635 = vrot.lane.b32.xlu1 %v2182_v23, %s8894_s15  ;;  %v2383_v18 = vrot.slane %v10729_v55, 1  ;;  %v2384_v61 = vrot.slane %v2116_v38, 1  ;;  %v2234_v36 = vshll.u32 %v10729_v55, 16 }
 0x374   : > { %2035 = vst.msk [vmem:[#allocation3 + $0x121] sm:$0xff] %vm1956_vm14, %v1946_v1  ;;  %v10700_v21 = vsel %vm875_vm2, %v2377_v16, %v2378_v48  ;;  %v2217_v45 = vrot.slane %v2215_v25, 1  ;;  %v2067_v58 = vld [vmem:[#allocation3 + $0xb0] sm:$0xff]  ;;  %v2068_v57 = vld [vmem:[#allocation3 + $0xb8] sm:$0x3]  ;;  %v2239_v30 = vshll.u32 %v2116_v38, 16 }
 0x375   : > { %2030 = vst.msk [vmem:[#allocation3 + $0xe1] sm:$0xff] %vm1956_vm14, %v1941_v13  ;;  %v1871_v19 = vpop.permute.xlu0 %1870  ;;  %v10740_v1 = vsel %vm875_vm2, %v2383_v18, %v2384_v61  ;;  %v10742_v15 = vpack.c.bf16 %v2067_v58, %v2066_v53  ;;  %v2232_v13 = vshrl.u32 %v10729_v55, 16 }
 0x376   : > { %v1945_v5 = vadd.f32 %v1871_v19, %v10436_v9  ;;  %v1869_v54 = vpop.permute.xlu1 %1868  ;;  %v2218_v6 = vsel %vm650_vm3, %v2213_v10, %v2217_v45  ;;  %v2114_v19 = vpack.c.bf16 %v2068_v57, %v2068_v57  ;;  %v2075_v10 = vld [vmem:[#allocation3 + $0xf0] sm:$0xff] }
 0x377   : > { %v1944_v42 = vadd.f32 %v1869_v54, %v10440_v11  ;;  %2637 = vrot.lane.b32.xlu0 %v2194_v47, %s8894_s15  ;;  %2609 = vrot.lane.b32.xlu1 %v10683_v3, %s8895_s24  ;;  %v2061_v11 = vld [vmem:[#allocation3 + $0x80] sm:$0xff]  ;;  %v2241_v54 = vrot.slane %v2239_v30, 1  ;;  %v2220_v48 = vshrl.u32 %v10742_v15, 16 }
 0x378   : > { %2034 = vst.msk [vmem:[#allocation3 + $0x111] sm:$0xff] %vm1956_vm14, %v1945_v5  ;;  %v10702_v32 = vpack.c.bf16 %v2061_v11, %v2060_v49  ;;  %v2222_v5 = vshll.u32 %v10742_v15, 16  ;;  %v2227_v41 = vshll.u32 %v2114_v19, 16  ;;  %v2077_v25 = vld [vmem:[#allocation3 + $0x100] sm:$0x3] }
 0x379   : > { %2033 = vst.msk [vmem:[#allocation3 + $0x109] sm:$0xff] %vm1956_vm14, %v1944_v42  ;;  %v2380_v42 = vrot.slane %v10742_v15, 1 }
 0x37a   : > { %v1875_v7 = vpop.permute.xlu1 %1874  ;;  %v2198_v22 = vshll.u32 %v10702_v32, 16  ;;  %v2374_v20 = vrot.slane %v10702_v32, 1  ;;  %v2196_v47 = vshrl.u32 %v10702_v32, 16  ;;  %v2224_v16 = vrot.slane %v2222_v5, 1 }
 0x37b   : > { %v1947_v9 = vadd.f32 %v1875_v7, %v10444_v59  ;;  %2541 = vrot.lane.b32.xlu0 %v2182_v23, %s8899_s29  ;;  %2515 = vrot.lane.b32.xlu1 %v10683_v3, %s8896_s27  ;;  %v2062_v59 = vld [vmem:[#allocation3 + $0x88] sm:$0x3]  ;;  %v2381_v7 = vrot.slane %v2114_v19, 1  ;;  %v2229_v49 = vrot.slane %v2227_v41, 1 }
 0x37c   : > { %v2110_v33 = vpack.c.bf16 %v2062_v59, %v2062_v59  ;;  %v2200_v35 = vrot.slane %v2198_v22, 1  ;;  %v2225_v11 = vor.u32 %v2224_v16, %v2220_v48  ;;  %v2076_v59 = vld [vmem:[#allocation3 + $0xf8] sm:$0xff]  ;;  %v2120_v22 = vpack.c.bf16 %v2077_v25, %v2077_v25  ;;  %v2074_v24 = vld [vmem:[#allocation3 + $0xe8] sm:$0x3] }
 0x37d   : > { %2036 = vst.msk [vmem:[#allocation3 + $0x129] sm:$0xff] %vm1956_vm14, %v1947_v9  ;;  %v10760_v9 = vsel %vm875_vm2, %v2380_v42, %v2381_v7  ;;  %v2118_v58 = vpack.c.bf16 %v2074_v24, %v2074_v24 }
 0x37e   : > { %v2375_v28 = vrot.slane %v2110_v33, 1  ;;  %v2203_v8 = vshll.u32 %v2110_v33, 16  ;;  %v2201_v17 = vor.u32 %v2200_v35, %v2196_v47  ;;  %v2230_v43 = vsel %vm650_vm3, %v2225_v11, %v2229_v49  ;;  %v2602_v29 = vpop.permute.xlu1 %2601  ;;  %v2073_v35 = vld [vmem:[#allocation3 + $0xe0] sm:$0xff] }
 0x37f   : > { %2447 = vrot.lane.b32.xlu0 %v2182_v23, %s8892_s20  ;;  %2579 = vrot.lane.b32.xlu1 %v10700_v21, %s8898_s12  ;;  %v2236_v23 = vrot.slane %v2234_v36, 1  ;;  %v10769_v33 = vpack.c.bf16 %v2076_v59, %v2075_v10  ;;  %v2263_v18 = vshll.u32 %v2120_v22, 16  ;;  %v2387_v19 = vrot.slane %v2118_v58, 1 }
 0x380   : > { %v10720_v52 = vsel %vm875_vm2, %v2374_v20, %v2375_v28  ;;  %v2205_v50 = vrot.slane %v2203_v8, 1  ;;  %v2390_v20 = vrot.slane %v2120_v22, 1  ;;  %v2251_v42 = vshll.u32 %v2118_v58, 16 }
 0x381   : > { %v2237_v2 = vor.u32 %v2236_v23, %v2232_v13  ;;  %v2258_v28 = vshll.u32 %v10769_v33, 16  ;;  %v2256_v38 = vshrl.u32 %v10769_v33, 16  ;;  %v2265_v57 = vrot.slane %v2263_v18, 1 }
 0x382   : > { %v2206_v4 = vsel %vm650_vm3, %v2201_v17, %v2205_v50  ;;  %v2508_v45 = vpop.permute.xlu1 %2507  ;;  %v2072_v17 = vld [vmem:[#allocation3 + $0xd8] sm:$0xff]  ;;  %v2253_v11 = vrot.slane %v2251_v42, 1 }
 0x383   : > { %2485 = vrot.lane.b32.xlu1 %v10700_v21, %s8893_s21  ;;  %2607 = vrot.lane.b32.xlu0 %v10702_v32, %s8895_s24  ;;  %v2242_v60 = vsel %vm650_vm3, %v2237_v2, %v2241_v54  ;;  %v2260_v27 = vrot.slane %v2258_v28, 1 }
 0x384   : > { %v2082_v59 = vld [vmem:[#allocation3 + $0x128] sm:$0xff]  ;;  %v2083_v25 = vld [vmem:[#allocation3 + $0x130] sm:$0x3] }
 0x385   : > { %v2261_v36 = vor.u32 %v2260_v27, %v2256_v38  ;;  %v2666_v38 = vsel %vm1956_vm14, %v10098_v31, %v10251_v44  ;;  %v2078_v31 = vld [vmem:[#allocation3 + $0x108] sm:$0xff]  ;;  %v2079_v44 = vld [vmem:[#allocation3 + $0x110] sm:$0xff] }
 0x387   : > { %2547 = vrot.lane.b32.xlu1 %v2218_v6, %s8899_s29  ;;  %2513 = vrot.lane.b32.xlu0 %v10702_v32, %s8896_s27  ;;  %v2266_v30 = vsel %vm650_vm3, %v2261_v36, %v2265_v57 }
 0x38b   : > { %2453 = vrot.lane.b32.xlu1 %v2218_v6, %s8892_s20  ;;  %2577 = vrot.lane.b32.xlu0 %v10720_v52, %s8898_s12 }
 0x38f   : > { %2483 = vrot.lane.b32.xlu0 %v10720_v52, %s8893_s21  ;;  %2639 = vrot.lane.b32.xlu1 %v2206_v4, %s8894_s15 }
 0x393   : > { %2641 = vrot.lane.b32.xlu0 %v2218_v6, %s8894_s15  ;;  %2613 = vrot.lane.b32.xlu1 %v10729_v55, %s8895_s24  ;;  %v2389_v6 = vrot.slane %v10769_v33, 1 }
 0x395   : > { %v10782_v50 = vsel %vm875_vm2, %v2389_v6, %v2390_v20  ;;  %v2081_v6 = vld [vmem:[#allocation3 + $0x120] sm:$0xff] }
 0x397   : > { %2545 = vrot.lane.b32.xlu0 %v2206_v4, %s8899_s29  ;;  %2519 = vrot.lane.b32.xlu1 %v10729_v55, %s8896_s27 }
 0x39b   : > { %2451 = vrot.lane.b32.xlu0 %v2206_v4, %s8892_s20  ;;  %2583 = vrot.lane.b32.xlu1 %v10740_v1, %s8898_s12  ;;  %v10784_v4 = vpack.c.bf16 %v2073_v35, %v2072_v17  ;;  %v10827_v35 = vpack.c.bf16 %v2082_v59, %v2081_v6  ;;  %v2124_v17 = vpack.c.bf16 %v2083_v25, %v2083_v25 }
 0x39d   : > { %v2246_v53 = vshll.u32 %v10784_v4, 16  ;;  %v2386_v2 = vrot.slane %v10784_v4, 1  ;;  %v2395_v36 = vrot.slane %v10827_v35, 1  ;;  %v2282_v57 = vshll.u32 %v10827_v35, 16 }
 0x39e   : > { %v2280_v42 = vshrl.u32 %v10827_v35, 16 }
 0x39f   : > { %2489 = vrot.lane.b32.xlu1 %v10740_v1, %s8893_s21  ;;  %2611 = vrot.lane.b32.xlu0 %v10742_v15, %s8895_s24  ;;  %v2248_v5 = vrot.slane %v2246_v53, 1  ;;  %v10810_v16 = vsel %vm875_vm2, %v2386_v2, %v2387_v19 }
 0x3a3   : > { %2551 = vrot.lane.b32.xlu1 %v2242_v60, %s8899_s29  ;;  %2517 = vrot.lane.b32.xlu0 %v10742_v15, %s8896_s27 }
 0x3a7   : > { %2457 = vrot.lane.b32.xlu1 %v2242_v60, %s8892_s20  ;;  %2581 = vrot.lane.b32.xlu0 %v10760_v9, %s8898_s12 }
 0x3ab   : > { %2487 = vrot.lane.b32.xlu0 %v10760_v9, %s8893_s21  ;;  %2643 = vrot.lane.b32.xlu1 %v2230_v43, %s8894_s15 }
 0x3af   : > { %2645 = vrot.lane.b32.xlu0 %v2242_v60, %s8894_s15  ;;  %2617 = vrot.lane.b32.xlu1 %v10769_v33, %s8895_s24  ;;  %v2244_v60 = vshrl.u32 %v10784_v4, 16 }
 0x3b1   : > { %v2249_v48 = vor.u32 %v2248_v5, %v2244_v60  ;;  %v10860_v5 = vpack.c.bf16 %v2079_v44, %v2078_v31  ;;  %v2284_v60 = vrot.slane %v2282_v57, 1 }
 0x3b3   : > { %2549 = vrot.lane.b32.xlu0 %v2230_v43, %s8899_s29  ;;  %2523 = vrot.lane.b32.xlu1 %v10769_v33, %s8896_s27  ;;  %v2285_v25 = vor.u32 %v2284_v60, %v2280_v42 }
 0x3b4   : > { %v10779_v47 = vpop.permute.xlu0 %2623 }
 0x3b5   : > { %v2506_v8 = vpop.permute.xlu1 %2505 }
 0x3b7   : > { %2455 = vrot.lane.b32.xlu0 %v2230_v43, %s8892_s20  ;;  %2587 = vrot.lane.b32.xlu1 %v10782_v50, %s8898_s12  ;;  %v2254_v43 = vsel %vm650_vm3, %v2249_v48, %v2253_v11 }
 0x3b8   : > { %v10789_v51 = vpop.permute.xlu0 %2529 }
 0x3b9   : > { %v10792_v61 = vpop.permute.xlu1 %2571 }
 0x3bb   : > { %2493 = vrot.lane.b32.xlu1 %v10782_v50, %s8893_s21  ;;  %2615 = vrot.lane.b32.xlu0 %v10784_v4, %s8895_s24 }
 0x3bc   : > { %v2570_v23 = vpop.permute.xlu0 %2569 }
 0x3bd   : > { %v10799_v13 = vpop.permute.xlu1 %2477  ;;  %v2863_v10 = vsel %vm2861_vm11, %v2570_v23, %v2602_v29  ;;  %v2748_v29 = vsel %vm2746_vm13, %v10249_v40, %v2506_v8  ;;  %v2396_v8 = vrot.slane %v2124_v17, 1 }
 0x3bf   : > { %2555 = vrot.lane.b32.xlu1 %v2266_v30, %s8899_s29  ;;  %2521 = vrot.lane.b32.xlu0 %v10784_v4, %s8896_s27  ;;  %v10858_v19 = vsel %vm875_vm2, %v2395_v36, %v2396_v8  ;;  %v2087_v36 = vld [vmem:[#allocation3 + $0x150] sm:$0xff] }
 0x3c0   : > { %v10806_v54 = vpop.permute.xlu0 %2475 }
 0x3c1   : > { %v2540_v7 = vpop.permute.xlu1 %2539  ;;  %v2750_v27 = vsel %vm2746_vm13, %v10806_v54, %v2508_v45 }
 0x3c2   : > { %v2783_v58 = vsel %vm2779_vm15, %v2750_v27, %v2540_v7  ;;  %v2287_v7 = vshll.u32 %v2124_v17, 16  ;;  %v2392_v27 = vrot.slane %v10860_v5, 1 }
 0x3c3   : > { %2461 = vrot.lane.b32.xlu1 %v2266_v30, %s8892_s20  ;;  %2585 = vrot.lane.b32.xlu0 %v10810_v16, %s8898_s12 }
 0x3c4   : > { %v10815_v41 = vpop.permute.xlu0 %2593  ;;  %v2289_v6 = vrot.slane %v2287_v7, 1 }
 0x3c5   : > { %v10817_v49 = vpop.permute.xlu1 %2445 }
 0x3c6   : > { %v2290_v17 = vsel %vm650_vm3, %v2285_v25, %v2289_v6 }
 0x3c7   : > { %2491 = vrot.lane.b32.xlu0 %v10810_v16, %s8893_s21  ;;  %2647 = vrot.lane.b32.xlu1 %v2254_v43, %s8894_s15 }
 0x3c8   : > { %v2634_v22 = vpop.permute.xlu0 %2633 }
 0x3c9   : > { %v2896_v20 = vsel %vm2894_vm12, %v2863_v10, %v2634_v22  ;;  %v10825_v28 = vpop.permute.xlu1 %2605  ;;  %v2270_v22 = vshll.u32 %v10860_v5, 16 }
 0x3ca   : > { %3408 = vmatmul.mubr.bf16.vlgmr.msra.gmra.mrb[24].mxu0 %v2896_v20 }
 0x3cb   : > { %2649 = vrot.lane.b32.xlu0 %v2266_v30, %s8894_s15  ;;  %2621 = vrot.lane.b32.xlu1 %v10827_v35, %s8895_s24 }
 0x3cc   : > { %8154 = vmatprep.mubr.msk.bf16.mxu0 %vm1956_vm14, %v10667_v37  ;;  %v2538_v24 = vpop.permute.xlu0 %2537  ;;  %v2699_v37 = vsel %vm2697_vm1, %v2666_v38, %v10249_v40  ;;  %v2080_v40 = vld [vmem:[#allocation3 + $0x118] sm:$0x3] }
 0x3cd   : > { %v2781_v45 = vsel %vm2779_vm15, %v2748_v29, %v2538_v24  ;;  %v10842_v18 = vpop.permute.xlu1 %2511  ;;  %v2122_v10 = vpack.c.bf16 %v2080_v40, %v2080_v40  ;;  %v2272_v24 = vrot.slane %v2270_v22, 1  ;;  %v2088_v38 = vld [vmem:[#allocation3 + $0x158] sm:$0xff] }
 0x3ce   : > { %v2814_v53 = vsel %vm2812_vm5, %v2781_v45, %v2570_v23  ;;  %v2817_v23 = vsel %vm2812_vm5, %v2783_v58, %v10792_v61  ;;  %v2268_v45 = vshrl.u32 %v10860_v5, 16  ;;  %v10887_v8 = vpack.c.bf16 %v2088_v38, %v2087_v36 }
 0x3cf   : > { %2553 = vrot.lane.b32.xlu0 %v2254_v43, %s8899_s29  ;;  %2527 = vrot.lane.b32.xlu1 %v10827_v35, %s8896_s27  ;;  %v2393_v29 = vrot.slane %v2122_v10, 1 }
 0x3d0   : > { %3246 = vmatprep.mubr.bf16.mxu1 %v2814_v53  ;;  %v2444_v30 = vpop.permute.xlu0 %2443  ;;  %v2273_v31 = vor.u32 %v2272_v24, %v2268_v45  ;;  %v2306_v60 = vshll.u32 %v10887_v8, 16  ;;  %v2090_v24 = vld [vmem:[#allocation3 + $0x168] sm:$0xff] }
 0x3d1   : > { %3247 = vmatmul.mubr.bf16.vlgmr.msra.gmra.mrb[8].mxu1 %v2699_v37  ;;  %v10853_v2 = vpop.permute.xlu1 %2655  ;;  %v2668_v48 = vsel %vm1956_vm14, %v10533_v62, %v2444_v30  ;;  %v10890_v57 = vsel %vm875_vm2, %v2392_v27, %v2393_v29  ;;  %v2089_v37 = vld [vmem:[#allocation3 + $0x160] sm:$0x3]  ;;  %v2091_v27 = vld [vmem:[#allocation3 + $0x170] sm:$0xff] }
 0x3d2   : > { %3254 = vmatprep.mubr.bf16.mxu1 %v2817_v23  ;;  %v2128_v42 = vpack.c.bf16 %v2089_v37, %v2089_v37  ;;  %v10913_v38 = vpack.c.bf16 %v2091_v27, %v2090_v24 }
 0x3d3   : > { %2459 = vrot.lane.b32.xlu0 %v2254_v43, %s8892_s20  ;;  %2591 = vrot.lane.b32.xlu1 %v10858_v19, %s8898_s12  ;;  %v2702_v43 = vsel %vm2697_vm1, %v2668_v48, %v10806_v54  ;;  %v2275_v54 = vshll.u32 %v2122_v10, 16  ;;  %v2308_v10 = vrot.slane %v2306_v60, 1  ;;  %v2092_v60 = vld [vmem:[#allocation3 + $0x178] sm:$0x3] }
 0x3d4   : > { %v2311_v6 = vshll.u32 %v2128_v42, 16  ;;  %v2402_v37 = vrot.slane %v2128_v42, 1 }
 0x3d5   : > { %v10868_v11 = vpop.permute.xlu1 %2575  ;;  %v2604_v59 = vpop.permute.xlu0 %2603  ;;  %v2277_v44 = vrot.slane %v2275_v54, 1  ;;  %v2401_v54 = vrot.slane %v10887_v8, 1 }
 0x3d6   : > { %v2865_v7 = vsel %vm2861_vm11, %v10792_v61, %v2604_v59  ;;  %v2313_v45 = vrot.slane %v2311_v6, 1 }
 0x3d7   : > { %2497 = vrot.lane.b32.xlu1 %v10858_v19, %s8893_s21  ;;  %2619 = vrot.lane.b32.xlu0 %v10860_v5, %s8895_s24  ;;  %v2278_v40 = vsel %vm650_vm3, %v2273_v31, %v2277_v44 }
 0x3d9   : > { %3255 = vmatmul.mubr.bf16.gmra.mrb[12].mxu1 %v2702_v43  ;;  %v10877_v20 = vpop.permute.xlu1 %2481  ;;  %v2510_v62 = vpop.permute.xlu0 %2509  ;;  %v2304_v43 = vshrl.u32 %v10887_v8, 16 }
 0x3da   : > { %v2752_v36 = vsel %vm2746_vm13, %v10799_v13, %v2510_v62  ;;  %v10941_v62 = vpack.c.bf16 %v2092_v60, %v2092_v60 }
 0x3db   : > { %2559 = vrot.lane.b32.xlu1 %v2290_v17, %s8899_s29  ;;  %2525 = vrot.lane.b32.xlu0 %v10860_v5, %s8896_s27  ;;  %v2309_v59 = vor.u32 %v2308_v10, %v2304_v43 }
 0x3dd   : > { %v2544_v58 = vpop.permute.xlu1 %2543  ;;  %v10885_v53 = vpop.permute.xlu0 %2561 }
 0x3df   : > { %2465 = vrot.lane.b32.xlu1 %v2290_v17, %s8892_s20  ;;  %2589 = vrot.lane.b32.xlu0 %v10890_v57, %s8898_s12 }
 0x3e1   : > { %v10895_v30 = vpop.permute.xlu1 %2449  ;;  %v2574_v23 = vpop.permute.xlu0 %2573 }
 0x3e3   : > { %2495 = vrot.lane.b32.xlu0 %v10890_v57, %s8893_s21  ;;  %2651 = vrot.lane.b32.xlu1 %v2278_v40, %s8894_s15 }
 0x3e5   : > { %v2636_v48 = vpop.permute.xlu1 %2635  ;;  %v2480_v25 = vpop.permute.xlu0 %2479 }
 0x3e6   : > { %v2899_v22 = vsel %vm2894_vm12, %v2865_v7, %v2636_v48  ;;  %v2867_v7 = vsel %vm2861_vm11, %v2574_v23, %v10825_v28 }
 0x3e7   : > { %2653 = vrot.lane.b32.xlu0 %v2290_v17, %s8894_s15  ;;  %2625 = vrot.lane.b32.xlu1 %v10887_v8, %s8895_s24  ;;  %v2754_v17 = vsel %vm2746_vm13, %v2480_v25, %v10842_v18  ;;  %v2314_v18 = vsel %vm650_vm3, %v2309_v59, %v2313_v45 }
 0x3e8   : > { %3416 = vmatmul.mubr.bf16.gmra.mrb[28].mxu0 %v2899_v22  ;;  %v2787_v10 = vsel %vm2779_vm15, %v2754_v17, %v2544_v58  ;;  %v2318_v22 = vshll.u32 %v10913_v38, 16  ;;  %v2094_v17 = vld [vmem:[#allocation3 + $0x188] sm:$0xff] }
 0x3e9   : > { %8155 = vmatprep.mubr.msk.bf16.mxu0 %vm1956_vm14, %v10636_v39  ;;  %v10911_v29 = vpop.permute.xlu1 %2609  ;;  %v2638_v61 = vpop.permute.xlu0 %2637  ;;  %v2670_v39 = vsel %vm1956_vm14, %v10264_v63, %v10817_v49  ;;  %v2823_v43 = vsel %vm2812_vm5, %v2787_v10, %v10868_v11 }
 0x3ea   : > { %v2902_v63 = vsel %vm2894_vm12, %v2867_v7, %v2638_v61  ;;  %v2705_v28 = vsel %vm2697_vm1, %v2670_v39, %v10799_v13  ;;  %v2320_v6 = vrot.slane %v2318_v22, 1  ;;  %v2316_v13 = vshrl.u32 %v10913_v38, 16  ;;  %v2096_v7 = vld [vmem:[#allocation3 + $0x198] sm:$0xff] }
 0x3eb   : > { %2557 = vrot.lane.b32.xlu0 %v2278_v40, %s8899_s29  ;;  %2531 = vrot.lane.b32.xlu1 %v10887_v8, %s8896_s27 }
 0x3ec   : > { %v2321_v24 = vor.u32 %v2320_v6, %v2316_v13  ;;  %v2405_v13 = vrot.slane %v10941_v62, 1 }
 0x3ed   : > { %v10926_v31 = vpop.permute.xlu1 %2515  ;;  %v2542_v44 = vpop.permute.xlu0 %2541 }
 0x3ee   : > { %v2785_v48 = vsel %vm2779_vm15, %v2752_v36, %v2542_v44  ;;  %v2093_v44 = vld [vmem:[#allocation3 + $0x180] sm:$0xff] }
 0x3ef   : > { %2499 = vrot.lane.b32.xlu0 %v10590_v56, %s8893_s21  ;;  %2563 = vrot.lane.b32.xlu1 %v2314_v18, %s8899_s29  ;;  %v2820_v49 = vsel %vm2812_vm5, %v2785_v48, %v2574_v23  ;;  %v10950_v23 = vsel %vm875_vm2, %v2401_v54, %v2402_v37  ;;  %v2097_v48 = vld [vmem:[#allocation3 + $0x1a0] sm:$0xff] }
 0x3f0   : > { %3424 = vmatmul.mubr.bf16.gmra.mrb[32].mxu0 %v2902_v63  ;;  %3262 = vmatprep.mubr.bf16.mxu1 %v2820_v49  ;;  %v10980_v63 = vpack.c.bf16 %v2097_v48, %v2096_v7  ;;  %v2674_v48 = vsel %vm1956_vm14, %v10602_v34, %v10895_v30 }
 0x3f1   : > { %8156 = vmatprep.mubr.msk.bf16.mxu0 %vm1956_vm14, %v10720_v52  ;;  %v10945_v58 = vpop.permute.xlu1 %2579  ;;  %3263 = vmatmul.mubr.bf16.gmra.mrb[16].mxu1 %v2705_v28  ;;  %v2448_v42 = vpop.permute.xlu0 %2447  ;;  %v2323_v52 = vshll.u32 %v10941_v62, 16 }
 0x3f2   : > { %3270 = vmatprep.mubr.bf16.mxu1 %v2823_v43  ;;  %v2672_v27 = vsel %vm1956_vm14, %v10632_v26, %v2448_v42  ;;  %v10968_v26 = vpack.c.bf16 %v2094_v17, %v2093_v44  ;;  %v2098_v42 = vld [vmem:[#allocation3 + $0x1a8] sm:$0x3] }
 0x3f3   : > { %2657 = vrot.lane.b32.xlu0 %v2314_v18, %s8894_s15  ;;  %2595 = vrot.lane.b32.xlu1 %v10950_v23, %s8898_s12  ;;  %v2708_v45 = vsel %vm2697_vm1, %v2672_v27, %v2480_v25  ;;  %v2325_v54 = vrot.slane %v2323_v52, 1  ;;  %v2095_v25 = vld [vmem:[#allocation3 + $0x190] sm:$0x3]  ;;  %v10992_v27 = vpack.c.bf16 %v2098_v42, %v2098_v42 }
 0x3f4   : > { %v2410_v10 = vshll.u32 %v10968_v26, 16  ;;  %v2132_v22 = vpack.c.bf16 %v2095_v25, %v2095_v25  ;;  %v2408_v52 = vshrl.u32 %v10968_v26, 16  ;;  %v2425_v25 = vshrl.u32 %v10980_v63, 16 }
 0x3f5   : > { %v10959_v61 = vpop.permute.xlu1 %2485  ;;  %v2608_v59 = vpop.permute.xlu0 %2607  ;;  %v10966_v37 = vsel %vm650_vm3, %v2321_v24, %v2325_v54  ;;  %v2432_v7 = vshll.u32 %v10992_v27, 16 }
 0x3f6   : > { %v2412_v6 = vrot.slane %v2410_v10, 1  ;;  %v2422_v42 = vrot.slane %v2132_v22, 1 }
 0x3f7   : > { %2463 = vrot.lane.b32.xlu0 %v2278_v40, %s8892_s20  ;;  %2501 = vrot.lane.b32.xlu1 %v10950_v23, %s8893_s21 }
 0x3f9   : > { %v2548_v39 = vpop.permute.xlu1 %2547  ;;  %3271 = vmatmul.mubr.bf16.gmra.mrb[20].mxu1 %v2708_v45  ;;  %v2514_v36 = vpop.permute.xlu0 %2513  ;;  %v2413_v45 = vor.u32 %v2412_v6, %v2408_v52 }
 0x3fb   : > { %2467 = vrot.lane.b32.xlu0 %v10624_v46, %s8892_s20  ;;  %2659 = vrot.lane.b32.xlu1 %v10966_v37, %s8894_s15  ;;  %v2869_v46 = vsel %vm2861_vm11, %v10868_v11, %v2608_v59  ;;  %v2415_v11 = vshll.u32 %v2132_v22, 16  ;;  %v2427_v59 = vshll.u32 %v10980_v63, 16 }
 0x3fd   : > { %v10974_v40 = vpop.permute.xlu1 %2453  ;;  %v2578_v60 = vpop.permute.xlu0 %2577  ;;  %v2417_v44 = vrot.slane %v2415_v11, 1 }
 0x3ff   : > { %2627 = vrot.lane.b32.xlu0 %v10913_v38, %s8895_s24  ;;  %2469 = vrot.lane.b32.xlu1 %v2314_v18, %s8892_s20  ;;  %v2404_v18 = vrot.slane %v10913_v38, 1 }
 0x401   : > { %v2640_v49 = vpop.permute.xlu1 %2639  ;;  %v2484_v28 = vpop.permute.xlu0 %2483  ;;  %v11006_v62 = vsel %vm875_vm2, %v2404_v18, %v2405_v13  ;;  %v2418_v18 = vsel %vm650_vm3, %v2413_v45, %v2417_v44 }
 0x402   : > { %v2905_v43 = vsel %vm2894_vm12, %v2869_v46, %v2640_v49  ;;  %v2758_v54 = vsel %vm2746_vm13, %v2484_v28, %v10926_v31  ;;  %v2756_v31 = vsel %vm2746_vm13, %v10877_v20, %v2514_v36  ;;  %v2421_v49 = vrot.slane %v10968_v26, 1 }
 0x403   : > { %2533 = vrot.lane.b32.xlu0 %v10913_v38, %s8896_s27  ;;  %2629 = vrot.lane.b32.xlu1 %v10968_v26, %s8895_s24  ;;  %v2791_v13 = vsel %vm2779_vm15, %v2758_v54, %v2548_v39 }
 0x404   : > { %3432 = vmatmul.mubr.bf16.gmra.mrb[36].mxu0 %v2905_v43  ;;  %v2871_v43 = vsel %vm2861_vm11, %v2578_v60, %v10911_v29  ;;  %v2711_v29 = vsel %vm2697_vm1, %v2674_v48, %v10877_v20  ;;  %v2829_v52 = vsel %vm2812_vm5, %v2791_v13, %v10945_v58 }
 0x405   : > { %8157 = vmatprep.mubr.msk.bf16.mxu0 %vm1956_vm14, %v10700_v21  ;;  %v10997_v24 = vpop.permute.xlu1 %2613  ;;  %v2642_v17 = vpop.permute.xlu0 %2641  ;;  %v2429_v21 = vrot.slane %v2427_v59, 1 }
 0x406   : > { %v2908_v34 = vsel %vm2894_vm12, %v2871_v43, %v2642_v17 }
 0x407   : > { %2535 = vrot.lane.b32.xlu1 %v10968_v26, %s8896_s27  ;;  %2565 = vrot.lane.b32.xlu0 %v10966_v37, %s8899_s29  ;;  %v2430_v36 = vor.u32 %v2429_v21, %v2425_v25  ;;  %v2434_v26 = vrot.slane %v2432_v7, 1 }
 0x409   : > { %v2520_v10 = vpop.permute.xlu1 %2519  ;;  %v2546_v46 = vpop.permute.xlu0 %2545  ;;  %v2435_v20 = vsel %vm650_vm3, %v2430_v36, %v2434_v26  ;;  %v3623_v36 = vld [vmem:[#allocation4] sm:$0xff]  ;;  %v3624_v26 = vld [vmem:[#allocation4 + $0x8] sm:$0xff] }
 0x40a   : > { %v2789_v6 = vsel %vm2779_vm15, %v2756_v31, %v2546_v46  ;;  %v2678_v46 = vsel %vm1956_vm14, %v10683_v3, %v10974_v40 }
 0x40b   : > { %2567 = vrot.lane.b32.xlu1 %v2418_v18, %s8899_s29  ;;  %2597 = vrot.lane.b32.xlu0 %v11006_v62, %s8898_s12  ;;  %v2826_v30 = vsel %vm2812_vm5, %v2789_v6, %v2578_v60  ;;  %v11035_v60 = vsel %vm875_vm2, %v2421_v49, %v2422_v42  ;;  %v2717_v3 = vsel %vm2697_vm1, %v2678_v46, %v10959_v61 }
 0x40c   : > { %3440 = vmatmul.mubr.bf16.gmra.mrb[40].mxu0 %v2908_v34  ;;  %3278 = vmatprep.mubr.bf16.mxu1 %v2826_v30 }
 0x40d   : > { %8158 = vmatprep.mubr.msk.bf16.mxu0 %vm1956_vm14, %v10760_v9  ;;  %v11030_v39 = vpop.permute.xlu1 %2583  ;;  %3279 = vmatmul.mubr.bf16.gmra.mrb[24].mxu1 %v2711_v29  ;;  %v2452_v22 = vpop.permute.xlu0 %2451 }
 0x40e   : > { %3286 = vmatprep.mubr.bf16.mxu1 %v2829_v52  ;;  %v2676_v9 = vsel %vm1956_vm14, %v10702_v32, %v2452_v22  ;;  %v3625_v22 = vld [vmem:[#allocation4 + $0x10] sm:$0x3] }
 0x40f   : > { %2599 = vrot.lane.b32.xlu1 %v11035_v60, %s8898_s12  ;;  %2503 = vrot.lane.b32.xlu0 %v11006_v62, %s8893_s21  ;;  %v2714_v17 = vsel %vm2697_vm1, %v2676_v9, %v2484_v28  ;;  %v3678_v52 = vpack.c.bf16 %v3625_v22, %v3625_v22 }
 0x411   : > { %v11044_v11 = vpop.permute.xlu1 %2489  ;;  %v2612_v59 = vpop.permute.xlu0 %2611 }
 0x412   : > { %v2873_v32 = vsel %vm2861_vm11, %v10945_v58, %v2612_v59 }
 0x413   : > { %2661 = vrot.lane.b32.xlu0 %v2418_v18, %s8894_s15  ;;  %2663 = vrot.lane.b32.xlu1 %v2435_v20, %s8894_s15 }
 0x415   : > { %v2552_v45 = vpop.permute.xlu1 %2551  ;;  %3287 = vmatmul.mubr.bf16.gmra.mrb[28].mxu1 %v2714_v17  ;;  %v2518_v54 = vpop.permute.xlu0 %2517 }
 0x416   : > { %v2760_v49 = vsel %vm2746_vm13, %v10959_v61, %v2518_v54  ;;  %v3721_v54 = vshll.u32 %v3678_v52, 16 }
 0x417   : > { %2471 = vrot.lane.b32.xlu0 %v10966_v37, %s8892_s20 }
 0x419   : > { %v11051_v44 = vpop.permute.xlu1 %2457  ;;  %v2582_v25 = vpop.permute.xlu0 %2581 }
 0x41a   : > { %v2875_v58 = vsel %vm2861_vm11, %v2582_v25, %v10997_v24 }
 0x41b   : > { %2631 = vrot.lane.b32.xlu0 %v10980_v63, %s8895_s24 }
 0x41d   : > { %v2644_v21 = vpop.permute.xlu1 %2643  ;;  %v2488_v7 = vpop.permute.xlu0 %2487 }
 0x41e   : > { %v2911_v48 = vsel %vm2894_vm12, %v2873_v32, %v2644_v21  ;;  %v2762_v37 = vsel %vm2746_vm13, %v2488_v7, %v2520_v10  ;;  %v3723_v21 = vrot.slane %v3721_v54, 1 }
 0x41f   : > { %3448 = vmatmul.mubr.bf16.gmra.mrb[44].mxu0 %v2911_v48  ;;  %v2795_v18 = vsel %vm2779_vm15, %v2762_v37, %v2552_v45 }
 0x420   : > { %8159 = vmatprep.mubr.msk.bf16.mxu0 %vm1956_vm14, %v10740_v1  ;;  %v2835_v13 = vsel %vm2812_vm5, %v2795_v18, %v11030_v39 }
 0x421   : > { %v2618_v28 = vpop.permute.xlu1 %2617  ;;  %v2646_v31 = vpop.permute.xlu0 %2645 }
 0x422   : > { %v2914_v1 = vsel %vm2894_vm12, %v2875_v58, %v2646_v31 }
 0x425   : > { %v2524_v42 = vpop.permute.xlu1 %2523  ;;  %v2550_v43 = vpop.permute.xlu0 %2549 }
 0x426   : > { %v2793_v6 = vsel %vm2779_vm15, %v2760_v49, %v2550_v43 }
 0x427   : > { %3456 = vmatmul.mubr.bf16.gmra.mrb[48].mxu0 %v2914_v1  ;;  %v2832_v10 = vsel %vm2812_vm5, %v2793_v6, %v2582_v25  ;;  %v3938_v25 = vrot.slane %v3678_v52, 1 }
 0x428   : > { %3294 = vmatprep.mubr.bf16.mxu1 %v2832_v10  ;;  %8160 = vmatprep.mubr.msk.bf16.mxu0 %vm1956_vm14, %v10810_v16  ;;  %v11084_v16 = vpack.c.bf16 %v3624_v26, %v3623_v36  ;;  %v2682_v10 = vsel %vm1956_vm14, %v10729_v55, %v11051_v44 }
 0x429   : > { %v11076_v40 = vpop.permute.xlu1 %2587  ;;  %3295 = vmatmul.mubr.bf16.gmra.mrb[32].mxu1 %v2717_v3  ;;  %v2456_v24 = vpop.permute.xlu0 %2455  ;;  %v2723_v55 = vsel %vm2697_vm1, %v2682_v10, %v11044_v11 }
 0x42a   : > { %3302 = vmatprep.mubr.bf16.mxu1 %v2835_v13  ;;  %v2680_v34 = vsel %vm1956_vm14, %v10742_v15, %v2456_v24  ;;  %v3714_v20 = vshrl.u32 %v11084_v16, 16  ;;  %v3716_v9 = vshll.u32 %v11084_v16, 16  ;;  %v3937_v59 = vrot.slane %v11084_v16, 1 }
 0x42b   : > { %v2720_v61 = vsel %vm2697_vm1, %v2680_v34, %v2488_v7 }
 0x42c   : > { %v3718_v45 = vrot.slane %v3716_v9, 1  ;;  %v3939_v48 = vsel %vm875_vm2, %v3937_v59, %v3938_v25  ;;  %v8689_v9 = vld [vmem:[%s13429_s5] sm:$0xff]  }
 0x42d   : > { %v11082_v30 = vpop.permute.xlu1 %2493  ;;  %v2616_v29 = vpop.permute.xlu0 %2615  ;;  %4051 = vrot.lane.b32.xlu0 %v3939_v48, %s8893_s21  ;;  %v8691_v48 = vld [vmem:[%s13429_s5 + $0x48] sm:$0xff]  }
 0x42e   : > { %v3719_v32 = vor.u32 %v3718_v45, %v3714_v20  ;;  %v2877_v46 = vsel %vm2861_vm11, %v11030_v39, %v2616_v29 }
 0x430   : > { %v3724_v37 = vsel %vm650_vm3, %v3719_v32, %v3723_v21 }
 0x431   : > { %v2556_v17 = vpop.permute.xlu1 %2555  ;;  %3303 = vmatmul.mubr.bf16.gmra.mrb[36].mxu1 %v2720_v61  ;;  %v2522_v15 = vpop.permute.xlu0 %2521  ;;  %4019 = vrot.lane.b32.xlu1 %v3724_v37, %s8892_s20  ;;  %v8693_v37 = vld [vmem:[%s13429_s5 + $0x88] sm:$0xff]  }
 0x432   : > { %v2764_v3 = vsel %vm2746_vm13, %v11044_v11, %v2522_v15  ;;  %v8688_v11 = vld [vmem:[%s13429_s5 + $0x40] sm:$0xff]  }
 0x433   : > { %8408 = vmatprep.subr.bf16.mxu1 %v8688_v11 }
 0x434   : > { %8409 = vmatpush3.bf16.msra.mxu1 %v8689_v9 }
 0x435   : > { %v2462_v31 = vpop.permute.xlu1 %2461  ;;  %v2586_v7 = vpop.permute.xlu0 %2585  ;;  %8410 = vmatprep.subr.bf16.mxu1 %v8691_v48 }
 0x436   : > { %v2879_v39 = vsel %vm2861_vm11, %v2586_v7, %v2618_v28 }
 0x439   : > { %v2648_v49 = vpop.permute.xlu1 %2647  ;;  %v2492_v58 = vpop.permute.xlu0 %2491 }
 0x43a   : > { %v2917_v43 = vsel %vm2894_vm12, %v2877_v46, %v2648_v49  ;;  %v2766_v18 = vsel %vm2746_vm13, %v2492_v58, %v2524_v42 }
 0x43b   : > { %3464 = vmatmul.mubr.bf16.gmra.mrb[52].mxu0 %v2917_v43 }
 0x43c   : > { %8161 = vmatprep.mubr.msk.bf16.mxu0 %vm1956_vm14, %v10782_v50  ;;  %v2799_v50 = vsel %vm2779_vm15, %v2766_v18, %v2556_v17 }
 0x43d   : > { %v2622_v6 = vpop.permute.xlu1 %2621  ;;  %v2650_v1 = vpop.permute.xlu0 %2649  ;;  %v2841_v36 = vsel %vm2812_vm5, %v2799_v50, %v11076_v40 }
 0x43e   : > { %v2920_v29 = vsel %vm2894_vm12, %v2879_v39, %v2650_v1 }
 0x441   : > { %v2528_v24 = vpop.permute.xlu1 %2527  ;;  %v2554_v13 = vpop.permute.xlu0 %2553 }
 0x442   : > { %v2797_v34 = vsel %vm2779_vm15, %v2764_v3, %v2554_v13 }
 0x443   : > { %3472 = vmatmul.mubr.bf16.gmra.mrb[56].mxu0 %v2920_v29  ;;  %v2838_v42 = vsel %vm2812_vm5, %v2797_v34, %v2586_v7  ;;  %v8692_v7 = vld [vmem:[%s13429_s5 + $0x8] sm:$0xff]  }
 0x444   : > { %3310 = vmatprep.mubr.bf16.mxu1 %v2838_v42  ;;  %8162 = vmatprep.mubr.msk.bf16.mxu0 %vm1956_vm14, %v10890_v57 }
 0x445   : > { %v2592_v44 = vpop.permute.xlu1 %2591  ;;  %3311 = vmatmul.mubr.bf16.gmra.mrb[40].mxu1 %v2723_v55  ;;  %v2460_v28 = vpop.permute.xlu0 %2459 }
 0x446   : > { %3318 = vmatprep.mubr.bf16.mxu1 %v2841_v36  ;;  %v2684_v26 = vsel %vm1956_vm14, %v10784_v4, %v2460_v28  ;;  %v8690_v4 = vld [vmem:[%s13429_s5 + $0x80] sm:$0xff]   ;;  %8411 = vmatpush3.bf16.msra.mxu1 %v8692_v7 }
 0x447   : > { %v2726_v52 = vsel %vm2697_vm1, %v2684_v26, %v2492_v58  ;;  %4948 = vmatpush1.bf16.msra.mxu0 %v8690_v4  ;;  %v8697_v26 = vld [vmem:[%s13429_s5 + $0x98] sm:$0xff]  }
 0x448   : > { %4949 = vmatprep.subr.bf16.mxu0 %v8897_v14 }
 0x449   : > { %v11118_v61 = vpop.permute.xlu1 %2497  ;;  %v2620_v22 = vpop.permute.xlu0 %2619 }
 0x44a   : > { %v2881_v15 = vsel %vm2861_vm11, %v11076_v40, %v2620_v22  ;;  %v2772_v29 = vsel %vm2746_vm13, %v11118_v61, %v10789_v51  ;;  %v8694_v51 = vld [vmem:[%s13429_s5 + $0x90] sm:$0xff]  }
 0x44b   : > { %4950 = vmatpush1.bf16.msra.mxu0 %v8693_v37  ;;  %v2805_v42 = vsel %vm2779_vm15, %v2772_v29, %v10885_v53 }
 0x44c   : > { %4951 = vmatprep.subr.bf16.mxu0 %v8897_v14  ;;  %v2850_v53 = vsel %vm2812_vm5, %v2805_v42, %v10815_v41 }
 0x44d   : > { %v2560_v20 = vpop.permute.xlu1 %2559  ;;  %3319 = vmatmul.mubr.bf16.gmra.mrb[44].mxu1 %v2726_v52  ;;  %v2526_v57 = vpop.permute.xlu0 %2525 }
 0x44e   : > { %v2768_v46 = vsel %vm2746_vm13, %v11082_v30, %v2526_v57 }
 0x44f   : > { %4952 = vmatpush1.bf16.msra.mxu0 %v8694_v51 }
 0x450   : > { %4953 = vmatprep.subr.bf16.mxu0 %v8897_v14 }
 0x451   : > { %v11130_v59 = vpop.permute.xlu1 %2465  ;;  %v2590_v17 = vpop.permute.xlu0 %2589 }
 0x452   : > { %v2883_v49 = vsel %vm2861_vm11, %v2590_v17, %v2622_v6  ;;  %v2690_v22 = vsel %vm1956_vm14, %v10827_v35, %v11130_v59 }
 0x453   : > { %4954 = vmatpush1.bf16.msra.mxu0 %v8697_v26  ;;  %v2735_v11 = vsel %vm2697_vm1, %v2690_v22, %v11118_v61  ;;  %v8709_v26 = vld [vmem:[%s13429_s5 + $0x30] sm:$0xff]  }
 0x454   : > { %4955 = vmatprep.subr.bf16.mxu0 %v8897_v14 }
 0x455   : > { %v2652_v45 = vpop.permute.xlu1 %2651  ;;  %v2496_v54 = vpop.permute.xlu0 %2495 }
 0x456   : > { %v2923_v25 = vsel %vm2894_vm12, %v2881_v15, %v2652_v45  ;;  %v2770_v40 = vsel %vm2746_vm13, %v2496_v54, %v2528_v24  ;;  %v2885_v24 = vsel %vm2861_vm11, %v2592_v44, %v10779_v47  ;;  %v8699_v15 = vld [vmem:[%s13429_s5 + $0x18] sm:$0xff]  }
 0x457   : > { %3480 = vmatmul.mubr.bf16.gmra.mrb[60].mxu0 %v2923_v25  ;;  %v2803_v10 = vsel %vm2779_vm15, %v2770_v40, %v2560_v20 }
 0x458   : > { %8163 = vmatprep.mubr.msk.bf16.mxu0 %vm1956_vm14, %v10858_v19  ;;  %v2686_v19 = vsel %vm1956_vm14, %v10769_v33, %v2462_v31  ;;  %v2847_v39 = vsel %vm2812_vm5, %v2803_v10, %v2592_v44 }
 0x459   : > { %v2626_v32 = vpop.permute.xlu1 %2625  ;;  %v2654_v21 = vpop.permute.xlu0 %2653  ;;  %v2729_v33 = vsel %vm2697_vm1, %v2686_v19, %v11082_v30  ;;  %v2438_v19 = vrot.slane %v10980_v63, 1 }
 0x45a   : > { %v2926_v18 = vsel %vm2894_vm12, %v2883_v49, %v2654_v21 }
 0x45d   : > { %v2532_v58 = vpop.permute.xlu1 %2531  ;;  %v2558_v43 = vpop.permute.xlu0 %2557 }
 0x45e   : > { %v2801_v1 = vsel %vm2779_vm15, %v2768_v46, %v2558_v43  ;;  %v2439_v46 = vrot.slane %v10992_v27, 1  ;;  %v8701_v27 = vld [vmem:[%s13429_s5 + $0x60] sm:$0xff]  }
 0x45f   : > { %3488 = vmatmul.mubr.bf16.gmra.mrb[64].mxu0 %v2926_v18  ;;  %v2844_v3 = vsel %vm2812_vm5, %v2801_v1, %v2590_v17  ;;  %v8698_v17 = vld [vmem:[%s13429_s5 + $0x58] sm:$0xff]  }
 0x460   : > { %3326 = vmatprep.mubr.bf16.mxu1 %v2844_v3  ;;  %8164 = vmatprep.mubr.msk.bf16.mxu0 %vm1956_vm14, %v10590_v56  ;;  %v2929_v56 = vsel %vm2894_vm12, %v2885_v24, %v10853_v2  ;;  %v8695_v2 = vld [vmem:[%s13429_s5 + $0x50] sm:$0xff]   ;;  %v2440_v3 = vsel %vm875_vm2, %v2438_v19, %v2439_v46 }
 0x461   : > { %v2564_v31 = vpop.permute.xlu1 %2563  ;;  %3327 = vmatmul.mubr.bf16.gmra.mrb[48].mxu1 %v2729_v33  ;;  %v2500_v6 = vpop.permute.xlu0 %2499  ;;  %8412 = vmatprep.subr.bf16.mxu1 %v8695_v2  ;;  %v8702_v33 = vld [vmem:[%s13429_s5 + $0x20] sm:$0xff]  }
 0x462   : > { %3334 = vmatprep.mubr.bf16.mxu1 %v2847_v39 }
 0x465   : > { %v2596_v13 = vpop.permute.xlu1 %2595  ;;  %v2658_v34 = vpop.permute.xlu0 %2657 }
 0x467   : > { %3496 = vmatmul.mubr.bf16.gmra.mrb[68].mxu0 %v2929_v56 }
 0x468   : > { %8165 = vmatprep.mubr.msk.bf16.mxu0 %vm1956_vm14, %v10950_v23  ;;  %v8696_v23 = vld [vmem:[%s13429_s5 + $0x10] sm:$0xff]  }
 0x469   : > { %v11172_v30 = vpop.permute.xlu1 %2501  ;;  %v2464_v50 = vpop.permute.xlu0 %2463  ;;  %8413 = vmatpush3.bf16.msra.mxu1 %v8696_v23  ;;  %v8707_v23 = vld [vmem:[%s13429_s5 + $0xb8] sm:$0xff]  }
 0x46a   : > { %v2688_v47 = vsel %vm1956_vm14, %v10860_v5, %v2464_v50  ;;  %v2887_v5 = vsel %vm2861_vm11, %v10815_v41, %v2626_v32  ;;  %v2774_v41 = vsel %vm2746_vm13, %v2500_v6, %v2532_v58  ;;  %8414 = vmatprep.subr.bf16.mxu1 %v8698_v17  ;;  %v8700_v32 = vld [vmem:[%s13429_s5 + $0xa0] sm:$0xff]   ;;  %v8706_v50 = vld [vmem:[%s13429_s5 + $0x28] sm:$0xff]  }
 0x46b   : > { %v2732_v55 = vsel %vm2697_vm1, %v2688_v47, %v2496_v54  ;;  %v2932_v36 = vsel %vm2894_vm12, %v2887_v5, %v2658_v34  ;;  %v2807_v9 = vsel %vm2779_vm15, %v2774_v41, %v2564_v31  ;;  %4956 = vmatpush1.bf16.msra.mxu0 %v8700_v32  ;;  %v8703_v31 = vld [vmem:[%s13429_s5 + $0xa8] sm:$0xff]  }
 0x46c   : > { %3335 = vmatmul.mubr.bf16.gmra.mrb[52].mxu1 %v2732_v55  ;;  %v2853_v35 = vsel %vm2812_vm5, %v2807_v9, %v2596_v13  ;;  %4957 = vmatprep.subr.bf16.mxu0 %v8897_v14 }
 0x46d   : > { %v2660_v44 = vpop.permute.xlu1 %2659  ;;  %3342 = vmatprep.mubr.bf16.mxu1 %v2850_v53  ;;  %v2468_v28 = vpop.permute.xlu0 %2467  ;;  %8415 = vmatpush3.bf16.msra.mxu1 %v8699_v15  ;;  %v11270_v53 = vld [vmem:[#allocation7] ss:$0 sm:$0xff] }
 0x46e   : > { %v2692_v61 = vsel %vm1956_vm14, %v10530_v12, %v2468_v28  ;;  %8416 = vmatprep.subr.bf16.mxu1 %v8701_v27 }
 0x46f   : > { %3504 = vmatmul.mubr.bf16.gmra.mrb[72].mxu0 %v2932_v36  ;;  %v2738_v25 = vsel %vm2697_vm1, %v2692_v61, %v2500_v6  ;;  %v8708_v36 = vld [vmem:[%s13429_s5 + $0x70] sm:$0xff]   ;;  %v8711_v61 = vld [vmem:[%s13429_s5 + $0x78] sm:$0xff]  }
 0x470   : > { %8166 = vmatprep.mubr.msk.bf16.mxu0 %vm1956_vm14, %v11006_v62  ;;  %4958 = vmatpush1.bf16.msra.mxu0 %v8703_v31 }
 0x471   : > { %v2470_v52 = vpop.permute.xlu1 %2469  ;;  %v2628_v20 = vpop.permute.xlu0 %2627  ;;  %8417 = vmatpush3.bf16.msra.mxu1 %v8702_v33  ;;  %4959 = vmatprep.subr.bf16.mxu0 %v8897_v14 }
 0x472   : > { %v2889_v57 = vsel %vm2861_vm11, %v2596_v13, %v2628_v20  ;;  %v2694_v40 = vsel %vm1956_vm14, %v10887_v8, %v2470_v52 }
 0x473   : > { %v2935_v62 = vsel %vm2894_vm12, %v2889_v57, %v2660_v44  ;;  %v2741_v43 = vsel %vm2697_vm1, %v2694_v40, %v11172_v30 }
 0x474   : > { %3343 = vmatmul.mubr.bf16.gmra.mrb[56].mxu1 %v2735_v11 }
 0x475   : > { %v2630_v4 = vpop.permute.xlu1 %2629  ;;  %3350 = vmatprep.mubr.bf16.mxu1 %v2853_v35  ;;  %v2534_v59 = vpop.permute.xlu0 %2533 }
 0x476   : > { %v2776_v21 = vsel %vm2746_vm13, %v11172_v30, %v2534_v59  ;;  %v8704_v30 = vld [vmem:[%s13429_s5 + $0xb0] sm:$0xff]  }
 0x477   : > { %3512 = vmatmul.mubr.bf16.gmra.mrb[76].mxu0 %v2935_v62 }
 0x478   : > { %8167 = vmatprep.mubr.msk.bf16.mxu0 %vm1956_vm14, %v11035_v60  ;;  %4960 = vmatpush1.bf16.msra.mxu0 %v8704_v30 }
 0x479   : > { %v2536_v45 = vpop.permute.xlu1 %2535  ;;  %v2566_v54 = vpop.permute.xlu0 %2565  ;;  %4961 = vmatprep.subr.bf16.mxu0 %v8897_v14 }
 0x47a   : > { %v2809_v48 = vsel %vm2779_vm15, %v2776_v21, %v2566_v54 }
 0x47c   : > { %3351 = vmatmul.mubr.bf16.gmra.mrb[60].mxu1 %v2738_v25  ;;  %4962 = vmatpush1.bf16.msra.mxu0 %v8707_v23 }
 0x47d   : > { %v2568_v12 = vpop.permute.xlu1 %2567  ;;  %v2598_v7 = vpop.permute.xlu0 %2597  ;;  %4963 = vmatprep.subr.bf16.mxu0 %v8897_v14 }
 0x47e   : > { %v2856_v60 = vsel %vm2812_vm5, %v2809_v48, %v2598_v7  ;;  %v2891_v10 = vsel %vm2861_vm11, %v2598_v7, %v2630_v4  ;;  %v8710_v4 = vld [vmem:[%s13429_s5 + $0xc0] sm:$0xff]   ;;  %v8712_v48 = vld [vmem:[%s13429_s5 + $0x38] sm:$0xff]  }
 0x47f   : > { %3358 = vmatprep.mubr.bf16.mxu1 %v2856_v60 }
 0x480   : > { %4964 = vmatpush1.bf16.msra.mxu0 %v8710_v4 }
 0x481   : > { %v2504_v37 = vpop.permute.xlu0 %2503  ;;  %v2600_v58 = vpop.permute.xlu1 %2599  ;;  %4965 = vmatprep.subr.bf16.mxu0 %v8897_v14 }
 0x482   : > { %v2778_v49 = vsel %vm2746_vm13, %v2504_v37, %v2536_v45 }
 0x483   : > { %v2811_v1 = vsel %vm2779_vm15, %v2778_v49, %v2568_v12 }
 0x484   : > { %3359 = vmatmul.mubr.bf16.gmra.mrb[64].mxu1 %v2741_v43  ;;  %v2859_v18 = vsel %vm2812_vm5, %v2811_v1, %v2600_v58 }
 0x485   : > { %3366 = vmatprep.mubr.bf16.mxu1 %v2859_v18  ;;  %v2662_v8 = vpop.permute.xlu0 %2661  ;;  %v2664_v13 = vpop.permute.xlu1 %2663 }
 0x486   : > { %v2938_v63 = vsel %vm2894_vm12, %v2891_v10, %v2662_v8  ;;  %v8713_v10 = vld [vmem:[%s13429_s5 + $0xc8] sm:$0xff]  }
 0x487   : > { %3520 = vmatmul.mubr.bf16.gmra.mrb[80].mxu0 %v2938_v63 }
 0x488   : > { %8168 = vmatprep.mubr.msk.bf16.mxu0 %vm1956_vm14, %v2440_v3  ;;  %4966 = vmatpush1.bf16.msra.mxu0 %v8713_v10 }
 0x489   : > { %v2472_v6 = vpop.permute.xlu0 %2471  ;;  %4967 = vmatprep.subr.bf16.mxu0 %v8897_v14 }
 0x48a   : > { %v2696_v39 = vsel %vm1956_vm14, %v10913_v38, %v2472_v6  ;;  %v8705_v38 = vld [vmem:[%s13429_s5 + $0x68] sm:$0xff]  }
 0x48b   : > { %v2744_v24 = vsel %vm2697_vm1, %v2696_v39, %v2504_v37  ;;  %8418 = vmatprep.subr.bf16.mxu1 %v8705_v38  ;;  %v8714_v39 = vld [vmem:[%s13429_s5 + $0xd0] sm:$0xff]  }
 0x48c   : > { %3367 = vmatmul.mubr.bf16.gmra.mrb[68].mxu1 %v2744_v24  ;;  %4968 = vmatpush1.bf16.msra.mxu0 %v8714_v39 }
 0x48d   : > { %v2632_v34 = vpop.permute.xlu0 %2631  ;;  %8419 = vmatpush3.bf16.msra.mxu1 %v8706_v50  ;;  %7597 = vmatprep.subr.bf16.mxu0 %v8897_v14 }
 0x48e   : > { %v2893_v29 = vsel %vm2861_vm11, %v2600_v58, %v2632_v34  ;;  %8420 = vmatprep.subr.bf16.mxu1 %v8708_v36 }
 0x48f   : > { %v2941_v56 = vsel %vm2894_vm12, %v2893_v29, %v2664_v13 }
 0x490   : > { %3528 = vmatmul.mubr.bf16.gmra.mrb[84].mxu0 %v2941_v56 }
 0x491   : > { %8421 = vmatpush3.bf16.msra.mxu1 %v8709_v26 }
 0x492   : > { %8422 = vmatprep.subr.bf16.mxu1 %v8711_v61 }
 0x495   : > { %8423 = vmatpush3.bf16.msra.mxu1 %v8712_v48 }
 0x496   : > { %6275 = vmatprep.subr.bf16.mxu1 %v8897_v14 }
 0x49d   : > { %v3409_v42 = vpop.f32.mrb[24].mxu0 }
 0x49e   : > { %v3411_v47 = vpop.f32.mrb[25].mxu0 }
 0x49f   : > { %v3412_v51 = vpop.f32.mrb[26].mxu0 }
 0x4a0   : > { %v3414_v2 = vpop.f32.mrb[27].mxu0 }
 0x4a4   : > { %v8312_v55 = vpop.f32.mrb[8].mxu1 }
 0x4a5   : > { %v8313_v5 = vpop.f32.mrb[9].mxu1 }
 0x4a6   : > { %v8314_v44 = vadd.f32 %v8313_v5, %v8312_v55  ;;  %v8315_v28 = vpop.f32.mrb[10].mxu1 }
 0x4a7   : > { %v8316_v22 = vpop.f32.mrb[11].mxu1 }
 0x4a8   : > { %v3249_v41 = vadd.f32 %v8314_v44, %v11270_v53  ;;  %v8317_v52 = vadd.f32 %v8316_v22, %v8315_v28 }
 0x4aa   : > { %v3410_v20 = vadd.f32 %v3409_v42, %v3249_v41  ;;  %v3252_v57 = vadd.f32 %v8317_v52, %v11270_v53 }
 0x4ac   : > { %3591 = vst.msk [vmem:[#allocation4 + $0x19] sm:$0xff] %vm1956_vm14, %v3410_v20  ;;  %v3413_v11 = vadd.f32 %v3412_v51, %v3252_v57  ;;  %v8318_v9 = vpop.f32.mrb[12].mxu1 }
 0x4ad   : > { %v8319_v35 = vpop.f32.mrb[13].mxu1 }
 0x4ae   : > { %3592 = vst.msk [vmem:[#allocation4 + $0x21] sm:$0xff] %vm1956_vm14, %v3413_v11  ;;  %v8320_v59 = vadd.f32 %v8319_v35, %v8318_v9  ;;  %v8321_v62 = vpop.f32.mrb[14].mxu1 }
 0x4af   : > { %v8322_v17 = vpop.f32.mrb[15].mxu1 }
 0x4b0   : > { %v8323_v15 = vadd.f32 %v8322_v17, %v8321_v62  ;;  %v3257_v37 = vadd.f32 %v8320_v59, %v11270_v53 }
 0x4b2   : > { %v3260_v43 = vadd.f32 %v8323_v15, %v11270_v53 }
 0x4b3   : > { %v3626_v45 = vld [vmem:[#allocation4 + $0x18] sm:$0xff] }
 0x4b5   : > { %v3627_v54 = vld [vmem:[#allocation4 + $0x20] sm:$0xff]  ;;  %v3628_v25 = vld [vmem:[#allocation4 + $0x28] sm:$0x3] }
 0x4b6   : > { %v11290_v32 = vpack.c.bf16 %v3627_v54, %v3626_v45  ;;  %v3680_v21 = vpack.c.bf16 %v3628_v25, %v3628_v25 }
 0x4b8   : > { %4083 = vrot.lane.b32.xlu1 %v11290_v32, %s8896_s27  ;;  %v3940_v12 = vrot.slane %v11290_v32, 1  ;;  %v3941_v7 = vrot.slane %v3680_v21, 1  ;;  %v3728_v60 = vshll.u32 %v11290_v32, 16  ;;  %v3726_v1 = vshrl.u32 %v11290_v32, 16 }
 0x4b9   : > { %v3733_v18 = vshll.u32 %v3680_v21, 16 }
 0x4ba   : > { %v3942_v40 = vsel %vm875_vm2, %v3940_v12, %v3941_v7  ;;  %v3730_v19 = vrot.slane %v3728_v60, 1 }
 0x4bb   : > { %4147 = vrot.lane.b32.xlu0 %v3942_v40, %s8898_s12  ;;  %v3417_v46 = vpop.f32.mrb[28].mxu0  ;;  %v3735_v33 = vrot.slane %v3733_v18, 1 }
 0x4bc   : > { %v3418_v49 = vadd.f32 %v3417_v46, %v3257_v37  ;;  %v3419_v58 = vpop.f32.mrb[29].mxu0  ;;  %v3731_v27 = vor.u32 %v3730_v19, %v3726_v1 }
 0x4bd   : > { %v3420_v8 = vpop.f32.mrb[30].mxu0 }
 0x4be   : > { %3593 = vst.msk [vmem:[#allocation4 + $0x31] sm:$0xff] %vm1956_vm14, %v3418_v49  ;;  %v3421_v3 = vadd.f32 %v3420_v8, %v3260_v43  ;;  %v3422_v63 = vpop.f32.mrb[31].mxu0  ;;  %v3736_v31 = vsel %vm650_vm3, %v3731_v27, %v3735_v33 }
 0x4bf   : > { %4053 = vrot.lane.b32.xlu0 %v3942_v40, %s8893_s21 }
 0x4c0   : > { %3594 = vst.msk [vmem:[#allocation4 + $0x39] sm:$0xff] %vm1956_vm14, %v3421_v3 }
 0x4c3   : > { %4115 = vrot.lane.b32.xlu0 %v3736_v31, %s8899_s29  ;;  %v3425_v6 = vpop.f32.mrb[32].mxu0 }
 0x4c4   : > { %v3427_v24 = vpop.f32.mrb[33].mxu0  ;;  %v8324_v13 = vpop.f32.mrb[16].mxu1 }
 0x4c5   : > { %v3428_v34 = vpop.f32.mrb[34].mxu0  ;;  %v8325_v29 = vpop.f32.mrb[17].mxu1  ;;  %v3629_v42 = vld [vmem:[#allocation4 + $0x30] sm:$0xff] }
 0x4c6   : > { %v8326_v56 = vadd.f32 %v8325_v29, %v8324_v13  ;;  %v3430_v30 = vpop.f32.mrb[35].mxu0  ;;  %v8327_v38 = vpop.f32.mrb[18].mxu1 }
 0x4c7   : > { %4021 = vrot.lane.b32.xlu0 %v3736_v31, %s8892_s20  ;;  %v8328_v50 = vpop.f32.mrb[19].mxu1  ;;  %v3630_v47 = vld [vmem:[#allocation4 + $0x38] sm:$0xff]  ;;  %v3631_v51 = vld [vmem:[#allocation4 + $0x40] sm:$0x3] }
 0x4c8   : > { %v3265_v2 = vadd.f32 %v8326_v56, %v11270_v53  ;;  %v8329_v23 = vadd.f32 %v8328_v50, %v8327_v38  ;;  %v11320_v55 = vpack.c.bf16 %v3630_v47, %v3629_v42  ;;  %v3682_v5 = vpack.c.bf16 %v3631_v51, %v3631_v51 }
 0x4ca   : > { %v3426_v44 = vadd.f32 %v3425_v6, %v3265_v2  ;;  %v3268_v28 = vadd.f32 %v8329_v23, %v11270_v53  ;;  %4179 = vrot.lane.b32.xlu1 %v11320_v55, %s8895_s24  ;;  %v3943_v36 = vrot.slane %v11320_v55, 1  ;;  %v3944_v26 = vrot.slane %v3682_v5, 1 }
 0x4cb   : > { %v3740_v22 = vshll.u32 %v11320_v55, 16  ;;  %v3745_v41 = vshll.u32 %v3682_v5, 16  ;;  %v3738_v9 = vshrl.u32 %v11320_v55, 16 }
 0x4cc   : > { %3595 = vst.msk [vmem:[#allocation4 + $0x49] sm:$0xff] %vm1956_vm14, %v3426_v44  ;;  %v3429_v52 = vadd.f32 %v3428_v34, %v3268_v28  ;;  %v8330_v20 = vpop.f32.mrb[20].mxu1  ;;  %v3945_v57 = vsel %vm875_vm2, %v3943_v36, %v3944_v26 }
 0x4cd   : > { %8197 = vmatprep.mubr.msk.bf16.mxu0 %vm1956_vm14, %v3945_v57  ;;  %v8331_v11 = vpop.f32.mrb[21].mxu1  ;;  %v3742_v35 = vrot.slane %v3740_v22, 1  ;;  %v3747_v15 = vrot.slane %v3745_v41, 1 }
 0x4ce   : > { %3596 = vst.msk [vmem:[#allocation4 + $0x51] sm:$0xff] %vm1956_vm14, %v3429_v52  ;;  %4085 = vrot.lane.b32.xlu1 %v11320_v55, %s8896_s27  ;;  %v8332_v4 = vadd.f32 %v8331_v11, %v8330_v20  ;;  %v8333_v59 = vpop.f32.mrb[22].mxu1 }
 0x4cf   : > { %v8334_v62 = vpop.f32.mrb[23].mxu1  ;;  %v3743_v17 = vor.u32 %v3742_v35, %v3738_v9 }
 0x4d0   : > { %v8335_v61 = vadd.f32 %v8334_v62, %v8333_v59  ;;  %v3273_v48 = vadd.f32 %v8332_v4, %v11270_v53 }
 0x4d1   : > { %v3748_v45 = vsel %vm650_vm3, %v3743_v17, %v3747_v15 }
 0x4d2   : > { %4211 = vrot.lane.b32.xlu0 %v3748_v45, %s8894_s15  ;;  %4149 = vrot.lane.b32.xlu1 %v3945_v57, %s8898_s12  ;;  %v3276_v19 = vadd.f32 %v8335_v61, %v11270_v53 }
 0x4d3   : > { %v3632_v54 = vld [vmem:[#allocation4 + $0x48] sm:$0xff] }
 0x4d5   : > { %v3633_v25 = vld [vmem:[#allocation4 + $0x50] sm:$0xff]  ;;  %v3634_v21 = vld [vmem:[#allocation4 + $0x58] sm:$0x3] }
 0x4d6   : > { %4055 = vrot.lane.b32.xlu1 %v3945_v57, %s8893_s21  ;;  %v11339_v12 = vpack.c.bf16 %v3633_v25, %v3632_v54  ;;  %v3684_v60 = vpack.c.bf16 %v3634_v21, %v3634_v21 }
 0x4d7   : > { %v3433_v7 = vpop.f32.mrb[36].mxu0 }
 0x4d8   : > { %v3434_v40 = vadd.f32 %v3433_v7, %v3273_v48  ;;  %v3435_v37 = vpop.f32.mrb[37].mxu0  ;;  %4181 = vrot.lane.b32.xlu0 %v11339_v12, %s8895_s24  ;;  %v3752_v49 = vshll.u32 %v11339_v12, 16  ;;  %v3946_v1 = vrot.slane %v11339_v12, 1  ;;  %v3947_v18 = vrot.slane %v3684_v60, 1 }
 0x4d9   : > { %v3436_v46 = vpop.f32.mrb[38].mxu0  ;;  %v3750_v10 = vshrl.u32 %v11339_v12, 16  ;;  %v3757_v3 = vshll.u32 %v3684_v60, 16 }
 0x4da   : > { %3597 = vst.msk [vmem:[#allocation4 + $0x61] sm:$0xff] %vm1956_vm14, %v3434_v40  ;;  %v3437_v58 = vadd.f32 %v3436_v46, %v3276_v19  ;;  %4117 = vrot.lane.b32.xlu1 %v3748_v45, %s8899_s29  ;;  %v3438_v43 = vpop.f32.mrb[39].mxu0  ;;  %v3754_v8 = vrot.slane %v3752_v49, 1  ;;  %v11354_v33 = vsel %vm875_vm2, %v3946_v1, %v3947_v18 }
 0x4db   : > { %v3759_v31 = vrot.slane %v3757_v3, 1 }
 0x4dc   : > { %3598 = vst.msk [vmem:[#allocation4 + $0x69] sm:$0xff] %vm1956_vm14, %v3437_v58  ;;  %4087 = vrot.lane.b32.xlu0 %v11339_v12, %s8896_s27  ;;  %v3755_v63 = vor.u32 %v3754_v8, %v3750_v10 }
 0x4de   : > { %4023 = vrot.lane.b32.xlu1 %v3748_v45, %s8892_s20  ;;  %v3760_v13 = vsel %vm650_vm3, %v3755_v63, %v3759_v31 }
 0x4df   : > { %v3441_v27 = vpop.f32.mrb[40].mxu0 }
 0x4e0   : > { %v3443_v6 = vpop.f32.mrb[41].mxu0  ;;  %4151 = vrot.lane.b32.xlu0 %v11354_v33, %s8898_s12  ;;  %v8336_v39 = vpop.f32.mrb[24].mxu1 }
 0x4e1   : > { %v3444_v24 = vpop.f32.mrb[42].mxu0  ;;  %v8337_v34 = vpop.f32.mrb[25].mxu1  ;;  %v3635_v50 = vld [vmem:[#allocation4 + $0x60] sm:$0xff] }
 0x4e2   : > { %4213 = vrot.lane.b32.xlu1 %v3760_v13, %s8894_s15  ;;  %v8338_v29 = vadd.f32 %v8337_v34, %v8336_v39  ;;  %v3446_v56 = vpop.f32.mrb[43].mxu0  ;;  %v8339_v30 = vpop.f32.mrb[26].mxu1 }
 0x4e3   : > { %v8340_v38 = vpop.f32.mrb[27].mxu1  ;;  %v3636_v42 = vld [vmem:[#allocation4 + $0x68] sm:$0xff]  ;;  %v3637_v47 = vld [vmem:[#allocation4 + $0x70] sm:$0x3] }
 0x4e4   : > { %v3281_v51 = vadd.f32 %v8338_v29, %v11270_v53  ;;  %v8341_v2 = vadd.f32 %v8340_v38, %v8339_v30  ;;  %4057 = vrot.lane.b32.xlu0 %v11354_v33, %s8893_s21  ;;  %v11363_v23 = vpack.c.bf16 %v3636_v42, %v3635_v50  ;;  %v3686_v5 = vpack.c.bf16 %v3637_v47, %v3637_v47 }
 0x4e6   : > { %v3442_v44 = vadd.f32 %v3441_v27, %v3281_v51  ;;  %v3284_v28 = vadd.f32 %v8341_v2, %v11270_v53  ;;  %4183 = vrot.lane.b32.xlu1 %v11363_v23, %s8895_s24  ;;  %v3764_v36 = vshll.u32 %v11363_v23, 16  ;;  %v3949_v41 = vrot.slane %v11363_v23, 1 }
 0x4e7   : > { %v3950_v20 = vrot.slane %v3686_v5, 1  ;;  %v3762_v57 = vshrl.u32 %v11363_v23, 16  ;;  %v3769_v9 = vshll.u32 %v3686_v5, 16 }
 0x4e8   : > { %3599 = vst.msk [vmem:[#allocation4 + $0x79] sm:$0xff] %vm1956_vm14, %v3442_v44  ;;  %v3445_v26 = vadd.f32 %v3444_v24, %v3284_v28  ;;  %4119 = vrot.lane.b32.xlu0 %v3760_v13, %s8899_s29  ;;  %v8342_v22 = vpop.f32.mrb[28].mxu1  ;;  %v3766_v11 = vrot.slane %v3764_v36, 1 }
 0x4e9   : > { %v8343_v52 = vpop.f32.mrb[29].mxu1  ;;  %v11378_v15 = vsel %vm875_vm2, %v3949_v41, %v3950_v20  ;;  %v3771_v61 = vrot.slane %v3769_v9, 1 }
 0x4ea   : > { %3600 = vst.msk [vmem:[#allocation4 + $0x81] sm:$0xff] %vm1956_vm14, %v3445_v26  ;;  %4089 = vrot.lane.b32.xlu1 %v11363_v23, %s8896_s27  ;;  %v8344_v35 = vadd.f32 %v8343_v52, %v8342_v22  ;;  %v8345_v4 = vpop.f32.mrb[30].mxu1  ;;  %v3767_v62 = vor.u32 %v3766_v11, %v3762_v57 }
 0x4eb   : > { %v8346_v59 = vpop.f32.mrb[31].mxu1 }
 0x4ec   : > { %v8347_v17 = vadd.f32 %v8346_v59, %v8345_v4  ;;  %4025 = vrot.lane.b32.xlu0 %v3760_v13, %s8892_s20  ;;  %v3772_v45 = vsel %vm650_vm3, %v3767_v62, %v3771_v61  ;;  %v3289_v54 = vadd.f32 %v8344_v35, %v11270_v53 }
 0x4ee   : > { %4153 = vrot.lane.b32.xlu1 %v11378_v15, %s8898_s12  ;;  %v3292_v19 = vadd.f32 %v8347_v17, %v11270_v53 }
 0x4ef   : > { %v3638_v25 = vld [vmem:[#allocation4 + $0x78] sm:$0xff] }
 0x4f0   : > { %4215 = vrot.lane.b32.xlu0 %v3772_v45, %s8894_s15 }
 0x4f1   : > { %v3639_v21 = vld [vmem:[#allocation4 + $0x80] sm:$0xff]  ;;  %v3640_v48 = vld [vmem:[#allocation4 + $0x88] sm:$0x3] }
 0x4f2   : > { %4059 = vrot.lane.b32.xlu1 %v11378_v15, %s8893_s21  ;;  %v3449_v7 = vpop.f32.mrb[44].mxu0  ;;  %v11387_v60 = vpack.c.bf16 %v3639_v21, %v3638_v25  ;;  %v3688_v46 = vpack.c.bf16 %v3640_v48, %v3640_v48 }
 0x4f3   : > { %v3450_v40 = vadd.f32 %v3449_v7, %v3289_v54  ;;  %v3451_v37 = vpop.f32.mrb[45].mxu0 }
 0x4f4   : > { %4185 = vrot.lane.b32.xlu0 %v11387_v60, %s8895_s24  ;;  %v3452_v49 = vpop.f32.mrb[46].mxu0  ;;  %v3776_v58 = vshll.u32 %v11387_v60, 16  ;;  %v3952_v10 = vrot.slane %v11387_v60, 1  ;;  %v3953_v8 = vrot.slane %v3688_v46, 1  ;;  %v3774_v3 = vshrl.u32 %v11387_v60, 16 }
 0x4f5   : > { %3601 = vst.msk [vmem:[#allocation4 + $0x91] sm:$0xff] %vm1956_vm14, %v3450_v40  ;;  %v3453_v43 = vadd.f32 %v3452_v49, %v3292_v19  ;;  %v3454_v1 = vpop.f32.mrb[47].mxu0  ;;  %v3781_v63 = vshll.u32 %v3688_v46, 16 }
 0x4f6   : > { %4121 = vrot.lane.b32.xlu1 %v3772_v45, %s8899_s29  ;;  %v3778_v18 = vrot.slane %v3776_v58, 1  ;;  %v11402_v39 = vsel %vm875_vm2, %v3952_v10, %v3953_v8 }
 0x4f7   : > { %3602 = vst.msk [vmem:[#allocation4 + $0x99] sm:$0xff] %vm1956_vm14, %v3453_v43  ;;  %v3783_v24 = vrot.slane %v3781_v63, 1 }
 0x4f8   : > { %4091 = vrot.lane.b32.xlu0 %v11387_v60, %s8896_s27  ;;  %v3779_v27 = vor.u32 %v3778_v18, %v3774_v3 }
 0x4fa   : > { %4027 = vrot.lane.b32.xlu1 %v3772_v45, %s8892_s20  ;;  %v3457_v31 = vpop.f32.mrb[48].mxu0  ;;  %v3784_v29 = vsel %vm650_vm3, %v3779_v27, %v3783_v24 }
 0x4fb   : > { %v3459_v6 = vpop.f32.mrb[49].mxu0 }
 0x4fc   : > { %4155 = vrot.lane.b32.xlu0 %v11402_v39, %s8898_s12  ;;  %v8348_v13 = vpop.f32.mrb[32].mxu1  ;;  %v3460_v34 = vpop.f32.mrb[50].mxu0  ;;  %v3641_v42 = vld [vmem:[#allocation4 + $0x90] sm:$0xff] }
 0x4fd   : > { %v8349_v56 = vpop.f32.mrb[33].mxu1  ;;  %v3462_v30 = vpop.f32.mrb[51].mxu0 }
 0x4fe   : > { %4217 = vrot.lane.b32.xlu1 %v3784_v29, %s8894_s15  ;;  %v8350_v38 = vadd.f32 %v8349_v56, %v8348_v13  ;;  %v8351_v50 = vpop.f32.mrb[34].mxu1  ;;  %v3642_v47 = vld [vmem:[#allocation4 + $0x98] sm:$0xff]  ;;  %v3643_v51 = vld [vmem:[#allocation4 + $0xa0] sm:$0x3] }
 0x4ff   : > { %v8352_v2 = vpop.f32.mrb[35].mxu1  ;;  %v11408_v5 = vpack.c.bf16 %v3642_v47, %v3641_v42  ;;  %v3690_v36 = vpack.c.bf16 %v3643_v51, %v3643_v51 }
 0x500   : > { %v3297_v44 = vadd.f32 %v8350_v38, %v11270_v53  ;;  %v8353_v28 = vadd.f32 %v8352_v2, %v8351_v50  ;;  %4061 = vrot.lane.b32.xlu0 %v11402_v39, %s8893_s21 }
 0x501   : > { %v3788_v26 = vshll.u32 %v11408_v5, 16  ;;  %v3955_v9 = vrot.slane %v11408_v5, 1  ;;  %v3956_v35 = vrot.slane %v3690_v36, 1  ;;  %v3786_v4 = vshrl.u32 %v11408_v5, 16 }
 0x502   : > { %v3458_v22 = vadd.f32 %v3457_v31, %v3297_v44  ;;  %v3300_v41 = vadd.f32 %v8353_v28, %v11270_v53  ;;  %4187 = vrot.lane.b32.xlu1 %v11408_v5, %s8895_s24  ;;  %v3793_v59 = vshll.u32 %v3690_v36, 16 }
 0x503   : > { %v3790_v52 = vrot.slane %v3788_v26, 1  ;;  %v11426_v25 = vsel %vm875_vm2, %v3955_v9, %v3956_v35 }
 0x504   : > { %3603 = vst.msk [vmem:[#allocation4 + $0xa9] sm:$0xff] %vm1956_vm14, %v3458_v22  ;;  %v3461_v20 = vadd.f32 %v3460_v34, %v3300_v41  ;;  %4123 = vrot.lane.b32.xlu0 %v3784_v29, %s8899_s29  ;;  %v8354_v57 = vpop.f32.mrb[36].mxu1  ;;  %v3795_v21 = vrot.slane %v3793_v59, 1 }
 0x505   : > { %v8355_v11 = vpop.f32.mrb[37].mxu1  ;;  %v3791_v45 = vor.u32 %v3790_v52, %v3786_v4 }
 0x506   : > { %3604 = vst.msk [vmem:[#allocation4 + $0xb1] sm:$0xff] %vm1956_vm14, %v3461_v20  ;;  %4093 = vrot.lane.b32.xlu1 %v11408_v5, %s8896_s27  ;;  %v8356_v62 = vadd.f32 %v8355_v11, %v8354_v57  ;;  %v8357_v17 = vpop.f32.mrb[38].mxu1 }
 0x507   : > { %v8358_v61 = vpop.f32.mrb[39].mxu1  ;;  %v3796_v48 = vsel %vm650_vm3, %v3791_v45, %v3795_v21 }
 0x508   : > { %v8359_v54 = vadd.f32 %v8358_v61, %v8357_v17  ;;  %4029 = vrot.lane.b32.xlu0 %v3784_v29, %s8892_s20  ;;  %v3305_v7 = vadd.f32 %v8356_v62, %v11270_v53 }
 0x50a   : > { %4157 = vrot.lane.b32.xlu1 %v11426_v25, %s8898_s12  ;;  %v3308_v1 = vadd.f32 %v8359_v54, %v11270_v53 }
 0x50b   : > { %v3644_v40 = vld [vmem:[#allocation4 + $0xa8] sm:$0xff] }
 0x50c   : > { %4219 = vrot.lane.b32.xlu0 %v3796_v48, %s8894_s15 }
 0x50d   : > { %v3645_v37 = vld [vmem:[#allocation4 + $0xb0] sm:$0xff]  ;;  %v3646_v19 = vld [vmem:[#allocation4 + $0xb8] sm:$0x3] }
 0x50e   : > { %4063 = vrot.lane.b32.xlu1 %v11426_v25, %s8893_s21  ;;  %v3465_v46 = vpop.f32.mrb[52].mxu0  ;;  %v11435_v49 = vpack.c.bf16 %v3645_v37, %v3644_v40  ;;  %v3692_v18 = vpack.c.bf16 %v3646_v19, %v3646_v19 }
 0x50f   : > { %v3466_v58 = vadd.f32 %v3465_v46, %v3305_v7  ;;  %v3467_v43 = vpop.f32.mrb[53].mxu0 }
 0x510   : > { %4189 = vrot.lane.b32.xlu0 %v11435_v49, %s8895_s24  ;;  %v3468_v10 = vpop.f32.mrb[54].mxu0  ;;  %v3800_v8 = vshll.u32 %v11435_v49, 16  ;;  %v3958_v31 = vrot.slane %v11435_v49, 1  ;;  %v3959_v6 = vrot.slane %v3692_v18, 1  ;;  %v3798_v24 = vshrl.u32 %v11435_v49, 16 }
 0x511   : > { %3605 = vst.msk [vmem:[#allocation4 + $0xc1] sm:$0xff] %vm1956_vm14, %v3466_v58  ;;  %v3469_v3 = vadd.f32 %v3468_v10, %v3308_v1  ;;  %v3470_v63 = vpop.f32.mrb[55].mxu0  ;;  %v3805_v13 = vshll.u32 %v3692_v18, 16  ;;  %v4052_v18 = vpop.permute.xlu0 %4051 }
 0x512   : > { %4125 = vrot.lane.b32.xlu1 %v3796_v48, %s8899_s29  ;;  %v3802_v27 = vrot.slane %v3800_v8, 1  ;;  %v11450_v30 = vsel %vm875_vm2, %v3958_v31, %v3959_v6 }
 0x513   : > { %3606 = vst.msk [vmem:[#allocation4 + $0xc9] sm:$0xff] %vm1956_vm14, %v3469_v3  ;;  %v3807_v38 = vrot.slane %v3805_v13, 1 }
 0x514   : > { %4095 = vrot.lane.b32.xlu0 %v11435_v49, %s8896_s27  ;;  %v3803_v34 = vor.u32 %v3802_v27, %v3798_v24 }
 0x516   : > { %4031 = vrot.lane.b32.xlu1 %v3796_v48, %s8892_s20  ;;  %v3473_v29 = vpop.f32.mrb[56].mxu0  ;;  %v3808_v47 = vsel %vm650_vm3, %v3803_v34, %v3807_v38 }
 0x517   : > { %v3475_v56 = vpop.f32.mrb[57].mxu0 }
 0x518   : > { %4159 = vrot.lane.b32.xlu0 %v11450_v30, %s8898_s12  ;;  %v8360_v50 = vpop.f32.mrb[40].mxu1  ;;  %v3476_v42 = vpop.f32.mrb[58].mxu0  ;;  %v3647_v36 = vld [vmem:[#allocation4 + $0xc0] sm:$0xff] }
 0x519   : > { %v8361_v51 = vpop.f32.mrb[41].mxu1  ;;  %v3478_v2 = vpop.f32.mrb[59].mxu0 }
 0x51a   : > { %4221 = vrot.lane.b32.xlu1 %v3808_v47, %s8894_s15  ;;  %v8362_v44 = vadd.f32 %v8361_v51, %v8360_v50  ;;  %v8363_v28 = vpop.f32.mrb[42].mxu1  ;;  %v3648_v26 = vld [vmem:[#allocation4 + $0xc8] sm:$0xff]  ;;  %v3649_v22 = vld [vmem:[#allocation4 + $0xd0] sm:$0x3] }
 0x51b   : > { %v8364_v41 = vpop.f32.mrb[43].mxu1  ;;  %v11456_v52 = vpack.c.bf16 %v3648_v26, %v3647_v36  ;;  %v3694_v11 = vpack.c.bf16 %v3649_v22, %v3649_v22 }
 0x51c   : > { %v3313_v20 = vadd.f32 %v8362_v44, %v11270_v53  ;;  %v8365_v57 = vadd.f32 %v8364_v41, %v8363_v28  ;;  %4065 = vrot.lane.b32.xlu0 %v11450_v30, %s8893_s21 }
 0x51d   : > { %v3812_v9 = vshll.u32 %v11456_v52, 16  ;;  %v3961_v45 = vrot.slane %v11456_v52, 1  ;;  %v3962_v54 = vrot.slane %v3694_v11, 1  ;;  %v3810_v21 = vshrl.u32 %v11456_v52, 16 }
 0x51e   : > { %v3474_v35 = vadd.f32 %v3473_v29, %v3313_v20  ;;  %v3316_v4 = vadd.f32 %v8365_v57, %v11270_v53  ;;  %4191 = vrot.lane.b32.xlu1 %v11456_v52, %s8895_s24  ;;  %v3817_v48 = vshll.u32 %v3694_v11, 16  ;;  %v4020_v29 = vpop.permute.xlu1 %4019 }
 0x51f   : > { %v3814_v59 = vrot.slane %v3812_v9, 1  ;;  %v11474_v58 = vsel %vm875_vm2, %v3961_v45, %v3962_v54 }
 0x520   : > { %3607 = vst.msk [vmem:[#allocation4 + $0xd9] sm:$0xff] %vm1956_vm14, %v3474_v35  ;;  %v3477_v62 = vadd.f32 %v3476_v42, %v3316_v4  ;;  %4127 = vrot.lane.b32.xlu0 %v3808_v47, %s8899_s29  ;;  %v8366_v17 = vpop.f32.mrb[44].mxu1  ;;  %v3819_v43 = vrot.slane %v3817_v48, 1 }
 0x521   : > { %v8367_v61 = vpop.f32.mrb[45].mxu1  ;;  %v3815_v19 = vor.u32 %v3814_v59, %v3810_v21  ;;  %v4244_v59 = vsel %vm1956_vm14, %v11084_v16, %v4020_v29 }
 0x522   : > { %3608 = vst.msk [vmem:[#allocation4 + $0xe1] sm:$0xff] %vm1956_vm14, %v3477_v62  ;;  %4097 = vrot.lane.b32.xlu1 %v11456_v52, %s8896_s27  ;;  %v8368_v7 = vadd.f32 %v8367_v61, %v8366_v17  ;;  %v8369_v40 = vpop.f32.mrb[46].mxu1 }
 0x523   : > { %v8370_v37 = vpop.f32.mrb[47].mxu1  ;;  %v3820_v1 = vsel %vm650_vm3, %v3815_v19, %v3819_v43 }
 0x524   : > { %v8371_v46 = vadd.f32 %v8370_v37, %v8369_v40  ;;  %4033 = vrot.lane.b32.xlu0 %v3808_v47, %s8892_s20  ;;  %v3321_v10 = vadd.f32 %v8368_v7, %v11270_v53 }
 0x526   : > { %4161 = vrot.lane.b32.xlu1 %v11474_v58, %s8898_s12  ;;  %v3324_v13 = vadd.f32 %v8371_v46, %v11270_v53 }
 0x527   : > { %v3650_v8 = vld [vmem:[#allocation4 + $0xd8] sm:$0xff] }
 0x528   : > { %4223 = vrot.lane.b32.xlu0 %v3820_v1, %s8894_s15 }
 0x529   : > { %v3651_v3 = vld [vmem:[#allocation4 + $0xe0] sm:$0xff]  ;;  %v3652_v63 = vld [vmem:[#allocation4 + $0xe8] sm:$0x3] }
 0x52a   : > { %4067 = vrot.lane.b32.xlu1 %v11474_v58, %s8893_s21  ;;  %v3481_v27 = vpop.f32.mrb[60].mxu0  ;;  %v11483_v31 = vpack.c.bf16 %v3651_v3, %v3650_v8  ;;  %v3696_v34 = vpack.c.bf16 %v3652_v63, %v3652_v63  ;;  %v4084_v41 = vpop.permute.xlu1 %4083 }
 0x52b   : > { %v3482_v6 = vadd.f32 %v3481_v27, %v3321_v10  ;;  %v3483_v24 = vpop.f32.mrb[61].mxu0  ;;  %v4324_v62 = vsel %vm2746_vm13, %v4052_v18, %v4084_v41 }
 0x52c   : > { %4193 = vrot.lane.b32.xlu0 %v11483_v31, %s8895_s24  ;;  %v3484_v56 = vpop.f32.mrb[62].mxu0  ;;  %v3824_v38 = vshll.u32 %v11483_v31, 16  ;;  %v3964_v2 = vrot.slane %v11483_v31, 1  ;;  %v3965_v44 = vrot.slane %v3696_v34, 1  ;;  %v3822_v28 = vshrl.u32 %v11483_v31, 16 }
 0x52d   : > { %3609 = vst.msk [vmem:[#allocation4 + $0xf1] sm:$0xff] %vm1956_vm14, %v3482_v6  ;;  %v3485_v50 = vadd.f32 %v3484_v56, %v3324_v13  ;;  %v11490_v42 = vpop.permute.xlu0 %4147  ;;  %v3486_v47 = vpop.f32.mrb[63].mxu0  ;;  %v3829_v36 = vshll.u32 %v3696_v34, 16 }
 0x52e   : > { %4129 = vrot.lane.b32.xlu1 %v3820_v1, %s8899_s29  ;;  %v3826_v51 = vrot.slane %v3824_v38, 1  ;;  %v11502_v11 = vsel %vm875_vm2, %v3964_v2, %v3965_v44 }
 0x52f   : > { %3610 = vst.msk [vmem:[#allocation4 + $0xf9] sm:$0xff] %vm1956_vm14, %v3485_v50  ;;  %v3831_v9 = vrot.slane %v3829_v36, 1 }
 0x530   : > { %4099 = vrot.lane.b32.xlu0 %v11483_v31, %s8896_s27  ;;  %v3827_v22 = vor.u32 %v3826_v51, %v3822_v28 }
 0x531   : > { %v11498_v26 = vpop.permute.xlu0 %4053 }
 0x532   : > { %4035 = vrot.lane.b32.xlu1 %v3820_v1, %s8892_s20  ;;  %v3489_v20 = vpop.f32.mrb[64].mxu0  ;;  %v3832_v61 = vsel %vm650_vm3, %v3827_v22, %v3831_v9  ;;  %v4276_v1 = vsel %vm2697_vm1, %v4244_v59, %v4052_v18 }
 0x533   : > { %v3491_v57 = vpop.f32.mrb[65].mxu0 }
 0x534   : > { %4163 = vrot.lane.b32.xlu0 %v11502_v11, %s8898_s12  ;;  %v8372_v35 = vpop.f32.mrb[48].mxu1  ;;  %v3492_v4 = vpop.f32.mrb[66].mxu0  ;;  %v3653_v40 = vld [vmem:[#allocation4 + $0xf0] sm:$0xff] }
 0x535   : > { %v4116_v17 = vpop.permute.xlu0 %4115  ;;  %v8373_v45 = vpop.f32.mrb[49].mxu1 }
 0x536   : > { %v4356_v54 = vsel %vm2779_vm15, %v4324_v62, %v4116_v17  ;;  %4225 = vrot.lane.b32.xlu1 %v3832_v61, %s8894_s15  ;;  %v8374_v21 = vadd.f32 %v8373_v45, %v8372_v35  ;;  %v3494_v48 = vpop.f32.mrb[67].mxu0  ;;  %v8375_v7 = vpop.f32.mrb[50].mxu1  ;;  %v3654_v37 = vld [vmem:[#allocation4 + $0xf8] sm:$0xff]  ;;  %v3655_v19 = vld [vmem:[#allocation4 + $0x100] sm:$0x3] }
 0x537   : > { %v8376_v46 = vpop.f32.mrb[51].mxu1  ;;  %v4388_v16 = vsel %vm2812_vm5, %v4356_v54, %v11490_v42  ;;  %v11514_v43 = vpack.c.bf16 %v3654_v37, %v3653_v40  ;;  %v3698_v3 = vpack.c.bf16 %v3655_v19, %v3655_v19 }
 0x538   : > { %v3329_v10 = vadd.f32 %v8374_v21, %v11270_v53  ;;  %v8377_v8 = vadd.f32 %v8376_v46, %v8375_v7  ;;  %4818 = vmatprep.mubr.bf16.mxu1 %v4388_v16  ;;  %4069 = vrot.lane.b32.xlu0 %v11502_v11, %s8893_s21 }
 0x539   : > { %4819 = vmatmul.mubr.bf16.vlgmr.msra.gmra.mrb[72].mxu1 %v4276_v1  ;;  %v3836_v63 = vshll.u32 %v11514_v43, 16  ;;  %v3967_v50 = vrot.slane %v11514_v43, 1  ;;  %v3968_v47 = vrot.slane %v3698_v3, 1  ;;  %v3834_v51 = vshrl.u32 %v11514_v43, 16  ;;  %v4022_v44 = vpop.permute.xlu0 %4021 }
 0x53a   : > { %v3490_v27 = vadd.f32 %v3489_v20, %v3329_v10  ;;  %v3332_v6 = vadd.f32 %v8377_v8, %v11270_v53  ;;  %4195 = vrot.lane.b32.xlu1 %v11514_v43, %s8895_s24  ;;  %v3497_v24 = vpop.f32.mrb[68].mxu0  ;;  %v3841_v2 = vshll.u32 %v3698_v3, 16 }
 0x53b   : > { %v3499_v13 = vpop.f32.mrb[69].mxu0  ;;  %v3838_v18 = vrot.slane %v3836_v63, 1  ;;  %v11533_v57 = vsel %vm875_vm2, %v3967_v50, %v3968_v47 }
 0x53c   : > { %3611 = vst.msk [vmem:[#allocation4 + $0x109] sm:$0xff] %vm1956_vm14, %v3490_v27  ;;  %v3493_v34 = vadd.f32 %v3492_v4, %v3332_v6  ;;  %v4180_v29 = vpop.permute.xlu1 %4179  ;;  %4131 = vrot.lane.b32.xlu0 %v3832_v61, %s8899_s29  ;;  %v3500_v56 = vpop.f32.mrb[70].mxu0  ;;  %v3843_v35 = vrot.slane %v3841_v2, 1 }
 0x53d   : > { %v3502_v38 = vpop.f32.mrb[71].mxu0  ;;  %v3839_v36 = vor.u32 %v3838_v18, %v3834_v51 }
 0x53e   : > { %3612 = vst.msk [vmem:[#allocation4 + $0x111] sm:$0xff] %vm1956_vm14, %v3493_v34  ;;  %4101 = vrot.lane.b32.xlu1 %v11514_v43, %s8896_s27 }
 0x53f   : > { %v8378_v28 = vpop.f32.mrb[52].mxu1  ;;  %v3844_v54 = vsel %vm650_vm3, %v3839_v36, %v3843_v35 }
 0x540   : > { %v4086_v22 = vpop.permute.xlu1 %4085  ;;  %4037 = vrot.lane.b32.xlu0 %v3832_v61, %s8892_s20  ;;  %v8379_v41 = vpop.f32.mrb[53].mxu1  ;;  %v4436_v61 = vsel %vm2861_vm11, %v11490_v42, %v4180_v29 }
 0x541   : > { %v8380_v20 = vadd.f32 %v8379_v41, %v8378_v28  ;;  %v8381_v9 = vpop.f32.mrb[54].mxu1  ;;  %v4246_v41 = vsel %vm1956_vm14, %v11290_v32, %v4022_v44 }
 0x542   : > { %4165 = vrot.lane.b32.xlu1 %v11533_v57, %s8898_s12  ;;  %v8382_v4 = vpop.f32.mrb[55].mxu1  ;;  %v3505_v59 = vpop.f32.mrb[72].mxu0 }
 0x543   : > { %v3337_v62 = vadd.f32 %v8380_v20, %v11270_v53  ;;  %v8383_v17 = vadd.f32 %v8382_v4, %v8381_v9  ;;  %v3507_v45 = vpop.f32.mrb[73].mxu0  ;;  %v3656_v46 = vld [vmem:[#allocation4 + $0x108] sm:$0xff]  ;;  %v4326_v20 = vsel %vm2746_vm13, %v11498_v26, %v4086_v22 }
 0x544   : > { %v4212_v21 = vpop.permute.xlu0 %4211  ;;  %v11541_v48 = vpop.permute.xlu1 %4149  ;;  %4227 = vrot.lane.b32.xlu0 %v3844_v54, %s8894_s15 }
 0x545   : > { %v3498_v7 = vadd.f32 %v3497_v24, %v3337_v62  ;;  %v3340_v40 = vadd.f32 %v8383_v17, %v11270_v53  ;;  %v4468_v37 = vsel %vm2894_vm12, %v4436_v61, %v4212_v21  ;;  %v3508_v19 = vpop.f32.mrb[74].mxu0  ;;  %v3657_v16 = vld [vmem:[#allocation4 + $0x110] sm:$0xff]  ;;  %v3658_v1 = vld [vmem:[#allocation4 + $0x118] sm:$0x3] }
 0x546   : > { %4980 = vmatmul.mubr.bf16.vlgmr.msra.gmra.mrb[88].mxu0 %v4468_v37  ;;  %4071 = vrot.lane.b32.xlu1 %v11533_v57, %s8893_s21  ;;  %v3510_v10 = vpop.f32.mrb[75].mxu0  ;;  %v11548_v42 = vpack.c.bf16 %v3657_v16, %v3656_v46  ;;  %v3700_v8 = vpack.c.bf16 %v3658_v1, %v3658_v1 }
 0x547   : > { %3613 = vst.msk [vmem:[#allocation4 + $0x121] sm:$0xff] %vm1956_vm14, %v3498_v7  ;;  %v3501_v3 = vadd.f32 %v3500_v56, %v3340_v40  ;;  %8198 = vmatprep.mubr.msk.bf16.mxu0 %vm1956_vm14, %v11354_v33  ;;  %v8384_v63 = vpop.f32.mrb[56].mxu1 }
 0x548   : > { %v11553_v27 = vpop.permute.xlu1 %4055  ;;  %4197 = vrot.lane.b32.xlu0 %v11548_v42, %s8895_s24  ;;  %v8385_v6 = vpop.f32.mrb[57].mxu1  ;;  %v3848_v24 = vshll.u32 %v11548_v42, 16  ;;  %v3970_v56 = vrot.slane %v11548_v42, 1  ;;  %v3971_v33 = vrot.slane %v3700_v8, 1  ;;  %v3846_v28 = vshrl.u32 %v11548_v42, 16 }
 0x549   : > { %3614 = vst.msk [vmem:[#allocation4 + $0x129] sm:$0xff] %vm1956_vm14, %v3501_v3  ;;  %v8386_v13 = vadd.f32 %v8385_v6, %v8384_v63  ;;  %v8387_v18 = vpop.f32.mrb[58].mxu1  ;;  %v3853_v36 = vshll.u32 %v3700_v8, 16 }
 0x54a   : > { %4133 = vrot.lane.b32.xlu1 %v3844_v54, %s8899_s29  ;;  %v8388_v34 = vpop.f32.mrb[59].mxu1  ;;  %v3513_v29 = vpop.f32.mrb[76].mxu0  ;;  %v3850_v38 = vrot.slane %v3848_v24, 1  ;;  %v11578_v7 = vsel %vm875_vm2, %v3970_v56, %v3971_v33 }
 0x54b   : > { %v3345_v50 = vadd.f32 %v8386_v13, %v11270_v53  ;;  %v8389_v47 = vadd.f32 %v8388_v34, %v8387_v18  ;;  %v4182_v51 = vpop.permute.xlu0 %4181  ;;  %v3515_v2 = vpop.f32.mrb[77].mxu0  ;;  %v3855_v40 = vrot.slane %v3853_v36, 1 }
 0x54c   : > { %v4118_v9 = vpop.permute.xlu1 %4117  ;;  %4103 = vrot.lane.b32.xlu0 %v11548_v42, %s8896_s27  ;;  %v3516_v35 = vpop.f32.mrb[78].mxu0  ;;  %v3851_v61 = vor.u32 %v3850_v38, %v3846_v28  ;;  %v4438_v13 = vsel %vm2861_vm11, %v11541_v48, %v4182_v51  ;;  %v11595_v38 = vld [vmem:[#allocation7] ss:$0 sm:$0xff] }
 0x54d   : > { %v3506_v4 = vadd.f32 %v3505_v59, %v3345_v50  ;;  %v3348_v62 = vadd.f32 %v8389_v47, %v11270_v53  ;;  %v4358_v17 = vsel %vm2779_vm15, %v4326_v20, %v4118_v9  ;;  %v3518_v45 = vpop.f32.mrb[79].mxu0  ;;  %v4279_v59 = vsel %vm2697_vm1, %v4246_v41, %v11498_v26 }
 0x54e   : > { %4039 = vrot.lane.b32.xlu1 %v3844_v54, %s8892_s20  ;;  %v4391_v32 = vsel %vm2812_vm5, %v4358_v17, %v11541_v48  ;;  %v3659_v46 = vld [vmem:[#allocation4 + $0x120] sm:$0xff]  ;;  %v3856_v1 = vsel %vm650_vm3, %v3851_v61, %v3855_v40 }
 0x54f   : > { %3615 = vst.msk [vmem:[#allocation4 + $0x139] sm:$0xff] %vm1956_vm14, %v3506_v4  ;;  %v3509_v44 = vadd.f32 %v3508_v19, %v3348_v62  ;;  %4826 = vmatprep.mubr.bf16.mxu1 %v4391_v32  ;;  %v4088_v22 = vpop.permute.xlu0 %4087  ;;  %v8390_v21 = vpop.f32.mrb[60].mxu1 }
 0x550   : > { %v4024_v37 = vpop.permute.xlu1 %4023  ;;  %4827 = vmatmul.mubr.bf16.gmra.mrb[76].mxu1 %v4279_v59  ;;  %4167 = vrot.lane.b32.xlu0 %v11578_v7, %s8898_s12  ;;  %v8391_v54 = vpop.f32.mrb[61].mxu1  ;;  %v3660_v16 = vld [vmem:[#allocation4 + $0x128] sm:$0xff]  ;;  %v3661_v26 = vld [vmem:[#allocation4 + $0x130] sm:$0x3] }
 0x551   : > { %3616 = vst.msk [vmem:[#allocation4 + $0x141] sm:$0xff] %vm1956_vm14, %v3509_v44  ;;  %v8392_v19 = vadd.f32 %v8391_v54, %v8390_v21  ;;  %v8393_v10 = vpop.f32.mrb[62].mxu1  ;;  %v11584_v8 = vpack.c.bf16 %v3660_v16, %v3659_v46  ;;  %v3702_v34 = vpack.c.bf16 %v3661_v26, %v3661_v26  ;;  %v4248_v61 = vsel %vm1956_vm14, %v11320_v55, %v4024_v37 }
 0x552   : > { %4229 = vrot.lane.b32.xlu1 %v3856_v1, %s8894_s15  ;;  %v8394_v3 = vpop.f32.mrb[63].mxu1 }
 0x553   : > { %v3353_v63 = vadd.f32 %v8392_v19, %v11270_v53  ;;  %v8395_v6 = vadd.f32 %v8394_v3, %v8393_v10  ;;  %v11588_v24 = vpop.permute.xlu0 %4151  ;;  %v3860_v56 = vshll.u32 %v11584_v8, 16  ;;  %v3973_v36 = vrot.slane %v11584_v8, 1 }
 0x554   : > { %v4214_v18 = vpop.permute.xlu1 %4213  ;;  %4073 = vrot.lane.b32.xlu0 %v11578_v7, %s8893_s21  ;;  %v3974_v41 = vrot.slane %v3702_v34, 1  ;;  %v3865_v20 = vshll.u32 %v3702_v34, 16 }
 0x555   : > { %v3514_v33 = vadd.f32 %v3513_v29, %v3353_v63  ;;  %v3356_v50 = vadd.f32 %v11595_v38, %v8395_v6  ;;  %v4471_v53 = vsel %vm2894_vm12, %v4438_v13, %v4214_v18  ;;  %v3862_v29 = vrot.slane %v3860_v56, 1 }
 0x556   : > { %4199 = vrot.lane.b32.xlu1 %v11584_v8, %s8895_s24  ;;  %4988 = vmatmul.mubr.bf16.gmra.mrb[92].mxu0 %v4471_v53  ;;  %v11620_v16 = vsel %vm875_vm2, %v3973_v36, %v3974_v41  ;;  %v3867_v19 = vrot.slane %v3865_v20, 1  ;;  %v3662_v10 = vld [vmem:[#allocation4 + $0x138] sm:$0xff] }
 0x557   : > { %3617 = vst.msk [vmem:[#allocation4 + $0x151] sm:$0xff] %vm1956_vm14, %v3514_v33  ;;  %v3517_v48 = vadd.f32 %v3516_v35, %v3356_v50  ;;  %8199 = vmatprep.mubr.msk.bf16.mxu0 %vm1956_vm14, %v11378_v15  ;;  %v11604_v47 = vpop.permute.xlu0 %4057  ;;  %v8396_v51 = vpop.f32.mrb[64].mxu1  ;;  %v3858_v35 = vshrl.u32 %v11584_v8, 16  ;;  %v4328_v15 = vsel %vm2746_vm13, %v11553_v27, %v4088_v22 }
 0x558   : > { %v4184_v2 = vpop.permute.xlu1 %4183  ;;  %4135 = vrot.lane.b32.xlu0 %v3856_v1, %s8899_s29  ;;  %v8397_v28 = vpop.f32.mrb[65].mxu1  ;;  %v3663_v45 = vld [vmem:[#allocation4 + $0x140] sm:$0xff]  ;;  %v3664_v50 = vld [vmem:[#allocation4 + $0x148] sm:$0x3] }
 0x559   : > { %3618 = vst.msk [vmem:[#allocation4 + $0x159] sm:$0xff] %vm1956_vm14, %v3517_v48  ;;  %v8398_v9 = vadd.f32 %v8397_v28, %v8396_v51  ;;  %v8399_v4 = vpop.f32.mrb[66].mxu1  ;;  %v3863_v40 = vor.u32 %v3862_v29, %v3858_v35  ;;  %v11625_v63 = vpack.c.bf16 %v3663_v45, %v3662_v10  ;;  %v4440_v29 = vsel %vm2861_vm11, %v11588_v24, %v4184_v2 }
 0x55a   : > { %4105 = vrot.lane.b32.xlu1 %v11584_v8, %s8896_s27  ;;  %v8400_v62 = vpop.f32.mrb[67].mxu1  ;;  %v3521_v17 = vpop.f32.mrb[80].mxu0 }
 0x55b   : > { %v8401_v32 = vadd.f32 %v8400_v62, %v8399_v4  ;;  %v3361_v44 = vadd.f32 %v11595_v38, %v8398_v9  ;;  %v4120_v21 = vpop.permute.xlu0 %4119  ;;  %v3523_v59 = vpop.f32.mrb[81].mxu0  ;;  %v3868_v34 = vsel %vm650_vm3, %v3863_v40, %v3867_v19  ;;  %v3872_v51 = vshll.u32 %v11625_v63, 16 }
 0x55c   : > { %v4360_v54 = vsel %vm2779_vm15, %v4328_v15, %v4120_v21  ;;  %v4090_v46 = vpop.permute.xlu1 %4089  ;;  %4041 = vrot.lane.b32.xlu0 %v3856_v1, %s8892_s20  ;;  %v3524_v22 = vpop.f32.mrb[82].mxu0  ;;  %v4282_v1 = vsel %vm2697_vm1, %v4248_v61, %v11553_v27  ;;  %v3704_v9 = vpack.c.bf16 %v3664_v50, %v3664_v50  ;;  %v3976_v61 = vrot.slane %v11625_v63, 1 }
 0x55d   : > { %v3522_v26 = vadd.f32 %v3521_v17, %v3361_v44  ;;  %v3364_v55 = vadd.f32 %v11595_v38, %v8401_v32  ;;  %v3526_v37 = vpop.f32.mrb[83].mxu0  ;;  %v4394_v3 = vsel %vm2812_vm5, %v4360_v54, %v11588_v24  ;;  %v3874_v24 = vrot.slane %v3872_v51, 1 }
 0x55e   : > { %4169 = vrot.lane.b32.xlu1 %v11620_v16, %s8898_s12  ;;  %4834 = vmatprep.mubr.bf16.mxu1 %v4394_v3  ;;  %v3977_v21 = vrot.slane %v3704_v9, 1  ;;  %v3870_v59 = vshrl.u32 %v11625_v63, 16  ;;  %v3877_v40 = vshll.u32 %v3704_v9, 16 }
 0x55f   : > { %3619 = vst.msk [vmem:[#allocation4 + $0x169] sm:$0xff] %vm1956_vm14, %v3522_v26  ;;  %v3525_v6 = vadd.f32 %v3524_v22, %v3364_v55  ;;  %4835 = vmatmul.mubr.bf16.gmra.mrb[80].mxu1 %v4282_v1  ;;  %v4026_v13 = vpop.permute.xlu0 %4025  ;;  %v8402_v18 = vpop.f32.mrb[68].mxu1  ;;  %v3665_v55 = vld [vmem:[#allocation4 + $0x150] sm:$0xff] }
 0x560   : > { %v4154_v56 = vpop.permute.xlu1 %4153  ;;  %4231 = vrot.lane.b32.xlu0 %v3868_v34, %s8894_s15  ;;  %v8403_v33 = vpop.f32.mrb[69].mxu1  ;;  %v4250_v54 = vsel %vm1956_vm14, %v11339_v12, %v4026_v13  ;;  %v3875_v10 = vor.u32 %v3874_v24, %v3870_v59  ;;  %v11666_v37 = vsel %vm875_vm2, %v3976_v61, %v3977_v21  ;;  %v3879_v3 = vrot.slane %v3877_v40, 1 }
 0x561   : > { %3620 = vst.msk [vmem:[#allocation4 + $0x171] sm:$0xff] %vm1956_vm14, %v3525_v6  ;;  %v8404_v53 = vadd.f32 %v8403_v33, %v8402_v18  ;;  %v8405_v48 = vpop.f32.mrb[70].mxu1  ;;  %v4285_v12 = vsel %vm2697_vm1, %v4250_v54, %v11604_v47  ;;  %v3667_v18 = vld [vmem:[#allocation4 + $0x160] sm:$0x3] }
 0x562   : > { %4075 = vrot.lane.b32.xlu1 %v11620_v16, %s8893_s21  ;;  %v8406_v27 = vpop.f32.mrb[71].mxu1  ;;  %v3880_v13 = vsel %vm650_vm3, %v3875_v10, %v3879_v3 }
 0x563   : > { %v8407_v28 = vadd.f32 %v8406_v27, %v8405_v48  ;;  %v4216_v36 = vpop.permute.xlu0 %4215  ;;  %v3369_v41 = vadd.f32 %v11595_v38, %v8404_v53  ;;  %v3529_v20 = vpop.f32.mrb[84].mxu0  ;;  %v3706_v48 = vpack.c.bf16 %v3667_v18, %v3667_v18 }
 0x564   : > { %v11641_v4 = vpop.permute.xlu1 %4059  ;;  %4201 = vrot.lane.b32.xlu0 %v11625_v63, %s8895_s24  ;;  %v3531_v35 = vpop.f32.mrb[85].mxu0  ;;  %v4474_v15 = vsel %vm2894_vm12, %v4440_v29, %v4216_v36 }
 0x565   : > { %v3530_v62 = vadd.f32 %v3529_v20, %v3369_v41  ;;  %4996 = vmatmul.mubr.bf16.gmra.mrb[96].mxu0 %v4474_v15  ;;  %v3372_v17 = vadd.f32 %v11595_v38, %v8407_v28  ;;  %v3532_v45 = vpop.f32.mrb[86].mxu0  ;;  %v4330_v38 = vsel %vm2746_vm13, %v11604_v47, %v4090_v46  ;;  %v3980_v28 = vrot.slane %v3706_v48, 1 }
 0x566   : > { %4137 = vrot.lane.b32.xlu1 %v3868_v34, %s8899_s29  ;;  %8200 = vmatprep.mubr.msk.bf16.mxu0 %vm1956_vm14, %v11402_v39  ;;  %v3534_v2 = vpop.f32.mrb[87].mxu0  ;;  %v3666_v39 = vld [vmem:[#allocation4 + $0x158] sm:$0xff]  ;;  %v3889_v41 = vshll.u32 %v3706_v48, 16 }
 0x567   : > { %3621 = vst.msk [vmem:[#allocation4 + $0x181] sm:$0xff] %vm1956_vm14, %v3530_v62  ;;  %v3533_v32 = vadd.f32 %v3532_v45, %v3372_v17  ;;  %v4186_v44 = vpop.permute.xlu0 %4185  ;;  %v11668_v1 = vpack.c.bf16 %v3666_v39, %v3665_v55  ;;  %v3668_v45 = vld [vmem:[#allocation4 + $0x168] sm:$0xff] }
 0x568   : > { %v4122_v22 = vpop.permute.xlu1 %4121  ;;  %4107 = vrot.lane.b32.xlu0 %v11625_v63, %s8896_s27  ;;  %v4442_v47 = vsel %vm2861_vm11, %v4154_v56, %v4186_v44  ;;  %v3669_v20 = vld [vmem:[#allocation4 + $0x170] sm:$0xff]  ;;  %v3891_v61 = vrot.slane %v3889_v41, 1  ;;  %v3670_v40 = vld [vmem:[#allocation4 + $0x178] sm:$0x3]  ;;  %v3675_v41 = vld [vmem:[#allocation4 + $0x1a0] sm:$0xff] }
 0x569   : > { %3622 = vst.msk [vmem:[#allocation4 + $0x189] sm:$0xff] %vm1956_vm14, %v3533_v32  ;;  %v4362_v19 = vsel %vm2779_vm15, %v4330_v38, %v4122_v22  ;;  %v3884_v33 = vshll.u32 %v11668_v1, 16  ;;  %v3882_v36 = vshrl.u32 %v11668_v1, 16  ;;  %v11700_v32 = vpack.c.bf16 %v3669_v20, %v3668_v45  ;;  %v3676_v45 = vld [vmem:[#allocation4 + $0x1a8] sm:$0x3] }
 0x56a   : > { %4043 = vrot.lane.b32.xlu1 %v3868_v34, %s8892_s20  ;;  %v4397_v26 = vsel %vm2812_vm5, %v4362_v19, %v4154_v56  ;;  %v3979_v56 = vrot.slane %v11668_v1, 1  ;;  %v3708_v39 = vpack.c.bf16 %v3670_v40, %v3670_v40  ;;  %v11765_v40 = vpack.c.bf16 %v3676_v45, %v3676_v45 }
 0x56b   : > { %4842 = vmatprep.mubr.bf16.mxu1 %v4397_v26  ;;  %v4092_v46 = vpop.permute.xlu0 %4091  ;;  %v3886_v27 = vrot.slane %v3884_v33, 1  ;;  %v3896_v38 = vshll.u32 %v11700_v32, 16  ;;  %v3982_v55 = vrot.slane %v11700_v32, 1 }
 0x56c   : > { %v4028_v6 = vpop.permute.xlu1 %4027  ;;  %4843 = vmatmul.mubr.bf16.gmra.mrb[84].mxu1 %v4285_v12  ;;  %4171 = vrot.lane.b32.xlu0 %v11666_v37, %s8898_s12  ;;  %v4332_v9 = vsel %vm2746_vm13, %v11641_v4, %v4092_v46  ;;  %v11697_v24 = vsel %vm875_vm2, %v3979_v56, %v3980_v28  ;;  %v3983_v3 = vrot.slane %v3708_v39, 1 }
 0x56d   : > { %v3887_v15 = vor.u32 %v3886_v27, %v3882_v36  ;;  %v3898_v26 = vrot.slane %v3896_v38, 1  ;;  %v3674_v36 = vld [vmem:[#allocation4 + $0x198] sm:$0xff] }
 0x56e   : > { %4233 = vrot.lane.b32.xlu1 %v3880_v13, %s8894_s15  ;;  %v3671_v46 = vld [vmem:[#allocation4 + $0x180] sm:$0xff]  ;;  %v11736_v56 = vsel %vm875_vm2, %v3982_v55, %v3983_v3  ;;  %v4010_v55 = vshll.u32 %v11765_v40, 16 }
 0x56f   : > { %v4156_v34 = vpop.permute.xlu0 %4155  ;;  %v3892_v21 = vsel %vm650_vm3, %v3887_v15, %v3891_v61 }
 0x570   : > { %v4218_v50 = vpop.permute.xlu1 %4217  ;;  %4077 = vrot.lane.b32.xlu0 %v11666_v37, %s8893_s21  ;;  %v3672_v10 = vld [vmem:[#allocation4 + $0x188] sm:$0xff]  ;;  %v3673_v48 = vld [vmem:[#allocation4 + $0x190] sm:$0x3] }
 0x571   : > { %v4477_v53 = vsel %vm2894_vm12, %v4442_v47, %v4218_v50  ;;  %v11722_v18 = vpack.c.bf16 %v3672_v10, %v3671_v46 }
 0x572   : > { %4203 = vrot.lane.b32.xlu1 %v11668_v1, %s8895_s24  ;;  %5004 = vmatmul.mubr.bf16.gmra.mrb[100].mxu0 %v4477_v53 }
 0x573   : > { %8201 = vmatprep.mubr.msk.bf16.mxu0 %vm1956_vm14, %v11426_v25  ;;  %v11683_v51 = vpop.permute.xlu0 %4061  ;;  %v4252_v25 = vsel %vm1956_vm14, %v11363_v23, %v4028_v6  ;;  %v3894_v6 = vshrl.u32 %v11700_v32, 16  ;;  %v3988_v28 = vshll.u32 %v11722_v18, 16  ;;  %v3986_v61 = vshrl.u32 %v11722_v18, 16 }
 0x574   : > { %v4188_v29 = vpop.permute.xlu1 %4187  ;;  %4139 = vrot.lane.b32.xlu0 %v3880_v13, %s8899_s29  ;;  %v4288_v23 = vsel %vm2697_vm1, %v4252_v25, %v11641_v4  ;;  %v11744_v25 = vpack.c.bf16 %v3673_v48, %v3673_v48 }
 0x575   : > { %v4444_v54 = vsel %vm2861_vm11, %v4156_v34, %v4188_v29  ;;  %v3899_v50 = vor.u32 %v3898_v26, %v3894_v6  ;;  %v3990_v15 = vrot.slane %v3988_v28, 1  ;;  %v3999_v6 = vrot.slane %v11722_v18, 1  ;;  %v5198_v28 = vld [vmem:[#allocation5 + $0x10] sm:$0x3] }
 0x576   : > { %4109 = vrot.lane.b32.xlu1 %v11668_v1, %s8896_s27 }
 0x577   : > { %v4124_v35 = vpop.permute.xlu0 %4123 }
 0x578   : > { %v4364_v62 = vsel %vm2779_vm15, %v4332_v9, %v4124_v35  ;;  %v4094_v17 = vpop.permute.xlu1 %4093  ;;  %4045 = vrot.lane.b32.xlu0 %v3880_v13, %s8892_s20  ;;  %v3901_v13 = vshll.u32 %v3708_v39, 16 }
 0x579   : > { %v4400_v2 = vsel %vm2812_vm5, %v4364_v62, %v4156_v34  ;;  %v4334_v34 = vsel %vm2746_vm13, %v11683_v51, %v4094_v17 }
 0x57a   : > { %4173 = vrot.lane.b32.xlu1 %v11697_v24, %s8898_s12  ;;  %4850 = vmatprep.mubr.bf16.mxu1 %v4400_v2 }
 0x57b   : > { %4851 = vmatmul.mubr.bf16.gmra.mrb[88].mxu1 %v4288_v23  ;;  %v4030_v44 = vpop.permute.xlu0 %4029  ;;  %v3993_v23 = vshll.u32 %v11744_v25, 16 }
 0x57c   : > { %v4158_v59 = vpop.permute.xlu1 %4157  ;;  %4235 = vrot.lane.b32.xlu0 %v3892_v21, %s8894_s15  ;;  %v4254_v33 = vsel %vm1956_vm14, %v11387_v60, %v4030_v44  ;;  %v3903_v60 = vrot.slane %v3901_v13, 1  ;;  %v4000_v13 = vrot.slane %v11744_v25, 1 }
 0x57d   : > { %v4291_v29 = vsel %vm2697_vm1, %v4254_v33, %v11683_v51  ;;  %v11748_v51 = vpack.c.bf16 %v3675_v41, %v3674_v36  ;;  %v5251_v41 = vpack.c.bf16 %v5198_v28, %v5198_v28 }
 0x57e   : > { %4079 = vrot.lane.b32.xlu1 %v11697_v24, %s8893_s21  ;;  %v11742_v9 = vsel %vm650_vm3, %v3899_v50, %v3903_v60 }
 0x57f   : > { %v4220_v22 = vpop.permute.xlu0 %4219  ;;  %v4005_v44 = vshll.u32 %v11748_v51, 16  ;;  %v5294_v45 = vshll.u32 %v5251_v41, 16 }
 0x580   : > { %v11712_v19 = vpop.permute.xlu1 %4063  ;;  %4205 = vrot.lane.b32.xlu0 %v11700_v32, %s8895_s24  ;;  %v4480_v4 = vsel %vm2894_vm12, %v4444_v54, %v4220_v22  ;;  %v3995_v54 = vrot.slane %v3993_v23, 1  ;;  %v4003_v22 = vshrl.u32 %v11748_v51, 16 }
 0x581   : > { %5012 = vmatmul.mubr.bf16.gmra.mrb[104].mxu0 %v4480_v4  ;;  %v4007_v39 = vrot.slane %v4005_v44, 1  ;;  %v5296_v44 = vrot.slane %v5294_v45, 1 }
 0x582   : > { %4141 = vrot.lane.b32.xlu1 %v3892_v21, %s8899_s29  ;;  %8202 = vmatprep.mubr.msk.bf16.mxu0 %vm1956_vm14, %v11450_v30 }
 0x583   : > { %v4190_v12 = vpop.permute.xlu0 %4189  ;;  %v4008_v33 = vor.u32 %v4007_v39, %v4003_v22 }
 0x584   : > { %v4126_v47 = vpop.permute.xlu1 %4125  ;;  %4111 = vrot.lane.b32.xlu0 %v11700_v32, %s8896_s27  ;;  %v4446_v62 = vsel %vm2861_vm11, %v4158_v59, %v4190_v12 }
 0x585   : > { %v4366_v30 = vsel %vm2779_vm15, %v4334_v34, %v4126_v47  ;;  %v4012_v47 = vrot.slane %v4010_v55, 1 }
 0x586   : > { %4047 = vrot.lane.b32.xlu1 %v3892_v21, %s8892_s20  ;;  %v4403_v53 = vsel %vm2812_vm5, %v4366_v30, %v4158_v59  ;;  %v3991_v59 = vor.u32 %v3990_v15, %v3986_v61 }
 0x587   : > { %4858 = vmatprep.mubr.bf16.mxu1 %v4403_v53  ;;  %v4096_v27 = vpop.permute.xlu0 %4095  ;;  %v4013_v53 = vsel %vm650_vm3, %v4008_v33, %v4012_v47 }
 0x588   : > { %v4032_v20 = vpop.permute.xlu1 %4031  ;;  %4859 = vmatmul.mubr.bf16.gmra.mrb[92].mxu1 %v4291_v29  ;;  %4175 = vrot.lane.b32.xlu0 %v11736_v56, %s8898_s12  ;;  %v3996_v26 = vsel %vm650_vm3, %v3991_v59, %v3995_v54  ;;  %v5197_v29 = vld [vmem:[#allocation5 + $0x8] sm:$0xff]  ;;  %v5511_v54 = vrot.slane %v5251_v41, 1 }
 0x589   : > { %v4256_v4 = vsel %vm1956_vm14, %v11408_v5, %v4032_v20 }
 0x58a   : > { %4237 = vrot.lane.b32.xlu1 %v11742_v9, %s8894_s15  ;;  %v4294_v5 = vsel %vm2697_vm1, %v4256_v4, %v11712_v19 }
 0x58b   : > { %v11750_v35 = vpop.permute.xlu0 %4159 }
 0x58c   : > { %v4222_v17 = vpop.permute.xlu1 %4221  ;;  %4143 = vrot.lane.b32.xlu0 %v11742_v9, %s8899_s29 }
 0x58d   : > { %v4483_v2 = vsel %vm2894_vm12, %v4446_v62, %v4222_v17 }
 0x58e   : > { %4207 = vrot.lane.b32.xlu1 %v11722_v18, %s8895_s24  ;;  %5020 = vmatmul.mubr.bf16.gmra.mrb[108].mxu0 %v4483_v2 }
 0x58f   : > { %8203 = vmatprep.mubr.msk.bf16.mxu0 %vm1956_vm14, %v11474_v58  ;;  %v11763_v21 = vpop.permute.xlu0 %4065  ;;  %v4336_v58 = vsel %vm2746_vm13, %v11712_v19, %v4096_v27  ;;  %v5196_v27 = vld [vmem:[#allocation5] sm:$0xff] }
 0x590   : > { %v11767_v38 = vpop.permute.xlu1 %4191  ;;  %4081 = vrot.lane.b32.xlu0 %v11736_v56, %s8893_s21  ;;  %v11877_v60 = vpack.c.bf16 %v5197_v29, %v5196_v27 }
 0x591   : > { %v4448_v30 = vsel %vm2861_vm11, %v11750_v35, %v11767_v38 }
 0x592   : > { %4113 = vrot.lane.b32.xlu1 %v11722_v18, %s8896_s27  ;;  %v11866_v18 = vsel %vm875_vm2, %v3999_v6, %v4000_v13  ;;  %v5289_v20 = vshll.u32 %v11877_v60, 16  ;;  %v5287_v62 = vshrl.u32 %v11877_v60, 16  ;;  %v5510_v38 = vrot.slane %v11877_v60, 1 }
 0x593   : > { %v4128_v10 = vpop.permute.xlu0 %4127 }
 0x594   : > { %v4368_v46 = vsel %vm2779_vm15, %v4336_v58, %v4128_v10  ;;  %v11781_v12 = vpop.permute.xlu1 %4097  ;;  %4239 = vrot.lane.b32.xlu0 %v3996_v26, %s8894_s15  ;;  %v5291_v17 = vrot.slane %v5289_v20, 1  ;;  %v5512_v39 = vsel %vm875_vm2, %v5510_v38, %v5511_v54 }
 0x595   : > { %v4406_v3 = vsel %vm2812_vm5, %v4368_v46, %v11750_v35 }
 0x596   : > { %4145 = vrot.lane.b32.xlu1 %v3996_v26, %s8899_s29  ;;  %4866 = vmatprep.mubr.bf16.mxu1 %v4406_v3  ;;  %v5292_v23 = vor.u32 %v5291_v17, %v5287_v62 }
 0x597   : > { %4867 = vmatmul.mubr.bf16.gmra.mrb[96].mxu1 %v4294_v5  ;;  %v4034_v34 = vpop.permute.xlu0 %4033 }
 0x598   : > { %v4162_v19 = vpop.permute.xlu1 %4161  ;;  %4049 = vrot.lane.b32.xlu0 %v11742_v9, %s8892_s20  ;;  %v4338_v9 = vsel %vm2746_vm13, %v11763_v21, %v11781_v12  ;;  %v4258_v25 = vsel %vm1956_vm14, %v11435_v49, %v4034_v34  ;;  %v5297_v49 = vsel %vm650_vm3, %v5292_v23, %v5296_v44 }
 0x599   : > { %v4297_v61 = vsel %vm2697_vm1, %v4258_v25, %v11763_v21 }
 0x59a   : > { %4177 = vrot.lane.b32.xlu1 %v11866_v18, %s8898_s12 }
 0x59b   : > { %v4224_v50 = vpop.permute.xlu0 %4223 }
 0x59c   : > { %v4068_v48 = vpop.permute.xlu1 %4067  ;;  %4209 = vrot.lane.b32.xlu0 %v11748_v51, %s8895_s24  ;;  %v4486_v0 = vsel %vm2894_vm12, %v4448_v30, %v4224_v50  ;;  %s8901_s24 = smov 120  }
 0x59d   : > { %5028 = vmatmul.mubr.bf16.gmra.mrb[112].mxu0 %v4486_v0 }
 0x59e   : > { %4241 = vrot.lane.b32.xlu1 %v4013_v53, %s8894_s15  ;;  %8204 = vmatprep.mubr.msk.bf16.mxu0 %vm1956_vm14, %v11502_v11  ;;  %s8900_s15 = smov 72  }
 0x59f   : > { %v4194_v36 = vpop.permute.xlu0 %4193 }
 0x5a0   : > { %v4130_v35 = vpop.permute.xlu1 %4129  ;;  %5592 = vrot.lane.b32.xlu0 %v5297_v49, %s8890_s25  ;;  %v4450_v58 = vsel %vm2861_vm11, %v4162_v19, %v4194_v36 }
 0x5a1   : > { %v4370_v15 = vsel %vm2779_vm15, %v4338_v9, %v4130_v35 }
 0x5a2   : > { %v4409_v11 = vsel %vm2812_vm5, %v4370_v15, %v4162_v19  ;;  %5624 = vrot.lane.b32.xlu1 %v5512_v39, %s8892_s20  ;;  %v8716_v15 = vld [vmem:[%s13431_s7 + $0x8] sm:$0xff]  }
 0x5a3   : > { %4874 = vmatprep.mubr.bf16.mxu1 %v4409_v11  ;;  %v4100_v2 = vpop.permute.xlu0 %4099 }
 0x5a4   : > { %v4036_v59 = vpop.permute.xlu1 %4035  ;;  %4875 = vmatmul.mubr.bf16.gmra.mrb[100].mxu1 %v4297_v61  ;;  %v4340_v55 = vsel %vm2746_vm13, %v4068_v48, %v4100_v2 }
 0x5a5   : > { %v4260_v46 = vsel %vm1956_vm14, %v11456_v52, %v4036_v59 }
 0x5a6   : > { %v4300_v5 = vsel %vm2697_vm1, %v4260_v46, %v4068_v48 }
 0x5a7   : > { %v4164_v22 = vpop.permute.xlu0 %4163 }
 0x5a8   : > { %v4226_v4 = vpop.permute.xlu1 %4225 }
 0x5a9   : > { %v4489_v21 = vsel %vm2894_vm12, %v4450_v58, %v4226_v4 }
 0x5aa   : > { %5036 = vmatmul.mubr.bf16.gmra.mrb[116].mxu0 %v4489_v21 }
 0x5ab   : > { %8205 = vmatprep.mubr.msk.bf16.mxu0 %vm1956_vm14, %v11533_v57  ;;  %v4070_v10 = vpop.permute.xlu0 %4069 }
 0x5ac   : > { %v4196_v26 = vpop.permute.xlu1 %4195 }
 0x5ad   : > { %v4452_v57 = vsel %vm2861_vm11, %v4164_v22, %v4196_v26 }
 0x5af   : > { %v4132_v12 = vpop.permute.xlu0 %4131 }
 0x5b0   : > { %v4372_v3 = vsel %vm2779_vm15, %v4340_v55, %v4132_v12  ;;  %v4102_v6 = vpop.permute.xlu1 %4101  ;;  %v8718_v12 = vld [vmem:[%s13431_s7 + $0x18] sm:$0xff]  }
 0x5b1   : > { %v4412_v13 = vsel %vm2812_vm5, %v4372_v3, %v4164_v22  ;;  %v4342_v50 = vsel %vm2746_vm13, %v4070_v10, %v4102_v6  ;;  %v8717_v22 = vld [vmem:[%s13431_s7 + $0x10] sm:$0xff]  }
 0x5b2   : > { %4882 = vmatprep.mubr.bf16.mxu1 %v4412_v13 }
 0x5b3   : > { %4883 = vmatmul.mubr.bf16.gmra.mrb[104].mxu1 %v4300_v5  ;;  %v4038_v34 = vpop.permute.xlu0 %4037 }
 0x5b4   : > { %v4166_v33 = vpop.permute.xlu1 %4165  ;;  %v4262_v53 = vsel %vm1956_vm14, %v11483_v31, %v4038_v34  ;;  %v8719_v34 = vld [vmem:[%s13431_s7 + $0x20] sm:$0xff]  }
 0x5b5   : > { %v4303_v28 = vsel %vm2697_vm1, %v4262_v53, %v4070_v10 }
 0x5b7   : > { %v4228_v47 = vpop.permute.xlu0 %4227 }
 0x5b8   : > { %v4072_v19 = vpop.permute.xlu1 %4071  ;;  %v4492_v30 = vsel %vm2894_vm12, %v4452_v57, %v4228_v47 }
 0x5b9   : > { %5044 = vmatmul.mubr.bf16.gmra.mrb[120].mxu0 %v4492_v30 }
 0x5ba   : > { %8206 = vmatprep.mubr.msk.bf16.mxu0 %vm1956_vm14, %v11578_v7  ;;  %v8715_v7 = vld [vmem:[%s13431_s7] sm:$0xff]  }
 0x5bb   : > { %v4198_v52 = vpop.permute.xlu0 %4197  ;;  %6276 = vmatpush1.bf16.msra.mxu1 %v8715_v7 }
 0x5bc   : > { %v4134_v48 = vpop.permute.xlu1 %4133  ;;  %v4454_v20 = vsel %vm2861_vm11, %v4166_v33, %v4198_v52  ;;  %6277 = vmatprep.subr.bf16.mxu1 %v8897_v14 }
 0x5bd   : > { %v4374_v0 = vsel %vm2779_vm15, %v4342_v50, %v4134_v48  ;;  %v8720_v48 = vld [vmem:[%s13431_s7 + $0x28] sm:$0xff]  }
 0x5be   : > { %v4415_v27 = vsel %vm2812_vm5, %v4374_v0, %v4166_v33 }
 0x5bf   : > { %4890 = vmatprep.mubr.bf16.mxu1 %v4415_v27  ;;  %v4104_v29 = vpop.permute.xlu0 %4103  ;;  %6278 = vmatpush1.bf16.msra.mxu1 %v8716_v15 }
 0x5c0   : > { %v4040_v36 = vpop.permute.xlu1 %4039  ;;  %4891 = vmatmul.mubr.bf16.gmra.mrb[108].mxu1 %v4303_v28  ;;  %v4344_v62 = vsel %vm2746_vm13, %v4072_v19, %v4104_v29  ;;  %6279 = vmatprep.subr.bf16.mxu1 %v8897_v14 }
 0x5c1   : > { %v4264_v17 = vsel %vm1956_vm14, %v11514_v43, %v4040_v36 }
 0x5c3   : > { %v4168_v41 = vpop.permute.xlu0 %4167  ;;  %6280 = vmatpush1.bf16.msra.mxu1 %v8717_v22 }
 0x5c4   : > { %v4230_v9 = vpop.permute.xlu1 %4229  ;;  %6281 = vmatprep.subr.bf16.mxu1 %v8897_v14 }
 0x5c5   : > { %v4495_v31 = vsel %vm2894_vm12, %v4454_v20, %v4230_v9 }
 0x5c6   : > { %5052 = vmatmul.mubr.bf16.gmra.mrb[124].mxu0 %v4495_v31 }
 0x5c7   : > { %8207 = vmatprep.mubr.msk.bf16.mxu0 %vm1956_vm14, %v11620_v16  ;;  %v4074_v25 = vpop.permute.xlu0 %4073  ;;  %v4306_v16 = vsel %vm2697_vm1, %v4264_v17, %v4072_v19  ;;  %6282 = vmatpush1.bf16.msra.mxu1 %v8718_v12 }
 0x5c8   : > { %v4200_v35 = vpop.permute.xlu1 %4199  ;;  %6283 = vmatprep.subr.bf16.mxu1 %v8897_v14 }
 0x5c9   : > { %v4456_v59 = vsel %vm2861_vm11, %v4168_v41, %v4200_v35 }
 0x5cb   : > { %v4136_v45 = vpop.permute.xlu0 %4135  ;;  %6284 = vmatpush1.bf16.msra.mxu1 %v8719_v34 }
 0x5cc   : > { %v4376_v11 = vsel %vm2779_vm15, %v4344_v62, %v4136_v45  ;;  %v4106_v2 = vpop.permute.xlu1 %4105  ;;  %6285 = vmatprep.subr.bf16.mxu1 %v8897_v14 }
 0x5cd   : > { %v4418_v61 = vsel %vm2812_vm5, %v4376_v11, %v4168_v41  ;;  %v4346_v39 = vsel %vm2746_vm13, %v4074_v25, %v4106_v2 }
 0x5ce   : > { %4898 = vmatprep.mubr.bf16.mxu1 %v4418_v61 }
 0x5cf   : > { %4899 = vmatmul.mubr.bf16.gmra.mrb[112].mxu1 %v4306_v16  ;;  %v4042_v23 = vpop.permute.xlu0 %4041 }
 0x5d0   : > { %v4170_v44 = vpop.permute.xlu1 %4169  ;;  %v4266_v58 = vsel %vm1956_vm14, %v11548_v42, %v4042_v23  ;;  %6286 = vmatpush1.bf16.msra.mxu1 %v8720_v48 }
 0x5d1   : > { %v4309_v26 = vsel %vm2697_vm1, %v4266_v58, %v4074_v25  ;;  %6287 = vmatprep.subr.bf16.mxu1 %v8897_v14 }
 0x5d3   : > { %v4232_v49 = vpop.permute.xlu0 %4231 }
 0x5d4   : > { %v4076_v38 = vpop.permute.xlu1 %4075  ;;  %v4498_v43 = vsel %vm2894_vm12, %v4456_v59, %v4232_v49  ;;  %v8722_v59 = vld [vmem:[%s13431_s7 + $0x38] sm:$0xff]  }
 0x5d5   : > { %5060 = vmatmul.mubr.bf16.gmra.mrb[128].mxu0 %v4498_v43 }
 0x5d6   : > { %8208 = vmatprep.mubr.msk.bf16.mxu0 %vm1956_vm14, %v11666_v37 }
 0x5d7   : > { %v4202_v54 = vpop.permute.xlu0 %4201 }
 0x5d8   : > { %v4138_v4 = vpop.permute.xlu1 %4137  ;;  %v4458_v42 = vsel %vm2861_vm11, %v4170_v44, %v4202_v54 }
 0x5d9   : > { %v4378_v21 = vsel %vm2779_vm15, %v4346_v39, %v4138_v4 }
 0x5da   : > { %v4421_v10 = vsel %vm2812_vm5, %v4378_v21, %v4170_v44 }
 0x5db   : > { %4906 = vmatprep.mubr.bf16.mxu1 %v4421_v10  ;;  %v4108_v37 = vpop.permute.xlu0 %4107 }
 0x5dc   : > { %v4044_v55 = vpop.permute.xlu1 %4043  ;;  %4907 = vmatmul.mubr.bf16.gmra.mrb[116].mxu1 %v4309_v26  ;;  %v4348_v33 = vsel %vm2746_vm13, %v4076_v38, %v4108_v37 }
 0x5dd   : > { %v4268_v57 = vsel %vm1956_vm14, %v11584_v8, %v4044_v55 }
 0x5df   : > { %v4172_v46 = vpop.permute.xlu0 %4171 }
 0x5e0   : > { %v4234_v3 = vpop.permute.xlu1 %4233 }
 0x5e1   : > { %v4501_v6 = vsel %vm2894_vm12, %v4458_v42, %v4234_v3 }
 0x5e2   : > { %5068 = vmatmul.mubr.bf16.gmra.mrb[132].mxu0 %v4501_v6 }
 0x5e3   : > { %8209 = vmatprep.mubr.msk.bf16.mxu0 %vm1956_vm14, %v11697_v24  ;;  %v4078_v13 = vpop.permute.xlu0 %4077  ;;  %v4312_v24 = vsel %vm2697_vm1, %v4268_v57, %v4076_v38  ;;  %v4017_v38 = vrot.slane %v11765_v40, 1  ;;  %v12018_v57 = vld [vmem:[#allocation9] ss:$0 sm:$0xff] }
 0x5e4   : > { %v4204_v5 = vpop.permute.xlu1 %4203 }
 0x5e5   : > { %v4460_v8 = vsel %vm2861_vm11, %v4172_v46, %v4204_v5 }
 0x5e7   : > { %v4140_v47 = vpop.permute.xlu0 %4139 }
 0x5e8   : > { %v4380_v19 = vsel %vm2779_vm15, %v4348_v33, %v4140_v47  ;;  %v4110_v30 = vpop.permute.xlu1 %4109  ;;  %v8724_v47 = vld [vmem:[%s13431_s7 + $0x48] sm:$0xff]  }
 0x5e9   : > { %v4424_v52 = vsel %vm2812_vm5, %v4380_v19, %v4172_v46  ;;  %v4350_v36 = vsel %vm2746_vm13, %v4078_v13, %v4110_v30 }
 0x5ea   : > { %4914 = vmatprep.mubr.bf16.mxu1 %v4424_v52 }
 0x5eb   : > { %4915 = vmatmul.mubr.bf16.gmra.mrb[120].mxu1 %v4312_v24  ;;  %v4046_v50 = vpop.permute.xlu0 %4045 }
 0x5ec   : > { %v4174_v53 = vpop.permute.xlu1 %4173  ;;  %v4270_v41 = vsel %vm1956_vm14, %v11625_v63, %v4046_v50 }
 0x5ed   : > { %v4315_v25 = vsel %vm2697_vm1, %v4270_v41, %v4078_v13 }
 0x5ef   : > { %v4236_v0 = vpop.permute.xlu0 %4235 }
 0x5f0   : > { %v4080_v27 = vpop.permute.xlu1 %4079  ;;  %v4504_v29 = vsel %vm2894_vm12, %v4460_v8, %v4236_v0  ;;  %v8725_v0 = vld [vmem:[%s13431_s7 + $0x50] sm:$0xff]  }
 0x5f1   : > { %5076 = vmatmul.mubr.bf16.gmra.mrb[136].mxu0 %v4504_v29 }
 0x5f2   : > { %8210 = vmatprep.mubr.msk.bf16.mxu0 %vm1956_vm14, %v11736_v56  ;;  %v8721_v56 = vld [vmem:[%s13431_s7 + $0x30] sm:$0xff]  }
 0x5f3   : > { %v4206_v28 = vpop.permute.xlu0 %4205  ;;  %6288 = vmatpush1.bf16.msra.mxu1 %v8721_v56 }
 0x5f4   : > { %v4142_v7 = vpop.permute.xlu1 %4141  ;;  %v4462_v62 = vsel %vm2861_vm11, %v4174_v53, %v4206_v28  ;;  %6289 = vmatprep.subr.bf16.mxu1 %v8897_v14 }
 0x5f5   : > { %v4382_v20 = vsel %vm2779_vm15, %v4350_v36, %v4142_v7 }
 0x5f6   : > { %v4427_v9 = vsel %vm2812_vm5, %v4382_v20, %v4174_v53 }
 0x5f7   : > { %4922 = vmatprep.mubr.bf16.mxu1 %v4427_v9  ;;  %v4112_v31 = vpop.permute.xlu0 %4111  ;;  %6290 = vmatpush1.bf16.msra.mxu1 %v8722_v59 }
 0x5f8   : > { %v4048_v35 = vpop.permute.xlu1 %4047  ;;  %4923 = vmatmul.mubr.bf16.gmra.mrb[124].mxu1 %v4315_v25  ;;  %v4352_v45 = vsel %vm2746_vm13, %v4080_v27, %v4112_v31  ;;  %6291 = vmatprep.subr.bf16.mxu1 %v8897_v14 }
 0x5f9   : > { %v4272_v11 = vsel %vm1956_vm14, %v11668_v1, %v4048_v35  ;;  %v4016_v1 = vrot.slane %v11748_v51, 1  ;;  %v8723_v51 = vld [vmem:[%s13431_s7 + $0x40] sm:$0xff]  }
 0x5fa   : > { %v4318_v44 = vsel %vm2697_vm1, %v4272_v11, %v4080_v27 }
 0x5fb   : > { %v4176_v15 = vpop.permute.xlu0 %4175  ;;  %v4018_v22 = vsel %vm875_vm2, %v4016_v1, %v4017_v38  ;;  %6292 = vmatpush1.bf16.msra.mxu1 %v8723_v51 }
 0x5fc   : > { %v4238_v63 = vpop.permute.xlu1 %4237  ;;  %6293 = vmatprep.subr.bf16.mxu1 %v8897_v14 }
 0x5fd   : > { %v4507_v17 = vsel %vm2894_vm12, %v4462_v62, %v4238_v63 }
 0x5fe   : > { %5084 = vmatmul.mubr.bf16.gmra.mrb[140].mxu0 %v4507_v17 }
 0x5ff   : > { %8211 = vmatprep.mubr.msk.bf16.mxu0 %vm1956_vm14, %v11866_v18  ;;  %v4144_v2 = vpop.permute.xlu0 %4143  ;;  %6294 = vmatpush1.bf16.msra.mxu1 %v8724_v47 }
 0x600   : > { %v4384_v61 = vsel %vm2779_vm15, %v4352_v45, %v4144_v2  ;;  %v4208_v16 = vpop.permute.xlu1 %4207  ;;  %6295 = vmatprep.subr.bf16.mxu1 %v8897_v14 }
 0x601   : > { %v4430_v23 = vsel %vm2812_vm5, %v4384_v61, %v4176_v15  ;;  %v4464_v43 = vsel %vm2861_vm11, %v4176_v15, %v4208_v16  ;;  %v8726_v15 = vld [vmem:[%s13431_s7 + $0x58] sm:$0xff]  }
 0x602   : > { %4930 = vmatprep.mubr.bf16.mxu1 %v4430_v23 }
 0x603   : > { %4931 = vmatmul.mubr.bf16.gmra.mrb[128].mxu1 %v4318_v44  ;;  %v4082_v49 = vpop.permute.xlu0 %4081 }
 0x604   : > { %v4114_v18 = vpop.permute.xlu1 %4113  ;;  %6296 = vmatpush1.bf16.msra.mxu1 %v8725_v0 }
 0x605   : > { %v4354_v40 = vsel %vm2746_vm13, %v4082_v49, %v4114_v18  ;;  %6297 = vmatprep.subr.bf16.mxu1 %v8897_v14 }
 0x607   : > { %v4240_v54 = vpop.permute.xlu0 %4239 }
 0x608   : > { %v4146_v39 = vpop.permute.xlu1 %4145  ;;  %v4510_v58 = vsel %vm2894_vm12, %v4464_v43, %v4240_v54  ;;  %6298 = vmatpush1.bf16.msra.mxu1 %v8726_v15 }
 0x609   : > { %5092 = vmatmul.mubr.bf16.gmra.mrb[144].mxu0 %v4510_v58  ;;  %v4386_v21 = vsel %vm2779_vm15, %v4354_v40, %v4146_v39  ;;  %6299 = vmatprep.subr.bf16.mxu1 %v8897_v14 }
 0x60a   : > { %8212 = vmatprep.mubr.msk.bf16.mxu0 %vm1956_vm14, %v4018_v22  ;;  %v8727_v22 = vld [vmem:[%s13431_s7 + $0x60] sm:$0xff]  }
 0x60b   : > { %v4050_v4 = vpop.permute.xlu0 %4049 }
 0x60c   : > { %v4274_v10 = vsel %vm1956_vm14, %v11700_v32, %v4050_v4  ;;  %v4178_v37 = vpop.permute.xlu1 %4177  ;;  %v8424_v26 = vpop.f32.mrb[72].mxu1  ;;  %6300 = vmatpush1.bf16.msra.mxu1 %v8727_v22 }
 0x60d   : > { %v8425_v55 = vpop.f32.mrb[73].mxu1  ;;  %v4433_v46 = vsel %vm2812_vm5, %v4386_v21, %v4178_v37  ;;  %v4321_v12 = vsel %vm2697_vm1, %v4274_v10, %v4082_v49  ;;  %6301 = vmatprep.subr.bf16.mxu1 %v8897_v14 }
 0x60e   : > { %v8426_v42 = vadd.f32 %v8425_v55, %v8424_v26  ;;  %v8427_v3 = vpop.f32.mrb[74].mxu1  ;;  %4938 = vmatprep.mubr.bf16.mxu1 %v4433_v46 }
 0x60f   : > { %v8428_v6 = vpop.f32.mrb[75].mxu1  ;;  %4939 = vmatmul.mubr.bf16.gmra.mrb[132].mxu1 %v4321_v12  ;;  %v4210_v13 = vpop.permute.xlu0 %4209 }
 0x610   : > { %v8429_v5 = vadd.f32 %v8428_v6, %v8427_v3  ;;  %v4466_v34 = vsel %vm2861_vm11, %v4178_v37, %v4210_v13  ;;  %v4242_v32 = vpop.permute.xlu1 %4241  ;;  %v4821_v19 = vadd.f32 %v8426_v42, %v12018_v57  ;;  %v8728_v42 = vld [vmem:[%s13431_s7 + $0x68] ss:$0 sps:$4 sm:$0xff]  }
 0x611   : > { %v4513_v33 = vsel %vm2894_vm12, %v4466_v34, %v4242_v32 }
 0x612   : > { %5100 = vmatmul.mubr.bf16.gmra.mrb[148].mxu0 %v4513_v33  ;;  %v4824_v50 = vadd.f32 %v8429_v5, %v12018_v57 }
 0x619   : > { %v4981_v30 = vpop.f32.mrb[88].mxu0 }
 0x61a   : > { %v4982_v52 = vadd.f32 %v4981_v30, %v4821_v19  ;;  %v4983_v24 = vpop.f32.mrb[89].mxu0 }
 0x61b   : > { %v4984_v53 = vpop.f32.mrb[90].mxu0 }
 0x61c   : > { %5164 = vst.msk [vmem:[#allocation5 + $0x19] sm:$0xff] %vm1444_vm4, %v4982_v52  ;;  %v4985_v48 = vadd.f32 %v4984_v53, %v4824_v50  ;;  %v4986_v8 = vpop.f32.mrb[91].mxu0 }
 0x61e   : > { %5165 = vst.msk [vmem:[#allocation5 + $0x21] sm:$0xff] %vm1444_vm4, %v4985_v48  ;;  %v6273_v48 = vsel %vm6271_vm0, %v8728_v42, 0 }
 0x61f   : > { %6302 = vmatpush1.bf16.msra.mxu1 %v6273_v48 }
 0x620   : > { %8560 = vmatprep.subr.bf16.mxu1 %v8897_v14 }
 0x623   : > { %v8430_v27 = vpop.f32.mrb[76].mxu1  ;;  %v5199_v41 = vld [vmem:[#allocation5 + $0x18] sm:$0xff] }
 0x624   : > { %v8431_v29 = vpop.f32.mrb[77].mxu1 }
 0x625   : > { %v8432_v28 = vadd.f32 %v8431_v29, %v8430_v27  ;;  %v8433_v36 = vpop.f32.mrb[78].mxu1  ;;  %v5200_v7 = vld [vmem:[#allocation5 + $0x20] sm:$0xff]  ;;  %v5201_v20 = vld [vmem:[#allocation5 + $0x28] sm:$0x3] }
 0x626   : > { %v8434_v9 = vpop.f32.mrb[79].mxu1  ;;  %v12032_v31 = vpack.c.bf16 %v5200_v7, %v5199_v41  ;;  %v5253_v25 = vpack.c.bf16 %v5201_v20, %v5201_v20 }
 0x627   : > { %v8435_v35 = vadd.f32 %v8434_v9, %v8433_v36  ;;  %v4829_v56 = vadd.f32 %v8432_v28, %v12018_v57 }
 0x628   : > { %5656 = vrot.lane.b32.xlu0 %v12032_v31, %s8900_s15  ;;  %v5513_v62 = vrot.slane %v12032_v31, 1  ;;  %v5514_v63 = vrot.slane %v5253_v25, 1  ;;  %v5301_v17 = vshll.u32 %v12032_v31, 16  ;;  %v5306_v2 = vshll.u32 %v5253_v25, 16 }
 0x629   : > { %v4989_v45 = vpop.f32.mrb[92].mxu0  ;;  %v4832_v11 = vadd.f32 %v8435_v35, %v12018_v57  ;;  %v5299_v44 = vshrl.u32 %v12032_v31, 16 }
 0x62a   : > { %v4990_v61 = vadd.f32 %v4989_v45, %v4829_v56  ;;  %v5515_v16 = vsel %vm875_vm2, %v5513_v62, %v5514_v63  ;;  %v4991_v23 = vpop.f32.mrb[93].mxu0  ;;  %v5303_v59 = vrot.slane %v5301_v17, 1  ;;  %v5308_v43 = vrot.slane %v5306_v2, 1 }
 0x62b   : > { %5626 = vrot.lane.b32.xlu1 %v5515_v16, %s8892_s20  ;;  %v4992_v49 = vpop.f32.mrb[94].mxu0 }
 0x62c   : > { %5166 = vst.msk [vmem:[#allocation5 + $0x31] sm:$0xff] %vm1444_vm4, %v4990_v61  ;;  %v4993_v1 = vadd.f32 %v4992_v49, %v4832_v11  ;;  %5720 = vrot.lane.b32.xlu0 %v5515_v16, %s8901_s24  ;;  %v4994_v38 = vpop.f32.mrb[95].mxu0  ;;  %v5304_v18 = vor.u32 %v5303_v59, %v5299_v44 }
 0x62e   : > { %5167 = vst.msk [vmem:[#allocation5 + $0x39] sm:$0xff] %vm1444_vm4, %v4993_v1  ;;  %v5309_v54 = vsel %vm650_vm3, %v5304_v18, %v5308_v43 }
 0x630   : > { %5688 = vrot.lane.b32.xlu0 %v5309_v54, %s8893_s21 }
 0x632   : > { %v8436_v39 = vpop.f32.mrb[80].mxu1 }
 0x633   : > { %v8437_v58 = vpop.f32.mrb[81].mxu1  ;;  %v5202_v21 = vld [vmem:[#allocation5 + $0x30] sm:$0xff] }
 0x634   : > { %v8438_v51 = vadd.f32 %v8437_v58, %v8436_v39  ;;  %5594 = vrot.lane.b32.xlu0 %v5309_v54, %s8890_s25  ;;  %v8439_v40 = vpop.f32.mrb[82].mxu1 }
 0x635   : > { %v8440_v4 = vpop.f32.mrb[83].mxu1  ;;  %v5203_v10 = vld [vmem:[#allocation5 + $0x38] sm:$0xff]  ;;  %v5204_v37 = vld [vmem:[#allocation5 + $0x40] sm:$0x3] }
 0x636   : > { %v8441_v26 = vadd.f32 %v8440_v4, %v8439_v40  ;;  %v12057_v55 = vpack.c.bf16 %v5203_v10, %v5202_v21  ;;  %v4837_v46 = vadd.f32 %v8438_v51, %v12018_v57  ;;  %v5255_v12 = vpack.c.bf16 %v5204_v37, %v5204_v37 }
 0x638   : > { %5752 = vrot.lane.b32.xlu1 %v12057_v55, %s8896_s27  ;;  %v4997_v3 = vpop.f32.mrb[96].mxu0  ;;  %5658 = vrot.lane.b32.xlu0 %v12057_v55, %s8900_s15  ;;  %v4840_v6 = vadd.f32 %v8441_v26, %v12018_v57  ;;  %v5516_v13 = vrot.slane %v12057_v55, 1  ;;  %v5517_v5 = vrot.slane %v5255_v12, 1  ;;  %v5313_v33 = vshll.u32 %v12057_v55, 16 }
 0x639   : > { %v4998_v34 = vadd.f32 %v4997_v3, %v4837_v46  ;;  %v4999_v32 = vpop.f32.mrb[97].mxu0  ;;  %v5318_v47 = vshll.u32 %v5255_v12, 16  ;;  %v5311_v50 = vshrl.u32 %v12057_v55, 16 }
 0x63a   : > { %v5000_v19 = vpop.f32.mrb[98].mxu0  ;;  %v5518_v30 = vsel %vm875_vm2, %v5516_v13, %v5517_v5  ;;  %v5315_v53 = vrot.slane %v5313_v33, 1 }
 0x63b   : > { %5168 = vst.msk [vmem:[#allocation5 + $0x49] sm:$0xff] %vm1444_vm4, %v4998_v34  ;;  %v5001_v52 = vadd.f32 %v5000_v19, %v4840_v6  ;;  %v5002_v24 = vpop.f32.mrb[99].mxu0  ;;  %v5320_v0 = vrot.slane %v5318_v47, 1 }
 0x63c   : > { %5816 = vrot.lane.b32.xlu1 %v5518_v30, %s8899_s29  ;;  %5722 = vrot.lane.b32.xlu0 %v5518_v30, %s8901_s24  ;;  %v5316_v8 = vor.u32 %v5315_v53, %v5311_v50 }
 0x63d   : > { %5169 = vst.msk [vmem:[#allocation5 + $0x51] sm:$0xff] %vm1444_vm4, %v5001_v52 }
 0x63e   : > { %v5321_v29 = vsel %vm650_vm3, %v5316_v8, %v5320_v0 }
 0x63f   : > { %v8442_v27 = vpop.f32.mrb[84].mxu1 }
 0x640   : > { %5628 = vrot.lane.b32.xlu1 %v5518_v30, %s8892_s20  ;;  %v8443_v28 = vpop.f32.mrb[85].mxu1  ;;  %5690 = vrot.lane.b32.xlu0 %v5321_v29, %s8893_s21 }
 0x641   : > { %v8444_v36 = vadd.f32 %v8443_v28, %v8442_v27  ;;  %v8445_v41 = vpop.f32.mrb[86].mxu1 }
 0x642   : > { %v8446_v7 = vpop.f32.mrb[87].mxu1  ;;  %v5205_v25 = vld [vmem:[#allocation5 + $0x48] sm:$0xff] }
 0x643   : > { %v8447_v20 = vadd.f32 %v8446_v7, %v8445_v41  ;;  %v4845_v9 = vadd.f32 %v8444_v36, %v12018_v57 }
 0x644   : > { %5784 = vrot.lane.b32.xlu1 %v5321_v29, %s8902_s16  ;;  %5596 = vrot.lane.b32.xlu0 %v5321_v29, %s8890_s25  ;;  %v5206_v35 = vld [vmem:[#allocation5 + $0x50] sm:$0xff]  ;;  %v5207_v56 = vld [vmem:[#allocation5 + $0x58] sm:$0x3] }
 0x645   : > { %v5005_v15 = vpop.f32.mrb[100].mxu0  ;;  %v4848_v62 = vadd.f32 %v8447_v20, %v12018_v57  ;;  %v12085_v63 = vpack.c.bf16 %v5206_v35, %v5205_v25  ;;  %v5257_v17 = vpack.c.bf16 %v5207_v56, %v5207_v56 }
 0x646   : > { %v5006_v45 = vadd.f32 %v5005_v15, %v4845_v9  ;;  %v5007_v11 = vpop.f32.mrb[101].mxu0 }
 0x647   : > { %v5008_v2 = vpop.f32.mrb[102].mxu0  ;;  %v5519_v61 = vrot.slane %v12085_v63, 1  ;;  %v5520_v16 = vrot.slane %v5257_v17, 1  ;;  %v5325_v23 = vshll.u32 %v12085_v63, 16  ;;  %v5323_v49 = vshrl.u32 %v12085_v63, 16 }
 0x648   : > { %5170 = vst.msk [vmem:[#allocation5 + $0x61] sm:$0xff] %vm1444_vm4, %v5006_v45  ;;  %v5009_v44 = vadd.f32 %v5008_v2, %v4848_v62  ;;  %5754 = vrot.lane.b32.xlu1 %v12085_v63, %s8896_s27  ;;  %v5010_v59 = vpop.f32.mrb[103].mxu0  ;;  %5660 = vrot.lane.b32.xlu0 %v12085_v63, %s8900_s15  ;;  %v5330_v38 = vshll.u32 %v5257_v17, 16 }
 0x649   : > { %v5327_v1 = vrot.slane %v5325_v23, 1  ;;  %v5521_v18 = vsel %vm875_vm2, %v5519_v61, %v5520_v16 }
 0x64a   : > { %5171 = vst.msk [vmem:[#allocation5 + $0x69] sm:$0xff] %vm1444_vm4, %v5009_v44  ;;  %v5332_v54 = vrot.slane %v5330_v38, 1 }
 0x64b   : > { %v5328_v43 = vor.u32 %v5327_v1, %v5323_v49 }
 0x64c   : > { %5818 = vrot.lane.b32.xlu1 %v5521_v18, %s8899_s29  ;;  %5724 = vrot.lane.b32.xlu0 %v5521_v18, %s8901_s24 }
 0x64d   : > { %v5333_v58 = vsel %vm650_vm3, %v5328_v43, %v5332_v54 }
 0x64e   : > { %v8448_v22 = vpop.f32.mrb[88].mxu1 }
 0x64f   : > { %v8449_v39 = vpop.f32.mrb[89].mxu1  ;;  %v5208_v21 = vld [vmem:[#allocation5 + $0x60] sm:$0xff] }
 0x650   : > { %v8450_v51 = vadd.f32 %v8449_v39, %v8448_v22  ;;  %5630 = vrot.lane.b32.xlu1 %v5521_v18, %s8892_s20  ;;  %v8451_v40 = vpop.f32.mrb[90].mxu1  ;;  %5692 = vrot.lane.b32.xlu0 %v5333_v58, %s8893_s21 }
 0x651   : > { %v8452_v4 = vpop.f32.mrb[91].mxu1  ;;  %v5209_v10 = vld [vmem:[#allocation5 + $0x68] sm:$0xff]  ;;  %v5210_v37 = vld [vmem:[#allocation5 + $0x70] sm:$0x3] }
 0x652   : > { %v8453_v26 = vadd.f32 %v8452_v4, %v8451_v40  ;;  %v4853_v46 = vadd.f32 %v8450_v51, %v12018_v57  ;;  %v12103_v12 = vpack.c.bf16 %v5209_v10, %v5208_v21  ;;  %v5259_v42 = vpack.c.bf16 %v5210_v37, %v5210_v37 }
 0x654   : > { %5786 = vrot.lane.b32.xlu1 %v5333_v58, %s8902_s16  ;;  %v5013_v3 = vpop.f32.mrb[104].mxu0  ;;  %5598 = vrot.lane.b32.xlu0 %v5333_v58, %s8890_s25  ;;  %v4856_v6 = vadd.f32 %v8453_v26, %v12018_v57  ;;  %v5337_v34 = vshll.u32 %v12103_v12, 16  ;;  %v5522_v19 = vrot.slane %v12103_v12, 1  ;;  %v5523_v30 = vrot.slane %v5259_v42, 1 }
 0x655   : > { %v5014_v13 = vadd.f32 %v5013_v3, %v4853_v46  ;;  %v5015_v5 = vpop.f32.mrb[105].mxu0  ;;  %v5335_v24 = vshrl.u32 %v12103_v12, 16  ;;  %v5342_v50 = vshll.u32 %v5259_v42, 16 }
 0x656   : > { %v5016_v32 = vpop.f32.mrb[106].mxu0  ;;  %v5339_v52 = vrot.slane %v5337_v34, 1  ;;  %v5524_v48 = vsel %vm875_vm2, %v5522_v19, %v5523_v30 }
 0x657   : > { %5172 = vst.msk [vmem:[#allocation5 + $0x79] sm:$0xff] %vm1444_vm4, %v5014_v13  ;;  %v5017_v33 = vadd.f32 %v5016_v32, %v4856_v6  ;;  %v5018_v47 = vpop.f32.mrb[107].mxu0  ;;  %v5344_v28 = vrot.slane %v5342_v50, 1 }
 0x658   : > { %5756 = vrot.lane.b32.xlu1 %v12103_v12, %s8896_s27  ;;  %5662 = vrot.lane.b32.xlu0 %v12103_v12, %s8900_s15  ;;  %v5340_v8 = vor.u32 %v5339_v52, %v5335_v24 }
 0x659   : > { %5173 = vst.msk [vmem:[#allocation5 + $0x81] sm:$0xff] %vm1444_vm4, %v5017_v33 }
 0x65a   : > { %v5345_v7 = vsel %vm650_vm3, %v5340_v8, %v5344_v28 }
 0x65b   : > { %v8454_v53 = vpop.f32.mrb[92].mxu1 }
 0x65c   : > { %5820 = vrot.lane.b32.xlu1 %v5524_v48, %s8899_s29  ;;  %v8455_v0 = vpop.f32.mrb[93].mxu1  ;;  %5726 = vrot.lane.b32.xlu0 %v5524_v48, %s8901_s24 }
 0x65d   : > { %v8456_v27 = vadd.f32 %v8455_v0, %v8454_v53  ;;  %v8457_v29 = vpop.f32.mrb[94].mxu1 }
 0x65e   : > { %v8458_v36 = vpop.f32.mrb[95].mxu1  ;;  %v5211_v9 = vld [vmem:[#allocation5 + $0x78] sm:$0xff] }
 0x65f   : > { %v8459_v41 = vadd.f32 %v8458_v36, %v8457_v29  ;;  %v4861_v20 = vadd.f32 %v8456_v27, %v12018_v57 }
 0x660   : > { %5632 = vrot.lane.b32.xlu1 %v5524_v48, %s8892_s20  ;;  %5694 = vrot.lane.b32.xlu0 %v5345_v7, %s8893_s21  ;;  %v5212_v25 = vld [vmem:[#allocation5 + $0x80] sm:$0xff]  ;;  %v5213_v35 = vld [vmem:[#allocation5 + $0x88] sm:$0x3] }
 0x661   : > { %v5021_v56 = vpop.f32.mrb[108].mxu0  ;;  %v4864_v15 = vadd.f32 %v8459_v41, %v12018_v57  ;;  %v12125_v62 = vpack.c.bf16 %v5212_v25, %v5211_v9  ;;  %v5261_v2 = vpack.c.bf16 %v5213_v35, %v5213_v35 }
 0x662   : > { %v5022_v17 = vadd.f32 %v5021_v56, %v4861_v20  ;;  %v5023_v45 = vpop.f32.mrb[109].mxu0 }
 0x663   : > { %v5024_v11 = vpop.f32.mrb[110].mxu0  ;;  %v5349_v61 = vshll.u32 %v12125_v62, 16  ;;  %v5525_v44 = vrot.slane %v12125_v62, 1  ;;  %v5526_v59 = vrot.slane %v5261_v2, 1  ;;  %v5347_v1 = vshrl.u32 %v12125_v62, 16 }
 0x664   : > { %5174 = vst.msk [vmem:[#allocation5 + $0x91] sm:$0xff] %vm1444_vm4, %v5022_v17  ;;  %v5025_v16 = vadd.f32 %v5024_v11, %v4864_v15  ;;  %5788 = vrot.lane.b32.xlu1 %v5345_v7, %s8902_s16  ;;  %v5026_v23 = vpop.f32.mrb[111].mxu0  ;;  %5600 = vrot.lane.b32.xlu0 %v5345_v7, %s8890_s25  ;;  %v5354_v38 = vshll.u32 %v5261_v2, 16 }
 0x665   : > { %v5351_v49 = vrot.slane %v5349_v61, 1  ;;  %v5527_v54 = vsel %vm875_vm2, %v5525_v44, %v5526_v59 }
 0x666   : > { %5175 = vst.msk [vmem:[#allocation5 + $0x99] sm:$0xff] %vm1444_vm4, %v5025_v16  ;;  %v5356_v40 = vrot.slane %v5354_v38, 1 }
 0x667   : > { %v5352_v22 = vor.u32 %v5351_v49, %v5347_v1 }
 0x668   : > { %5758 = vrot.lane.b32.xlu1 %v12125_v62, %s8896_s27  ;;  %5664 = vrot.lane.b32.xlu0 %v12125_v62, %s8900_s15 }
 0x669   : > { %v5357_v26 = vsel %vm650_vm3, %v5352_v22, %v5356_v40 }
 0x66a   : > { %v8460_v18 = vpop.f32.mrb[96].mxu1 }
 0x66b   : > { %v8461_v43 = vpop.f32.mrb[97].mxu1  ;;  %v5214_v37 = vld [vmem:[#allocation5 + $0x90] sm:$0xff] }
 0x66c   : > { %v8462_v39 = vadd.f32 %v8461_v43, %v8460_v18  ;;  %5822 = vrot.lane.b32.xlu1 %v5527_v54, %s8899_s29  ;;  %v8463_v58 = vpop.f32.mrb[98].mxu1  ;;  %5728 = vrot.lane.b32.xlu0 %v5527_v54, %s8901_s24 }
 0x66d   : > { %v8464_v51 = vpop.f32.mrb[99].mxu1  ;;  %v5215_v4 = vld [vmem:[#allocation5 + $0x98] sm:$0xff]  ;;  %v5216_v6 = vld [vmem:[#allocation5 + $0xa0] sm:$0x3] }
 0x66e   : > { %v8465_v21 = vadd.f32 %v8464_v51, %v8463_v58  ;;  %v4869_v10 = vadd.f32 %v8462_v39, %v12018_v57  ;;  %v12143_v46 = vpack.c.bf16 %v5215_v4, %v5214_v37  ;;  %v5263_v47 = vpack.c.bf16 %v5216_v6, %v5216_v6 }
 0x670   : > { %5634 = vrot.lane.b32.xlu1 %v5527_v54, %s8892_s20  ;;  %v5029_v42 = vpop.f32.mrb[112].mxu0  ;;  %5696 = vrot.lane.b32.xlu0 %v5357_v26, %s8893_s21  ;;  %v4872_v3 = vadd.f32 %v8465_v21, %v12018_v57  ;;  %v5361_v19 = vshll.u32 %v12143_v46, 16  ;;  %v5528_v52 = vrot.slane %v12143_v46, 1  ;;  %v5529_v24 = vrot.slane %v5263_v47, 1 }
 0x671   : > { %v5030_v13 = vadd.f32 %v5029_v42, %v4869_v10  ;;  %v5031_v5 = vpop.f32.mrb[113].mxu0  ;;  %v5359_v0 = vshrl.u32 %v12143_v46, 16  ;;  %v5366_v27 = vshll.u32 %v5263_v47, 16 }
 0x672   : > { %v5032_v34 = vpop.f32.mrb[114].mxu0  ;;  %v5363_v50 = vrot.slane %v5361_v19, 1  ;;  %v5530_v36 = vsel %vm875_vm2, %v5528_v52, %v5529_v24 }
 0x673   : > { %5176 = vst.msk [vmem:[#allocation5 + $0xa9] sm:$0xff] %vm1444_vm4, %v5030_v13  ;;  %v5033_v32 = vadd.f32 %v5032_v34, %v4872_v3  ;;  %v5034_v33 = vpop.f32.mrb[115].mxu0  ;;  %v5368_v35 = vrot.slane %v5366_v27, 1 }
 0x674   : > { %5790 = vrot.lane.b32.xlu1 %v5357_v26, %s8902_s16  ;;  %5602 = vrot.lane.b32.xlu0 %v5357_v26, %s8890_s25  ;;  %v5364_v7 = vor.u32 %v5363_v50, %v5359_v0 }
 0x675   : > { %5177 = vst.msk [vmem:[#allocation5 + $0xb1] sm:$0xff] %vm1444_vm4, %v5033_v32 }
 0x676   : > { %v5369_v11 = vsel %vm650_vm3, %v5364_v7, %v5368_v35 }
 0x677   : > { %v8466_v30 = vpop.f32.mrb[100].mxu1 }
 0x678   : > { %5760 = vrot.lane.b32.xlu1 %v12143_v46, %s8896_s27  ;;  %v8467_v53 = vpop.f32.mrb[101].mxu1  ;;  %5666 = vrot.lane.b32.xlu0 %v12143_v46, %s8900_s15 }
 0x679   : > { %v8468_v48 = vadd.f32 %v8467_v53, %v8466_v30  ;;  %v8469_v8 = vpop.f32.mrb[102].mxu1 }
 0x67a   : > { %v8470_v29 = vpop.f32.mrb[103].mxu1  ;;  %v5217_v17 = vld [vmem:[#allocation5 + $0xa8] sm:$0xff] }
 0x67b   : > { %v8471_v28 = vadd.f32 %v8470_v29, %v8469_v8  ;;  %v4877_v41 = vadd.f32 %v8468_v48, %v12018_v57  ;;  %v12195_v48 = vpop.permute.xlu0 %5592 }
 0x67c   : > { %5824 = vrot.lane.b32.xlu1 %v5530_v36, %s8899_s29  ;;  %5730 = vrot.lane.b32.xlu0 %v5530_v36, %s8901_s24  ;;  %v5218_v20 = vld [vmem:[#allocation5 + $0xb0] sm:$0xff]  ;;  %v5219_v23 = vld [vmem:[#allocation5 + $0xb8] sm:$0x3] }
 0x67d   : > { %v5037_v9 = vpop.f32.mrb[116].mxu0  ;;  %v4880_v25 = vadd.f32 %v8471_v28, %v12018_v57  ;;  %v12165_v2 = vpack.c.bf16 %v5218_v20, %v5217_v17  ;;  %v5265_v44 = vpack.c.bf16 %v5219_v23, %v5219_v23 }
 0x67e   : > { %v5038_v56 = vadd.f32 %v5037_v9, %v4877_v41  ;;  %v5039_v15 = vpop.f32.mrb[117].mxu0 }
 0x67f   : > { %v5040_v45 = vpop.f32.mrb[118].mxu0  ;;  %v5373_v59 = vshll.u32 %v12165_v2, 16  ;;  %v5531_v38 = vrot.slane %v12165_v2, 1  ;;  %v5532_v18 = vrot.slane %v5265_v44, 1  ;;  %v5371_v58 = vshrl.u32 %v12165_v2, 16 }
 0x680   : > { %5178 = vst.msk [vmem:[#allocation5 + $0xc1] sm:$0xff] %vm1444_vm4, %v5038_v56  ;;  %v5041_v61 = vadd.f32 %v5040_v45, %v4880_v25  ;;  %5636 = vrot.lane.b32.xlu1 %v5530_v36, %s8892_s20  ;;  %v5042_v16 = vpop.f32.mrb[119].mxu0  ;;  %5698 = vrot.lane.b32.xlu0 %v5369_v11, %s8893_s21  ;;  %v5378_v51 = vshll.u32 %v5265_v44, 16 }
 0x681   : > { %v5375_v43 = vrot.slane %v5373_v59, 1  ;;  %v5533_v21 = vsel %vm875_vm2, %v5531_v38, %v5532_v18 }
 0x682   : > { %5179 = vst.msk [vmem:[#allocation5 + $0xc9] sm:$0xff] %vm1444_vm4, %v5041_v61  ;;  %v5380_v13 = vrot.slane %v5378_v51, 1 }
 0x683   : > { %v5376_v10 = vor.u32 %v5375_v43, %v5371_v58  ;;  %v5625_v43 = vpop.permute.xlu1 %5624 }
 0x684   : > { %5792 = vrot.lane.b32.xlu1 %v5369_v11, %s8902_s16  ;;  %5604 = vrot.lane.b32.xlu0 %v5369_v11, %s8890_s25 }
 0x685   : > { %v5381_v47 = vsel %vm650_vm3, %v5376_v10, %v5380_v13 }
 0x686   : > { %v8472_v49 = vpop.f32.mrb[104].mxu1 }
 0x687   : > { %v8473_v1 = vpop.f32.mrb[105].mxu1  ;;  %v5220_v34 = vld [vmem:[#allocation5 + $0xc0] sm:$0xff] }
 0x688   : > { %v8474_v54 = vadd.f32 %v8473_v1, %v8472_v49  ;;  %5762 = vrot.lane.b32.xlu1 %v12165_v2, %s8896_s27  ;;  %v8475_v22 = vpop.f32.mrb[106].mxu1  ;;  %5668 = vrot.lane.b32.xlu0 %v12165_v2, %s8900_s15 }
 0x689   : > { %v8476_v39 = vpop.f32.mrb[107].mxu1  ;;  %v5221_v42 = vld [vmem:[#allocation5 + $0xc8] sm:$0xff]  ;;  %v5222_v30 = vld [vmem:[#allocation5 + $0xd0] sm:$0x3] }
 0x68a   : > { %v8477_v40 = vadd.f32 %v8476_v39, %v8475_v22  ;;  %v4885_v4 = vadd.f32 %v8474_v54, %v12018_v57  ;;  %v12187_v19 = vpack.c.bf16 %v5221_v42, %v5220_v34  ;;  %v5267_v24 = vpack.c.bf16 %v5222_v30, %v5222_v30 }
 0x68c   : > { %5826 = vrot.lane.b32.xlu1 %v5533_v21, %s8899_s29  ;;  %v5045_v37 = vpop.f32.mrb[120].mxu0  ;;  %5732 = vrot.lane.b32.xlu0 %v5533_v21, %s8901_s24  ;;  %v4888_v26 = vadd.f32 %v8477_v40, %v12018_v57  ;;  %v5385_v50 = vshll.u32 %v12187_v19, 16  ;;  %v5534_v29 = vrot.slane %v12187_v19, 1  ;;  %v5535_v41 = vrot.slane %v5267_v24, 1 }
 0x68d   : > { %v5046_v3 = vadd.f32 %v5045_v37, %v4885_v4  ;;  %v5047_v6 = vpop.f32.mrb[121].mxu0  ;;  %v5383_v25 = vshrl.u32 %v12187_v19, 16  ;;  %v5390_v35 = vshll.u32 %v5267_v24, 16 }
 0x68e   : > { %v5048_v5 = vpop.f32.mrb[122].mxu0  ;;  %v5387_v7 = vrot.slane %v5385_v50, 1  ;;  %v5536_v11 = vsel %vm875_vm2, %v5534_v29, %v5535_v41 }
 0x68f   : > { %5180 = vst.msk [vmem:[#allocation5 + $0xd9] sm:$0xff] %vm1444_vm4, %v5046_v3  ;;  %v5049_v32 = vadd.f32 %v5048_v5, %v4888_v26  ;;  %v5050_v33 = vpop.f32.mrb[123].mxu0  ;;  %v5392_v59 = vrot.slane %v5390_v35, 1 }
 0x690   : > { %5638 = vrot.lane.b32.xlu1 %v5533_v21, %s8892_s20  ;;  %5700 = vrot.lane.b32.xlu0 %v5381_v47, %s8893_s21  ;;  %v5388_v61 = vor.u32 %v5387_v7, %v5383_v25 }
 0x691   : > { %5181 = vst.msk [vmem:[#allocation5 + $0xe1] sm:$0xff] %vm1444_vm4, %v5049_v32 }
 0x692   : > { %v5393_v38 = vsel %vm650_vm3, %v5388_v61, %v5392_v59 }
 0x693   : > { %v8478_v52 = vpop.f32.mrb[108].mxu1 }
 0x694   : > { %5794 = vrot.lane.b32.xlu1 %v5381_v47, %s8902_s16  ;;  %v8479_v53 = vpop.f32.mrb[109].mxu1  ;;  %5606 = vrot.lane.b32.xlu0 %v5381_v47, %s8890_s25 }
 0x695   : > { %v8480_v8 = vadd.f32 %v8479_v53, %v8478_v52  ;;  %v8481_v0 = vpop.f32.mrb[110].mxu1 }
 0x696   : > { %v8482_v27 = vpop.f32.mrb[111].mxu1  ;;  %v5223_v1 = vld [vmem:[#allocation5 + $0xd8] sm:$0xff] }
 0x697   : > { %v8483_v28 = vadd.f32 %v8482_v27, %v8481_v0  ;;  %v4893_v36 = vadd.f32 %v8480_v8, %v12018_v57 }
 0x698   : > { %5764 = vrot.lane.b32.xlu1 %v12187_v19, %s8896_s27  ;;  %5670 = vrot.lane.b32.xlu0 %v12187_v19, %s8900_s15  ;;  %v5224_v44 = vld [vmem:[#allocation5 + $0xe0] sm:$0xff]  ;;  %v5225_v54 = vld [vmem:[#allocation5 + $0xe8] sm:$0x3] }
 0x699   : > { %v5053_v20 = vpop.f32.mrb[124].mxu0  ;;  %v4896_v9 = vadd.f32 %v8483_v28, %v12018_v57  ;;  %v12215_v18 = vpack.c.bf16 %v5224_v44, %v5223_v1  ;;  %v5269_v51 = vpack.c.bf16 %v5225_v54, %v5225_v54 }
 0x69a   : > { %v5054_v56 = vadd.f32 %v5053_v20, %v4893_v36  ;;  %v12205_v15 = vpop.permute.xlu0 %5656  ;;  %v5055_v17 = vpop.f32.mrb[125].mxu0  ;;  %v5849_v20 = vsel %vm1444_vm4, %v11877_v60, %v12195_v48 }
 0x69b   : > { %v5056_v45 = vpop.f32.mrb[126].mxu0  ;;  %v5397_v40 = vshll.u32 %v12215_v18, 16  ;;  %v5537_v6 = vrot.slane %v12215_v18, 1  ;;  %v5538_v13 = vrot.slane %v5269_v51, 1  ;;  %v5395_v30 = vshrl.u32 %v12215_v18, 16 }
 0x69c   : > { %5182 = vst.msk [vmem:[#allocation5 + $0xf1] sm:$0xff] %vm1444_vm4, %v5054_v56  ;;  %v5057_v16 = vadd.f32 %v5056_v45, %v4896_v9  ;;  %5828 = vrot.lane.b32.xlu1 %v5536_v11, %s8899_s29  ;;  %v5058_v23 = vpop.f32.mrb[127].mxu0  ;;  %5734 = vrot.lane.b32.xlu0 %v5536_v11, %s8901_s24  ;;  %v5402_v52 = vshll.u32 %v5269_v51, 16 }
 0x69d   : > { %v12224_v37 = vpop.permute.xlu1 %5626  ;;  %v5399_v5 = vrot.slane %v5397_v40, 1  ;;  %v5539_v27 = vsel %vm875_vm2, %v5537_v6, %v5538_v13 }
 0x69e   : > { %5183 = vst.msk [vmem:[#allocation5 + $0xf9] sm:$0xff] %vm1444_vm4, %v5057_v16  ;;  %v12212_v49 = vpop.permute.xlu0 %5720  ;;  %v5404_v36 = vrot.slane %v5402_v52, 1  ;;  %v5881_v16 = vsel %vm1956_vm14, %v5849_v20, %v5625_v43 }
 0x69f   : > { %v5400_v29 = vor.u32 %v5399_v5, %v5395_v30  ;;  %v5914_v43 = vsel %vm5912_vm7, %v5881_v16, %v12205_v15 }
 0x6a0   : > { %5640 = vrot.lane.b32.xlu1 %v5536_v11, %s8892_s20  ;;  %5702 = vrot.lane.b32.xlu0 %v5393_v38, %s8893_s21 }
 0x6a1   : > { %v5405_v35 = vsel %vm650_vm3, %v5400_v29, %v5404_v36 }
 0x6a2   : > { %v12219_v22 = vpop.permute.xlu0 %5688  ;;  %v8484_v39 = vpop.f32.mrb[112].mxu1 }
 0x6a3   : > { %v8485_v58 = vpop.f32.mrb[113].mxu1  ;;  %v5226_v7 = vld [vmem:[#allocation5 + $0xf0] sm:$0xff] }
 0x6a4   : > { %v8486_v4 = vadd.f32 %v8485_v58, %v8484_v39  ;;  %5796 = vrot.lane.b32.xlu1 %v5393_v38, %s8902_s16  ;;  %v8487_v21 = vpop.f32.mrb[114].mxu1  ;;  %5608 = vrot.lane.b32.xlu0 %v5393_v38, %s8890_s25  ;;  %v5946_v58 = vsel %vm2697_vm1, %v5914_v43, %v12219_v22 }
 0x6a5   : > { %v8488_v10 = vpop.f32.mrb[115].mxu1  ;;  %v5227_v28 = vld [vmem:[#allocation5 + $0xf8] sm:$0xff]  ;;  %v5228_v45 = vld [vmem:[#allocation5 + $0x100] sm:$0x3] }
 0x6a6   : > { %v8489_v26 = vadd.f32 %v8488_v10, %v8487_v21  ;;  %v12226_v42 = vpop.permute.xlu0 %5594  ;;  %v4901_v3 = vadd.f32 %v8486_v4, %v12018_v57  ;;  %v12249_v56 = vpack.c.bf16 %v5227_v28, %v5226_v7  ;;  %v5271_v1 = vpack.c.bf16 %v5228_v45, %v5228_v45 }
 0x6a8   : > { %5766 = vrot.lane.b32.xlu1 %v12215_v18, %s8896_s27  ;;  %v5061_v34 = vpop.f32.mrb[128].mxu0  ;;  %5672 = vrot.lane.b32.xlu0 %v12215_v18, %s8900_s15  ;;  %v4904_v32 = vadd.f32 %v8489_v26, %v12018_v57  ;;  %v5409_v38 = vshll.u32 %v12249_v56, 16  ;;  %v5540_v15 = vrot.slane %v12249_v56, 1  ;;  %v5541_v6 = vrot.slane %v5271_v1, 1 }
 0x6a9   : > { %v5062_v33 = vadd.f32 %v5061_v34, %v4901_v3  ;;  %v5063_v47 = vpop.f32.mrb[129].mxu0 }
 0x6aa   : > { %v5753_v24 = vpop.permute.xlu1 %5752  ;;  %v5064_v50 = vpop.f32.mrb[130].mxu0  ;;  %v5411_v13 = vrot.slane %v5409_v38, 1  ;;  %v5414_v47 = vshll.u32 %v5271_v1, 16 }
 0x6ab   : > { %5184 = vst.msk [vmem:[#allocation5 + $0x109] sm:$0xff] %vm1444_vm4, %v5062_v33  ;;  %v5065_v53 = vadd.f32 %v5064_v50, %v4904_v32  ;;  %v12237_v8 = vpop.permute.xlu0 %5658  ;;  %v5066_v0 = vpop.f32.mrb[131].mxu0  ;;  %v6027_v51 = vsel %vm2746_vm13, %v12212_v49, %v5753_v24  ;;  %v5979_v32 = vsel %vm5977_vm9, %v5946_v58, %v12212_v49  ;;  %v5407_v33 = vshrl.u32 %v12249_v56, 16 }
 0x6ac   : > { %5830 = vrot.lane.b32.xlu1 %v5539_v27, %s8899_s29  ;;  %5736 = vrot.lane.b32.xlu0 %v5539_v27, %s8901_s24  ;;  %v5542_v24 = vsel %vm875_vm2, %v5540_v15, %v5541_v6  ;;  %v5416_v49 = vrot.slane %v5414_v47, 1 }
 0x6ad   : > { %5185 = vst.msk [vmem:[#allocation5 + $0x111] sm:$0xff] %vm1444_vm4, %v5065_v53  ;;  %v5412_v50 = vor.u32 %v5411_v13, %v5407_v33 }
 0x6ae   : > { %v5817_v41 = vpop.permute.xlu1 %5816 }
 0x6af   : > { %v12246_v9 = vpop.permute.xlu0 %5722  ;;  %v8490_v25 = vpop.f32.mrb[116].mxu1 }
 0x6b0   : > { %5642 = vrot.lane.b32.xlu1 %v5539_v27, %s8892_s20  ;;  %v8491_v17 = vpop.f32.mrb[117].mxu1  ;;  %5704 = vrot.lane.b32.xlu0 %v5405_v35, %s8893_s21 }
 0x6b1   : > { %v8492_v11 = vadd.f32 %v8491_v17, %v8490_v25  ;;  %v8493_v61 = vpop.f32.mrb[118].mxu1  ;;  %v5851_v17 = vsel %vm1444_vm4, %v12032_v31, %v12226_v42 }
 0x6b2   : > { %v12254_v23 = vpop.permute.xlu1 %5628  ;;  %v8494_v60 = vpop.f32.mrb[119].mxu1  ;;  %v5229_v29 = vld [vmem:[#allocation5 + $0x108] sm:$0xff]  ;;  %v5883_v1 = vsel %vm1956_vm14, %v5851_v17, %v12224_v37 }
 0x6b3   : > { %v8495_v48 = vadd.f32 %v8494_v60, %v8493_v61  ;;  %v12256_v44 = vpop.permute.xlu0 %5690  ;;  %v4909_v59 = vadd.f32 %v8492_v11, %v12018_v57  ;;  %v5916_v42 = vsel %vm5912_vm7, %v5883_v1, %v12237_v8 }
 0x6b4   : > { %5798 = vrot.lane.b32.xlu1 %v5405_v35, %s8902_s16  ;;  %5610 = vrot.lane.b32.xlu0 %v5405_v35, %s8890_s25  ;;  %v5230_v53 = vld [vmem:[#allocation5 + $0x110] sm:$0xff]  ;;  %v5231_v35 = vld [vmem:[#allocation5 + $0x118] sm:$0x3] }
 0x6b5   : > { %v5069_v54 = vpop.f32.mrb[132].mxu0  ;;  %v4912_v39 = vadd.f32 %v8495_v48, %v12018_v57  ;;  %v12292_v7 = vpack.c.bf16 %v5230_v53, %v5229_v29  ;;  %v5273_v48 = vpack.c.bf16 %v5231_v35, %v5231_v35 }
 0x6b6   : > { %v5070_v40 = vadd.f32 %v5069_v54, %v4909_v59  ;;  %v5785_v4 = vpop.permute.xlu1 %5784  ;;  %v5071_v21 = vpop.f32.mrb[133].mxu0 }
 0x6b7   : > { %v6060_v10 = vsel %vm6058_vm8, %v6027_v51, %v5785_v4  ;;  %v12270_v26 = vpop.permute.xlu0 %5596  ;;  %v5072_v3 = vpop.f32.mrb[134].mxu0  ;;  %v5421_v59 = vshll.u32 %v12292_v7, 16  ;;  %v5419_v6 = vshrl.u32 %v12292_v7, 16  ;;  %v5426_v13 = vshll.u32 %v5273_v48, 16 }
 0x6b8   : > { %5186 = vst.msk [vmem:[#allocation5 + $0x121] sm:$0xff] %vm1444_vm4, %v5070_v40  ;;  %v5073_v5 = vadd.f32 %v5072_v3, %v4912_v39  ;;  %5768 = vrot.lane.b32.xlu1 %v12249_v56, %s8896_s27  ;;  %v5074_v22 = vpop.f32.mrb[135].mxu0  ;;  %5674 = vrot.lane.b32.xlu0 %v12249_v56, %s8900_s15  ;;  %v6092_v34 = vsel %vm2779_vm15, %v6060_v10, %v5817_v41  ;;  %v5543_v40 = vrot.slane %v12292_v7, 1  ;;  %v5544_v10 = vrot.slane %v5273_v48, 1 }
 0x6b9   : > { %8228 = vmatprep.mubr.msk.bf16.mxu1 %vm6238_vm10, %v6092_v34  ;;  %v5417_v41 = vsel %vm650_vm3, %v5412_v50, %v5416_v49  ;;  %v5948_v39 = vsel %vm2697_vm1, %v5916_v42, %v12256_v44  ;;  %v5423_v3 = vrot.slane %v5421_v59, 1  ;;  %v5853_v17 = vsel %vm1444_vm4, %v12057_v55, %v12270_v26 }
 0x6ba   : > { %5187 = vst.msk [vmem:[#allocation5 + $0x129] sm:$0xff] %vm1444_vm4, %v5073_v5  ;;  %v5755_v30 = vpop.permute.xlu1 %5754  ;;  %6308 = vmatmul.mubr.bf16.vlgmr.msra.gmra.mrb[136].mxu1 %v5979_v32  ;;  %v5982_v15 = vsel %vm5977_vm9, %v5948_v39, %v12246_v9  ;;  %v5545_v32 = vsel %vm875_vm2, %v5543_v40, %v5544_v10 }
 0x6bb   : > { %v12284_v52 = vpop.permute.xlu0 %5660  ;;  %v6029_v58 = vsel %vm2746_vm13, %v12246_v9, %v5755_v30  ;;  %v5424_v33 = vor.u32 %v5423_v3, %v5419_v6  ;;  %v5428_v9 = vrot.slane %v5426_v13, 1 }
 0x6bc   : > { %5832 = vrot.lane.b32.xlu1 %v5542_v24, %s8899_s29  ;;  %5738 = vrot.lane.b32.xlu0 %v5542_v24, %s8901_s24 }
 0x6be   : > { %v5819_v0 = vpop.permute.xlu1 %5818  ;;  %v8496_v27 = vpop.f32.mrb[120].mxu1 }
 0x6bf   : > { %v12289_v28 = vpop.permute.xlu0 %5724  ;;  %v8497_v36 = vpop.f32.mrb[121].mxu1 }
 0x6c0   : > { %v8498_v20 = vadd.f32 %v8497_v36, %v8496_v27  ;;  %5644 = vrot.lane.b32.xlu1 %v5542_v24, %s8892_s20  ;;  %v8499_v25 = vpop.f32.mrb[122].mxu1  ;;  %5706 = vrot.lane.b32.xlu0 %v5417_v41, %s8893_s21  ;;  %v5429_v36 = vsel %vm650_vm3, %v5424_v33, %v5428_v9 }
 0x6c1   : > { %v8500_v45 = vpop.f32.mrb[123].mxu1  ;;  %v5233_v30 = vld [vmem:[#allocation5 + $0x128] sm:$0xff]  ;;  %v5234_v35 = vld [vmem:[#allocation5 + $0x130] sm:$0x3] }
 0x6c2   : > { %v8501_v11 = vadd.f32 %v8500_v45, %v8499_v25  ;;  %v12299_v61 = vpop.permute.xlu1 %5630  ;;  %v4917_v16 = vadd.f32 %v8498_v20, %v12018_v57 }
 0x6c3   : > { %v12302_v60 = vpop.permute.xlu0 %5692 }
 0x6c4   : > { %5800 = vrot.lane.b32.xlu1 %v5417_v41, %s8902_s16  ;;  %v5077_v38 = vpop.f32.mrb[136].mxu0  ;;  %5612 = vrot.lane.b32.xlu0 %v5417_v41, %s8890_s25  ;;  %v4920_v31 = vadd.f32 %v8501_v11, %v12018_v57  ;;  %v12339_v41 = vld [vmem:[#allocation9] ss:$0 sm:$0xff] }
 0x6c5   : > { %v5078_v43 = vadd.f32 %v5077_v38, %v4917_v16  ;;  %v5079_v54 = vpop.f32.mrb[137].mxu0 }
 0x6c6   : > { %v5787_v51 = vpop.permute.xlu1 %5786  ;;  %v5080_v37 = vpop.f32.mrb[138].mxu0 }
 0x6c7   : > { %5188 = vst.msk [vmem:[#allocation5 + $0x139] sm:$0xff] %vm1444_vm4, %v5078_v43  ;;  %v6062_v4 = vsel %vm6058_vm8, %v6029_v58, %v5787_v51  ;;  %v5081_v57 = vadd.f32 %v5080_v37, %v4920_v31  ;;  %v12319_v21 = vpop.permute.xlu0 %5598  ;;  %v5082_v8 = vpop.f32.mrb[139].mxu0  ;;  %v5275_v31 = vpack.c.bf16 %v5234_v35, %v5234_v35  ;;  %v5885_v43 = vsel %vm1956_vm14, %v5853_v17, %v12254_v23 }
 0x6c8   : > { %5770 = vrot.lane.b32.xlu1 %v12292_v7, %s8896_s27  ;;  %5676 = vrot.lane.b32.xlu0 %v12292_v7, %s8900_s15  ;;  %v6094_v44 = vsel %vm2779_vm15, %v6062_v4, %v5819_v0  ;;  %v5232_v0 = vld [vmem:[#allocation5 + $0x120] sm:$0xff]  ;;  %v5918_v26 = vsel %vm5912_vm7, %v5885_v43, %v12284_v52 }
 0x6c9   : > { %5189 = vst.msk [vmem:[#allocation5 + $0x141] sm:$0xff] %vm1444_vm4, %v5081_v57  ;;  %8229 = vmatprep.mubr.msk.bf16.mxu1 %vm6238_vm10, %v6094_v44  ;;  %v12342_v25 = vpack.c.bf16 %v5233_v30, %v5232_v0  ;;  %v5950_v39 = vsel %vm2697_vm1, %v5918_v26, %v12302_v60  ;;  %v5547_v8 = vrot.slane %v5275_v31, 1  ;;  %v5438_v13 = vshll.u32 %v5275_v31, 16 }
 0x6ca   : > { %v5757_v5 = vpop.permute.xlu1 %5756  ;;  %6316 = vmatmul.mubr.bf16.gmra.mrb[140].mxu1 %v5982_v15  ;;  %v5985_v15 = vsel %vm5977_vm9, %v5950_v39, %v12289_v28 }
 0x6cb   : > { %v12331_v22 = vpop.permute.xlu0 %5662  ;;  %v8502_v34 = vpop.f32.mrb[124].mxu1  ;;  %v5433_v42 = vshll.u32 %v12342_v25, 16  ;;  %v6031_v58 = vsel %vm2746_vm13, %v12289_v28, %v5757_v5  ;;  %v5546_v57 = vrot.slane %v12342_v25, 1  ;;  %v5431_v6 = vshrl.u32 %v12342_v25, 16 }
 0x6cc   : > { %5834 = vrot.lane.b32.xlu1 %v5545_v32, %s8899_s29  ;;  %v8503_v47 = vpop.f32.mrb[125].mxu1  ;;  %5740 = vrot.lane.b32.xlu0 %v5545_v32, %s8901_s24 }
 0x6cd   : > { %v8504_v24 = vadd.f32 %v8503_v47, %v8502_v34  ;;  %v8505_v50 = vpop.f32.mrb[126].mxu1  ;;  %v5435_v10 = vrot.slane %v5433_v42, 1  ;;  %v5548_v47 = vsel %vm875_vm2, %v5546_v57, %v5547_v8 }
 0x6ce   : > { %v5821_v53 = vpop.permute.xlu1 %5820  ;;  %v8506_v49 = vpop.f32.mrb[127].mxu1 }
 0x6cf   : > { %v8507_v27 = vadd.f32 %v8506_v49, %v8505_v50  ;;  %v12336_v29 = vpop.permute.xlu0 %5726  ;;  %v4925_v20 = vadd.f32 %v12339_v41, %v8504_v24  ;;  %v5436_v30 = vor.u32 %v5435_v10, %v5431_v6  ;;  %v5440_v49 = vrot.slane %v5438_v13, 1 }
 0x6d0   : > { %5646 = vrot.lane.b32.xlu1 %v5545_v32, %s8892_s20  ;;  %5708 = vrot.lane.b32.xlu0 %v5429_v36, %s8893_s21  ;;  %v5236_v50 = vld [vmem:[#allocation5 + $0x140] sm:$0xff] }
 0x6d1   : > { %v5085_v45 = vpop.f32.mrb[140].mxu0  ;;  %v4928_v11 = vadd.f32 %v12339_v41, %v8507_v27 }
 0x6d2   : > { %v5086_v16 = vadd.f32 %v5085_v45, %v4925_v20  ;;  %v12350_v48 = vpop.permute.xlu1 %5632  ;;  %v5087_v59 = vpop.f32.mrb[141].mxu0  ;;  %v5441_v45 = vsel %vm650_vm3, %v5436_v30, %v5440_v49 }
 0x6d3   : > { %v12352_v1 = vpop.permute.xlu0 %5694  ;;  %v5088_v38 = vpop.f32.mrb[142].mxu0  ;;  %v5855_v59 = vsel %vm1444_vm4, %v12085_v63, %v12319_v21 }
 0x6d4   : > { %5190 = vst.msk [vmem:[#allocation5 + $0x151] sm:$0xff] %vm1444_vm4, %v5086_v16  ;;  %v5089_v54 = vadd.f32 %v5088_v38, %v4928_v11  ;;  %5802 = vrot.lane.b32.xlu1 %v5429_v36, %s8902_s16  ;;  %v5090_v55 = vpop.f32.mrb[143].mxu0  ;;  %5614 = vrot.lane.b32.xlu0 %v5429_v36, %s8890_s25  ;;  %v5235_v36 = vld [vmem:[#allocation5 + $0x138] sm:$0xff]  ;;  %v5237_v16 = vld [vmem:[#allocation5 + $0x148] sm:$0x3]  ;;  %v5887_v26 = vsel %vm1956_vm14, %v5855_v59, %v12299_v61 }
 0x6d5   : > { %v12391_v11 = vpack.c.bf16 %v5236_v50, %v5235_v36  ;;  %v5920_v63 = vsel %vm5912_vm7, %v5887_v26, %v12331_v22 }
 0x6d6   : > { %5191 = vst.msk [vmem:[#allocation5 + $0x159] sm:$0xff] %vm1444_vm4, %v5089_v54  ;;  %v5789_v23 = vpop.permute.xlu1 %5788  ;;  %v8508_v51 = vpop.f32.mrb[128].mxu1  ;;  %v5277_v54 = vpack.c.bf16 %v5237_v16, %v5237_v16  ;;  %v5952_v10 = vsel %vm2697_vm1, %v5920_v63, %v12352_v1 }
 0x6d7   : > { %v6064_v37 = vsel %vm6058_vm8, %v6031_v58, %v5789_v23  ;;  %v12368_v40 = vpop.permute.xlu0 %5600  ;;  %v8509_v4 = vpop.f32.mrb[129].mxu1  ;;  %v5445_v55 = vshll.u32 %v12391_v11, 16  ;;  %v5549_v61 = vrot.slane %v12391_v11, 1  ;;  %v5443_v1 = vshrl.u32 %v12391_v11, 16 }
 0x6d8   : > { %v8510_v52 = vadd.f32 %v8509_v4, %v8508_v51  ;;  %5772 = vrot.lane.b32.xlu1 %v12342_v25, %s8896_s27  ;;  %v8511_v60 = vpop.f32.mrb[130].mxu1  ;;  %5678 = vrot.lane.b32.xlu0 %v12342_v25, %s8900_s15  ;;  %v6096_v3 = vsel %vm2779_vm15, %v6064_v37, %v5821_v53 }
 0x6d9   : > { %v8512_v44 = vpop.f32.mrb[131].mxu1  ;;  %8230 = vmatprep.mubr.msk.bf16.mxu1 %vm6238_vm10, %v6096_v3  ;;  %v5550_v3 = vrot.slane %v5277_v54, 1 }
 0x6da   : > { %v8513_v5 = vadd.f32 %v8512_v44, %v8511_v60  ;;  %v5759_v34 = vpop.permute.xlu1 %5758  ;;  %6324 = vmatmul.mubr.bf16.gmra.mrb[144].mxu1 %v5985_v15  ;;  %v4933_v32 = vadd.f32 %v12339_v41, %v8510_v52  ;;  %v5447_v44 = vrot.slane %v5445_v55, 1 }
 0x6db   : > { %v12381_v33 = vpop.permute.xlu0 %5664  ;;  %v6033_v51 = vsel %vm2746_vm13, %v12336_v29, %v5759_v34  ;;  %v5450_v34 = vshll.u32 %v5277_v54, 16  ;;  %v5238_v49 = vld [vmem:[#allocation5 + $0x150] sm:$0xff] }
 0x6dc   : > { %5836 = vrot.lane.b32.xlu1 %v5548_v47, %s8899_s29  ;;  %v5093_v24 = vpop.f32.mrb[144].mxu0  ;;  %5742 = vrot.lane.b32.xlu0 %v5548_v47, %s8901_s24  ;;  %v4936_v28 = vadd.f32 %v12339_v41, %v8513_v5 }
 0x6dd   : > { %v5094_v9 = vadd.f32 %v5093_v24, %v4933_v32  ;;  %v5095_v53 = vpop.f32.mrb[145].mxu0  ;;  %v5551_v24 = vsel %vm875_vm2, %v5549_v61, %v5550_v3  ;;  %v5239_v50 = vld [vmem:[#allocation5 + $0x158] sm:$0xff]  ;;  %v5240_v36 = vld [vmem:[#allocation5 + $0x160] sm:$0x3] }
 0x6de   : > { %v5823_v0 = vpop.permute.xlu1 %5822  ;;  %v5096_v27 = vpop.f32.mrb[146].mxu0  ;;  %v5279_v16 = vpack.c.bf16 %v5240_v36, %v5240_v36 }
 0x6df   : > { %5192 = vst.msk [vmem:[#allocation5 + $0x169] sm:$0xff] %vm1444_vm4, %v5094_v9  ;;  %v5097_v20 = vadd.f32 %v5096_v27, %v4936_v28  ;;  %v12388_v35 = vpop.permute.xlu0 %5728  ;;  %v5098_v17 = vpop.f32.mrb[147].mxu0  ;;  %v5448_v28 = vor.u32 %v5447_v44, %v5443_v1  ;;  %v5452_v9 = vrot.slane %v5450_v34, 1  ;;  %v12439_v27 = vpack.c.bf16 %v5239_v50, %v5238_v49 }
 0x6e0   : > { %5648 = vrot.lane.b32.xlu1 %v5548_v47, %s8892_s20  ;;  %5710 = vrot.lane.b32.xlu0 %v5441_v45, %s8893_s21 }
 0x6e1   : > { %5193 = vst.msk [vmem:[#allocation5 + $0x171] sm:$0xff] %vm1444_vm4, %v5097_v20  ;;  %v5857_v20 = vsel %vm1444_vm4, %v12103_v12, %v12368_v40  ;;  %v5457_v59 = vshll.u32 %v12439_v27, 16  ;;  %v5455_v63 = vshrl.u32 %v12439_v27, 16 }
 0x6e2   : > { %v12399_v38 = vpop.permute.xlu1 %5634  ;;  %v8514_v31 = vpop.f32.mrb[132].mxu1 }
 0x6e3   : > { %v12401_v42 = vpop.permute.xlu0 %5696  ;;  %v8515_v43 = vpop.f32.mrb[133].mxu1 }
 0x6e4   : > { %v8516_v39 = vadd.f32 %v8515_v43, %v8514_v31  ;;  %5804 = vrot.lane.b32.xlu1 %v5441_v45, %s8902_s16  ;;  %v8517_v58 = vpop.f32.mrb[134].mxu1  ;;  %5616 = vrot.lane.b32.xlu0 %v5441_v45, %s8890_s25  ;;  %v5889_v31 = vsel %vm1956_vm14, %v5857_v20, %v12350_v48  ;;  %v5552_v48 = vrot.slane %v12439_v27, 1 }
 0x6e5   : > { %v8518_v21 = vpop.f32.mrb[135].mxu1  ;;  %v5101_v23 = vpop.f32.mrb[148].mxu0  ;;  %v5922_v43 = vsel %vm5912_vm7, %v5889_v31, %v12381_v33 }
 0x6e6   : > { %v8519_v37 = vadd.f32 %v8518_v21, %v8517_v58  ;;  %v4941_v4 = vadd.f32 %v12339_v41, %v8516_v39  ;;  %v5791_v57 = vpop.permute.xlu1 %5790  ;;  %v5103_v8 = vpop.f32.mrb[149].mxu0  ;;  %v5954_v54 = vsel %vm2697_vm1, %v5922_v43, %v12401_v42  ;;  %v5553_v39 = vrot.slane %v5279_v16, 1 }
 0x6e7   : > { %v6066_v52 = vsel %vm6058_vm8, %v6033_v51, %v5791_v57  ;;  %v12417_v60 = vpop.permute.xlu0 %5602  ;;  %v5104_v22 = vpop.f32.mrb[150].mxu0  ;;  %v5459_v58 = vrot.slane %v5457_v59, 1  ;;  %v5991_v42 = vsel %vm5977_vm9, %v5954_v54, %v12388_v35  ;;  %v5462_v21 = vshll.u32 %v5279_v16, 16 }
 0x6e8   : > { %v5102_v15 = vadd.f32 %v5101_v23, %v4941_v4  ;;  %v4944_v6 = vadd.f32 %v12339_v41, %v8519_v37  ;;  %5774 = vrot.lane.b32.xlu1 %v12391_v11, %s8896_s27  ;;  %v5106_v13 = vpop.f32.mrb[151].mxu0  ;;  %5680 = vrot.lane.b32.xlu0 %v12391_v11, %s8900_s15  ;;  %v6098_v5 = vsel %vm2779_vm15, %v6066_v52, %v5823_v0  ;;  %v5242_v57 = vld [vmem:[#allocation5 + $0x170] sm:$0xff]  ;;  %v5243_v3 = vld [vmem:[#allocation5 + $0x178] sm:$0x3] }
 0x6e9   : > { %8231 = vmatprep.mubr.msk.bf16.mxu1 %vm6238_vm10, %v6098_v5  ;;  %v5988_v41 = vsel %vm5977_vm9, %v5952_v10, %v12336_v29  ;;  %v5453_v29 = vsel %vm650_vm3, %v5448_v28, %v5452_v9  ;;  %v5554_v37 = vsel %vm875_vm2, %v5552_v48, %v5553_v39  ;;  %v5460_v4 = vor.u32 %v5459_v58, %v5455_v63  ;;  %v5241_v10 = vld [vmem:[#allocation5 + $0x168] sm:$0xff]  ;;  %v5248_v39 = vld [vmem:[#allocation5 + $0x1a0] sm:$0xff]  ;;  %v6523_v58 = vld [vmem:[#allocation6] sm:$0xff] }
 0x6ea   : > { %5194 = vst.msk [vmem:[#allocation5 + $0x181] sm:$0xff] %vm1444_vm4, %v5102_v15  ;;  %v5105_v32 = vadd.f32 %v5104_v22, %v4944_v6  ;;  %v5761_v47 = vpop.permute.xlu1 %5760  ;;  %6332 = vmatmul.mubr.bf16.gmra.mrb[148].mxu1 %v5988_v41  ;;  %v5464_v8 = vrot.slane %v5462_v21, 1  ;;  %v12480_v22 = vpack.c.bf16 %v5242_v57, %v5241_v10  ;;  %v5859_v44 = vsel %vm1444_vm4, %v12125_v62, %v12417_v60  ;;  %v6525_v57 = vld [vmem:[#allocation6 + $0x10] sm:$0x3] }
 0x6eb   : > { %v12430_v30 = vpop.permute.xlu0 %5666  ;;  %v6035_v12 = vsel %vm2746_vm13, %v12388_v35, %v5761_v47  ;;  %v5281_v13 = vpack.c.bf16 %v5243_v3, %v5243_v3  ;;  %v5891_v1 = vsel %vm1956_vm14, %v5859_v44, %v12399_v38  ;;  %v12539_v10 = vpack.c.bf16 %v6525_v57, %v6525_v57 }
 0x6ec   : > { %5195 = vst.msk [vmem:[#allocation5 + $0x189] sm:$0xff] %vm1444_vm4, %v5105_v32  ;;  %5838 = vrot.lane.b32.xlu1 %v5551_v24, %s8899_s29  ;;  %5744 = vrot.lane.b32.xlu0 %v5551_v24, %s8901_s24  ;;  %v5465_v35 = vsel %vm650_vm3, %v5460_v4, %v5464_v8  ;;  %v5469_v5 = vshll.u32 %v12480_v22, 16  ;;  %v5924_v34 = vsel %vm5912_vm7, %v5891_v1, %v12430_v30  ;;  %v5467_v9 = vshrl.u32 %v12480_v22, 16 }
 0x6ed   : > { %v5556_v38 = vrot.slane %v5281_v13, 1 }
 0x6ee   : > { %v5825_v53 = vpop.permute.xlu1 %5824  ;;  %v5471_v28 = vrot.slane %v5469_v5, 1 }
 0x6ef   : > { %v12436_v0 = vpop.permute.xlu0 %5730 }
 0x6f0   : > { %5650 = vrot.lane.b32.xlu1 %v5551_v24, %s8892_s20  ;;  %5712 = vrot.lane.b32.xlu0 %v5453_v29, %s8893_s21  ;;  %v5555_v24 = vrot.slane %v12480_v22, 1  ;;  %v5472_v20 = vor.u32 %v5471_v28, %v5467_v9  ;;  %v6621_v28 = vshll.u32 %v12539_v10, 16 }
 0x6f1   : > { %v5244_v43 = vld [vmem:[#allocation5 + $0x180] sm:$0xff] }
 0x6f2   : > { %v12446_v17 = vpop.permute.xlu1 %5636  ;;  %v5557_v36 = vsel %vm875_vm2, %v5555_v24, %v5556_v38 }
 0x6f3   : > { %v5699_v45 = vpop.permute.xlu0 %5698  ;;  %v5246_v16 = vld [vmem:[#allocation5 + $0x190] sm:$0x3] }
 0x6f4   : > { %5806 = vrot.lane.b32.xlu1 %v5453_v29, %s8902_s16  ;;  %5618 = vrot.lane.b32.xlu0 %v5453_v29, %s8890_s25  ;;  %v5956_v32 = vsel %vm2697_vm1, %v5924_v34, %v5699_v45  ;;  %v5245_v45 = vld [vmem:[#allocation5 + $0x188] sm:$0xff] }
 0x6f5   : > { %v5994_v50 = vsel %vm5977_vm9, %v5956_v32, %v12436_v0 }
 0x6f6   : > { %v5793_v40 = vpop.permute.xlu1 %5792 }
 0x6f7   : > { %v6068_v55 = vsel %vm6058_vm8, %v6035_v12, %v5793_v40  ;;  %v12460_v26 = vpop.permute.xlu0 %5604  ;;  %v5282_v12 = vpack.c.bf16 %v5245_v45, %v5244_v43  ;;  %v5283_v40 = vpack.c.bf16 %v5246_v16, %v5246_v16 }
 0x6f8   : > { %5776 = vrot.lane.b32.xlu1 %v12439_v27, %s8896_s27  ;;  %5682 = vrot.lane.b32.xlu0 %v12439_v27, %s8900_s15  ;;  %v6100_v33 = vsel %vm2779_vm15, %v6068_v55, %v5825_v53  ;;  %v5474_v53 = vshll.u32 %v5281_v13, 16  ;;  %v5247_v55 = vld [vmem:[#allocation5 + $0x198] sm:$0xff]  ;;  %v5861_v48 = vsel %vm1444_vm4, %v12143_v46, %v12460_v26  ;;  %v5249_v26 = vld [vmem:[#allocation5 + $0x1a8] sm:$0x3] }
 0x6f9   : > { %8232 = vmatprep.mubr.msk.bf16.mxu1 %vm6238_vm10, %v6100_v33  ;;  %v6524_v33 = vld [vmem:[#allocation6 + $0x8] sm:$0xff]  ;;  %v5561_v4 = vshll.u32 %v5282_v12, 16  ;;  %v5893_v8 = vsel %vm1956_vm14, %v5861_v48, %v12446_v17  ;;  %v12535_v46 = vpack.c.bf16 %v5248_v39, %v5247_v55  ;;  %v5285_v32 = vpack.c.bf16 %v5249_v26, %v5249_v26 }
 0x6fa   : > { %v5763_v23 = vpop.permute.xlu1 %5762  ;;  %6340 = vmatmul.mubr.bf16.gmra.mrb[152].mxu1 %v5991_v42  ;;  %v5476_v59 = vrot.slane %v5474_v53, 1  ;;  %v12527_v63 = vpack.c.bf16 %v6524_v33, %v6523_v58  ;;  %v6838_v26 = vrot.slane %v12539_v10, 1 }
 0x6fb   : > { %v12472_v51 = vpop.permute.xlu0 %5668  ;;  %v6037_v62 = vsel %vm2746_vm13, %v12436_v0, %v5763_v23  ;;  %v5572_v23 = vrot.slane %v5282_v12, 1  ;;  %v5563_v34 = vrot.slane %v5561_v4, 1  ;;  %v5576_v53 = vshrl.u32 %v12535_v46, 16 }
 0x6fc   : > { %5840 = vrot.lane.b32.xlu1 %v5554_v37, %s8899_s29  ;;  %5746 = vrot.lane.b32.xlu0 %v5554_v37, %s8901_s24  ;;  %v5477_v54 = vsel %vm650_vm3, %v5472_v20, %v5476_v59  ;;  %v6614_v24 = vshrl.u32 %v12527_v63, 16  ;;  %v5583_v20 = vshll.u32 %v5285_v32, 16 }
 0x6fe   : > { %v5827_v61 = vpop.permute.xlu1 %5826 }
 0x6ff   : > { %v12477_v52 = vpop.permute.xlu0 %5732 }
 0x700   : > { %5652 = vrot.lane.b32.xlu1 %v5554_v37, %s8892_s20  ;;  %5714 = vrot.lane.b32.xlu0 %v5465_v35, %s8893_s21  ;;  %v5573_v37 = vrot.slane %v5283_v40, 1 }
 0x702   : > { %v12487_v15 = vpop.permute.xlu1 %5638  ;;  %v5574_v1 = vsel %vm875_vm2, %v5572_v23, %v5573_v37 }
 0x703   : > { %v5701_v6 = vpop.permute.xlu0 %5700 }
 0x704   : > { %5808 = vrot.lane.b32.xlu1 %v5465_v35, %s8902_s16  ;;  %5620 = vrot.lane.b32.xlu0 %v5465_v35, %s8890_s25  ;;  %v6616_v35 = vshll.u32 %v12527_v63, 16 }
 0x706   : > { %v5795_v60 = vpop.permute.xlu1 %5794  ;;  %v6618_v38 = vrot.slane %v6616_v35, 1 }
 0x707   : > { %v6070_v47 = vsel %vm6058_vm8, %v6037_v62, %v5795_v60  ;;  %v12500_v41 = vpop.permute.xlu0 %5606  ;;  %v5559_v62 = vshrl.u32 %v5282_v12, 16  ;;  %v5578_v60 = vshll.u32 %v12535_v46, 16 }
 0x708   : > { %5778 = vrot.lane.b32.xlu1 %v12480_v22, %s8896_s27  ;;  %5684 = vrot.lane.b32.xlu0 %v12480_v22, %s8900_s15  ;;  %v6102_v30 = vsel %vm2779_vm15, %v6070_v47, %v5827_v61  ;;  %v5926_v61 = vsel %vm5912_vm7, %v5893_v8, %v12472_v51  ;;  %v6619_v45 = vor.u32 %v6618_v38, %v6614_v24 }
 0x709   : > { %8233 = vmatprep.mubr.msk.bf16.mxu1 %vm6238_vm10, %v6102_v30  ;;  %v5958_v3 = vsel %vm2697_vm1, %v5926_v61, %v5701_v6  ;;  %v5566_v6 = vshll.u32 %v5283_v40, 16  ;;  %v5564_v9 = vor.u32 %v5563_v34, %v5559_v62  ;;  %v5863_v43 = vsel %vm1444_vm4, %v12165_v2, %v12500_v41 }
 0x70a   : > { %v5765_v49 = vpop.permute.xlu1 %5764  ;;  %6348 = vmatmul.mubr.bf16.gmra.mrb[156].mxu1 %v5994_v50  ;;  %v5997_v47 = vsel %vm5977_vm9, %v5958_v3, %v12477_v52  ;;  %v5895_v39 = vsel %vm1956_vm14, %v5863_v43, %v12487_v15  ;;  %v5589_v2 = vrot.slane %v12535_v46, 1  ;;  %v5590_v41 = vrot.slane %v5285_v32, 1 }
 0x70b   : > { %v12512_v29 = vpop.permute.xlu0 %5670  ;;  %v6039_v44 = vsel %vm2746_vm13, %v12477_v52, %v5765_v49  ;;  %v5580_v49 = vrot.slane %v5578_v60, 1  ;;  %v6623_v52 = vrot.slane %v6621_v28, 1 }
 0x70c   : > { %5842 = vrot.lane.b32.xlu1 %v5557_v36, %s8899_s29  ;;  %5748 = vrot.lane.b32.xlu0 %v5557_v36, %s8901_s24  ;;  %v5928_v58 = vsel %vm5912_vm7, %v5895_v39, %v12512_v29 }
 0x70d   : > { %v6624_v40 = vsel %vm650_vm3, %v6619_v45, %v6623_v52 }
 0x70e   : > { %v5829_v31 = vpop.permute.xlu1 %5828 }
 0x70f   : > { %v12517_v0 = vpop.permute.xlu0 %5734 }
 0x710   : > { %5654 = vrot.lane.b32.xlu1 %v5557_v36, %s8892_s20  ;;  %5716 = vrot.lane.b32.xlu0 %v5477_v54, %s8893_s21  ;;  %v5568_v36 = vrot.slane %v5566_v6, 1 }
 0x712   : > { %v12525_v42 = vpop.permute.xlu1 %5640 }
 0x713   : > { %v12529_v21 = vpop.permute.xlu0 %5702 }
 0x714   : > { %5810 = vrot.lane.b32.xlu1 %v5477_v54, %s8902_s16  ;;  %5622 = vrot.lane.b32.xlu0 %v5477_v54, %s8890_s25  ;;  %v5581_v54 = vor.u32 %v5580_v49, %v5576_v53  ;;  %v5960_v23 = vsel %vm2697_vm1, %v5928_v58, %v12529_v21  ;;  %v6837_v21 = vrot.slane %v12527_v63, 1 }
 0x715   : > { %v6000_v29 = vsel %vm5977_vm9, %v5960_v23, %v12517_v0 }
 0x716   : > { %v5797_v17 = vpop.permute.xlu1 %5796  ;;  %v6839_v3 = vsel %vm875_vm2, %v6837_v21, %v6838_v26 }
 0x717   : > { %v6072_v13 = vsel %vm6058_vm8, %v6039_v44, %v5797_v17  ;;  %v12546_v5 = vpop.permute.xlu0 %5608  ;;  %v6574_v44 = vld [vmem:[#allocation6 + $0x198] sm:$0xff]  ;;  %v6575_v17 = vld [vmem:[#allocation6 + $0x1a0] sm:$0xff] }
 0x718   : > { %5780 = vrot.lane.b32.xlu1 %v5282_v12, %s8896_s27  ;;  %5750 = vrot.lane.b32.xlu0 %v5574_v1, %s8901_s24  ;;  %v6104_v51 = vsel %vm2779_vm15, %v6072_v13, %v5829_v31  ;;  %v5569_v31 = vsel %vm650_vm3, %v5564_v9, %v5568_v36  ;;  %v5865_v34 = vsel %vm1444_vm4, %v12187_v19, %v12546_v5 }
 0x719   : > { %8234 = vmatprep.mubr.msk.bf16.mxu1 %vm6238_vm10, %v6104_v51  ;;  %v5897_v51 = vsel %vm1956_vm14, %v5865_v34, %v12525_v42 }
 0x71a   : > { %v5767_v30 = vpop.permute.xlu1 %5766  ;;  %6356 = vmatmul.mubr.bf16.gmra.mrb[160].mxu1 %v5997_v47 }
 0x71b   : > { %v5673_v50 = vpop.permute.xlu0 %5672  ;;  %v6041_v37 = vsel %vm2746_vm13, %v12517_v0, %v5767_v30  ;;  %v12593_v0 = vpack.c.bf16 %v6575_v17, %v6574_v44 }
 0x71c   : > { %5844 = vrot.lane.b32.xlu1 %v5574_v1, %s8899_s29  ;;  %5686 = vrot.lane.b32.xlu0 %v5282_v12, %s8900_s15  ;;  %v5585_v12 = vrot.slane %v5583_v20, 1  ;;  %v5930_v62 = vsel %vm5912_vm7, %v5897_v51, %v5673_v50 }
 0x71e   : > { %v5831_v16 = vpop.permute.xlu1 %5830  ;;  %v5586_v33 = vsel %vm650_vm3, %v5581_v54, %v5585_v12 }
 0x71f   : > { %v5737_v59 = vpop.permute.xlu0 %5736 }
 0x720   : > { %5812 = vrot.lane.b32.xlu1 %v5569_v31, %s8902_s16  ;;  %5718 = vrot.lane.b32.xlu0 %v5569_v31, %s8893_s21 }
 0x722   : > { %v5643_v55 = vpop.permute.xlu1 %5642 }
 0x723   : > { %v5705_v48 = vpop.permute.xlu0 %5704 }
 0x724   : > { %5782 = vrot.lane.b32.xlu1 %v12535_v46, %s8896_s27  ;;  %6919 = vrot.lane.b32.xlu0 %v6624_v40, %s8890_s25  ;;  %v5591_v46 = vsel %vm875_vm2, %v5589_v2, %v5590_v41  ;;  %v5962_v6 = vsel %vm2697_vm1, %v5930_v62, %v5705_v48 }
 0x725   : > { %v6003_v5 = vsel %vm5977_vm9, %v5962_v6, %v5737_v59 }
 0x726   : > { %v5799_v15 = vpop.permute.xlu1 %5798 }
 0x727   : > { %v6074_v4 = vsel %vm6058_vm8, %v6041_v37, %v5799_v15  ;;  %v5611_v57 = vpop.permute.xlu0 %5610 }
 0x728   : > { %5814 = vrot.lane.b32.xlu1 %v5586_v33, %s8902_s16  ;;  %v6106_v8 = vsel %vm2779_vm15, %v6074_v4, %v5831_v16  ;;  %v5867_v50 = vsel %vm1444_vm4, %v12215_v18, %v5611_v57 }
 0x729   : > { %8235 = vmatprep.mubr.msk.bf16.mxu1 %vm6238_vm10, %v6106_v8  ;;  %v5899_v36 = vsel %vm1956_vm14, %v5867_v50, %v5643_v55 }
 0x72a   : > { %v5769_v61 = vpop.permute.xlu1 %5768  ;;  %6364 = vmatmul.mubr.bf16.gmra.mrb[164].mxu1 %v6000_v29 }
 0x72b   : > { %v5675_v35 = vpop.permute.xlu0 %5674  ;;  %v6043_v60 = vsel %vm2746_vm13, %v5737_v59, %v5769_v61 }
 0x72c   : > { %5846 = vrot.lane.b32.xlu1 %v5591_v46, %s8899_s29  ;;  %v5932_v20 = vsel %vm5912_vm7, %v5899_v36, %v5675_v35  ;;  %v8730_v36 = vld [vmem:[%s13433_s9 + $0x8] sm:$0xff]  }
 0x72e   : > { %v5833_v13 = vpop.permute.xlu1 %5832 }
 0x72f   : > { %v5739_v1 = vpop.permute.xlu0 %5738 }
 0x730   : > { %6951 = vrot.lane.b32.xlu1 %v6839_v3, %s8892_s20 }
 0x732   : > { %v5645_v10 = vpop.permute.xlu1 %5644 }
 0x733   : > { %v5707_v32 = vpop.permute.xlu0 %5706 }
 0x734   : > { %7109 = vrot.lane.b32.xlu1 %v12593_v0, %s8896_s27  ;;  %v5964_v45 = vsel %vm2697_vm1, %v5932_v20, %v5707_v32 }
 0x735   : > { %v6006_v18 = vsel %vm5977_vm9, %v5964_v45, %v5739_v1 }
 0x736   : > { %v5801_v47 = vpop.permute.xlu1 %5800 }
 0x737   : > { %v6076_v24 = vsel %vm6058_vm8, %v6043_v60, %v5801_v47  ;;  %v5613_v38 = vpop.permute.xlu0 %5612 }
 0x738   : > { %v6108_v19 = vsel %vm2779_vm15, %v6076_v24, %v5833_v13  ;;  %v5869_v48 = vsel %vm1444_vm4, %v12249_v56, %v5613_v38 }
 0x739   : > { %8236 = vmatprep.mubr.msk.bf16.mxu1 %vm6238_vm10, %v6108_v19  ;;  %v5901_v33 = vsel %vm1956_vm14, %v5869_v48, %v5645_v10 }
 0x73a   : > { %v5771_v42 = vpop.permute.xlu1 %5770  ;;  %6372 = vmatmul.mubr.bf16.gmra.mrb[168].mxu1 %v6003_v5 }
 0x73b   : > { %v5677_v28 = vpop.permute.xlu0 %5676  ;;  %v6045_v52 = vsel %vm2746_vm13, %v5739_v1, %v5771_v42  ;;  %v8729_v42 = vld [vmem:[%s13433_s9] sm:$0xff]  }
 0x73c   : > { %v5934_v2 = vsel %vm5912_vm7, %v5901_v33, %v5677_v28  ;;  %7598 = vmatpush1.bf16.msra.mxu0 %v8729_v42  ;;  %8574 = vmatpush1.bf16.msra.mxu1 %v8729_v42 }
 0x73d   : > { %7599 = vmatprep.subr.bf16.mxu0 %v8897_v14  ;;  %8561 = vmatprep.subr.bf16.mxu1 %v8897_v14 }
 0x73e   : > { %v5835_v30 = vpop.permute.xlu1 %5834 }
 0x73f   : > { %v5741_v9 = vpop.permute.xlu0 %5740 }
 0x740   : > { %7600 = vmatpush1.bf16.msra.mxu0 %v8730_v36  ;;  %8575 = vmatpush1.bf16.msra.mxu1 %v8730_v36 }
 0x741   : > { %7601 = vmatprep.subr.bf16.mxu0 %v8897_v14  ;;  %8562 = vmatprep.subr.bf16.mxu1 %v8897_v14 }
 0x742   : > { %v5647_v53 = vpop.permute.xlu1 %5646 }
 0x743   : > { %v5709_v49 = vpop.permute.xlu0 %5708 }
 0x744   : > { %v5966_v41 = vsel %vm2697_vm1, %v5934_v2, %v5709_v49 }
 0x745   : > { %v6009_v56 = vsel %vm5977_vm9, %v5966_v41, %v5741_v9 }
 0x746   : > { %v5803_v16 = vpop.permute.xlu1 %5802 }
 0x747   : > { %v6078_v59 = vsel %vm6058_vm8, %v6045_v52, %v5803_v16  ;;  %v5615_v31 = vpop.permute.xlu0 %5614 }
 0x748   : > { %v6110_v43 = vsel %vm2779_vm15, %v6078_v59, %v5835_v30  ;;  %v5871_v26 = vsel %vm1444_vm4, %v12292_v7, %v5615_v31  ;;  %v8731_v59 = vld [vmem:[%s13433_s9 + $0x10] sm:$0xff]  }
 0x749   : > { %8237 = vmatprep.mubr.msk.bf16.mxu1 %vm6238_vm10, %v6110_v43  ;;  %v5903_v3 = vsel %vm1956_vm14, %v5871_v26, %v5647_v53  ;;  %7602 = vmatpush1.bf16.msra.mxu0 %v8731_v59 }
 0x74a   : > { %v5773_v54 = vpop.permute.xlu1 %5772  ;;  %6380 = vmatmul.mubr.bf16.gmra.mrb[172].mxu1 %v6006_v18  ;;  %v8732_v18 = vld [vmem:[%s13433_s9 + $0x18] sm:$0xff]   ;;  %7603 = vmatprep.subr.bf16.mxu0 %v8897_v14 }
 0x74b   : > { %v5679_v12 = vpop.permute.xlu0 %5678  ;;  %v6047_v23 = vsel %vm2746_vm13, %v5741_v9, %v5773_v54  ;;  %8576 = vmatpush1.bf16.msra.mxu1 %v8731_v59 }
 0x74c   : > { %v5936_v44 = vsel %vm5912_vm7, %v5903_v3, %v5679_v12  ;;  %8563 = vmatprep.subr.bf16.mxu1 %v8897_v14 }
 0x74d   : > { %7604 = vmatpush1.bf16.msra.mxu0 %v8732_v18 }
 0x74e   : > { %v5837_v40 = vpop.permute.xlu1 %5836  ;;  %7605 = vmatprep.subr.bf16.mxu0 %v8897_v14 }
 0x74f   : > { %v5743_v55 = vpop.permute.xlu0 %5742  ;;  %8577 = vmatpush1.bf16.msra.mxu1 %v8732_v18 }
 0x750   : > { %8564 = vmatprep.subr.bf16.mxu1 %v8897_v14 }
 0x752   : > { %v5649_v39 = vpop.permute.xlu1 %5648 }
 0x753   : > { %v5711_v58 = vpop.permute.xlu0 %5710 }
 0x754   : > { %v5968_v17 = vsel %vm2697_vm1, %v5936_v44, %v5711_v58 }
 0x755   : > { %v6012_v7 = vsel %vm5977_vm9, %v5968_v17, %v5743_v55 }
 0x756   : > { %v5805_v37 = vpop.permute.xlu1 %5804 }
 0x757   : > { %v6080_v15 = vsel %vm6058_vm8, %v6047_v23, %v5805_v37  ;;  %v5617_v4 = vpop.permute.xlu0 %5616  ;;  %v8734_v37 = vld [vmem:[%s13433_s9 + $0x28] sm:$0xff]  }
 0x758   : > { %v6112_v57 = vsel %vm2779_vm15, %v6080_v15, %v5837_v40  ;;  %v5873_v47 = vsel %vm1444_vm4, %v12342_v25, %v5617_v4  ;;  %v12691_v15 = vld [vmem:[#allocation11] ss:$0 sm:$0xff] }
 0x759   : > { %8238 = vmatprep.mubr.msk.bf16.mxu1 %vm6238_vm10, %v6112_v57  ;;  %v5905_v19 = vsel %vm1956_vm14, %v5873_v47, %v5649_v39  ;;  %v8733_v39 = vld [vmem:[%s13433_s9 + $0x20] sm:$0xff]  }
 0x75a   : > { %v5775_v8 = vpop.permute.xlu1 %5774  ;;  %6388 = vmatmul.mubr.bf16.gmra.mrb[176].mxu1 %v6009_v56  ;;  %7606 = vmatpush1.bf16.msra.mxu0 %v8733_v39 }
 0x75b   : > { %v5681_v29 = vpop.permute.xlu0 %5680  ;;  %v6049_v13 = vsel %vm2746_vm13, %v5743_v55, %v5775_v8  ;;  %7607 = vmatprep.subr.bf16.mxu0 %v8897_v14  ;;  %8578 = vmatpush1.bf16.msra.mxu1 %v8733_v39 }
 0x75c   : > { %v5938_v5 = vsel %vm5912_vm7, %v5905_v19, %v5681_v29  ;;  %8565 = vmatprep.subr.bf16.mxu1 %v8897_v14 }
 0x75e   : > { %v5839_v46 = vpop.permute.xlu1 %5838  ;;  %7608 = vmatpush1.bf16.msra.mxu0 %v8734_v37 }
 0x75f   : > { %v5745_v21 = vpop.permute.xlu0 %5744  ;;  %7609 = vmatprep.subr.bf16.mxu0 %v8897_v14  ;;  %8579 = vmatpush1.bf16.msra.mxu1 %v8734_v37 }
 0x760   : > { %8566 = vmatprep.subr.bf16.mxu1 %v8897_v14 }
 0x762   : > { %v5651_v61 = vpop.permute.xlu1 %5650 }
 0x763   : > { %v5713_v35 = vpop.permute.xlu0 %5712 }
 0x764   : > { %v5970_v28 = vsel %vm2697_vm1, %v5938_v5, %v5713_v35  ;;  %v8735_v35 = vld [vmem:[%s13433_s9 + $0x30] sm:$0xff]  }
 0x765   : > { %v6015_v49 = vsel %vm5977_vm9, %v5970_v28, %v5745_v21  ;;  %7610 = vmatpush1.bf16.msra.mxu0 %v8735_v35  ;;  %8580 = vmatpush1.bf16.msra.mxu1 %v8735_v35 }
 0x766   : > { %v5807_v1 = vpop.permute.xlu1 %5806  ;;  %7611 = vmatprep.subr.bf16.mxu0 %v8897_v14  ;;  %8567 = vmatprep.subr.bf16.mxu1 %v8897_v14 }
 0x767   : > { %v6082_v34 = vsel %vm6058_vm8, %v6049_v13, %v5807_v1  ;;  %v5619_v10 = vpop.permute.xlu0 %5618  ;;  %v8736_v1 = vld [vmem:[%s13433_s9 + $0x38] sm:$0xff]  }
 0x768   : > { %v6114_v32 = vsel %vm2779_vm15, %v6082_v34, %v5839_v46  ;;  %v5875_v31 = vsel %vm1444_vm4, %v12391_v11, %v5619_v10 }
 0x769   : > { %8239 = vmatprep.mubr.msk.bf16.mxu1 %vm6238_vm10, %v6114_v32  ;;  %v5907_v12 = vsel %vm1956_vm14, %v5875_v31, %v5651_v61  ;;  %7612 = vmatpush1.bf16.msra.mxu0 %v8736_v1 }
 0x76a   : > { %v5777_v51 = vpop.permute.xlu1 %5776  ;;  %6396 = vmatmul.mubr.bf16.gmra.mrb[180].mxu1 %v6012_v7  ;;  %7613 = vmatprep.subr.bf16.mxu0 %v8897_v14 }
 0x76b   : > { %v5683_v62 = vpop.permute.xlu0 %5682  ;;  %v6051_v30 = vsel %vm2746_vm13, %v5745_v21, %v5777_v51  ;;  %8581 = vmatpush1.bf16.msra.mxu1 %v8736_v1 }
 0x76c   : > { %v5940_v40 = vsel %vm5912_vm7, %v5907_v12, %v5683_v62  ;;  %8568 = vmatprep.subr.bf16.mxu1 %v8897_v14 }
 0x76e   : > { %v5841_v6 = vpop.permute.xlu1 %5840 }
 0x76f   : > { %v5747_v60 = vpop.permute.xlu0 %5746 }
 0x772   : > { %v12641_v24 = vpop.permute.xlu1 %5652 }
 0x773   : > { %v5715_v38 = vpop.permute.xlu0 %5714 }
 0x774   : > { %v5972_v55 = vsel %vm2697_vm1, %v5940_v40, %v5715_v38 }
 0x775   : > { %v6018_v41 = vsel %vm5977_vm9, %v5972_v55, %v5747_v60 }
 0x776   : > { %v5809_v9 = vpop.permute.xlu1 %5808 }
 0x777   : > { %v6084_v50 = vsel %vm6058_vm8, %v6051_v30, %v5809_v9  ;;  %v5621_v53 = vpop.permute.xlu0 %5620  ;;  %v8738_v30 = vld [vmem:[%s13433_s9 + $0x48] sm:$0xff]  }
 0x778   : > { %v6116_v25 = vsel %vm2779_vm15, %v6084_v50, %v5841_v6  ;;  %v5877_v4 = vsel %vm1444_vm4, %v12439_v27, %v5621_v53  ;;  %v8737_v6 = vld [vmem:[%s13433_s9 + $0x40] sm:$0xff]  }
 0x779   : > { %8240 = vmatprep.mubr.msk.bf16.mxu1 %vm6238_vm10, %v6116_v25  ;;  %v5909_v26 = vsel %vm1956_vm14, %v5877_v4, %v12641_v24  ;;  %7614 = vmatpush1.bf16.msra.mxu0 %v8737_v6 }
 0x77a   : > { %v5779_v20 = vpop.permute.xlu1 %5778  ;;  %6404 = vmatmul.mubr.bf16.gmra.mrb[184].mxu1 %v6015_v49  ;;  %7615 = vmatprep.subr.bf16.mxu0 %v8897_v14 }
 0x77b   : > { %v5685_v45 = vpop.permute.xlu0 %5684  ;;  %v6053_v11 = vsel %vm2746_vm13, %v5747_v60, %v5779_v20  ;;  %8582 = vmatpush1.bf16.msra.mxu1 %v8737_v6 }
 0x77c   : > { %v5942_v3 = vsel %vm5912_vm7, %v5909_v26, %v5685_v45  ;;  %8569 = vmatprep.subr.bf16.mxu1 %v8897_v14 }
 0x77d   : > { %7616 = vmatpush1.bf16.msra.mxu0 %v8738_v30 }
 0x77e   : > { %v5843_v52 = vpop.permute.xlu1 %5842  ;;  %7617 = vmatprep.subr.bf16.mxu0 %v8897_v14 }
 0x77f   : > { %v12661_v16 = vpop.permute.xlu0 %5748  ;;  %8583 = vmatpush1.bf16.msra.mxu1 %v8738_v30 }
 0x780   : > { %8570 = vmatprep.subr.bf16.mxu1 %v8897_v14 }
 0x782   : > { %v12668_v43 = vpop.permute.xlu1 %5654 }
 0x783   : > { %v5717_v54 = vpop.permute.xlu0 %5716 }
 0x784   : > { %v5974_v44 = vsel %vm2697_vm1, %v5942_v3, %v5717_v54 }
 0x785   : > { %v6021_v7 = vsel %vm5977_vm9, %v5974_v44, %v12661_v16 }
 0x786   : > { %v5811_v48 = vpop.permute.xlu1 %5810 }
 0x787   : > { %v6086_v58 = vsel %vm6058_vm8, %v6053_v11, %v5811_v48  ;;  %v5623_v33 = vpop.permute.xlu0 %5622 }
 0x788   : > { %v6118_v2 = vsel %vm2779_vm15, %v6086_v58, %v5843_v52  ;;  %v5879_v62 = vsel %vm1444_vm4, %v12480_v22, %v5623_v33  ;;  %v8739_v58 = vld [vmem:[%s13433_s9 + $0x50] sm:$0xff]  }
 0x789   : > { %8241 = vmatprep.mubr.msk.bf16.mxu1 %vm6238_vm10, %v6118_v2  ;;  %v5911_v38 = vsel %vm1956_vm14, %v5879_v62, %v12668_v43  ;;  %7618 = vmatpush1.bf16.msra.mxu0 %v8739_v58  ;;  %v8740_v2 = vld [vmem:[%s13433_s9 + $0x58] sm:$0xff]  }
 0x78a   : > { %v5781_v23 = vpop.permute.xlu1 %5780  ;;  %6412 = vmatmul.mubr.bf16.gmra.mrb[188].mxu1 %v6018_v41  ;;  %7619 = vmatprep.subr.bf16.mxu0 %v8897_v14  ;;  %v8741_v41 = vld [vmem:[%s13433_s9 + $0x60] sm:$0xff]  }
 0x78b   : > { %v12697_v57 = vpop.permute.xlu0 %5750  ;;  %v6055_v17 = vsel %vm2746_vm13, %v12661_v16, %v5781_v23  ;;  %8584 = vmatpush1.bf16.msra.mxu1 %v8739_v58 }
 0x78c   : > { %8571 = vmatprep.subr.bf16.mxu1 %v8897_v14 }
 0x78d   : > { %v6309_v56 = vpop.f32.mrb[136].mxu1  ;;  %7620 = vmatpush1.bf16.msra.mxu0 %v8740_v2 }
 0x78e   : > { %v6310_v8 = vadd.f32 %v12691_v15, %v6309_v56  ;;  %v5845_v29 = vpop.permute.xlu1 %5844  ;;  %v6311_v46 = vpop.f32.mrb[137].mxu1  ;;  %7621 = vmatprep.subr.bf16.mxu0 %v8897_v14 }
 0x78f   : > { %v6312_v21 = vpop.f32.mrb[138].mxu1  ;;  %v5687_v10 = vpop.permute.xlu0 %5686  ;;  %8585 = vmatpush1.bf16.msra.mxu1 %v8740_v2 }
 0x790   : > { %6491 = vst.msk [vmem:[#allocation6 + $0x19] sm:$0xff] %vm1444_vm4, %v6310_v8  ;;  %v6313_v61 = vadd.f32 %v12691_v15, %v6312_v21  ;;  %v6314_v27 = vpop.f32.mrb[139].mxu1  ;;  %v5944_v28 = vsel %vm5912_vm7, %v5911_v38, %v5687_v10  ;;  %v8742_v8 = vld [vmem:[%s13433_s9 + $0x68] ss:$0 sps:$4 sm:$0xff]   ;;  %8572 = vmatprep.subr.bf16.mxu1 %v8897_v14 }
 0x791   : > { %7622 = vmatpush1.bf16.msra.mxu0 %v8741_v41  ;;  %v7595_v27 = vsel %vm6271_vm0, %v8742_v8, 0 }
 0x792   : > { %6492 = vst.msk [vmem:[#allocation6 + $0x21] sm:$0xff] %vm1444_vm4, %v6313_v61  ;;  %v5813_v13 = vpop.permute.xlu1 %5812  ;;  %7623 = vmatprep.subr.bf16.mxu0 %v8897_v14 }
 0x793   : > { %v6088_v34 = vsel %vm6058_vm8, %v6055_v17, %v5813_v13  ;;  %v5719_v19 = vpop.permute.xlu0 %5718  ;;  %8586 = vmatpush1.bf16.msra.mxu1 %v8741_v41 }
 0x794   : > { %v6120_v32 = vsel %vm2779_vm15, %v6088_v34, %v5845_v29  ;;  %v5976_v49 = vsel %vm2697_vm1, %v5944_v28, %v5719_v19  ;;  %8573 = vmatprep.subr.bf16.mxu1 %v8897_v14 }
 0x795   : > { %8242 = vmatprep.mubr.msk.bf16.mxu1 %vm6238_vm10, %v6120_v32  ;;  %v6024_v11 = vsel %vm5977_vm9, %v5976_v49, %v12697_v57  ;;  %7624 = vmatpush1.bf16.msra.mxu0 %v7595_v27 }
 0x796   : > { %v5783_v51 = vpop.permute.xlu1 %5782  ;;  %6420 = vmatmul.mubr.bf16.gmra.mrb[192].mxu1 %v6021_v7 }
 0x797   : > { %v6526_v60 = vld [vmem:[#allocation6 + $0x18] sm:$0xff]  ;;  %v6057_v9 = vsel %vm2746_vm13, %v12697_v57, %v5783_v51  ;;  %8587 = vmatpush1.bf16.msra.mxu1 %v7595_v27 }
 0x799   : > { %v6527_v47 = vld [vmem:[#allocation6 + $0x20] sm:$0xff]  ;;  %v6528_v24 = vld [vmem:[#allocation6 + $0x28] sm:$0x3] }
 0x79a   : > { %v5815_v5 = vpop.permute.xlu1 %5814  ;;  %v12733_v42 = vpack.c.bf16 %v6527_v47, %v6526_v60  ;;  %v6580_v22 = vpack.c.bf16 %v6528_v24, %v6528_v24 }
 0x79b   : > { %v6090_v36 = vsel %vm6058_vm8, %v6057_v9, %v5815_v5 }
 0x79c   : > { %6983 = vrot.lane.b32.xlu0 %v12733_v42, %s8900_s15  ;;  %v6840_v50 = vrot.slane %v12733_v42, 1  ;;  %v6841_v53 = vrot.slane %v6580_v22, 1  ;;  %v6628_v25 = vshll.u32 %v12733_v42, 16  ;;  %v6633_v45 = vshll.u32 %v6580_v22, 16 }
 0x79d   : > { %v6317_v20 = vpop.f32.mrb[140].mxu1  ;;  %v6626_v43 = vshrl.u32 %v12733_v42, 16 }
 0x79e   : > { %v6318_v52 = vadd.f32 %v12691_v15, %v6317_v20  ;;  %v5847_v16 = vpop.permute.xlu1 %5846  ;;  %v6319_v59 = vpop.f32.mrb[141].mxu1  ;;  %v6842_v31 = vsel %vm875_vm2, %v6840_v50, %v6841_v53  ;;  %v6630_v18 = vrot.slane %v6628_v25, 1  ;;  %v6635_v39 = vrot.slane %v6633_v45, 1 }
 0x79f   : > { %v6122_v54 = vsel %vm2779_vm15, %v6090_v36, %v5847_v16  ;;  %6953 = vrot.lane.b32.xlu1 %v6842_v31, %s8892_s20  ;;  %v6320_v12 = vpop.f32.mrb[142].mxu1 }
 0x7a0   : > { %6493 = vst.msk [vmem:[#allocation6 + $0x31] sm:$0xff] %vm1444_vm4, %v6318_v52  ;;  %v6321_v40 = vadd.f32 %v12691_v15, %v6320_v12  ;;  %v6322_v55 = vpop.f32.mrb[143].mxu1  ;;  %7047 = vrot.lane.b32.xlu0 %v6842_v31, %s8901_s24  ;;  %8243 = vmatprep.mubr.msk.bf16.mxu1 %vm6238_vm10, %v6122_v54  ;;  %v6631_v48 = vor.u32 %v6630_v18, %v6626_v43 }
 0x7a1   : > { %6428 = vmatmul.mubr.bf16.gmra.mrb[196].mxu1 %v6024_v11 }
 0x7a2   : > { %6494 = vst.msk [vmem:[#allocation6 + $0x39] sm:$0xff] %vm1444_vm4, %v6321_v40  ;;  %v6636_v33 = vsel %vm650_vm3, %v6631_v48, %v6635_v39 }
 0x7a4   : > { %7015 = vrot.lane.b32.xlu0 %v6636_v33, %s8893_s21 }
 0x7a7   : > { %v6529_v23 = vld [vmem:[#allocation6 + $0x30] sm:$0xff] }
 0x7a8   : > { %6921 = vrot.lane.b32.xlu0 %v6636_v33, %s8890_s25 }
 0x7a9   : > { %v6530_v37 = vld [vmem:[#allocation6 + $0x38] sm:$0xff]  ;;  %v6531_v4 = vld [vmem:[#allocation6 + $0x40] sm:$0x3] }
 0x7aa   : > { %v12778_v57 = vpack.c.bf16 %v6530_v37, %v6529_v23  ;;  %v6582_v56 = vpack.c.bf16 %v6531_v4, %v6531_v4 }
 0x7ac   : > { %7079 = vrot.lane.b32.xlu1 %v12778_v57, %s8896_s27  ;;  %6985 = vrot.lane.b32.xlu0 %v12778_v57, %s8900_s15  ;;  %v6843_v29 = vrot.slane %v12778_v57, 1  ;;  %v6844_v46 = vrot.slane %v6582_v56, 1  ;;  %v6640_v21 = vshll.u32 %v12778_v57, 16  ;;  %v6645_v61 = vshll.u32 %v6582_v56, 16 }
 0x7ad   : > { %v6325_v26 = vpop.f32.mrb[144].mxu1  ;;  %v6638_v17 = vshrl.u32 %v12778_v57, 16 }
 0x7ae   : > { %v6326_v35 = vadd.f32 %v12691_v15, %v6325_v26  ;;  %v6327_v3 = vpop.f32.mrb[145].mxu1  ;;  %v6845_v44 = vsel %vm875_vm2, %v6843_v29, %v6844_v46  ;;  %v6642_v13 = vrot.slane %v6640_v21, 1  ;;  %v6647_v7 = vrot.slane %v6645_v61, 1 }
 0x7af   : > { %v6328_v1 = vpop.f32.mrb[146].mxu1 }
 0x7b0   : > { %6495 = vst.msk [vmem:[#allocation6 + $0x49] sm:$0xff] %vm1444_vm4, %v6326_v35  ;;  %v6329_v34 = vadd.f32 %v12691_v15, %v6328_v1  ;;  %7143 = vrot.lane.b32.xlu1 %v6845_v44, %s8899_s29  ;;  %v6330_v10 = vpop.f32.mrb[147].mxu1  ;;  %7049 = vrot.lane.b32.xlu0 %v6845_v44, %s8901_s24  ;;  %v6643_v32 = vor.u32 %v6642_v13, %v6638_v17 }
 0x7b2   : > { %6496 = vst.msk [vmem:[#allocation6 + $0x51] sm:$0xff] %vm1444_vm4, %v6329_v34  ;;  %v6648_v51 = vsel %vm650_vm3, %v6643_v32, %v6647_v7 }
 0x7b4   : > { %6955 = vrot.lane.b32.xlu1 %v6845_v44, %s8892_s20  ;;  %7017 = vrot.lane.b32.xlu0 %v6648_v51, %s8893_s21 }
 0x7b7   : > { %v6532_v14 = vld [vmem:[#allocation6 + $0x48] sm:$0xff] }
 0x7b8   : > { %7111 = vrot.lane.b32.xlu1 %v6648_v51, %s8902_s16  ;;  %6923 = vrot.lane.b32.xlu0 %v6648_v51, %s8890_s25 }
 0x7b9   : > { %v6533_v62 = vld [vmem:[#allocation6 + $0x50] sm:$0xff]  ;;  %v6534_v6 = vld [vmem:[#allocation6 + $0x58] sm:$0x3] }
 0x7ba   : > { %v12806_v60 = vpack.c.bf16 %v6533_v62, %v6532_v14  ;;  %v6584_v47 = vpack.c.bf16 %v6534_v6, %v6534_v6 }
 0x7bc   : > { %7081 = vrot.lane.b32.xlu1 %v12806_v60, %s8896_s27  ;;  %6987 = vrot.lane.b32.xlu0 %v12806_v60, %s8900_s15  ;;  %v6846_v24 = vrot.slane %v12806_v60, 1  ;;  %v6847_v38 = vrot.slane %v6584_v47, 1  ;;  %v6652_v19 = vshll.u32 %v12806_v60, 16  ;;  %v6657_v5 = vshll.u32 %v6584_v47, 16 }
 0x7bd   : > { %v6333_v22 = vpop.f32.mrb[148].mxu1  ;;  %v6650_v30 = vshrl.u32 %v12806_v60, 16 }
 0x7be   : > { %v6848_v28 = vsel %vm875_vm2, %v6846_v24, %v6847_v38  ;;  %v6654_v9 = vrot.slane %v6652_v19, 1  ;;  %v6334_v50 = vadd.f32 %v12691_v15, %v6333_v22  ;;  %v6335_v53 = vpop.f32.mrb[149].mxu1  ;;  %v6659_v36 = vrot.slane %v6657_v5, 1 }
 0x7bf   : > { %v6336_v25 = vpop.f32.mrb[150].mxu1 }
 0x7c0   : > { %7145 = vrot.lane.b32.xlu1 %v6848_v28, %s8899_s29  ;;  %7051 = vrot.lane.b32.xlu0 %v6848_v28, %s8901_s24  ;;  %v6655_v49 = vor.u32 %v6654_v9, %v6650_v30  ;;  %6497 = vst.msk [vmem:[#allocation6 + $0x61] sm:$0xff] %vm1444_vm4, %v6334_v50  ;;  %v6337_v20 = vadd.f32 %v12691_v15, %v6336_v25  ;;  %v6338_v45 = vpop.f32.mrb[151].mxu1 }
 0x7c2   : > { %v6660_v52 = vsel %vm650_vm3, %v6655_v49, %v6659_v36  ;;  %6498 = vst.msk [vmem:[#allocation6 + $0x69] sm:$0xff] %vm1444_vm4, %v6337_v20 }
 0x7c4   : > { %6957 = vrot.lane.b32.xlu1 %v6848_v28, %s8892_s20  ;;  %7019 = vrot.lane.b32.xlu0 %v6660_v52, %s8893_s21 }
 0x7c7   : > { %v6535_v16 = vld [vmem:[#allocation6 + $0x60] sm:$0xff] }
 0x7c8   : > { %7113 = vrot.lane.b32.xlu1 %v6660_v52, %s8902_s16  ;;  %6925 = vrot.lane.b32.xlu0 %v6660_v52, %s8890_s25 }
 0x7c9   : > { %v6536_v59 = vld [vmem:[#allocation6 + $0x68] sm:$0xff]  ;;  %v6537_v31 = vld [vmem:[#allocation6 + $0x70] sm:$0x3] }
 0x7ca   : > { %v12827_v43 = vpack.c.bf16 %v6536_v59, %v6535_v16  ;;  %v6586_v18 = vpack.c.bf16 %v6537_v31, %v6537_v31 }
 0x7cc   : > { %7083 = vrot.lane.b32.xlu1 %v12827_v43, %s8896_s27  ;;  %6989 = vrot.lane.b32.xlu0 %v12827_v43, %s8900_s15  ;;  %v6849_v12 = vrot.slane %v12827_v43, 1  ;;  %v6850_v40 = vrot.slane %v6586_v18, 1  ;;  %v6664_v55 = vshll.u32 %v12827_v43, 16  ;;  %v6669_v39 = vshll.u32 %v6586_v18, 16 }
 0x7cd   : > { %v6341_v54 = vpop.f32.mrb[152].mxu1  ;;  %v6662_v2 = vshrl.u32 %v12827_v43, 16 }
 0x7ce   : > { %v6342_v11 = vadd.f32 %v12691_v15, %v6341_v54  ;;  %v6343_v48 = vpop.f32.mrb[153].mxu1  ;;  %v6851_v33 = vsel %vm875_vm2, %v6849_v12, %v6850_v40  ;;  %v6666_v41 = vrot.slane %v6664_v55, 1  ;;  %v6671_v56 = vrot.slane %v6669_v39, 1 }
 0x7cf   : > { %v6344_v58 = vpop.f32.mrb[154].mxu1 }
 0x7d0   : > { %6499 = vst.msk [vmem:[#allocation6 + $0x79] sm:$0xff] %vm1444_vm4, %v6342_v11  ;;  %v6345_v23 = vadd.f32 %v12691_v15, %v6344_v58  ;;  %v6346_v37 = vpop.f32.mrb[155].mxu1  ;;  %7147 = vrot.lane.b32.xlu1 %v6851_v33, %s8899_s29  ;;  %7053 = vrot.lane.b32.xlu0 %v6851_v33, %s8901_s24  ;;  %v6667_v4 = vor.u32 %v6666_v41, %v6662_v2 }
 0x7d2   : > { %6500 = vst.msk [vmem:[#allocation6 + $0x81] sm:$0xff] %vm1444_vm4, %v6345_v23  ;;  %v6672_v8 = vsel %vm650_vm3, %v6667_v4, %v6671_v56 }
 0x7d4   : > { %6959 = vrot.lane.b32.xlu1 %v6851_v33, %s8892_s20  ;;  %7021 = vrot.lane.b32.xlu0 %v6672_v8, %s8893_s21 }
 0x7d7   : > { %v6538_v29 = vld [vmem:[#allocation6 + $0x78] sm:$0xff] }
 0x7d8   : > { %7115 = vrot.lane.b32.xlu1 %v6672_v8, %s8902_s16  ;;  %6927 = vrot.lane.b32.xlu0 %v6672_v8, %s8890_s25 }
 0x7d9   : > { %v6539_v46 = vld [vmem:[#allocation6 + $0x80] sm:$0xff]  ;;  %v6540_v21 = vld [vmem:[#allocation6 + $0x88] sm:$0x3] }
 0x7da   : > { %v12848_v26 = vpack.c.bf16 %v6539_v46, %v6538_v29  ;;  %v6588_v61 = vpack.c.bf16 %v6540_v21, %v6540_v21 }
 0x7dc   : > { %v6852_v27 = vrot.slane %v12848_v26, 1  ;;  %v6853_v35 = vrot.slane %v6588_v61, 1  ;;  %v6676_v3 = vshll.u32 %v12848_v26, 16  ;;  %7085 = vrot.lane.b32.xlu1 %v12848_v26, %s8896_s27  ;;  %6991 = vrot.lane.b32.xlu0 %v12848_v26, %s8900_s15  ;;  %v6681_v17 = vshll.u32 %v6588_v61, 16 }
 0x7dd   : > { %v6349_v44 = vpop.f32.mrb[156].mxu1  ;;  %v6674_v10 = vshrl.u32 %v12848_v26, 16 }
 0x7de   : > { %v6350_v13 = vadd.f32 %v12691_v15, %v6349_v44  ;;  %v6351_v1 = vpop.f32.mrb[157].mxu1  ;;  %v6854_v34 = vsel %vm875_vm2, %v6852_v27, %v6853_v35  ;;  %v6678_v32 = vrot.slane %v6676_v3, 1  ;;  %v6683_v6 = vrot.slane %v6681_v17, 1  ;;  %v12909_v3 = vpop.permute.xlu0 %6919 }
 0x7df   : > { %v6352_v7 = vpop.f32.mrb[158].mxu1 }
 0x7e0   : > { %6501 = vst.msk [vmem:[#allocation6 + $0x91] sm:$0xff] %vm1444_vm4, %v6350_v13  ;;  %v6353_v51 = vadd.f32 %v12691_v15, %v6352_v7  ;;  %v6354_v14 = vpop.f32.mrb[159].mxu1  ;;  %v6679_v62 = vor.u32 %v6678_v32, %v6674_v10  ;;  %7149 = vrot.lane.b32.xlu1 %v6854_v34, %s8899_s29  ;;  %7055 = vrot.lane.b32.xlu0 %v6854_v34, %s8901_s24 }
 0x7e2   : > { %6502 = vst.msk [vmem:[#allocation6 + $0x99] sm:$0xff] %vm1444_vm4, %v6353_v51  ;;  %v6684_v47 = vsel %vm650_vm3, %v6679_v62, %v6683_v6  ;;  %v12917_v51 = vpop.permute.xlu1 %6951 }
 0x7e4   : > { %6961 = vrot.lane.b32.xlu1 %v6854_v34, %s8892_s20  ;;  %7023 = vrot.lane.b32.xlu0 %v6684_v47, %s8893_s21 }
 0x7e7   : > { %v6541_v24 = vld [vmem:[#allocation6 + $0x90] sm:$0xff] }
 0x7e8   : > { %7117 = vrot.lane.b32.xlu1 %v6684_v47, %s8902_s16  ;;  %6929 = vrot.lane.b32.xlu0 %v6684_v47, %s8890_s25 }
 0x7e9   : > { %v6542_v38 = vld [vmem:[#allocation6 + $0x98] sm:$0xff]  ;;  %v6543_v19 = vld [vmem:[#allocation6 + $0xa0] sm:$0x3] }
 0x7ea   : > { %v12869_v5 = vpack.c.bf16 %v6542_v38, %v6541_v24  ;;  %v6590_v22 = vpack.c.bf16 %v6543_v19, %v6543_v19 }
 0x7ec   : > { %v6855_v28 = vrot.slane %v12869_v5, 1  ;;  %v6856_v30 = vrot.slane %v6590_v22, 1  ;;  %v6688_v9 = vshll.u32 %v12869_v5, 16  ;;  %7087 = vrot.lane.b32.xlu1 %v12869_v5, %s8896_s27  ;;  %6993 = vrot.lane.b32.xlu0 %v12869_v5, %s8900_s15  ;;  %v6693_v53 = vshll.u32 %v6590_v22, 16 }
 0x7ed   : > { %v6357_v50 = vpop.f32.mrb[160].mxu1  ;;  %v6686_v20 = vshrl.u32 %v12869_v5, 16 }
 0x7ee   : > { %v6358_v25 = vadd.f32 %v12691_v15, %v6357_v50  ;;  %v6359_v49 = vpop.f32.mrb[161].mxu1  ;;  %v6857_v36 = vsel %vm875_vm2, %v6855_v28, %v6856_v30  ;;  %v6690_v45 = vrot.slane %v6688_v9, 1  ;;  %v6695_v18 = vrot.slane %v6693_v53, 1 }
 0x7ef   : > { %v6360_v52 = vpop.f32.mrb[162].mxu1 }
 0x7f0   : > { %6503 = vst.msk [vmem:[#allocation6 + $0xa9] sm:$0xff] %vm1444_vm4, %v6358_v25  ;;  %v6361_v16 = vadd.f32 %v12691_v15, %v6360_v52  ;;  %v6362_v59 = vpop.f32.mrb[163].mxu1  ;;  %v6691_v31 = vor.u32 %v6690_v45, %v6686_v20  ;;  %7151 = vrot.lane.b32.xlu1 %v6857_v36, %s8899_s29  ;;  %7057 = vrot.lane.b32.xlu0 %v6857_v36, %s8901_s24 }
 0x7f2   : > { %6504 = vst.msk [vmem:[#allocation6 + $0xb1] sm:$0xff] %vm1444_vm4, %v6361_v16  ;;  %v6696_v54 = vsel %vm650_vm3, %v6691_v31, %v6695_v18 }
 0x7f4   : > { %6963 = vrot.lane.b32.xlu1 %v6857_v36, %s8892_s20  ;;  %7025 = vrot.lane.b32.xlu0 %v6696_v54, %s8893_s21  ;;  %v12936_v36 = vpop.permute.xlu1 %7109 }
 0x7f7   : > { %v6544_v12 = vld [vmem:[#allocation6 + $0xa8] sm:$0xff] }
 0x7f8   : > { %7119 = vrot.lane.b32.xlu1 %v6696_v54, %s8902_s16  ;;  %6931 = vrot.lane.b32.xlu0 %v6696_v54, %s8890_s25 }
 0x7f9   : > { %v6545_v40 = vld [vmem:[#allocation6 + $0xb0] sm:$0xff]  ;;  %v6546_v55 = vld [vmem:[#allocation6 + $0xb8] sm:$0x3] }
 0x7fa   : > { %v12890_v11 = vpack.c.bf16 %v6545_v40, %v6544_v12  ;;  %v6592_v48 = vpack.c.bf16 %v6546_v55, %v6546_v55 }
 0x7fc   : > { %v6858_v39 = vrot.slane %v12890_v11, 1  ;;  %v6859_v58 = vrot.slane %v6592_v48, 1  ;;  %v6700_v33 = vshll.u32 %v12890_v11, 16  ;;  %7089 = vrot.lane.b32.xlu1 %v12890_v11, %s8896_s27  ;;  %6995 = vrot.lane.b32.xlu0 %v12890_v11, %s8900_s15  ;;  %v6705_v41 = vshll.u32 %v6592_v48, 16 }
 0x7fd   : > { %v6365_v2 = vpop.f32.mrb[164].mxu1  ;;  %v6698_v56 = vshrl.u32 %v12890_v11, 16 }
 0x7fe   : > { %v6366_v23 = vadd.f32 %v12691_v15, %v6365_v2  ;;  %v6367_v37 = vpop.f32.mrb[165].mxu1  ;;  %v6860_v4 = vsel %vm875_vm2, %v6858_v39, %v6859_v58  ;;  %v6702_v8 = vrot.slane %v6700_v33, 1  ;;  %v6707_v27 = vrot.slane %v6705_v41, 1 }
 0x7ff   : > { %v6368_v29 = vpop.f32.mrb[166].mxu1 }
 0x800   : > { %6505 = vst.msk [vmem:[#allocation6 + $0xc1] sm:$0xff] %vm1444_vm4, %v6366_v23  ;;  %v6369_v46 = vadd.f32 %v12691_v15, %v6368_v29  ;;  %v6370_v21 = vpop.f32.mrb[167].mxu1  ;;  %v6703_v61 = vor.u32 %v6702_v8, %v6698_v56  ;;  %7153 = vrot.lane.b32.xlu1 %v6860_v4, %s8899_s29  ;;  %7059 = vrot.lane.b32.xlu0 %v6860_v4, %s8901_s24 }
 0x802   : > { %6506 = vst.msk [vmem:[#allocation6 + $0xc9] sm:$0xff] %vm1444_vm4, %v6369_v46  ;;  %v6708_v35 = vsel %vm650_vm3, %v6703_v61, %v6707_v27 }
 0x804   : > { %6965 = vrot.lane.b32.xlu1 %v6860_v4, %s8892_s20  ;;  %7027 = vrot.lane.b32.xlu0 %v6708_v35, %s8893_s21 }
 0x807   : > { %v6547_v44 = vld [vmem:[#allocation6 + $0xc0] sm:$0xff] }
 0x808   : > { %7121 = vrot.lane.b32.xlu1 %v6708_v35, %s8902_s16  ;;  %6933 = vrot.lane.b32.xlu0 %v6708_v35, %s8890_s25 }
 0x809   : > { %v6548_v17 = vld [vmem:[#allocation6 + $0xc8] sm:$0xff]  ;;  %v6549_v13 = vld [vmem:[#allocation6 + $0xd0] sm:$0x3] }
 0x80a   : > { %v12913_v1 = vpack.c.bf16 %v6548_v17, %v6547_v44  ;;  %v6594_v34 = vpack.c.bf16 %v6549_v13, %v6549_v13  ;;  %v7176_v44 = vsel %vm1444_vm4, %v12527_v63, %v12909_v3 }
 0x80b   : > { %v7208_v13 = vsel %vm1956_vm14, %v7176_v44, %v12917_v51 }
 0x80c   : > { %v6861_v10 = vrot.slane %v12913_v1, 1  ;;  %v6862_v32 = vrot.slane %v6594_v34, 1  ;;  %v6712_v7 = vshll.u32 %v12913_v1, 16  ;;  %7091 = vrot.lane.b32.xlu1 %v12913_v1, %s8896_s27  ;;  %6997 = vrot.lane.b32.xlu0 %v12913_v1, %s8900_s15  ;;  %v6717_v62 = vshll.u32 %v6594_v34, 16 }
 0x80d   : > { %v6373_v14 = vpop.f32.mrb[168].mxu1  ;;  %v6710_v19 = vshrl.u32 %v12913_v1, 16 }
 0x80e   : > { %v6374_v6 = vadd.f32 %v12691_v15, %v6373_v14  ;;  %v6375_v47 = vpop.f32.mrb[169].mxu1  ;;  %v12924_v24 = vpop.permute.xlu0 %6983  ;;  %v6863_v38 = vsel %vm875_vm2, %v6861_v10, %v6862_v32  ;;  %v6714_v22 = vrot.slane %v6712_v7, 1  ;;  %v6719_v53 = vrot.slane %v6717_v62, 1 }
 0x80f   : > { %v6376_v28 = vpop.f32.mrb[170].mxu1  ;;  %v7240_v63 = vsel %vm5912_vm7, %v7208_v13, %v12924_v24 }
 0x810   : > { %6507 = vst.msk [vmem:[#allocation6 + $0xd9] sm:$0xff] %vm1444_vm4, %v6374_v6  ;;  %v6377_v30 = vadd.f32 %v12691_v15, %v6376_v28  ;;  %v6378_v9 = vpop.f32.mrb[171].mxu1  ;;  %v6715_v50 = vor.u32 %v6714_v22, %v6710_v19  ;;  %7155 = vrot.lane.b32.xlu1 %v6863_v38, %s8899_s29  ;;  %7061 = vrot.lane.b32.xlu0 %v6863_v38, %s8901_s24 }
 0x811   : > { %v12942_v59 = vpop.permute.xlu1 %6953 }
 0x812   : > { %6508 = vst.msk [vmem:[#allocation6 + $0xe1] sm:$0xff] %vm1444_vm4, %v6377_v30  ;;  %v12933_v25 = vpop.permute.xlu0 %7047  ;;  %v6720_v49 = vsel %vm650_vm3, %v6715_v50, %v6719_v53 }
 0x814   : > { %6967 = vrot.lane.b32.xlu1 %v6863_v38, %s8892_s20  ;;  %7029 = vrot.lane.b32.xlu0 %v6720_v49, %s8893_s21 }
 0x816   : > { %v7016_v20 = vpop.permute.xlu0 %7015 }
 0x817   : > { %v6550_v45 = vld [vmem:[#allocation6 + $0xd8] sm:$0xff]  ;;  %v7272_v51 = vsel %vm2697_vm1, %v7240_v63, %v7016_v20 }
 0x818   : > { %7123 = vrot.lane.b32.xlu1 %v6720_v49, %s8902_s16  ;;  %6935 = vrot.lane.b32.xlu0 %v6720_v49, %s8890_s25  ;;  %v7304_v50 = vsel %vm5977_vm9, %v7272_v51, %v12933_v25 }
 0x819   : > { %v6551_v52 = vld [vmem:[#allocation6 + $0xe0] sm:$0xff]  ;;  %v6552_v16 = vld [vmem:[#allocation6 + $0xe8] sm:$0x3] }
 0x81a   : > { %v12944_v31 = vpop.permute.xlu0 %6921  ;;  %v12946_v18 = vpack.c.bf16 %v6551_v52, %v6550_v45  ;;  %v6596_v54 = vpack.c.bf16 %v6552_v16, %v6552_v16 }
 0x81c   : > { %v6864_v12 = vrot.slane %v12946_v18, 1  ;;  %v6865_v40 = vrot.slane %v6596_v54, 1  ;;  %7093 = vrot.lane.b32.xlu1 %v12946_v18, %s8896_s27  ;;  %6999 = vrot.lane.b32.xlu0 %v12946_v18, %s8900_s15  ;;  %v6724_v48 = vshll.u32 %v12946_v18, 16  ;;  %v6729_v39 = vshll.u32 %v6596_v54, 16 }
 0x81d   : > { %v6381_v55 = vpop.f32.mrb[172].mxu1  ;;  %v6722_v4 = vshrl.u32 %v12946_v18, 16 }
 0x81e   : > { %v6382_v58 = vadd.f32 %v12691_v15, %v6381_v55  ;;  %v7080_v33 = vpop.permute.xlu1 %7079  ;;  %v6383_v2 = vpop.f32.mrb[173].mxu1  ;;  %v6866_v41 = vsel %vm875_vm2, %v6864_v12, %v6865_v40  ;;  %v6726_v56 = vrot.slane %v6724_v48, 1  ;;  %v6731_v21 = vrot.slane %v6729_v39, 1 }
 0x81f   : > { %v12956_v23 = vpop.permute.xlu0 %6985  ;;  %v6384_v37 = vpop.f32.mrb[174].mxu1  ;;  %v7352_v3 = vsel %vm2746_vm13, %v12933_v25, %v7080_v33  ;;  %v7178_v2 = vsel %vm1444_vm4, %v12733_v42, %v12944_v31 }
 0x820   : > { %6509 = vst.msk [vmem:[#allocation6 + $0xf1] sm:$0xff] %vm1444_vm4, %v6382_v58  ;;  %v6385_v8 = vadd.f32 %v12691_v15, %v6384_v37  ;;  %v6386_v29 = vpop.f32.mrb[175].mxu1  ;;  %7157 = vrot.lane.b32.xlu1 %v6866_v41, %s8899_s29  ;;  %7063 = vrot.lane.b32.xlu0 %v6866_v41, %s8901_s24  ;;  %v6727_v46 = vor.u32 %v6726_v56, %v6722_v4 }
 0x821   : > { %v7210_v4 = vsel %vm1956_vm14, %v7178_v2, %v12942_v59 }
 0x822   : > { %6510 = vst.msk [vmem:[#allocation6 + $0xf9] sm:$0xff] %vm1444_vm4, %v6385_v8  ;;  %v7144_v61 = vpop.permute.xlu1 %7143  ;;  %v6732_v35 = vsel %vm650_vm3, %v6727_v46, %v6731_v21  ;;  %v7242_v46 = vsel %vm5912_vm7, %v7210_v4, %v12956_v23 }
 0x823   : > { %v12964_v27 = vpop.permute.xlu0 %7049 }
 0x824   : > { %6969 = vrot.lane.b32.xlu1 %v6866_v41, %s8892_s20  ;;  %7031 = vrot.lane.b32.xlu0 %v6732_v35, %s8893_s21 }
 0x826   : > { %v12972_v17 = vpop.permute.xlu1 %6955 }
 0x827   : > { %v7018_v34 = vpop.permute.xlu0 %7017  ;;  %v6553_v10 = vld [vmem:[#allocation6 + $0xf0] sm:$0xff] }
 0x828   : > { %7125 = vrot.lane.b32.xlu1 %v6732_v35, %s8902_s16  ;;  %6937 = vrot.lane.b32.xlu0 %v6732_v35, %s8890_s25  ;;  %v7274_v35 = vsel %vm2697_vm1, %v7242_v46, %v7018_v34 }
 0x829   : > { %v6554_v32 = vld [vmem:[#allocation6 + $0xf8] sm:$0xff]  ;;  %v6555_v7 = vld [vmem:[#allocation6 + $0x100] sm:$0x3] }
 0x82a   : > { %v7112_v14 = vpop.permute.xlu1 %7111  ;;  %v12982_v62 = vpack.c.bf16 %v6554_v32, %v6553_v10  ;;  %v6598_v6 = vpack.c.bf16 %v6555_v7, %v6555_v7 }
 0x82b   : > { %v7384_v47 = vsel %vm6058_vm8, %v7352_v3, %v7112_v14  ;;  %v12986_v38 = vpop.permute.xlu0 %6923  ;;  %v7307_v14 = vsel %vm5977_vm9, %v7274_v35, %v12964_v27 }
 0x82c   : > { %v7416_v19 = vsel %vm2779_vm15, %v7384_v47, %v7144_v61  ;;  %v6867_v22 = vrot.slane %v12982_v62, 1  ;;  %v6868_v28 = vrot.slane %v6598_v6, 1  ;;  %7095 = vrot.lane.b32.xlu1 %v12982_v62, %s8896_s27  ;;  %7001 = vrot.lane.b32.xlu0 %v12982_v62, %s8900_s15  ;;  %v6736_v30 = vshll.u32 %v12982_v62, 16 }
 0x82d   : > { %v6389_v24 = vpop.f32.mrb[176].mxu1  ;;  %v6741_v9 = vshll.u32 %v6598_v6, 16  ;;  %8259 = vmatprep.mubr.msk.bf16.mxu0 %vm6238_vm10, %v7416_v19  ;;  %v6734_v54 = vshrl.u32 %v12982_v62, 16 }
 0x82e   : > { %v6390_v53 = vadd.f32 %v12691_v15, %v6389_v24  ;;  %v7082_v49 = vpop.permute.xlu1 %7081  ;;  %v6391_v20 = vpop.f32.mrb[177].mxu1  ;;  %v6869_v45 = vsel %vm875_vm2, %v6867_v22, %v6868_v28  ;;  %7630 = vmatmul.mubr.bf16.vlgmr.msra.gmra.mrb[152].mxu0 %v7304_v50  ;;  %v6738_v12 = vrot.slane %v6736_v30, 1 }
 0x82f   : > { %v13000_v52 = vpop.permute.xlu0 %6987  ;;  %v6392_v16 = vpop.f32.mrb[178].mxu1  ;;  %v6743_v48 = vrot.slane %v6741_v9, 1  ;;  %v7354_v21 = vsel %vm2746_vm13, %v12964_v27, %v7082_v49  ;;  %v7180_v20 = vsel %vm1444_vm4, %v12778_v57, %v12986_v38 }
 0x830   : > { %6511 = vst.msk [vmem:[#allocation6 + $0x109] sm:$0xff] %vm1444_vm4, %v6390_v53  ;;  %v6393_v40 = vadd.f32 %v12691_v15, %v6392_v16  ;;  %v6394_v25 = vpop.f32.mrb[179].mxu1  ;;  %7159 = vrot.lane.b32.xlu1 %v6869_v45, %s8899_s29  ;;  %7065 = vrot.lane.b32.xlu0 %v6869_v45, %s8901_s24  ;;  %v6739_v55 = vor.u32 %v6738_v12, %v6734_v54 }
 0x831   : > { %v7212_v54 = vsel %vm1956_vm14, %v7180_v20, %v12972_v17 }
 0x832   : > { %6512 = vst.msk [vmem:[#allocation6 + $0x111] sm:$0xff] %vm1444_vm4, %v6393_v40  ;;  %v7146_v39 = vpop.permute.xlu1 %7145  ;;  %v6744_v33 = vsel %vm650_vm3, %v6739_v55, %v6743_v48  ;;  %v7244_v12 = vsel %vm5912_vm7, %v7212_v54, %v13000_v52 }
 0x833   : > { %v13008_v58 = vpop.permute.xlu0 %7051 }
 0x834   : > { %6971 = vrot.lane.b32.xlu1 %v6869_v45, %s8892_s20  ;;  %7033 = vrot.lane.b32.xlu0 %v6744_v33, %s8893_s21 }
 0x836   : > { %v13016_v41 = vpop.permute.xlu1 %6957 }
 0x837   : > { %v7020_v37 = vpop.permute.xlu0 %7019  ;;  %v6556_v56 = vld [vmem:[#allocation6 + $0x108] sm:$0xff] }
 0x838   : > { %7127 = vrot.lane.b32.xlu1 %v6744_v33, %s8902_s16  ;;  %6939 = vrot.lane.b32.xlu0 %v6744_v33, %s8890_s25  ;;  %v7276_v48 = vsel %vm2697_vm1, %v7244_v12, %v7020_v37  ;;  %v13126_v12 = vld [vmem:[#allocation11] ss:$0 sm:$0xff] }
 0x839   : > { %v6557_v8 = vld [vmem:[#allocation6 + $0x110] sm:$0xff]  ;;  %v6558_v29 = vld [vmem:[#allocation6 + $0x118] sm:$0x3]  ;;  %v7310_v46 = vsel %vm5977_vm9, %v7276_v48, %v13008_v58 }
 0x83a   : > { %v7114_v42 = vpop.permute.xlu1 %7113  ;;  %v13026_v31 = vpack.c.bf16 %v6557_v8, %v6556_v56  ;;  %v6600_v61 = vpack.c.bf16 %v6558_v29, %v6558_v29 }
 0x83b   : > { %v7386_v59 = vsel %vm6058_vm8, %v7354_v21, %v7114_v42  ;;  %v13030_v44 = vpop.permute.xlu0 %6925 }
 0x83c   : > { %v7418_v13 = vsel %vm2779_vm15, %v7386_v59, %v7146_v39  ;;  %v6870_v10 = vrot.slane %v13026_v31, 1  ;;  %v6871_v32 = vrot.slane %v6600_v61, 1  ;;  %7097 = vrot.lane.b32.xlu1 %v13026_v31, %s8896_s27  ;;  %7003 = vrot.lane.b32.xlu0 %v13026_v31, %s8900_s15  ;;  %v6748_v7 = vshll.u32 %v13026_v31, 16 }
 0x83d   : > { %v6397_v23 = vpop.f32.mrb[180].mxu1  ;;  %v6753_v63 = vshll.u32 %v6600_v61, 16  ;;  %8260 = vmatprep.mubr.msk.bf16.mxu0 %vm6238_vm10, %v7418_v13  ;;  %v6746_v19 = vshrl.u32 %v13026_v31, 16 }
 0x83e   : > { %v6398_v34 = vadd.f32 %v12691_v15, %v6397_v23  ;;  %v6399_v3 = vpop.f32.mrb[181].mxu1  ;;  %v6872_v6 = vsel %vm875_vm2, %v6870_v10, %v6871_v32  ;;  %v7084_v51 = vpop.permute.xlu1 %7083  ;;  %7638 = vmatmul.mubr.bf16.gmra.mrb[156].mxu0 %v7307_v14  ;;  %v6750_v22 = vrot.slane %v6748_v7, 1 }
 0x83f   : > { %v13044_v47 = vpop.permute.xlu0 %6989  ;;  %v6400_v28 = vpop.f32.mrb[182].mxu1  ;;  %v6755_v9 = vrot.slane %v6753_v63, 1  ;;  %v7356_v57 = vsel %vm2746_vm13, %v13008_v58, %v7084_v51 }
 0x840   : > { %6513 = vst.msk [vmem:[#allocation6 + $0x121] sm:$0xff] %vm1444_vm4, %v6398_v34  ;;  %v6401_v24 = vadd.f32 %v12691_v15, %v6400_v28  ;;  %7161 = vrot.lane.b32.xlu1 %v6872_v6, %s8899_s29  ;;  %v6402_v30 = vpop.f32.mrb[183].mxu1  ;;  %7067 = vrot.lane.b32.xlu0 %v6872_v6, %s8901_s24  ;;  %v6751_v27 = vor.u32 %v6750_v22, %v6746_v19 }
 0x842   : > { %6514 = vst.msk [vmem:[#allocation6 + $0x129] sm:$0xff] %vm1444_vm4, %v6401_v24  ;;  %v7148_v50 = vpop.permute.xlu1 %7147  ;;  %v6756_v49 = vsel %vm650_vm3, %v6751_v27, %v6755_v9 }
 0x843   : > { %v13052_v53 = vpop.permute.xlu0 %7053 }
 0x844   : > { %6973 = vrot.lane.b32.xlu1 %v6872_v6, %s8892_s20  ;;  %7035 = vrot.lane.b32.xlu0 %v6756_v49, %s8893_s21 }
 0x846   : > { %v13060_v45 = vpop.permute.xlu1 %6959 }
 0x847   : > { %v7022_v16 = vpop.permute.xlu0 %7021  ;;  %v6559_v40 = vld [vmem:[#allocation6 + $0x120] sm:$0xff] }
 0x848   : > { %7129 = vrot.lane.b32.xlu1 %v6756_v49, %s8902_s16  ;;  %6941 = vrot.lane.b32.xlu0 %v6756_v49, %s8890_s25 }
 0x849   : > { %v6560_v25 = vld [vmem:[#allocation6 + $0x128] sm:$0xff]  ;;  %v6561_v55 = vld [vmem:[#allocation6 + $0x130] sm:$0x3] }
 0x84a   : > { %v7116_v38 = vpop.permute.xlu1 %7115  ;;  %v13073_v33 = vpack.c.bf16 %v6560_v25, %v6559_v40  ;;  %v6602_v17 = vpack.c.bf16 %v6561_v55, %v6561_v55 }
 0x84b   : > { %v13071_v39 = vpop.permute.xlu0 %6927  ;;  %v7388_v2 = vsel %vm6058_vm8, %v7356_v57, %v7116_v38 }
 0x84c   : > { %7099 = vrot.lane.b32.xlu1 %v13073_v33, %s8896_s27  ;;  %7005 = vrot.lane.b32.xlu0 %v13073_v33, %s8900_s15  ;;  %v7420_v37 = vsel %vm2779_vm15, %v7388_v2, %v7148_v50  ;;  %v6873_v4 = vrot.slane %v13073_v33, 1  ;;  %v6874_v56 = vrot.slane %v6602_v17, 1  ;;  %v6760_v21 = vshll.u32 %v13073_v33, 16 }
 0x84d   : > { %v6405_v52 = vpop.f32.mrb[184].mxu1  ;;  %8261 = vmatprep.mubr.msk.bf16.mxu0 %vm6238_vm10, %v7420_v37  ;;  %v6765_v42 = vshll.u32 %v6602_v17, 16  ;;  %v6758_v10 = vshrl.u32 %v13073_v33, 16 }
 0x84e   : > { %v6406_v8 = vadd.f32 %v12691_v15, %v6405_v52  ;;  %v6407_v29 = vpop.f32.mrb[185].mxu1  ;;  %v7086_v61 = vpop.permute.xlu1 %7085  ;;  %7646 = vmatmul.mubr.bf16.gmra.mrb[160].mxu0 %v7310_v46  ;;  %v6875_v59 = vsel %vm875_vm2, %v6873_v4, %v6874_v56  ;;  %v6762_v32 = vrot.slane %v6760_v21, 1 }
 0x84f   : > { %v13087_v35 = vpop.permute.xlu0 %6991  ;;  %v6408_v13 = vpop.f32.mrb[186].mxu1  ;;  %v6767_v63 = vrot.slane %v6765_v42, 1 }
 0x850   : > { %6515 = vst.msk [vmem:[#allocation6 + $0x139] sm:$0xff] %vm1444_vm4, %v6406_v8  ;;  %v6409_v23 = vadd.f32 %v12691_v15, %v6408_v13  ;;  %7163 = vrot.lane.b32.xlu1 %v6875_v59, %s8899_s29  ;;  %v6410_v58 = vpop.f32.mrb[187].mxu1  ;;  %7069 = vrot.lane.b32.xlu0 %v6875_v59, %s8901_s24  ;;  %v6763_v7 = vor.u32 %v6762_v32, %v6758_v10 }
 0x851   : > { %v7182_v15 = vsel %vm1444_vm4, %v12806_v60, %v13030_v44  ;;  %v7358_v60 = vsel %vm2746_vm13, %v13052_v53, %v7086_v61  ;;  %v7184_v61 = vsel %vm1444_vm4, %v12827_v43, %v13071_v39 }
 0x852   : > { %6516 = vst.msk [vmem:[#allocation6 + $0x141] sm:$0xff] %vm1444_vm4, %v6409_v23  ;;  %v7150_v34 = vpop.permute.xlu1 %7149  ;;  %v6768_v14 = vsel %vm650_vm3, %v6763_v7, %v6767_v63  ;;  %v7214_v19 = vsel %vm1956_vm14, %v7182_v15, %v13016_v41  ;;  %v7216_v10 = vsel %vm1956_vm14, %v7184_v61, %v13060_v45 }
 0x853   : > { %v13096_v3 = vpop.permute.xlu0 %7055  ;;  %v7246_v22 = vsel %vm5912_vm7, %v7214_v19, %v13044_v47  ;;  %v7248_v23 = vsel %vm5912_vm7, %v7216_v10, %v13087_v35 }
 0x854   : > { %6975 = vrot.lane.b32.xlu1 %v6875_v59, %s8892_s20  ;;  %7037 = vrot.lane.b32.xlu0 %v6768_v14, %s8893_s21  ;;  %v7278_v27 = vsel %vm2697_vm1, %v7246_v22, %v7022_v16 }
 0x855   : > { %v7313_v55 = vsel %vm5977_vm9, %v7278_v27, %v13052_v53 }
 0x856   : > { %v13104_v6 = vpop.permute.xlu1 %6961 }
 0x857   : > { %v7024_v51 = vpop.permute.xlu0 %7023  ;;  %v6562_v28 = vld [vmem:[#allocation6 + $0x138] sm:$0xff] }
 0x858   : > { %7131 = vrot.lane.b32.xlu1 %v6768_v14, %s8902_s16  ;;  %6943 = vrot.lane.b32.xlu0 %v6768_v14, %s8890_s25 }
 0x859   : > { %v6563_v24 = vld [vmem:[#allocation6 + $0x140] sm:$0xff]  ;;  %v6564_v30 = vld [vmem:[#allocation6 + $0x148] sm:$0x3] }
 0x85a   : > { %v7118_v44 = vpop.permute.xlu1 %7117  ;;  %v13117_v50 = vpack.c.bf16 %v6563_v24, %v6562_v28  ;;  %v6604_v41 = vpack.c.bf16 %v6564_v30, %v6564_v30 }
 0x85b   : > { %v13115_v9 = vpop.permute.xlu0 %6929  ;;  %v7390_v49 = vsel %vm6058_vm8, %v7358_v60, %v7118_v44 }
 0x85c   : > { %7101 = vrot.lane.b32.xlu1 %v13117_v50, %s8896_s27  ;;  %7007 = vrot.lane.b32.xlu0 %v13117_v50, %s8900_s15  ;;  %v7422_v20 = vsel %vm2779_vm15, %v7390_v49, %v7150_v34  ;;  %v6876_v16 = vrot.slane %v13117_v50, 1  ;;  %v6877_v54 = vrot.slane %v6604_v41, 1  ;;  %v6772_v48 = vshll.u32 %v13117_v50, 16 }
 0x85d   : > { %v6413_v47 = vpop.f32.mrb[188].mxu1  ;;  %8262 = vmatprep.mubr.msk.bf16.mxu0 %vm6238_vm10, %v7422_v20  ;;  %v6777_v57 = vshll.u32 %v6604_v41, 16  ;;  %v6770_v37 = vshrl.u32 %v13117_v50, 16  ;;  %v7280_v34 = vsel %vm2697_vm1, %v7248_v23, %v7024_v51 }
 0x85e   : > { %v6414_v40 = vadd.f32 %v13126_v12, %v6413_v47  ;;  %v6415_v25 = vpop.f32.mrb[189].mxu1  ;;  %v7088_v38 = vpop.permute.xlu1 %7087  ;;  %7654 = vmatmul.mubr.bf16.gmra.mrb[164].mxu0 %v7313_v55  ;;  %v6878_v2 = vsel %vm875_vm2, %v6876_v16, %v6877_v54  ;;  %v6774_v4 = vrot.slane %v6772_v48, 1  ;;  %v7316_v60 = vsel %vm5977_vm9, %v7280_v34, %v13096_v3 }
 0x85f   : > { %v13133_v17 = vpop.permute.xlu0 %6993  ;;  %v6416_v52 = vpop.f32.mrb[190].mxu1  ;;  %v6779_v29 = vrot.slane %v6777_v57, 1  ;;  %v7360_v14 = vsel %vm2746_vm13, %v13096_v3, %v7088_v38 }
 0x860   : > { %6517 = vst.msk [vmem:[#allocation6 + $0x151] sm:$0xff] %vm1444_vm4, %v6414_v40  ;;  %v6417_v56 = vadd.f32 %v13126_v12, %v6416_v52  ;;  %7165 = vrot.lane.b32.xlu1 %v6878_v2, %s8899_s29  ;;  %v6418_v53 = vpop.f32.mrb[191].mxu1  ;;  %7071 = vrot.lane.b32.xlu0 %v6878_v2, %s8901_s24  ;;  %v6775_v8 = vor.u32 %v6774_v4, %v6770_v37 }
 0x861   : > { %v7186_v37 = vsel %vm1444_vm4, %v12848_v26, %v13115_v9 }
 0x862   : > { %6518 = vst.msk [vmem:[#allocation6 + $0x159] sm:$0xff] %vm1444_vm4, %v6417_v56  ;;  %v7152_v46 = vpop.permute.xlu1 %7151  ;;  %v6780_v42 = vsel %vm650_vm3, %v6775_v8, %v6779_v29  ;;  %v7218_v23 = vsel %vm1956_vm14, %v7186_v37, %v13104_v6 }
 0x863   : > { %v13142_v21 = vpop.permute.xlu0 %7057  ;;  %v7250_v9 = vsel %vm5912_vm7, %v7218_v23, %v13133_v17 }
 0x864   : > { %6977 = vrot.lane.b32.xlu1 %v6878_v2, %s8892_s20  ;;  %7039 = vrot.lane.b32.xlu0 %v6780_v42, %s8893_s21 }
 0x866   : > { %v13150_v59 = vpop.permute.xlu1 %6963 }
 0x867   : > { %v13152_v13 = vpop.permute.xlu0 %7025  ;;  %v6565_v63 = vld [vmem:[#allocation6 + $0x150] sm:$0xff] }
 0x868   : > { %7133 = vrot.lane.b32.xlu1 %v6780_v42, %s8902_s16  ;;  %6945 = vrot.lane.b32.xlu0 %v6780_v42, %s8890_s25 }
 0x869   : > { %v6421_v32 = vpop.f32.mrb[192].mxu1  ;;  %v6566_v43 = vld [vmem:[#allocation6 + $0x158] sm:$0xff]  ;;  %v6567_v39 = vld [vmem:[#allocation6 + $0x160] sm:$0x3] }
 0x86a   : > { %v6422_v58 = vadd.f32 %v13126_v12, %v6421_v32  ;;  %v6423_v7 = vpop.f32.mrb[193].mxu1  ;;  %v7120_v45 = vpop.permute.xlu1 %7119  ;;  %v13166_v19 = vpack.c.bf16 %v6566_v43, %v6565_v63  ;;  %v6606_v22 = vpack.c.bf16 %v6567_v39, %v6567_v39 }
 0x86b   : > { %v13164_v15 = vpop.permute.xlu0 %6931  ;;  %v7392_v35 = vsel %vm6058_vm8, %v7360_v14, %v7120_v45  ;;  %v6424_v28 = vpop.f32.mrb[194].mxu1 }
 0x86c   : > { %6519 = vst.msk [vmem:[#allocation6 + $0x169] sm:$0xff] %vm1444_vm4, %v6422_v58  ;;  %v6425_v24 = vadd.f32 %v13126_v12, %v6424_v28  ;;  %7103 = vrot.lane.b32.xlu1 %v13166_v19, %s8896_s27  ;;  %v6426_v51 = vpop.f32.mrb[195].mxu1  ;;  %7009 = vrot.lane.b32.xlu0 %v13166_v19, %s8900_s15  ;;  %v7424_v30 = vsel %vm2779_vm15, %v7392_v35, %v7152_v46  ;;  %v6879_v27 = vrot.slane %v13166_v19, 1  ;;  %v6880_v44 = vrot.slane %v6606_v22, 1 }
 0x86d   : > { %8263 = vmatprep.mubr.msk.bf16.mxu0 %vm6238_vm10, %v7424_v30  ;;  %v6784_v41 = vshll.u32 %v13166_v19, 16  ;;  %v6789_v49 = vshll.u32 %v6606_v22, 16  ;;  %v6782_v54 = vshrl.u32 %v13166_v19, 16 }
 0x86e   : > { %6520 = vst.msk [vmem:[#allocation6 + $0x171] sm:$0xff] %vm1444_vm4, %v6425_v24  ;;  %v7090_v47 = vpop.permute.xlu1 %7089  ;;  %7662 = vmatmul.mubr.bf16.gmra.mrb[168].mxu0 %v7316_v60  ;;  %v6881_v16 = vsel %vm875_vm2, %v6879_v27, %v6880_v44 }
 0x86f   : > { %v13182_v20 = vpop.permute.xlu0 %6995  ;;  %v6786_v40 = vrot.slane %v6784_v41, 1  ;;  %v6791_v25 = vrot.slane %v6789_v49, 1  ;;  %v7362_v58 = vsel %vm2746_vm13, %v13142_v21, %v7090_v47  ;;  %v7188_v47 = vsel %vm1444_vm4, %v12869_v5, %v13164_v15 }
 0x870   : > { %7167 = vrot.lane.b32.xlu1 %v6881_v16, %s8899_s29  ;;  %7073 = vrot.lane.b32.xlu0 %v6881_v16, %s8901_s24 }
 0x871   : > { %v6787_v3 = vor.u32 %v6786_v40, %v6782_v54  ;;  %v6576_v40 = vld [vmem:[#allocation6 + $0x1a8] sm:$0x3] }
 0x872   : > { %v7154_v55 = vpop.permute.xlu1 %7153 }
 0x873   : > { %v13188_v48 = vpop.permute.xlu0 %7059  ;;  %v6792_v38 = vsel %vm650_vm3, %v6787_v3, %v6791_v25  ;;  %v6568_v56 = vld [vmem:[#allocation6 + $0x168] sm:$0xff] }
 0x874   : > { %v6429_v57 = vpop.f32.mrb[196].mxu1  ;;  %6979 = vrot.lane.b32.xlu1 %v6881_v16, %s8892_s20  ;;  %7041 = vrot.lane.b32.xlu0 %v6792_v38, %s8893_s21 }
 0x875   : > { %v6430_v2 = vadd.f32 %v13126_v12, %v6429_v57  ;;  %v6431_v52 = vpop.f32.mrb[197].mxu1  ;;  %v6569_v53 = vld [vmem:[#allocation6 + $0x170] sm:$0xff]  ;;  %v6570_v8 = vld [vmem:[#allocation6 + $0x178] sm:$0x3]  ;;  %v6905_v57 = vshll.u32 %v12593_v0, 16 }
 0x876   : > { %v6432_v4 = vpop.f32.mrb[198].mxu1  ;;  %v13198_v29 = vpop.permute.xlu1 %6965  ;;  %v13201_v61 = vpack.c.bf16 %v6569_v53, %v6568_v56  ;;  %v6608_v32 = vpack.c.bf16 %v6570_v8, %v6570_v8 }
 0x877   : > { %6521 = vst.msk [vmem:[#allocation6 + $0x181] sm:$0xff] %vm1444_vm4, %v6430_v2  ;;  %v6433_v46 = vadd.f32 %v13126_v12, %v6432_v4  ;;  %v7028_v42 = vpop.permute.xlu0 %7027  ;;  %v6434_v10 = vpop.f32.mrb[199].mxu1  ;;  %v7282_v12 = vsel %vm2697_vm1, %v7250_v9, %v13152_v13  ;;  %v6612_v2 = vpack.c.bf16 %v6576_v40, %v6576_v40 }
 0x878   : > { %7135 = vrot.lane.b32.xlu1 %v6792_v38, %s8902_s16  ;;  %6947 = vrot.lane.b32.xlu0 %v6792_v38, %s8890_s25  ;;  %v6796_v26 = vshll.u32 %v13201_v61, 16  ;;  %v6882_v43 = vrot.slane %v13201_v61, 1  ;;  %v6883_v39 = vrot.slane %v6608_v32, 1  ;;  %v7319_v13 = vsel %vm5977_vm9, %v7282_v12, %v13142_v21 }
 0x879   : > { %6522 = vst.msk [vmem:[#allocation6 + $0x189] sm:$0xff] %vm1444_vm4, %v6433_v46  ;;  %v6794_v14 = vshrl.u32 %v13201_v61, 16  ;;  %v6801_v45 = vshll.u32 %v6608_v32, 16  ;;  %v6907_v46 = vrot.slane %v6905_v57, 1  ;;  %v6910_v23 = vshll.u32 %v6612_v2, 16 }
 0x87a   : > { %v7122_v7 = vpop.permute.xlu1 %7121  ;;  %v6798_v34 = vrot.slane %v6796_v26, 1  ;;  %v6884_v28 = vsel %vm875_vm2, %v6882_v43, %v6883_v39 }
 0x87b   : > { %v13215_v63 = vpop.permute.xlu0 %6933  ;;  %v7394_v6 = vsel %vm6058_vm8, %v7362_v58, %v7122_v7  ;;  %v6803_v30 = vrot.slane %v6801_v45, 1  ;;  %v6912_v43 = vrot.slane %v6910_v23, 1  ;;  %v6917_v45 = vrot.slane %v6612_v2, 1 }
 0x87c   : > { %7105 = vrot.lane.b32.xlu1 %v13201_v61, %s8896_s27  ;;  %7011 = vrot.lane.b32.xlu0 %v13201_v61, %s8900_s15  ;;  %v7426_v17 = vsel %vm2779_vm15, %v7394_v6, %v7154_v55  ;;  %v6799_v24 = vor.u32 %v6798_v34, %v6794_v14  ;;  %v7220_v55 = vsel %vm1956_vm14, %v7188_v47, %v13150_v59  ;;  %v6916_v14 = vrot.slane %v12593_v0, 1 }
 0x87d   : > { %8264 = vmatprep.mubr.msk.bf16.mxu0 %vm6238_vm10, %v7426_v17  ;;  %v7252_v38 = vsel %vm5912_vm7, %v7220_v55, %v13182_v20  ;;  %v6903_v20 = vshrl.u32 %v12593_v0, 16  ;;  %v7190_v17 = vsel %vm1444_vm4, %v12890_v11, %v13215_v63 }
 0x87e   : > { %v7092_v22 = vpop.permute.xlu1 %7091  ;;  %7670 = vmatmul.mubr.bf16.gmra.mrb[172].mxu0 %v7319_v13  ;;  %v6571_v21 = vld [vmem:[#allocation6 + $0x180] sm:$0xff]  ;;  %v6804_v44 = vsel %vm650_vm3, %v6799_v24, %v6803_v30  ;;  %v7284_v5 = vsel %vm2697_vm1, %v7252_v38, %v7028_v42  ;;  %v7222_v24 = vsel %vm1956_vm14, %v7190_v17, %v13198_v29  ;;  %v6918_v30 = vsel %vm875_vm2, %v6916_v14, %v6917_v45 }
 0x87f   : > { %v13228_v35 = vpop.permute.xlu0 %6997  ;;  %v7364_v15 = vsel %vm2746_vm13, %v13188_v48, %v7092_v22  ;;  %v7322_v42 = vsel %vm5977_vm9, %v7284_v5, %v13188_v48  ;;  %v6908_v6 = vor.u32 %v6907_v46, %v6903_v20 }
 0x880   : > { %7169 = vrot.lane.b32.xlu1 %v6884_v28, %s8899_s29  ;;  %7075 = vrot.lane.b32.xlu0 %v6884_v28, %s8901_s24  ;;  %v6572_v51 = vld [vmem:[#allocation6 + $0x188] sm:$0xff]  ;;  %v6573_v49 = vld [vmem:[#allocation6 + $0x190] sm:$0x3] }
 0x881   : > { %v6609_v41 = vpack.c.bf16 %v6572_v51, %v6571_v21  ;;  %v6610_v3 = vpack.c.bf16 %v6573_v49, %v6573_v49  ;;  %v6913_v13 = vsel %vm650_vm3, %v6908_v6, %v6912_v43  ;;  %v7254_v51 = vsel %vm5912_vm7, %v7222_v24, %v13228_v35 }
 0x882   : > { %v7156_v27 = vpop.permute.xlu1 %7155 }
 0x883   : > { %v13233_v60 = vpop.permute.xlu0 %7061  ;;  %v6888_v25 = vshll.u32 %v6609_v41, 16  ;;  %v6899_v59 = vrot.slane %v6609_v41, 1  ;;  %v6900_v56 = vrot.slane %v6610_v3, 1  ;;  %v6886_v10 = vshrl.u32 %v6609_v41, 16 }
 0x884   : > { %6981 = vrot.lane.b32.xlu1 %v6884_v28, %s8892_s20  ;;  %7043 = vrot.lane.b32.xlu0 %v6804_v44, %s8893_s21  ;;  %v6893_v32 = vshll.u32 %v6610_v3, 16 }
 0x885   : > { %v6890_v53 = vrot.slane %v6888_v25, 1  ;;  %v6901_v12 = vsel %vm875_vm2, %v6899_v59, %v6900_v56 }
 0x886   : > { %v13241_v16 = vpop.permute.xlu1 %6967  ;;  %v6895_v7 = vrot.slane %v6893_v32, 1 }
 0x887   : > { %v7030_v54 = vpop.permute.xlu0 %7029  ;;  %v6891_v58 = vor.u32 %v6890_v53, %v6886_v10 }
 0x888   : > { %7137 = vrot.lane.b32.xlu1 %v6804_v44, %s8902_s16  ;;  %6949 = vrot.lane.b32.xlu0 %v6804_v44, %s8890_s25  ;;  %s8588_s25 = smul.u32 96, %s13449_s18 }
 0x889   : > { %v6896_v48 = vsel %vm650_vm3, %v6891_v58, %v6895_v7 }
 0x88a   : > { %v7124_v52 = vpop.permute.xlu1 %7123 }
 0x88b   : > { %v6936_v37 = vpop.permute.xlu0 %6935  ;;  %v7396_v4 = vsel %vm6058_vm8, %v7364_v15, %v7124_v52 }
 0x88c   : > { %7107 = vrot.lane.b32.xlu1 %v6609_v41, %s8896_s27  ;;  %7013 = vrot.lane.b32.xlu0 %v6609_v41, %s8900_s15  ;;  %v7428_v8 = vsel %vm2779_vm15, %v7396_v4, %v7156_v27  ;;  %v7286_v27 = vsel %vm2697_vm1, %v7254_v51, %v7030_v54  ;;  %v7192_v54 = vsel %vm1444_vm4, %v12913_v1, %v6936_v37  ;;  %s13399_s27 = scalar_lea.vmem %s13435_s11, %s8588_s25 }
 0x88d   : > { %8265 = vmatprep.mubr.msk.bf16.mxu0 %vm6238_vm10, %v7428_v8  ;;  %v7325_v35 = vsel %vm5977_vm9, %v7286_v27, %v13233_v60  ;;  %v7224_v25 = vsel %vm1956_vm14, %v7192_v54, %v13241_v16 }
 0x88e   : > { %v7094_v26 = vpop.permute.xlu1 %7093  ;;  %7678 = vmatmul.mubr.bf16.gmra.mrb[176].mxu0 %v7322_v42 }
 0x88f   : > { %v7000_v9 = vpop.permute.xlu0 %6999  ;;  %v7366_v11 = vsel %vm2746_vm13, %v13233_v60, %v7094_v26 }
 0x890   : > { %7171 = vrot.lane.b32.xlu1 %v6901_v12, %s8899_s29  ;;  %7077 = vrot.lane.b32.xlu0 %v6901_v12, %s8901_s24  ;;  %v7256_v55 = vsel %vm5912_vm7, %v7224_v25, %v7000_v9 }
 0x892   : > { %v7158_v39 = vpop.permute.xlu1 %7157 }
 0x893   : > { %v7064_v34 = vpop.permute.xlu0 %7063 }
 0x894   : > { %7139 = vrot.lane.b32.xlu1 %v6896_v48, %s8902_s16  ;;  %7045 = vrot.lane.b32.xlu0 %v6896_v48, %s8893_s21 }
 0x896   : > { %v6970_v22 = vpop.permute.xlu1 %6969 }
 0x897   : > { %v7032_v28 = vpop.permute.xlu0 %7031 }
 0x898   : > { %7141 = vrot.lane.b32.xlu1 %v6913_v13, %s8902_s16  ;;  %v7288_v57 = vsel %vm2697_vm1, %v7256_v55, %v7032_v28 }
 0x899   : > { %v7328_v1 = vsel %vm5977_vm9, %v7288_v57, %v7064_v34 }
 0x89a   : > { %v7126_v63 = vpop.permute.xlu1 %7125 }
 0x89b   : > { %v6938_v0 = vpop.permute.xlu0 %6937  ;;  %v7398_v21 = vsel %vm6058_vm8, %v7366_v11, %v7126_v63 }
 0x89c   : > { %7173 = vrot.lane.b32.xlu1 %v6918_v30, %s8899_s29  ;;  %v7430_v29 = vsel %vm2779_vm15, %v7398_v21, %v7158_v39  ;;  %v7194_v59 = vsel %vm1444_vm4, %v12946_v18, %v6938_v0 }
 0x89d   : > { %8266 = vmatprep.mubr.msk.bf16.mxu0 %vm6238_vm10, %v7430_v29  ;;  %v7226_v8 = vsel %vm1956_vm14, %v7194_v59, %v6970_v22 }
 0x89e   : > { %v7096_v44 = vpop.permute.xlu1 %7095  ;;  %7686 = vmatmul.mubr.bf16.gmra.mrb[180].mxu0 %v7325_v35 }
 0x89f   : > { %v7002_v41 = vpop.permute.xlu0 %7001  ;;  %v7368_v38 = vsel %vm2746_vm13, %v7064_v34, %v7096_v44 }
 0x8a0   : > { %v7258_v20 = vsel %vm5912_vm7, %v7226_v8, %v7002_v41 }
 0x8a2   : > { %v7160_v49 = vpop.permute.xlu1 %7159 }
 0x8a3   : > { %v7066_v47 = vpop.permute.xlu0 %7065 }
 0x8a6   : > { %v6972_v40 = vpop.permute.xlu1 %6971 }
 0x8a7   : > { %v7034_v3 = vpop.permute.xlu0 %7033 }
 0x8a8   : > { %v7290_v46 = vsel %vm2697_vm1, %v7258_v20, %v7034_v3 }
 0x8a9   : > { %v7331_v18 = vsel %vm5977_vm9, %v7290_v46, %v7066_v47 }
 0x8aa   : > { %v7128_v60 = vpop.permute.xlu1 %7127 }
 0x8ab   : > { %v6940_v2 = vpop.permute.xlu0 %6939  ;;  %v7400_v5 = vsel %vm6058_vm8, %v7368_v38, %v7128_v60 }
 0x8ac   : > { %v7432_v15 = vsel %vm2779_vm15, %v7400_v5, %v7160_v49  ;;  %v7196_v6 = vsel %vm1444_vm4, %v12982_v62, %v6940_v2 }
 0x8ad   : > { %8267 = vmatprep.mubr.msk.bf16.mxu0 %vm6238_vm10, %v7432_v15  ;;  %v7228_v34 = vsel %vm1956_vm14, %v7196_v6, %v6972_v40 }
 0x8ae   : > { %v7098_v52 = vpop.permute.xlu1 %7097  ;;  %7694 = vmatmul.mubr.bf16.gmra.mrb[184].mxu0 %v7328_v1 }
 0x8af   : > { %v7004_v37 = vpop.permute.xlu0 %7003  ;;  %v7370_v42 = vsel %vm2746_vm13, %v7066_v47, %v7098_v52 }
 0x8b0   : > { %v7260_v48 = vsel %vm5912_vm7, %v7228_v34, %v7004_v37 }
 0x8b2   : > { %v7162_v16 = vpop.permute.xlu1 %7161 }
 0x8b3   : > { %v7068_v4 = vpop.permute.xlu0 %7067 }
 0x8b6   : > { %v6974_v56 = vpop.permute.xlu1 %6973 }
 0x8b7   : > { %v7036_v53 = vpop.permute.xlu0 %7035 }
 0x8b8   : > { %v7292_v17 = vsel %vm2697_vm1, %v7260_v48, %v7036_v53 }
 0x8b9   : > { %v7334_v62 = vsel %vm5977_vm9, %v7292_v17, %v7068_v4 }
 0x8ba   : > { %v7130_v10 = vpop.permute.xlu1 %7129 }
 0x8bb   : > { %v6942_v32 = vpop.permute.xlu0 %6941  ;;  %v7402_v23 = vsel %vm6058_vm8, %v7370_v42, %v7130_v10 }
 0x8bc   : > { %v7434_v26 = vsel %vm2779_vm15, %v7402_v23, %v7162_v16  ;;  %v7198_v11 = vsel %vm1444_vm4, %v13026_v31, %v6942_v32 }
 0x8bd   : > { %8268 = vmatprep.mubr.msk.bf16.mxu0 %vm6238_vm10, %v7434_v26  ;;  %v7230_v21 = vsel %vm1956_vm14, %v7198_v11, %v6974_v56 }
 0x8be   : > { %v7100_v9 = vpop.permute.xlu1 %7099  ;;  %7702 = vmatmul.mubr.bf16.gmra.mrb[188].mxu0 %v7331_v18 }
 0x8bf   : > { %v7006_v12 = vpop.permute.xlu0 %7005  ;;  %v7372_v13 = vsel %vm2746_vm13, %v7068_v4, %v7100_v9 }
 0x8c0   : > { %v7262_v29 = vsel %vm5912_vm7, %v7230_v21, %v7006_v12 }
 0x8c2   : > { %v7164_v58 = vpop.permute.xlu1 %7163 }
 0x8c3   : > { %v7070_v7 = vpop.permute.xlu0 %7069 }
 0x8c6   : > { %v6976_v43 = vpop.permute.xlu1 %6975 }
 0x8c7   : > { %v7038_v39 = vpop.permute.xlu0 %7037 }
 0x8c8   : > { %v7294_v35 = vsel %vm2697_vm1, %v7262_v29, %v7038_v39 }
 0x8c9   : > { %v7337_v31 = vsel %vm5977_vm9, %v7294_v35, %v7070_v7 }
 0x8ca   : > { %v7132_v14 = vpop.permute.xlu1 %7131 }
 0x8cb   : > { %v6944_v45 = vpop.permute.xlu0 %6943  ;;  %v7404_v22 = vsel %vm6058_vm8, %v7372_v13, %v7132_v14 }
 0x8cc   : > { %v7436_v28 = vsel %vm2779_vm15, %v7404_v22, %v7164_v58  ;;  %v7200_v57 = vsel %vm1444_vm4, %v13073_v33, %v6944_v45 }
 0x8cd   : > { %8269 = vmatprep.mubr.msk.bf16.mxu0 %vm6238_vm10, %v7436_v28  ;;  %v7232_v2 = vsel %vm1956_vm14, %v7200_v57, %v6976_v43  ;;  %v13348_v43 = vld [vmem:[#allocation12] ss:$0 sm:$0xff] }
 0x8ce   : > { %v7102_v24 = vpop.permute.xlu1 %7101  ;;  %7710 = vmatmul.mubr.bf16.gmra.mrb[192].mxu0 %v7334_v62 }
 0x8cf   : > { %v7008_v51 = vpop.permute.xlu0 %7007  ;;  %v7374_v44 = vsel %vm2746_vm13, %v7070_v7, %v7102_v24 }
 0x8d0   : > { %v7264_v5 = vsel %vm5912_vm7, %v7232_v2, %v7008_v51 }
 0x8d2   : > { %v7166_v30 = vpop.permute.xlu1 %7165 }
 0x8d3   : > { %v7072_v27 = vpop.permute.xlu0 %7071 }
 0x8d6   : > { %v6978_v63 = vpop.permute.xlu1 %6977 }
 0x8d7   : > { %v7040_v0 = vpop.permute.xlu0 %7039 }
 0x8d8   : > { %v7296_v15 = vsel %vm2697_vm1, %v7264_v5, %v7040_v0 }
 0x8d9   : > { %v7340_v33 = vsel %vm5977_vm9, %v7296_v15, %v7072_v27 }
 0x8da   : > { %v7134_v41 = vpop.permute.xlu1 %7133 }
 0x8db   : > { %v6946_v49 = vpop.permute.xlu0 %6945  ;;  %v7406_v47 = vsel %vm6058_vm8, %v7374_v44, %v7134_v41 }
 0x8dc   : > { %v7438_v54 = vsel %vm2779_vm15, %v7406_v47, %v7166_v30  ;;  %v7202_v20 = vsel %vm1444_vm4, %v13117_v50, %v6946_v49 }
 0x8dd   : > { %8270 = vmatprep.mubr.msk.bf16.mxu0 %vm6238_vm10, %v7438_v54  ;;  %v7234_v10 = vsel %vm1956_vm14, %v7202_v20, %v6978_v63 }
 0x8de   : > { %v7104_v40 = vpop.permute.xlu1 %7103  ;;  %7718 = vmatmul.mubr.bf16.gmra.mrb[196].mxu0 %v7337_v31 }
 0x8df   : > { %v7010_v3 = vpop.permute.xlu0 %7009  ;;  %v7376_v1 = vsel %vm2746_vm13, %v7072_v27, %v7104_v40 }
 0x8e0   : > { %v7266_v32 = vsel %vm5912_vm7, %v7234_v10, %v7010_v3 }
 0x8e2   : > { %v7168_v25 = vpop.permute.xlu1 %7167 }
 0x8e3   : > { %v7074_v55 = vpop.permute.xlu0 %7073 }
 0x8e6   : > { %v6980_v38 = vpop.permute.xlu1 %6979 }
 0x8e7   : > { %v7042_v60 = vpop.permute.xlu0 %7041 }
 0x8e8   : > { %v7298_v23 = vsel %vm2697_vm1, %v7266_v32, %v7042_v60 }
 0x8e9   : > { %v7343_v50 = vsel %vm5977_vm9, %v7298_v23, %v7074_v55 }
 0x8ea   : > { %v7136_v52 = vpop.permute.xlu1 %7135 }
 0x8eb   : > { %v6948_v37 = vpop.permute.xlu0 %6947  ;;  %v7408_v16 = vsel %vm6058_vm8, %v7376_v1, %v7136_v52 }
 0x8ec   : > { %v7440_v4 = vsel %vm2779_vm15, %v7408_v16, %v7168_v25  ;;  %v7204_v39 = vsel %vm1444_vm4, %v13166_v19, %v6948_v37 }
 0x8ed   : > { %8271 = vmatprep.mubr.msk.bf16.mxu0 %vm6238_vm10, %v7440_v4  ;;  %v7236_v14 = vsel %vm1956_vm14, %v7204_v39, %v6980_v38 }
 0x8ee   : > { %v7106_v59 = vpop.permute.xlu1 %7105  ;;  %7726 = vmatmul.mubr.bf16.gmra.mrb[200].mxu0 %v7340_v33 }
 0x8ef   : > { %v7012_v56 = vpop.permute.xlu0 %7011  ;;  %v7378_v26 = vsel %vm2746_vm13, %v7074_v55, %v7106_v59 }
 0x8f0   : > { %v7268_v22 = vsel %vm5912_vm7, %v7236_v14, %v7012_v56 }
 0x8f2   : > { %v7170_v53 = vpop.permute.xlu1 %7169 }
 0x8f3   : > { %v7076_v8 = vpop.permute.xlu0 %7075 }
 0x8f6   : > { %v6982_v46 = vpop.permute.xlu1 %6981 }
 0x8f7   : > { %v7044_v42 = vpop.permute.xlu0 %7043 }
 0x8f8   : > { %v7300_v30 = vsel %vm2697_vm1, %v7268_v22, %v7044_v42 }
 0x8f9   : > { %v7346_v41 = vsel %vm5977_vm9, %v7300_v30, %v7076_v8 }
 0x8fa   : > { %v7138_v18 = vpop.permute.xlu1 %7137 }
 0x8fb   : > { %v6950_v9 = vpop.permute.xlu0 %6949  ;;  %v7410_v12 = vsel %vm6058_vm8, %v7378_v26, %v7138_v18 }
 0x8fc   : > { %v7442_v58 = vsel %vm2779_vm15, %v7410_v12, %v7170_v53  ;;  %v7206_v29 = vsel %vm1444_vm4, %v13201_v61, %v6950_v9 }
 0x8fd   : > { %8272 = vmatprep.mubr.msk.bf16.mxu0 %vm6238_vm10, %v7442_v58  ;;  %v7238_v40 = vsel %vm1956_vm14, %v7206_v29, %v6982_v46 }
 0x8fe   : > { %v7108_v7 = vpop.permute.xlu1 %7107  ;;  %7734 = vmatmul.mubr.bf16.gmra.mrb[204].mxu0 %v7343_v50 }
 0x8ff   : > { %v7014_v6 = vpop.permute.xlu0 %7013  ;;  %v7380_v19 = vsel %vm2746_vm13, %v7076_v8, %v7108_v7 }
 0x900   : > { %v7270_v3 = vsel %vm5912_vm7, %v7238_v40, %v7014_v6 }
 0x901   : > { %v7631_v34 = vpop.f32.mrb[152].mxu0 }
 0x902   : > { %v7632_v48 = vadd.f32 %v13348_v43, %v7631_v34  ;;  %v7172_v17 = vpop.permute.xlu1 %7171  ;;  %v7633_v13 = vpop.f32.mrb[153].mxu0 }
 0x903   : > { %v7634_v45 = vpop.f32.mrb[154].mxu0  ;;  %v7078_v62 = vpop.permute.xlu0 %7077 }
 0x904   : > { %vm7758_vm2 = vcmp.ge.f32.partialorder %v7632_v48, 0.0  ;;  %v7790_v28 = vmul.f32 0.25, %v7632_v48  ;;  %v7635_v24 = vadd.f32 %v13348_v43, %v7634_v45  ;;  %v7636_v51 = vpop.f32.mrb[155].mxu0  ;;  %v7382_v61 = vsel %vm2746_vm13, %v7078_v62, %v12936_v36 }
 0x906   : > { %vm7759_vm3 = vcmp.ge.f32.partialorder %v7635_v24, 0.0  ;;  %v7791_v27 = vmul.f32 0.25, %v7635_v24  ;;  %v7140_v11 = vpop.permute.xlu1 %7139  ;;  %v7822_v63 = vsel %vm7758_vm2, %v7632_v48, %v7790_v28 }
 0x907   : > { %v7412_v0 = vsel %vm6058_vm8, %v7380_v19, %v7140_v11  ;;  %v7854_v21 = vmax.f32 %v7822_v63, 0.0  ;;  %v7046_v54 = vpop.permute.xlu0 %7045 }
 0x908   : > { %v7444_v35 = vsel %vm2779_vm15, %v7412_v0, %v7172_v17  ;;  %v7823_v44 = vsel %vm7759_vm3, %v7635_v24, %v7791_v27  ;;  %v7302_v25 = vsel %vm2697_vm1, %v7270_v3, %v7046_v54 }
 0x909   : > { %8273 = vmatprep.mubr.msk.bf16.mxu0 %vm6238_vm10, %v7444_v35  ;;  %v7886_v49 = vmin.f32 %v7854_v21, 1.0  ;;  %v7855_v47 = vmax.f32 %v7823_v44, 0.0  ;;  %v7349_v2 = vsel %vm5977_vm9, %v7302_v25, %v7078_v62 }
 0x90a   : > { %v7142_v31 = vpop.permute.xlu1 %7141  ;;  %7742 = vmatmul.mubr.bf16.gmra.mrb[208].mxu0 %v7346_v41 }
 0x90b   : > { %7918 = vxpose.xlu0.b32.start [1/16] (narrow) %v7886_v49, 48  ;;  %v7887_v55 = vmin.f32 %v7855_v47, 1.0  ;;  %v7414_v57 = vsel %vm6058_vm8, %v7382_v61, %v7142_v31 }
 0x90e   : > { %v7174_v38 = vpop.permute.xlu1 %7173 }
 0x90f   : > { %v7446_v60 = vsel %vm2779_vm15, %v7414_v57, %v7174_v38  ;;  %7919 = vxpose.xlu0.b32.cont [2/16] (narrow) %v7887_v55, 48 }
 0x910   : > { %8274 = vmatprep.mubr.msk.bf16.mxu1 %vm6238_vm10, %v7446_v60 }
 0x911   : > { %v7639_v5 = vpop.f32.mrb[156].mxu0  ;;  %7750 = vmatmul.mubr.bf16.vlgmr.msra.gmra.mrb[200].mxu1 %v7349_v2 }
 0x912   : > { %v7640_v15 = vadd.f32 %v13348_v43, %v7639_v5  ;;  %v7641_v1 = vpop.f32.mrb[157].mxu0 }
 0x913   : > { %v7642_v52 = vpop.f32.mrb[158].mxu0 }
 0x914   : > { %vm7760_vm4 = vcmp.ge.f32.partialorder %v7640_v15, 0.0  ;;  %v7792_v36 = vmul.f32 0.25, %v7640_v15  ;;  %v7643_v37 = vadd.f32 %v13348_v43, %v7642_v52  ;;  %v7644_v16 = vpop.f32.mrb[159].mxu0 }
 0x916   : > { %vm7761_vm14 = vcmp.ge.f32.partialorder %v7643_v37, 0.0  ;;  %v7793_v4 = vmul.f32 0.25, %v7643_v37  ;;  %v7824_v33 = vsel %vm7760_vm4, %v7640_v15, %v7792_v36 }
 0x917   : > { %v7856_v59 = vmax.f32 %v7824_v33, 0.0 }
 0x918   : > { %v7825_v56 = vsel %vm7761_vm14, %v7643_v37, %v7793_v4 }
 0x919   : > { %v7888_v53 = vmin.f32 %v7856_v59, 1.0  ;;  %v7857_v8 = vmax.f32 %v7825_v56, 0.0 }
 0x91b   : > { %7920 = vxpose.xlu0.b32.cont [3/16] (narrow) %v7888_v53, 48  ;;  %v7889_v20 = vmin.f32 %v7857_v8, 1.0 }
 0x91f   : > { %7921 = vxpose.xlu0.b32.cont [4/16] (narrow) %v7889_v20, 48 }
 0x921   : > { %v7647_v46 = vpop.f32.mrb[160].mxu0 }
 0x922   : > { %v7648_v42 = vadd.f32 %v13348_v43, %v7647_v46  ;;  %v7649_v10 = vpop.f32.mrb[161].mxu0 }
 0x923   : > { %v7650_v32 = vpop.f32.mrb[162].mxu0 }
 0x924   : > { %vm7762_vm11 = vcmp.ge.f32.partialorder %v7648_v42, 0.0  ;;  %v7794_v23 = vmul.f32 0.25, %v7648_v42  ;;  %v7651_v26 = vadd.f32 %v13348_v43, %v7650_v32  ;;  %v7652_v18 = vpop.f32.mrb[163].mxu0 }
 0x926   : > { %vm7763_vm12 = vcmp.ge.f32.partialorder %v7651_v26, 0.0  ;;  %v7795_v9 = vmul.f32 0.25, %v7651_v26  ;;  %v7826_v12 = vsel %vm7762_vm11, %v7648_v42, %v7794_v23 }
 0x927   : > { %v7858_v58 = vmax.f32 %v7826_v12, 0.0 }
 0x928   : > { %v7827_v50 = vsel %vm7763_vm12, %v7651_v26, %v7795_v9 }
 0x929   : > { %v7890_v7 = vmin.f32 %v7858_v58, 1.0  ;;  %v7859_v6 = vmax.f32 %v7827_v50, 0.0 }
 0x92b   : > { %7922 = vxpose.xlu0.b32.cont [5/16] (narrow) %v7890_v7, 48  ;;  %v7891_v39 = vmin.f32 %v7859_v6, 1.0 }
 0x92f   : > { %7923 = vxpose.xlu0.b32.cont [6/16] (narrow) %v7891_v39, 48 }
 0x931   : > { %v7655_v34 = vpop.f32.mrb[164].mxu0 }
 0x932   : > { %v7656_v48 = vadd.f32 %v13348_v43, %v7655_v34  ;;  %v7657_v17 = vpop.f32.mrb[165].mxu0 }
 0x933   : > { %v7658_v13 = vpop.f32.mrb[166].mxu0 }
 0x934   : > { %vm7764_vm13 = vcmp.ge.f32.partialorder %v7656_v48, 0.0  ;;  %v7796_v14 = vmul.f32 0.25, %v7656_v48  ;;  %v7659_v45 = vadd.f32 %v13348_v43, %v7658_v13  ;;  %v7660_v22 = vpop.f32.mrb[167].mxu0 }
 0x936   : > { %vm7765_vm15 = vcmp.ge.f32.partialorder %v7659_v45, 0.0  ;;  %v7797_v28 = vmul.f32 0.25, %v7659_v45  ;;  %v7828_v62 = vsel %vm7764_vm13, %v7656_v48, %v7796_v14 }
 0x937   : > { %v7860_v24 = vmax.f32 %v7828_v62, 0.0 }
 0x938   : > { %v7829_v51 = vsel %vm7765_vm15, %v7659_v45, %v7797_v28 }
 0x939   : > { %v7892_v30 = vmin.f32 %v7860_v24, 1.0  ;;  %v7861_v19 = vmax.f32 %v7829_v51, 0.0 }
 0x93b   : > { %7924 = vxpose.xlu0.b32.cont [7/16] (narrow) %v7892_v30, 48  ;;  %v7893_v27 = vmin.f32 %v7861_v19, 1.0 }
 0x93f   : > { %7925 = vxpose.xlu0.b32.cont [8/16] (narrow) %v7893_v27, 48 }
 0x941   : > { %v7663_v11 = vpop.f32.mrb[168].mxu0 }
 0x942   : > { %v7664_v63 = vadd.f32 %v13348_v43, %v7663_v11  ;;  %v7665_v0 = vpop.f32.mrb[169].mxu0 }
 0x943   : > { %v7666_v21 = vpop.f32.mrb[170].mxu0 }
 0x944   : > { %vm7766_vm1 = vcmp.ge.f32.partialorder %v7664_v63, 0.0  ;;  %v7798_v29 = vmul.f32 0.25, %v7664_v63  ;;  %v7667_v35 = vadd.f32 %v13348_v43, %v7666_v21  ;;  %v7668_v44 = vpop.f32.mrb[171].mxu0 }
 0x946   : > { %vm7767_vm5 = vcmp.ge.f32.partialorder %v7667_v35, 0.0  ;;  %v7799_v41 = vmul.f32 0.25, %v7667_v35  ;;  %v7830_v49 = vsel %vm7766_vm1, %v7664_v63, %v7798_v29 }
 0x947   : > { %v7862_v47 = vmax.f32 %v7830_v49, 0.0 }
 0x948   : > { %v7831_v54 = vsel %vm7767_vm5, %v7667_v35, %v7799_v41 }
 0x949   : > { %v7894_v31 = vmin.f32 %v7862_v47, 1.0  ;;  %v7863_v40 = vmax.f32 %v7831_v54, 0.0 }
 0x94b   : > { %7926 = vxpose.xlu0.b32.cont [9/16] (narrow) %v7894_v31, 48  ;;  %v7895_v3 = vmin.f32 %v7863_v40, 1.0 }
 0x94f   : > { %7927 = vxpose.xlu0.b32.cont [10/16] (narrow) %v7895_v3, 48 }
 0x951   : > { %v7671_v61 = vpop.f32.mrb[172].mxu0 }
 0x952   : > { %v7672_v25 = vadd.f32 %v13348_v43, %v7671_v61  ;;  %v7673_v55 = vpop.f32.mrb[173].mxu0 }
 0x953   : > { %v7674_v57 = vpop.f32.mrb[174].mxu0 }
 0x954   : > { %vm7768_vm6 = vcmp.ge.f32.partialorder %v7672_v25, 0.0  ;;  %v7800_v38 = vmul.f32 0.25, %v7672_v25  ;;  %v7675_v60 = vadd.f32 %v13348_v43, %v7674_v57  ;;  %v7676_v2 = vpop.f32.mrb[175].mxu0 }
 0x956   : > { %vm7769_vm0 = vcmp.ge.f32.partialorder %v7675_v60, 0.0  ;;  %v7801_v5 = vmul.f32 0.25, %v7675_v60  ;;  %v7832_v15 = vsel %vm7768_vm6, %v7672_v25, %v7800_v38 }
 0x957   : > { %v7864_v1 = vmax.f32 %v7832_v15, 0.0 }
 0x958   : > { %v7833_v52 = vsel %vm7769_vm0, %v7675_v60, %v7801_v5 }
 0x959   : > { %v7896_v36 = vmin.f32 %v7864_v1, 1.0  ;;  %v7865_v37 = vmax.f32 %v7833_v52, 0.0 }
 0x95b   : > { %7928 = vxpose.xlu0.b32.cont [11/16] (narrow) %v7896_v36, 48  ;;  %v7897_v16 = vmin.f32 %v7865_v37, 1.0 }
 0x95f   : > { %7929 = vxpose.xlu0.b32.cont [12/16] (narrow) %v7897_v16, 48 }
 0x961   : > { %v7679_v4 = vpop.f32.mrb[176].mxu0 }
 0x962   : > { %v7680_v33 = vadd.f32 %v13348_v43, %v7679_v4  ;;  %v7681_v59 = vpop.f32.mrb[177].mxu0 }
 0x963   : > { %v7682_v56 = vpop.f32.mrb[178].mxu0 }
 0x964   : > { %vm7770_vm7 = vcmp.ge.f32.partialorder %v7680_v33, 0.0  ;;  %v7802_v53 = vmul.f32 0.25, %v7680_v33  ;;  %v7683_v8 = vadd.f32 %v13348_v43, %v7682_v56  ;;  %v7684_v20 = vpop.f32.mrb[179].mxu0 }
 0x966   : > { %vm7771_vm8 = vcmp.ge.f32.partialorder %v7683_v8, 0.0  ;;  %v7803_v46 = vmul.f32 0.25, %v7683_v8  ;;  %v7834_v42 = vsel %vm7770_vm7, %v7680_v33, %v7802_v53 }
 0x967   : > { %v7866_v10 = vmax.f32 %v7834_v42, 0.0 }
 0x968   : > { %v7835_v32 = vsel %vm7771_vm8, %v7683_v8, %v7803_v46 }
 0x969   : > { %v7898_v23 = vmin.f32 %v7866_v10, 1.0  ;;  %v7867_v26 = vmax.f32 %v7835_v32, 0.0 }
 0x96b   : > { %7930 = vxpose.xlu0.b32.cont [13/16] (narrow) %v7898_v23, 48  ;;  %v7899_v18 = vmin.f32 %v7867_v26, 1.0 }
 0x96f   : > { %7931 = vxpose.xlu0.b32.cont [14/16] (narrow) %v7899_v18, 48 }
 0x971   : > { %v7687_v9 = vpop.f32.mrb[180].mxu0 }
 0x972   : > { %v7688_v12 = vadd.f32 %v13348_v43, %v7687_v9  ;;  %v7689_v58 = vpop.f32.mrb[181].mxu0 }
 0x973   : > { %v7690_v50 = vpop.f32.mrb[182].mxu0 }
 0x974   : > { %vm7772_vm9 = vcmp.ge.f32.partialorder %v7688_v12, 0.0  ;;  %v7804_v7 = vmul.f32 0.25, %v7688_v12  ;;  %v7691_v6 = vadd.f32 %v13348_v43, %v7690_v50  ;;  %v7692_v39 = vpop.f32.mrb[183].mxu0 }
 0x976   : > { %vm7773_vm10 = vcmp.ge.f32.partialorder %v7691_v6, 0.0  ;;  %v7805_v34 = vmul.f32 0.25, %v7691_v6  ;;  %v7836_v48 = vsel %vm7772_vm9, %v7688_v12, %v7804_v7 }
 0x977   : > { %v7868_v17 = vmax.f32 %v7836_v48, 0.0 }
 0x978   : > { %v7837_v13 = vsel %vm7773_vm10, %v7691_v6, %v7805_v34 }
 0x979   : > { %v7900_v14 = vmin.f32 %v7868_v17, 1.0  ;;  %v7869_v45 = vmax.f32 %v7837_v13, 0.0 }
 0x97b   : > { %7932 = vxpose.xlu0.b32.cont [15/16] (narrow) %v7900_v14, 48  ;;  %v7901_v22 = vmin.f32 %v7869_v45, 1.0 }
 0x97f   : > { %7933 = vxpose.xlu0.b32.end [16/16] (narrow) %v7901_v22, 48 }
 0x981   : > { %v7695_v28 = vpop.f32.mrb[184].mxu0 }
 0x982   : > { %v7696_v62 = vadd.f32 %v13348_v43, %v7695_v28  ;;  %v7697_v24 = vpop.f32.mrb[185].mxu0 }
 0x983   : > { %v7698_v51 = vpop.f32.mrb[186].mxu0 }
 0x984   : > { %vm7774_vm2 = vcmp.ge.f32.partialorder %v7696_v62, 0.0  ;;  %v7806_v30 = vmul.f32 0.25, %v7696_v62  ;;  %v7699_v19 = vadd.f32 %v13348_v43, %v7698_v51  ;;  %v7700_v27 = vpop.f32.mrb[187].mxu0 }
 0x986   : > { %vm7775_vm3 = vcmp.ge.f32.partialorder %v7699_v19, 0.0  ;;  %v7807_v11 = vmul.f32 0.25, %v7699_v19  ;;  %v7838_v63 = vsel %vm7774_vm2, %v7696_v62, %v7806_v30 }
 0x987   : > { %v7870_v0 = vmax.f32 %v7838_v63, 0.0 }
 0x988   : > { %v7839_v21 = vsel %vm7775_vm3, %v7699_v19, %v7807_v11 }
 0x989   : > { %v7902_v29 = vmin.f32 %v7870_v0, 1.0  ;;  %v7871_v35 = vmax.f32 %v7839_v21, 0.0 }
 0x98b   : > { %7950 = vxpose.xlu1.b32.start [1/16] (narrow) %v7902_v29, 48  ;;  %v7903_v44 = vmin.f32 %v7871_v35, 1.0 }
 0x98f   : > { %7951 = vxpose.xlu1.b32.cont [2/16] (narrow) %v7903_v44, 48 }
 0x991   : > { %v7703_v41 = vpop.f32.mrb[188].mxu0 }
 0x992   : > { %v7704_v49 = vadd.f32 %v13348_v43, %v7703_v41  ;;  %v7705_v47 = vpop.f32.mrb[189].mxu0 }
 0x993   : > { %v7706_v54 = vpop.f32.mrb[190].mxu0 }
 0x994   : > { %vm7776_vm4 = vcmp.ge.f32.partialorder %v7704_v49, 0.0  ;;  %v7808_v31 = vmul.f32 0.25, %v7704_v49  ;;  %v7707_v40 = vadd.f32 %v13348_v43, %v7706_v54  ;;  %v7708_v3 = vpop.f32.mrb[191].mxu0 }
 0x996   : > { %vm7777_vm14 = vcmp.ge.f32.partialorder %v7707_v40, 0.0  ;;  %v7809_v61 = vmul.f32 0.25, %v7707_v40  ;;  %v7840_v25 = vsel %vm7776_vm4, %v7704_v49, %v7808_v31 }
 0x997   : > { %v7872_v55 = vmax.f32 %v7840_v25, 0.0 }
 0x998   : > { %v7841_v57 = vsel %vm7777_vm14, %v7707_v40, %v7809_v61 }
 0x999   : > { %v7904_v38 = vmin.f32 %v7872_v55, 1.0  ;;  %v7873_v60 = vmax.f32 %v7841_v57, 0.0 }
 0x99b   : > { %7952 = vxpose.xlu1.b32.cont [3/16] (narrow) %v7904_v38, 48  ;;  %v7905_v2 = vmin.f32 %v7873_v60, 1.0 }
 0x99f   : > { %7953 = vxpose.xlu1.b32.cont [4/16] (narrow) %v7905_v2, 48 }
 0x9a1   : > { %v7711_v5 = vpop.f32.mrb[192].mxu0 }
 0x9a2   : > { %v7712_v15 = vadd.f32 %v13348_v43, %v7711_v5  ;;  %v7713_v1 = vpop.f32.mrb[193].mxu0 }
 0x9a3   : > { %v7714_v52 = vpop.f32.mrb[194].mxu0 }
 0x9a4   : > { %vm7778_vm11 = vcmp.ge.f32.partialorder %v7712_v15, 0.0  ;;  %v7810_v36 = vmul.f32 0.25, %v7712_v15  ;;  %v7715_v37 = vadd.f32 %v13348_v43, %v7714_v52  ;;  %v7716_v16 = vpop.f32.mrb[195].mxu0 }
 0x9a6   : > { %vm7779_vm12 = vcmp.ge.f32.partialorder %v7715_v37, 0.0  ;;  %v7811_v4 = vmul.f32 0.25, %v7715_v37  ;;  %v7842_v33 = vsel %vm7778_vm11, %v7712_v15, %v7810_v36 }
 0x9a7   : > { %v7874_v59 = vmax.f32 %v7842_v33, 0.0 }
 0x9a8   : > { %v7843_v56 = vsel %vm7779_vm12, %v7715_v37, %v7811_v4 }
 0x9a9   : > { %v7906_v53 = vmin.f32 %v7874_v59, 1.0  ;;  %v7875_v8 = vmax.f32 %v7843_v56, 0.0 }
 0x9ab   : > { %7954 = vxpose.xlu1.b32.cont [5/16] (narrow) %v7906_v53, 48  ;;  %v7907_v20 = vmin.f32 %v7875_v8, 1.0 }
 0x9af   : > { %7955 = vxpose.xlu1.b32.cont [6/16] (narrow) %v7907_v20, 48 }
 0x9b1   : > { %v7719_v46 = vpop.f32.mrb[196].mxu0 }
 0x9b2   : > { %v7720_v42 = vadd.f32 %v13348_v43, %v7719_v46  ;;  %v7721_v10 = vpop.f32.mrb[197].mxu0 }
 0x9b3   : > { %v7722_v32 = vpop.f32.mrb[198].mxu0 }
 0x9b4   : > { %vm7780_vm13 = vcmp.ge.f32.partialorder %v7720_v42, 0.0  ;;  %v7812_v23 = vmul.f32 0.25, %v7720_v42  ;;  %v7723_v26 = vadd.f32 %v13348_v43, %v7722_v32  ;;  %v7724_v18 = vpop.f32.mrb[199].mxu0 }
 0x9b6   : > { %vm7781_vm15 = vcmp.ge.f32.partialorder %v7723_v26, 0.0  ;;  %v7813_v9 = vmul.f32 0.25, %v7723_v26  ;;  %v7844_v12 = vsel %vm7780_vm13, %v7720_v42, %v7812_v23 }
 0x9b7   : > { %v7876_v58 = vmax.f32 %v7844_v12, 0.0 }
 0x9b8   : > { %v7845_v50 = vsel %vm7781_vm15, %v7723_v26, %v7813_v9 }
 0x9b9   : > { %v7908_v7 = vmin.f32 %v7876_v58, 1.0  ;;  %v7877_v6 = vmax.f32 %v7845_v50, 0.0 }
 0x9bb   : > { %7956 = vxpose.xlu1.b32.cont [7/16] (narrow) %v7908_v7, 48  ;;  %v7909_v39 = vmin.f32 %v7877_v6, 1.0 }
 0x9bf   : > { %7957 = vxpose.xlu1.b32.cont [8/16] (narrow) %v7909_v39, 48 }
 0x9c1   : > { %v7727_v34 = vpop.f32.mrb[200].mxu0 }
 0x9c2   : > { %v7728_v48 = vadd.f32 %v13348_v43, %v7727_v34  ;;  %v7729_v17 = vpop.f32.mrb[201].mxu0 }
 0x9c3   : > { %v7730_v13 = vpop.f32.mrb[202].mxu0  ;;  %v7934_v14 = vpop.trf.xlu0 }
 0x9c4   : > { %vm7782_vm1 = vcmp.ge.f32.partialorder %v7728_v48, 0.0  ;;  %v7814_v45 = vmul.f32 0.25, %v7728_v48  ;;  %v7731_v22 = vadd.f32 %v13348_v43, %v7730_v13  ;;  %v7732_v28 = vpop.f32.mrb[203].mxu0  ;;  %7982 = vst [vmem:[%s13399_s27] sm:$0xff] %v7934_v14 }
 0x9c6   : > { %vm7783_vm5 = vcmp.ge.f32.partialorder %v7731_v22, 0.0  ;;  %v7815_v62 = vmul.f32 0.25, %v7731_v22  ;;  %v7846_v24 = vsel %vm7782_vm1, %v7728_v48, %v7814_v45 }
 0x9c7   : > { %v7878_v51 = vmax.f32 %v7846_v24, 0.0  ;;  %v7935_v30 = vpop.trf.xlu0 }
 0x9c8   : > { %v7847_v19 = vsel %vm7783_vm5, %v7731_v22, %v7815_v62  ;;  %7984 = vst [vmem:[%s13399_s27 + $0x10] sm:$0xff] %v7935_v30 }
 0x9c9   : > { %v7910_v27 = vmin.f32 %v7878_v51, 1.0  ;;  %v7879_v11 = vmax.f32 %v7847_v19, 0.0 }
 0x9cb   : > { %7958 = vxpose.xlu1.b32.cont [9/16] (narrow) %v7910_v27, 48  ;;  %v7936_v63 = vpop.trf.xlu0  ;;  %v7911_v0 = vmin.f32 %v7879_v11, 1.0 }
 0x9cc   : > { %7986 = vst [vmem:[%s13399_s27 + $0x20] sm:$0xff] %v7936_v63 }
 0x9cf   : > { %7959 = vxpose.xlu1.b32.cont [10/16] (narrow) %v7911_v0, 48  ;;  %v7937_v21 = vpop.trf.xlu0 }
 0x9d0   : > { %7988 = vst [vmem:[%s13399_s27 + $0x30] sm:$0xff] %v7937_v21 }
 0x9d1   : > { %v7735_v29 = vpop.f32.mrb[204].mxu0 }
 0x9d2   : > { %v7736_v35 = vadd.f32 %v13348_v43, %v7735_v29  ;;  %v7737_v44 = vpop.f32.mrb[205].mxu0 }
 0x9d3   : > { %v7738_v41 = vpop.f32.mrb[206].mxu0  ;;  %v7938_v49 = vpop.trf.xlu0 }
 0x9d4   : > { %vm7784_vm6 = vcmp.ge.f32.partialorder %v7736_v35, 0.0  ;;  %v7816_v47 = vmul.f32 0.25, %v7736_v35  ;;  %v7739_v54 = vadd.f32 %v13348_v43, %v7738_v41  ;;  %v7740_v31 = vpop.f32.mrb[207].mxu0  ;;  %7990 = vst [vmem:[%s13399_s27 + $0x40] sm:$0xff] %v7938_v49 }
 0x9d6   : > { %vm7785_vm0 = vcmp.ge.f32.partialorder %v7739_v54, 0.0  ;;  %v7817_v40 = vmul.f32 0.25, %v7739_v54  ;;  %v7848_v3 = vsel %vm7784_vm6, %v7736_v35, %v7816_v47 }
 0x9d7   : > { %v7880_v61 = vmax.f32 %v7848_v3, 0.0  ;;  %v7939_v25 = vpop.trf.xlu0 }
 0x9d8   : > { %v7849_v55 = vsel %vm7785_vm0, %v7739_v54, %v7817_v40  ;;  %7992 = vst [vmem:[%s13399_s27 + $0x50] sm:$0xff] %v7939_v25 }
 0x9d9   : > { %v7912_v57 = vmin.f32 %v7880_v61, 1.0  ;;  %v7881_v38 = vmax.f32 %v7849_v55, 0.0 }
 0x9db   : > { %7960 = vxpose.xlu1.b32.cont [11/16] (narrow) %v7912_v57, 48  ;;  %v7913_v2 = vmin.f32 %v7881_v38, 1.0 }
 0x9dd   : > { %v7743_v60 = vpop.f32.mrb[208].mxu0 }
 0x9de   : > { %v7744_v5 = vadd.f32 %v13348_v43, %v7743_v60  ;;  %v7745_v15 = vpop.f32.mrb[209].mxu0 }
 0x9df   : > { %7961 = vxpose.xlu1.b32.cont [12/16] (narrow) %v7913_v2, 48  ;;  %v7746_v1 = vpop.f32.mrb[210].mxu0 }
 0x9e0   : > { %vm7786_vm7 = vcmp.ge.f32.partialorder %v7744_v5, 0.0  ;;  %v7818_v52 = vmul.f32 0.25, %v7744_v5  ;;  %v7747_v36 = vadd.f32 %v13348_v43, %v7746_v1  ;;  %v7748_v37 = vpop.f32.mrb[211].mxu0 }
 0x9e2   : > { %vm7787_vm8 = vcmp.ge.f32.partialorder %v7747_v36, 0.0  ;;  %v7819_v16 = vmul.f32 0.25, %v7747_v36  ;;  %v7850_v4 = vsel %vm7786_vm7, %v7744_v5, %v7818_v52 }
 0x9e3   : > { %v7882_v33 = vmax.f32 %v7850_v4, 0.0 }
 0x9e4   : > { %v7751_v59 = vpop.f32.mrb[200].mxu1  ;;  %v7851_v56 = vsel %vm7787_vm8, %v7747_v36, %v7819_v16 }
 0x9e5   : > { %v7752_v53 = vadd.f32 %v13348_v43, %v7751_v59  ;;  %v7753_v8 = vpop.f32.mrb[201].mxu1  ;;  %v7914_v20 = vmin.f32 %v7882_v33, 1.0  ;;  %v7883_v46 = vmax.f32 %v7851_v56, 0.0 }
 0x9e6   : > { %v7754_v42 = vpop.f32.mrb[202].mxu1 }
 0x9e7   : > { %vm7788_vm9 = vcmp.ge.f32.partialorder %v7752_v53, 0.0  ;;  %v7820_v10 = vmul.f32 0.25, %v7752_v53  ;;  %v7755_v32 = vadd.f32 %v13348_v43, %v7754_v42  ;;  %7962 = vxpose.xlu1.b32.cont [13/16] (narrow) %v7914_v20, 48  ;;  %v7756_v23 = vpop.f32.mrb[203].mxu1  ;;  %v7915_v18 = vmin.f32 %v7883_v46, 1.0 }
 0x9e9   : > { %vm7789_vm10 = vcmp.ge.f32.partialorder %v7755_v32, 0.0  ;;  %v7821_v26 = vmul.f32 0.25, %v7755_v32  ;;  %v7852_v9 = vsel %vm7788_vm9, %v7752_v53, %v7820_v10 }
 0x9ea   : > { %v7884_v12 = vmax.f32 %v7852_v9, 0.0 }
 0x9eb   : > { %7963 = vxpose.xlu1.b32.cont [14/16] (narrow) %v7915_v18, 48  ;;  %v7853_v58 = vsel %vm7789_vm10, %v7755_v32, %v7821_v26 }
 0x9ec   : > { %v7916_v50 = vmin.f32 %v7884_v12, 1.0  ;;  %v7885_v7 = vmax.f32 %v7853_v58, 0.0 }
 0x9ee   : > { %v7917_v6 = vmin.f32 %v7885_v7, 1.0 }
 0x9ef   : > { %7964 = vxpose.xlu1.b32.cont [15/16] (narrow) %v7916_v50, 48 }
 0x9f3   : > { %7965 = vxpose.xlu1.b32.end [16/16] (narrow) %v7917_v6, 48 }
 0xa37   : > { %v7966_v43 = vpop.trf.xlu1 }
 0xa38   : > { %7983 = vst [vmem:[%s13399_s27 + $0x8] sm:$0xff] %v7966_v43 }
 0xa3b   : > { %v7967_v39 = vpop.trf.xlu1 }
 0xa3c   : > { %7985 = vst [vmem:[%s13399_s27 + $0x18] sm:$0xff] %v7967_v39 }
 0xa3f   : > { %v7968_v34 = vpop.trf.xlu1 }
 0xa40   : > { %7987 = vst [vmem:[%s13399_s27 + $0x28] sm:$0xff] %v7968_v34 }
 0xa43   : > { %v7969_v48 = vpop.trf.xlu1 }
 0xa44   : > { %7989 = vst [vmem:[%s13399_s27 + $0x38] sm:$0xff] %v7969_v48 }
 0xa47   : > { %v7970_v17 = vpop.trf.xlu1 }
 0xa48   : > { %7991 = vst [vmem:[%s13399_s27 + $0x48] sm:$0xff] %v7970_v17 }
 0xa4b   : > { %v7971_v13 = vpop.trf.xlu1 }
 0xa4c   : > { %7993 = vst [vmem:[%s13399_s27 + $0x58] sm:$0xff] %v7971_v13 }
 0xa4d PF: > { %s24_s17 = sadd.s32 1, %s8876_s17  }
 0xa4e   : > { %p21_p11 = scmp.ge.s32.totalorder %s24_s17, 4  }
 0xa50   :  { %23 = sbr.rel (!%p21_p11) target bundleno = 3 (0x3), region = 116 }
 0xa57   :  { %8015 = vsyncpa [#allocation8], 1 }
 0xa58   :  { %8017 = vsyncpa [#allocation8 + $0x1], 1 }
 0xa59   :  { %8018 = vsyncpa [#allocation10], 1 }
 0xa5a   :  { %8019 = vsyncpa [#allocation13], 1 }

</bundles_post_ra>
